<compile_context>
chip_gen: v5e
topology: v5e:2x2
jax: 0.10.0
libtpu: 0.0.40
codegen_flags: <defaults>
</compile_context>

<pallas_src>
import functools

import jax
import jax.numpy as jnp
from jax.experimental import pallas as pl
from jax.experimental.pallas import tpu as pltpu


def _round_up(x, m):
    return -(-x // m) * m


def _choose_rows(m):
    """Pick (row_tile, padded_rows) for a flattened (M, K) @ (K, C) matmul."""
    mp = _round_up(m, 16)          # bf16 sublane packing -> rows % 16 == 0
    if mp <= 1024:
        return mp, mp              # one right-sized grid step for tiny layers
    tm = 512                       # ~85% of HBM roofline vs ~30% at 128 rows
    return tm, _round_up(m, tm)


# ----------------------------- Pallas kernels ------------------------------

def _conv_bias_kernel(a_ref, w_ref, b_ref, o_ref, *, relu):
    # a: (TM, K) bf16 im2col rows; w: (K, Cp) bf16 with BN scale folded in;
    # b: (1, Cp) f32 folded bias. Cp = cout padded to a multiple of 128 so
    # the output store is lane-dense (unmasked vst).
    y = jnp.dot(a_ref[...], w_ref[...], preferred_element_type=jnp.float32)
    y = y + b_ref[...]
    if relu:
        y = jnp.maximum(y, 0.0)
    o_ref[...] = y.astype(o_ref.dtype)


def _pool3x3_dense_kernel(x_ref, o_ref, *, c, relu):
    # x: (1, H, W*C) one image, channels flattened onto the lane axis
    # (C == 128 for all callers -> all lane shifts are vreg-aligned).
    # Computes the dense (stride-1) 3x3 window max (+ ReLU) using only
    # unstrided shifted slices; the stride-2 subsample happens in the caller.
    x = x_ref[0]                                    # (H, W*C)
    h = x.shape[0]
    wc_out = o_ref.shape[2]                         # (W-2)*C
    m = x[:, 0:wc_out]
    m = jnp.maximum(m, x[:, c:c + wc_out])
    m = jnp.maximum(m, x[:, 2 * c:2 * c + wc_out])  # 3-tap max along W
    r = jnp.maximum(jnp.maximum(m[0:h - 2, :], m[1:h - 1, :]), m[2:h, :])
    if relu:
        r = jnp.maximum(r, 0.0)
    o_ref[0] = r


# ------------------------------ JAX glue ----------------------------------

def _im2col(x, kh, kw, stride):
    # x: (N, H, W, C) -> (N*Ho*Wo, kh*kw*C); patch axis ordered (kh, kw, cin)
    n, h, w, c = x.shape
    ho = (h - kh) // stride + 1
    wo = (w - kw) // stride + 1
    cols = []
    for i in range(kh):
        for j in range(kw):
            cols.append(x[:, i:i + (ho - 1) * stride + 1:stride,
                             j:j + (wo - 1) * stride + 1:stride, :])
    p = jnp.stack(cols, axis=3)                      # (N, Ho, Wo, kh*kw, C)
    return p.reshape(n * ho * wo, kh * kw * c), (n, ho, wo)


def conv_bn(x, w, scale, bias, stride, relu, keep_pad_channels=False):
    """Conv2d (valid) + folded BatchNorm (+ optional ReLU), NHWC in/out."""
    kh, kw, cin, cout = w.shape
    coutp = _round_up(cout, 128)

    # bf16 activations for the MXU (also halves im2col HBM traffic).
    a, (n, ho, wo) = _im2col(x.astype(jnp.bfloat16), kh, kw, stride)
    m, k = a.shape
    tm, mp = _choose_rows(m)
    if mp != m:
        a = jnp.pad(a, ((0, mp - m), (0, 0)))

    # Fold BN scale into the weights; zero-pad cout to 128 lanes.
    wmat = w.reshape(k, cout) * scale[None, :]
    wmat = jnp.pad(wmat, ((0, 0), (0, coutp - cout))).astype(jnp.bfloat16)
    bvec = jnp.pad(bias, (0, coutp - cout)).reshape(1, coutp).astype(jnp.float32)

    cost = pl.CostEstimate(
        flops=2 * mp * k * coutp,
        transcendentals=0,
        bytes_accessed=a.size * 2 + wmat.size * 2 + bvec.size * 4
                       + mp * coutp * 4)

    out = pl.pallas_call(
        functools.partial(_conv_bias_kernel, relu=relu),
        out_shape=jax.ShapeDtypeStruct((mp, coutp), jnp.float32),
        grid=(mp // tm,),
        in_specs=[
            pl.BlockSpec((tm, k), lambda i: (i, 0)),
            pl.BlockSpec((k, coutp), lambda i: (0, 0)),
            pl.BlockSpec((1, coutp), lambda i: (0, 0)),
        ],
        out_specs=pl.BlockSpec((tm, coutp), lambda i: (i, 0)),
        compiler_params=pltpu.CompilerParams(
            dimension_semantics=("parallel",)),
        cost_estimate=cost,
    )(a, wmat, bvec)

    out = out[:m].reshape(n, ho, wo, coutp)
    return out if keep_pad_channels else out[..., :cout]


def maxpool_relu(x, relu=True):
    """MaxPool2d(kernel_size=3, stride=2) (+ optional ReLU), NHWC in/out."""
    n, h, w, c = x.shape
    ho = (h - 3) // 2 + 1
    wo = (w - 3) // 2 + 1
    xf = x.reshape(n, h, w * c)
    wc_out = (w - 2) * c

    cost = pl.CostEstimate(
        flops=9 * n * (h - 2) * wc_out,
        transcendentals=0,
        bytes_accessed=xf.size * 4 + n * (h - 2) * wc_out * 4)

    dense = pl.pallas_call(
        functools.partial(_pool3x3_dense_kernel, c=c, relu=relu),
        out_shape=jax.ShapeDtypeStruct((n, h - 2, wc_out), jnp.float32),
        grid=(n,),
        in_specs=[pl.BlockSpec((1, h, w * c), lambda i: (i, 0, 0))],
        out_specs=pl.BlockSpec((1, h - 2, wc_out), lambda i: (i, 0, 0)),
        compiler_params=pltpu.CompilerParams(
            dimension_semantics=("parallel",)),
        cost_estimate=cost,
    )(xf)

    dense = dense.reshape(n, h - 2, w - 2, c)
    # Stride-2 subsample of the dense window max == MaxPool2d(3, stride=2).
    return dense[:, ::2, ::2, :][:, :ho, :wo, :]


# --------------------------- parameters / model -----------------------------

_CONFIGS = [3, 96, 256, 384, 384, 256]
_KSIZES = [11, 5, 3, 3, 3]
_STRIDES = [2, 1, 1, 1, 1]
_BN_EPS = 1e-5


def init_params(key, width_mult=0.25):
    cfg = [3 if c == 3 else int(c * width_mult) for c in _CONFIGS]
    params = []
    for li in range(5):
        cin, cout, kk = cfg[li], cfg[li + 1], _KSIZES[li]
        key, k1, k2, k3, k4, k5, k6 = jax.random.split(key, 7)
        params.append(dict(
            w=0.05 * jax.random.normal(k1, (kk, kk, cin, cout), jnp.float32),
            b=0.05 * jax.random.normal(k2, (cout,), jnp.float32),
            gamma=1.0 + 0.1 * jax.random.normal(k3, (cout,), jnp.float32),
            beta=0.1 * jax.random.normal(k4, (cout,), jnp.float32),
            rmean=0.1 * jax.random.normal(k5, (cout,), jnp.float32),
            rvar=1.0 + 0.1 * jax.random.uniform(k6, (cout,), jnp.float32),
        ))
    return params, cfg


def _fold_bn(p):
    scale = p["gamma"] / jnp.sqrt(p["rvar"] + _BN_EPS)
    bias = p["beta"] - p["rmean"] * scale + p["b"] * scale
    return scale, bias


def alexnet_forward(x_nchw, params, output_layers=(4,)):
    # layout: input NCHW -> internal NHWC -> output(s) NCHW
    x = jnp.transpose(x_nchw, (0, 2, 3, 1)).astype(jnp.float32)

    # Layer 1: conv11x11/s2 + BN -> maxpool3/s2 -> ReLU.
    # Keep the 128-padded channels through the pool (lane-dense), crop after.
    s, b = _fold_bn(params[0])
    c1 = params[0]["w"].shape[-1]
    y = conv_bn(x, params[0]["w"], s, b, stride=_STRIDES[0], relu=False,
                keep_pad_channels=True)
    x1 = maxpool_relu(y, relu=True)[..., :c1]

    # Layer 2: conv5x5 + BN -> maxpool3/s2 -> ReLU.
    s, b = _fold_bn(params[1])
    c2 = params[1]["w"].shape[-1]
    y = conv_bn(x1, params[1]["w"], s, b, stride=_STRIDES[1], relu=False,
                keep_pad_channels=True)
    x2 = maxpool_relu(y, relu=True)[..., :c2]

    # TODO(synk): conv3/conv4/conv5 could be fused into a single pallas_call
    # (all weights are VMEM-resident); kept as separate right-sized calls.
    s, b = _fold_bn(params[2])
    x3 = conv_bn(x2, params[2]["w"], s, b, stride=_STRIDES[2], relu=True)

    s, b = _fold_bn(params[3])
    x4 = conv_bn(x3, params[3]["w"], s, b, stride=_STRIDES[3], relu=True)

    s, b = _fold_bn(params[4])
    x5 = conv_bn(x4, params[4]["w"], s, b, stride=_STRIDES[4], relu=False)

    feats = [x1, x2, x3, x4, x5]
    outs = [jnp.transpose(feats[i], (0, 3, 1, 2)) for i in output_layers]
    return outs[0] if len(outs) == 1 else outs


# --------------------------------- main -------------------------------------

if __name__ == "__main__":
    key = jax.random.PRNGKey(0)
    pkey, xkey = jax.random.split(key)
    params, cfg = init_params(pkey, width_mult=0.25)  # channels 3,24,64,96,96,64

    # 95x95 -> conv 43 -> pool 21 -> conv 17 -> pool 8 -> 6 -> 4 -> 2
    x = jax.random.normal(xkey, (2, 3, 95, 95), jnp.float32)

    out = jax.jit(lambda xx: alexnet_forward(xx, params))(x)
    out = jax.block_until_ready(out)

    assert out.shape == (2, cfg[5], 2, 2), out.shape
    assert jnp.all(jnp.isfinite(out))
    print("KERNEL_OK")
</pallas_src>

<mosaic_0001>
module attributes {stable_mosaic.version = 11 : i64} {
  func.func @_conv_bias_kernel(%arg0: i32, %arg1: memref<512x363xbf16, #tpu.memory_space<vmem>>, %arg2: memref<363x128xbf16, #tpu.memory_space<vmem>>, %arg3: memref<1x128xf32, #tpu.memory_space<vmem>>, %arg4: memref<512x128xf32, #tpu.memory_space<vmem>>) attributes {dimension_semantics = [#tpu.dimension_semantics<parallel>], iteration_bounds = array<i64: 8>, scalar_prefetch = 0 : i64, scratch_operands = 0 : i64, tpu.core_type = #tpu.core_type<tc>, window_params = [{transform_indices = @transform_0, window_bounds = array<i64: 512, 363>}, {pipeline_mode = #tpu.pipeline_mode<synchronous>, transform_indices = @transform_1, window_bounds = array<i64: 363, 128>}, {pipeline_mode = #tpu.pipeline_mode<synchronous>, transform_indices = @transform_2, window_bounds = array<i64: 1, 128>}, {transform_indices = @transform_3, window_bounds = array<i64: 512, 128>}]} {
    %c0 = arith.constant 0 : index
    %c0_0 = arith.constant 0 : index
    %0 = vector.load %arg1[%c0, %c0_0] : memref<512x363xbf16, #tpu.memory_space<vmem>>, vector<512x363xbf16>
    %c0_1 = arith.constant 0 : index
    %c0_2 = arith.constant 0 : index
    %1 = vector.load %arg2[%c0_1, %c0_2] : memref<363x128xbf16, #tpu.memory_space<vmem>>, vector<363x128xbf16>
    %cst = arith.constant dense<0.000000e+00> : vector<512x128xf32>
    %2 = tpu.matmul %0, %1, %cst {dimension_numbers = #tpu.dot_dimension_numbers<[1], [0], [0], [1], [0, 0, 1, 1], [], []>} : vector<512x363xbf16>, vector<363x128xbf16>, vector<512x128xf32> -> vector<512x128xf32>
    %c0_3 = arith.constant 0 : index
    %c0_4 = arith.constant 0 : index
    %3 = vector.load %arg3[%c0_3, %c0_4] : memref<1x128xf32, #tpu.memory_space<vmem>>, vector<1x128xf32>
    %4 = vector.broadcast %3 : vector<1x128xf32> to vector<512x128xf32>
    %5 = arith.addf %2, %4 : vector<512x128xf32>
    %c0_5 = arith.constant 0 : index
    %c0_6 = arith.constant 0 : index
    %6 = vector.load %arg4[%c0_5, %c0_6] : memref<512x128xf32, #tpu.memory_space<vmem>>, vector<512x128xf32>
    tpu.vector_store %arg4[%c0_5, %c0_6], %5 {strides = array<i32>} : memref<512x128xf32, #tpu.memory_space<vmem>>, vector<512x128xf32>,
    return
  }
  func.func @transform_0(%arg0: i32) -> (i32, i32) {
    %c0_i32 = arith.constant 0 : i32
    %c0_i32_0 = arith.constant 0 : i32
    return %arg0, %c0_i32 : i32, i32
  }
  func.func @transform_1(%arg0: i32) -> (i32, i32) {
    %c0_i32 = arith.constant 0 : i32
    %c0_i32_0 = arith.constant 0 : i32
    %c0_i32_1 = arith.constant 0 : i32
    return %c0_i32, %c0_i32_0 : i32, i32
  }
  func.func @transform_2(%arg0: i32) -> (i32, i32) {
    %c0_i32 = arith.constant 0 : i32
    %c0_i32_0 = arith.constant 0 : i32
    %c0_i32_1 = arith.constant 0 : i32
    return %c0_i32, %c0_i32_0 : i32, i32
  }
  func.func @transform_3(%arg0: i32) -> (i32, i32) {
    %c0_i32 = arith.constant 0 : i32
    %c0_i32_0 = arith.constant 0 : i32
    return %arg0, %c0_i32 : i32, i32
  }
}

module attributes {stable_mosaic.version = 11 : i64} {
  func.func @_pool3x3_dense_kernel(%arg0: i32, %arg1: memref<1x43x5504xf32, #tpu.memory_space<vmem>>, %arg2: memref<1x41x5248xf32, #tpu.memory_space<vmem>>) attributes {dimension_semantics = [#tpu.dimension_semantics<parallel>], iteration_bounds = array<i64: 2>, scalar_prefetch = 0 : i64, scratch_operands = 0 : i64, tpu.core_type = #tpu.core_type<tc>, window_params = [{transform_indices = @transform_0, window_bounds = array<i64: 1, 43, 5504>}, {transform_indices = @transform_1, window_bounds = array<i64: 1, 41, 5248>}]} {
    %c0 = arith.constant 0 : index
    %c0_0 = arith.constant 0 : index
    %c0_1 = arith.constant 0 : index
    %0 = vector.load %arg1[%c0, %c0_0, %c0_1] : memref<1x43x5504xf32, #tpu.memory_space<vmem>>, vector<1x43x5504xf32>
    %1 = vector.shape_cast %0 : vector<1x43x5504xf32> to vector<43x5504xf32>
    %2 = vector.extract_strided_slice %1 {offsets = [0, 0], sizes = [43, 5248], strides = [1, 1]} : vector<43x5504xf32> to vector<43x5248xf32>
    %3 = vector.extract_strided_slice %1 {offsets = [0, 128], sizes = [43, 5248], strides = [1, 1]} : vector<43x5504xf32> to vector<43x5248xf32>
    %4 = arith.maximumf %2, %3 : vector<43x5248xf32>
    %5 = vector.extract_strided_slice %1 {offsets = [0, 256], sizes = [43, 5248], strides = [1, 1]} : vector<43x5504xf32> to vector<43x5248xf32>
    %6 = arith.maximumf %4, %5 : vector<43x5248xf32>
    %7 = vector.extract_strided_slice %6 {offsets = [0, 0], sizes = [41, 5248], strides = [1, 1]} : vector<43x5248xf32> to vector<41x5248xf32>
    %8 = vector.extract_strided_slice %6 {offsets = [1, 0], sizes = [41, 5248], strides = [1, 1]} : vector<43x5248xf32> to vector<41x5248xf32>
    %9 = arith.maximumf %7, %8 : vector<41x5248xf32>
    %10 = vector.extract_strided_slice %6 {offsets = [2, 0], sizes = [41, 5248], strides = [1, 1]} : vector<43x5248xf32> to vector<41x5248xf32>
    %11 = arith.maximumf %9, %10 : vector<41x5248xf32>
    %cst = arith.constant 0.000000e+00 : f32
    %12 = vector.broadcast %cst : f32 to vector<41x5248xf32>
    %13 = arith.maximumf %11, %12 : vector<41x5248xf32>
    %c0_2 = arith.constant 0 : index
    %c0_3 = arith.constant 0 : index
    %c0_4 = arith.constant 0 : index
    %14 = vector.load %arg2[%c0_2, %c0_3, %c0_4] : memref<1x41x5248xf32, #tpu.memory_space<vmem>>, vector<1x41x5248xf32>
    %15 = vector.shape_cast %14 : vector<1x41x5248xf32> to vector<41x5248xf32>
    %16 = vector.shape_cast %13 : vector<41x5248xf32> to vector<1x41x5248xf32>
    tpu.vector_store %arg2[%c0_2, %c0_3, %c0_4], %16 {strides = array<i32>} : memref<1x41x5248xf32, #tpu.memory_space<vmem>>, vector<1x41x5248xf32>,
    return
  }
  func.func @transform_0(%arg0: i32) -> (i32, i32, i32) {
    %c0_i32 = arith.constant 0 : i32
    %c0_i32_0 = arith.constant 0 : i32
    %c0_i32_1 = arith.constant 0 : i32
    return %arg0, %c0_i32, %c0_i32_0 : i32, i32, i32
  }
  func.func @transform_1(%arg0: i32) -> (i32, i32, i32) {
    %c0_i32 = arith.constant 0 : i32
    %c0_i32_0 = arith.constant 0 : i32
    %c0_i32_1 = arith.constant 0 : i32
    return %arg0, %c0_i32, %c0_i32_0 : i32, i32, i32
  }
}

module attributes {stable_mosaic.version = 11 : i64} {
  func.func @_conv_bias_kernel(%arg0: i32, %arg1: memref<592x600xbf16, #tpu.memory_space<vmem>>, %arg2: memref<600x128xbf16, #tpu.memory_space<vmem>>, %arg3: memref<1x128xf32, #tpu.memory_space<vmem>>, %arg4: memref<592x128xf32, #tpu.memory_space<vmem>>) attributes {dimension_semantics = [#tpu.dimension_semantics<parallel>], iteration_bounds = array<i64: 1>, scalar_prefetch = 0 : i64, scratch_operands = 0 : i64, tpu.core_type = #tpu.core_type<tc>, window_params = [{transform_indices = @transform_0, window_bounds = array<i64: 592, 600>}, {pipeline_mode = #tpu.pipeline_mode<synchronous>, transform_indices = @transform_1, window_bounds = array<i64: 600, 128>}, {pipeline_mode = #tpu.pipeline_mode<synchronous>, transform_indices = @transform_2, window_bounds = array<i64: 1, 128>}, {transform_indices = @transform_3, window_bounds = array<i64: 592, 128>}]} {
    %c0 = arith.constant 0 : index
    %c0_0 = arith.constant 0 : index
    %0 = vector.load %arg1[%c0, %c0_0] : memref<592x600xbf16, #tpu.memory_space<vmem>>, vector<592x600xbf16>
    %c0_1 = arith.constant 0 : index
    %c0_2 = arith.constant 0 : index
    %1 = vector.load %arg2[%c0_1, %c0_2] : memref<600x128xbf16, #tpu.memory_space<vmem>>, vector<600x128xbf16>
    %cst = arith.constant dense<0.000000e+00> : vector<592x128xf32>
    %2 = tpu.matmul %0, %1, %cst {dimension_numbers = #tpu.dot_dimension_numbers<[1], [0], [0], [1], [0, 0, 1, 1], [], []>} : vector<592x600xbf16>, vector<600x128xbf16>, vector<592x128xf32> -> vector<592x128xf32>
    %c0_3 = arith.constant 0 : index
    %c0_4 = arith.constant 0 : index
    %3 = vector.load %arg3[%c0_3, %c0_4] : memref<1x128xf32, #tpu.memory_space<vmem>>, vector<1x128xf32>
    %4 = vector.broadcast %3 : vector<1x128xf32> to vector<592x128xf32>
    %5 = arith.addf %2, %4 : vector<592x128xf32>
    %c0_5 = arith.constant 0 : index
    %c0_6 = arith.constant 0 : index
    %6 = vector.load %arg4[%c0_5, %c0_6] : memref<592x128xf32, #tpu.memory_space<vmem>>, vector<592x128xf32>
    tpu.vector_store %arg4[%c0_5, %c0_6], %5 {strides = array<i32>} : memref<592x128xf32, #tpu.memory_space<vmem>>, vector<592x128xf32>,
    return
  }
  func.func @transform_0(%arg0: i32) -> (i32, i32) {
    %c0_i32 = arith.constant 0 : i32
    %c0_i32_0 = arith.constant 0 : i32
    return %arg0, %c0_i32 : i32, i32
  }
  func.func @transform_1(%arg0: i32) -> (i32, i32) {
    %c0_i32 = arith.constant 0 : i32
    %c0_i32_0 = arith.constant 0 : i32
    %c0_i32_1 = arith.constant 0 : i32
    return %c0_i32, %c0_i32_0 : i32, i32
  }
  func.func @transform_2(%arg0: i32) -> (i32, i32) {
    %c0_i32 = arith.constant 0 : i32
    %c0_i32_0 = arith.constant 0 : i32
    %c0_i32_1 = arith.constant 0 : i32
    return %c0_i32, %c0_i32_0 : i32, i32
  }
  func.func @transform_3(%arg0: i32) -> (i32, i32) {
    %c0_i32 = arith.constant 0 : i32
    %c0_i32_0 = arith.constant 0 : i32
    return %arg0, %c0_i32 : i32, i32
  }
}

module attributes {stable_mosaic.version = 11 : i64} {
  func.func @_pool3x3_dense_kernel(%arg0: i32, %arg1: memref<1x17x2176xf32, #tpu.memory_space<vmem>>, %arg2: memref<1x15x1920xf32, #tpu.memory_space<vmem>>) attributes {dimension_semantics = [#tpu.dimension_semantics<parallel>], iteration_bounds = array<i64: 2>, scalar_prefetch = 0 : i64, scratch_operands = 0 : i64, tpu.core_type = #tpu.core_type<tc>, window_params = [{transform_indices = @transform_0, window_bounds = array<i64: 1, 17, 2176>}, {transform_indices = @transform_1, window_bounds = array<i64: 1, 15, 1920>}]} {
    %c0 = arith.constant 0 : index
    %c0_0 = arith.constant 0 : index
    %c0_1 = arith.constant 0 : index
    %0 = vector.load %arg1[%c0, %c0_0, %c0_1] : memref<1x17x2176xf32, #tpu.memory_space<vmem>>, vector<1x17x2176xf32>
    %1 = vector.shape_cast %0 : vector<1x17x2176xf32> to vector<17x2176xf32>
    %2 = vector.extract_strided_slice %1 {offsets = [0, 0], sizes = [17, 1920], strides = [1, 1]} : vector<17x2176xf32> to vector<17x1920xf32>
    %3 = vector.extract_strided_slice %1 {offsets = [0, 128], sizes = [17, 1920], strides = [1, 1]} : vector<17x2176xf32> to vector<17x1920xf32>
    %4 = arith.maximumf %2, %3 : vector<17x1920xf32>
    %5 = vector.extract_strided_slice %1 {offsets = [0, 256], sizes = [17, 1920], strides = [1, 1]} : vector<17x2176xf32> to vector<17x1920xf32>
    %6 = arith.maximumf %4, %5 : vector<17x1920xf32>
    %7 = vector.extract_strided_slice %6 {offsets = [0, 0], sizes = [15, 1920], strides = [1, 1]} : vector<17x1920xf32> to vector<15x1920xf32>
    %8 = vector.extract_strided_slice %6 {offsets = [1, 0], sizes = [15, 1920], strides = [1, 1]} : vector<17x1920xf32> to vector<15x1920xf32>
    %9 = arith.maximumf %7, %8 : vector<15x1920xf32>
    %10 = vector.extract_strided_slice %6 {offsets = [2, 0], sizes = [15, 1920], strides = [1, 1]} : vector<17x1920xf32> to vector<15x1920xf32>
    %11 = arith.maximumf %9, %10 : vector<15x1920xf32>
    %cst = arith.constant 0.000000e+00 : f32
    %12 = vector.broadcast %cst : f32 to vector<15x1920xf32>
    %13 = arith.maximumf %11, %12 : vector<15x1920xf32>
    %c0_2 = arith.constant 0 : index
    %c0_3 = arith.constant 0 : index
    %c0_4 = arith.constant 0 : index
    %14 = vector.load %arg2[%c0_2, %c0_3, %c0_4] : memref<1x15x1920xf32, #tpu.memory_space<vmem>>, vector<1x15x1920xf32>
    %15 = vector.shape_cast %14 : vector<1x15x1920xf32> to vector<15x1920xf32>
    %16 = vector.shape_cast %13 : vector<15x1920xf32> to vector<1x15x1920xf32>
    tpu.vector_store %arg2[%c0_2, %c0_3, %c0_4], %16 {strides = array<i32>} : memref<1x15x1920xf32, #tpu.memory_space<vmem>>, vector<1x15x1920xf32>,
    return
  }
  func.func @transform_0(%arg0: i32) -> (i32, i32, i32) {
    %c0_i32 = arith.constant 0 : i32
    %c0_i32_0 = arith.constant 0 : i32
    %c0_i32_1 = arith.constant 0 : i32
    return %arg0, %c0_i32, %c0_i32_0 : i32, i32, i32
  }
  func.func @transform_1(%arg0: i32) -> (i32, i32, i32) {
    %c0_i32 = arith.constant 0 : i32
    %c0_i32_0 = arith.constant 0 : i32
    %c0_i32_1 = arith.constant 0 : i32
    return %arg0, %c0_i32, %c0_i32_0 : i32, i32, i32
  }
}

module attributes {stable_mosaic.version = 11 : i64} {
  func.func @_conv_bias_kernel(%arg0: i32, %arg1: memref<80x576xbf16, #tpu.memory_space<vmem>>, %arg2: memref<576x128xbf16, #tpu.memory_space<vmem>>, %arg3: memref<1x128xf32, #tpu.memory_space<vmem>>, %arg4: memref<80x128xf32, #tpu.memory_space<vmem>>) attributes {dimension_semantics = [#tpu.dimension_semantics<parallel>], iteration_bounds = array<i64: 1>, scalar_prefetch = 0 : i64, scratch_operands = 0 : i64, tpu.core_type = #tpu.core_type<tc>, window_params = [{transform_indices = @transform_0, window_bounds = array<i64: 80, 576>}, {pipeline_mode = #tpu.pipeline_mode<synchronous>, transform_indices = @transform_1, window_bounds = array<i64: 576, 128>}, {pipeline_mode = #tpu.pipeline_mode<synchronous>, transform_indices = @transform_2, window_bounds = array<i64: 1, 128>}, {transform_indices = @transform_3, window_bounds = array<i64: 80, 128>}]} {
    %c0 = arith.constant 0 : index
    %c0_0 = arith.constant 0 : index
    %0 = vector.load %arg1[%c0, %c0_0] : memref<80x576xbf16, #tpu.memory_space<vmem>>, vector<80x576xbf16>
    %c0_1 = arith.constant 0 : index
    %c0_2 = arith.constant 0 : index
    %1 = vector.load %arg2[%c0_1, %c0_2] : memref<576x128xbf16, #tpu.memory_space<vmem>>, vector<576x128xbf16>
    %cst = arith.constant dense<0.000000e+00> : vector<80x128xf32>
    %2 = tpu.matmul %0, %1, %cst {dimension_numbers = #tpu.dot_dimension_numbers<[1], [0], [0], [1], [0, 0, 1, 1], [], []>} : vector<80x576xbf16>, vector<576x128xbf16>, vector<80x128xf32> -> vector<80x128xf32>
    %c0_3 = arith.constant 0 : index
    %c0_4 = arith.constant 0 : index
    %3 = vector.load %arg3[%c0_3, %c0_4] : memref<1x128xf32, #tpu.memory_space<vmem>>, vector<1x128xf32>
    %4 = vector.broadcast %3 : vector<1x128xf32> to vector<80x128xf32>
    %5 = arith.addf %2, %4 : vector<80x128xf32>
    %cst_5 = arith.constant 0.000000e+00 : f32
    %6 = vector.broadcast %cst_5 : f32 to vector<80x128xf32>
    %7 = arith.maximumf %5, %6 : vector<80x128xf32>
    %c0_6 = arith.constant 0 : index
    %c0_7 = arith.constant 0 : index
    %8 = vector.load %arg4[%c0_6, %c0_7] : memref<80x128xf32, #tpu.memory_space<vmem>>, vector<80x128xf32>
    tpu.vector_store %arg4[%c0_6, %c0_7], %7 {strides = array<i32>} : memref<80x128xf32, #tpu.memory_space<vmem>>, vector<80x128xf32>,
    return
  }
  func.func @transform_0(%arg0: i32) -> (i32, i32) {
    %c0_i32 = arith.constant 0 : i32
    %c0_i32_0 = arith.constant 0 : i32
    return %arg0, %c0_i32 : i32, i32
  }
  func.func @transform_1(%arg0: i32) -> (i32, i32) {
    %c0_i32 = arith.constant 0 : i32
    %c0_i32_0 = arith.constant 0 : i32
    %c0_i32_1 = arith.constant 0 : i32
    return %c0_i32, %c0_i32_0 : i32, i32
  }
  func.func @transform_2(%arg0: i32) -> (i32, i32) {
    %c0_i32 = arith.constant 0 : i32
    %c0_i32_0 = arith.constant 0 : i32
    %c0_i32_1 = arith.constant 0 : i32
    return %c0_i32, %c0_i32_0 : i32, i32
  }
  func.func @transform_3(%arg0: i32) -> (i32, i32) {
    %c0_i32 = arith.constant 0 : i32
    %c0_i32_0 = arith.constant 0 : i32
    return %arg0, %c0_i32 : i32, i32
  }
}

module attributes {stable_mosaic.version = 11 : i64} {
  func.func @_conv_bias_kernel(%arg0: i32, %arg1: memref<32x864xbf16, #tpu.memory_space<vmem>>, %arg2: memref<864x128xbf16, #tpu.memory_space<vmem>>, %arg3: memref<1x128xf32, #tpu.memory_space<vmem>>, %arg4: memref<32x128xf32, #tpu.memory_space<vmem>>) attributes {dimension_semantics = [#tpu.dimension_semantics<parallel>], iteration_bounds = array<i64: 1>, scalar_prefetch = 0 : i64, scratch_operands = 0 : i64, tpu.core_type = #tpu.core_type<tc>, window_params = [{transform_indices = @transform_0, window_bounds = array<i64: 32, 864>}, {pipeline_mode = #tpu.pipeline_mode<synchronous>, transform_indices = @transform_1, window_bounds = array<i64: 864, 128>}, {pipeline_mode = #tpu.pipeline_mode<synchronous>, transform_indices = @transform_2, window_bounds = array<i64: 1, 128>}, {transform_indices = @transform_3, window_bounds = array<i64: 32, 128>}]} {
    %c0 = arith.constant 0 : index
    %c0_0 = arith.constant 0 : index
    %0 = vector.load %arg1[%c0, %c0_0] : memref<32x864xbf16, #tpu.memory_space<vmem>>, vector<32x864xbf16>
    %c0_1 = arith.constant 0 : index
    %c0_2 = arith.constant 0 : index
    %1 = vector.load %arg2[%c0_1, %c0_2] : memref<864x128xbf16, #tpu.memory_space<vmem>>, vector<864x128xbf16>
    %cst = arith.constant dense<0.000000e+00> : vector<32x128xf32>
    %2 = tpu.matmul %0, %1, %cst {dimension_numbers = #tpu.dot_dimension_numbers<[1], [0], [0], [1], [0, 0, 1, 1], [], []>} : vector<32x864xbf16>, vector<864x128xbf16>, vector<32x128xf32> -> vector<32x128xf32>
    %c0_3 = arith.constant 0 : index
    %c0_4 = arith.constant 0 : index
    %3 = vector.load %arg3[%c0_3, %c0_4] : memref<1x128xf32, #tpu.memory_space<vmem>>, vector<1x128xf32>
    %4 = vector.broadcast %3 : vector<1x128xf32> to vector<32x128xf32>
    %5 = arith.addf %2, %4 : vector<32x128xf32>
    %cst_5 = arith.constant 0.000000e+00 : f32
    %6 = vector.broadcast %cst_5 : f32 to vector<32x128xf32>
    %7 = arith.maximumf %5, %6 : vector<32x128xf32>
    %c0_6 = arith.constant 0 : index
    %c0_7 = arith.constant 0 : index
    %8 = vector.load %arg4[%c0_6, %c0_7] : memref<32x128xf32, #tpu.memory_space<vmem>>, vector<32x128xf32>
    tpu.vector_store %arg4[%c0_6, %c0_7], %7 {strides = array<i32>} : memref<32x128xf32, #tpu.memory_space<vmem>>, vector<32x128xf32>,
    return
  }
  func.func @transform_0(%arg0: i32) -> (i32, i32) {
    %c0_i32 = arith.constant 0 : i32
    %c0_i32_0 = arith.constant 0 : i32
    return %arg0, %c0_i32 : i32, i32
  }
  func.func @transform_1(%arg0: i32) -> (i32, i32) {
    %c0_i32 = arith.constant 0 : i32
    %c0_i32_0 = arith.constant 0 : i32
    %c0_i32_1 = arith.constant 0 : i32
    return %c0_i32, %c0_i32_0 : i32, i32
  }
  func.func @transform_2(%arg0: i32) -> (i32, i32) {
    %c0_i32 = arith.constant 0 : i32
    %c0_i32_0 = arith.constant 0 : i32
    %c0_i32_1 = arith.constant 0 : i32
    return %c0_i32, %c0_i32_0 : i32, i32
  }
  func.func @transform_3(%arg0: i32) -> (i32, i32) {
    %c0_i32 = arith.constant 0 : i32
    %c0_i32_0 = arith.constant 0 : i32
    return %arg0, %c0_i32 : i32, i32
  }
}

module attributes {stable_mosaic.version = 11 : i64} {
  func.func @_conv_bias_kernel(%arg0: i32, %arg1: memref<16x864xbf16, #tpu.memory_space<vmem>>, %arg2: memref<864x128xbf16, #tpu.memory_space<vmem>>, %arg3: memref<1x128xf32, #tpu.memory_space<vmem>>, %arg4: memref<16x128xf32, #tpu.memory_space<vmem>>) attributes {dimension_semantics = [#tpu.dimension_semantics<parallel>], iteration_bounds = array<i64: 1>, scalar_prefetch = 0 : i64, scratch_operands = 0 : i64, tpu.core_type = #tpu.core_type<tc>, window_params = [{transform_indices = @transform_0, window_bounds = array<i64: 16, 864>}, {pipeline_mode = #tpu.pipeline_mode<synchronous>, transform_indices = @transform_1, window_bounds = array<i64: 864, 128>}, {pipeline_mode = #tpu.pipeline_mode<synchronous>, transform_indices = @transform_2, window_bounds = array<i64: 1, 128>}, {transform_indices = @transform_3, window_bounds = array<i64: 16, 128>}]} {
    %c0 = arith.constant 0 : index
    %c0_0 = arith.constant 0 : index
    %0 = vector.load %arg1[%c0, %c0_0] : memref<16x864xbf16, #tpu.memory_space<vmem>>, vector<16x864xbf16>
    %c0_1 = arith.constant 0 : index
    %c0_2 = arith.constant 0 : index
    %1 = vector.load %arg2[%c0_1, %c0_2] : memref<864x128xbf16, #tpu.memory_space<vmem>>, vector<864x128xbf16>
    %cst = arith.constant dense<0.000000e+00> : vector<16x128xf32>
    %2 = tpu.matmul %0, %1, %cst {dimension_numbers = #tpu.dot_dimension_numbers<[1], [0], [0], [1], [0, 0, 1, 1], [], []>} : vector<16x864xbf16>, vector<864x128xbf16>, vector<16x128xf32> -> vector<16x128xf32>
    %c0_3 = arith.constant 0 : index
    %c0_4 = arith.constant 0 : index
    %3 = vector.load %arg3[%c0_3, %c0_4] : memref<1x128xf32, #tpu.memory_space<vmem>>, vector<1x128xf32>
    %4 = vector.broadcast %3 : vector<1x128xf32> to vector<16x128xf32>
    %5 = arith.addf %2, %4 : vector<16x128xf32>
    %c0_5 = arith.constant 0 : index
    %c0_6 = arith.constant 0 : index
    %6 = vector.load %arg4[%c0_5, %c0_6] : memref<16x128xf32, #tpu.memory_space<vmem>>, vector<16x128xf32>
    tpu.vector_store %arg4[%c0_5, %c0_6], %5 {strides = array<i32>} : memref<16x128xf32, #tpu.memory_space<vmem>>, vector<16x128xf32>,
    return
  }
  func.func @transform_0(%arg0: i32) -> (i32, i32) {
    %c0_i32 = arith.constant 0 : i32
    %c0_i32_0 = arith.constant 0 : i32
    return %arg0, %c0_i32 : i32, i32
  }
  func.func @transform_1(%arg0: i32) -> (i32, i32) {
    %c0_i32 = arith.constant 0 : i32
    %c0_i32_0 = arith.constant 0 : i32
    %c0_i32_1 = arith.constant 0 : i32
    return %c0_i32, %c0_i32_0 : i32, i32
  }
  func.func @transform_2(%arg0: i32) -> (i32, i32) {
    %c0_i32 = arith.constant 0 : i32
    %c0_i32_0 = arith.constant 0 : i32
    %c0_i32_1 = arith.constant 0 : i32
    return %c0_i32, %c0_i32_0 : i32, i32
  }
  func.func @transform_3(%arg0: i32) -> (i32, i32) {
    %c0_i32 = arith.constant 0 : i32
    %c0_i32_0 = arith.constant 0 : i32
    return %arg0, %c0_i32 : i32, i32
  }
}

</mosaic_0001>

<bundles_post_ra>
// kernel: _lambda_.7
= control target key start
LH: loop header
LB: loop body
LE: loop exit
PB: predicated region body
PF: predicated region fallthrough
CT: control target
= control target key end

     0   :  { %s2406_s12 = smov 0   ;;  %s3005_s0 = inlined_call_operand.vmem [shape: bf16[4096,363], index: 0, kind: input, shape index: {}]   ;;  %s3006_s1 = inlined_call_operand.vmem [shape: bf16[363,128], index: 1, kind: input, shape index: {}]   ;;  %s3007_s2 = inlined_call_operand.vmem [shape: f32[1,128], index: 2, kind: input, shape index: {}]   ;;  %s3008_s3 = inlined_call_operand.vmem [shape: f32[4096,128], index: 3, kind: output, shape index: {}]  }
   0x1 LB: > { %s1704_s13 = sadd.s32 4294967295, %s2383_s12   ;;  %p1708_p0 = scmp.ge.s32.totalorder %s2383_s12, 1  ;;  %s2383_s12 = sphi %s2406_s12, %s13_s12  }
   0x2   : > { %p139_p1 = scmp.lt.s32.totalorder %s2383_s12, 9 }
   0x4   : > { %p140_p2 = pnand %p1708_p0, %p139_p1 }
   0x5   : > { %s1709_s5 = sshll.u32 (!%p140_p2), %s1704_s13, 6 }
   0x6   : > { %143 = sbr.rel (%p140_p2) target bundleno = 571 (0x23b), region = 32  ;;  %p165_p3 = scmp.lt.s32.totalorder (!%p140_p2), %s1709_s5, 511 }
   0xb   : > { %v2326_v0 = vld [vmem:[%s3006_s1 + $0x38] sm:$0xff]  ;;  %v2187_v2 = vld [vmem:[%s3006_s1 + $0xb0] sm:$0xf]  ;;  %vm1070_vm0 = vcmask 1044480   ;;  %vm1071_vm1 = vcmask 1045504   ;;  %v2385_v5 = vmov 65535  }
   0xc   : > { %v2420_v1 = vld [vmem:[%s3006_s1 + $0x78] sm:$0xff]  ;;  %v2341_v3 = vld [vmem:[%s3006_s1 + $0xb0] sm:$0x30]  ;;  %1077 = vmatpush.bf16.msra.mxu0 %v2326_v0  ;;  %2342 = vmatpush.bf16.msra.mxu3 %v2326_v0  ;;  %v1072_v6 = vsel %vm1070_vm0, 4294967295, %v2385_v5  ;;  %v2443_v11 = vld [vmem:[%s3006_s1 + $0xa8] sm:$0xff]  ;;  %s3010_s5 = smov (!%p165_p3, %s1709_s5), 511 }
   0xd   : > { %v2188_v4 = vor.u32 %v2341_v3, %v2187_v2  ;;  %v2325_v7 = vld [vmem:[%s3006_s1 + $0x30] sm:$0xff]  ;;  %1246 = vmatpush.bf16.msra.mxu1 %v2420_v1  ;;  %v1073_v8 = vsel %vm1071_vm1, %v1072_v6, 0  ;;  %v2324_v12 = vld [vmem:[%s3006_s1 + $0x28] sm:$0xff]  ;;  %v2458_v14 = vld [vmem:[%s3006_s1 + $0xa0] sm:$0xff]  ;;  %s2365_s23 = smul.u32 12, %s3010_s5  ;;  %vm973_vm2 = vcmask 875520  }
   0xe   : > { %v2435_v9 = vld [vmem:[%s3006_s1 + $0x70] sm:$0xff]  ;;  %v2452_v13 = vld [vmem:[%s3006_s1 + $0x68] sm:$0xff]  ;;  %v2323_v15 = vld [vmem:[%s3006_s1 + $0x20] sm:$0xff]  ;;  %s1712_s18 = sshll.u32 %s3010_s5, 3 }
   0xf   : > { %v2437_v10 = vand.u32 %v2188_v4, %v1073_v8  ;;  %v2467_v16 = vld [vmem:[%s3006_s1 + $0x60] sm:$0xff]  ;;  %v2473_v17 = vld [vmem:[%s3006_s1 + $0x98] sm:$0xff]  ;;  %v2488_v20 = vld [vmem:[%s3006_s1 + $0x90] sm:$0xff]  ;;  %s2509_s6 = scalar_lea.vmem %s3005_s0, %s2365_s23  ;;  %s2629_s21 = scalar_lea.vmem %s3008_s3, %s1712_s18 }
  0x10   : > { %1078 = vmatpush.bf16.msra.mxu0 %v2325_v7  ;;  %2343 = vmatpush.bf16.msra.mxu3 %v2325_v7  ;;  %v2322_v18 = vld [vmem:[%s3006_s1 + $0x18] sm:$0xff]  ;;  %v2321_v21 = vld [vmem:[%s3006_s1 + $0x10] sm:$0xff]  ;;  %v2501_v23 = vld [vmem:[%s3006_s1 + $0x88] sm:$0xff] }
  0x11   : > { %1416 = vmatpush.bf16.msra.mxu2 %v2437_v10  ;;  %1247 = vmatpush.bf16.msra.mxu1 %v2435_v9  ;;  %v2330_v19 = vld [vmem:[%s3006_s1 + $0x58] sm:$0xff]  ;;  %v2329_v22 = vld [vmem:[%s3006_s1 + $0x50] sm:$0xff]  ;;  %v2320_v24 = vld [vmem:[%s3006_s1 + $0x8] sm:$0xff] }
  0x12   : > { %v2328_v25 = vld [vmem:[%s3006_s1 + $0x48] sm:$0xff]  ;;  %v2517_v26 = vld [vmem:[%s3006_s1 + $0x80] sm:$0xff]  ;;  %v2225_v29 = vld [vmem:[%s2509_s6 + $0x10] sm:$0xf0] }
  0x13   : > { %v2319_v27 = vld [vmem:[%s3006_s1] sm:$0xff]  ;;  %v1723_v28 = vld [vmem:[%s2509_s6 + $0x8] sm:$0xf]  ;;  %v2224_v32 = vld [vmem:[%s2509_s6 + $0x8] sm:$0xf0] }
  0x14   : > { %1079 = vmatpush.bf16.msra.mxu0 %v2324_v12  ;;  %2344 = vmatpush.bf16.msra.mxu3 %v2324_v12  ;;  %v2327_v30 = vld [vmem:[%s3006_s1 + $0x40] sm:$0xff]  ;;  %v2296_v34 = vld [vmem:[%s2509_s6 + $0x248] sm:$0xf0]  ;;  %v1717_v36 = vld [vmem:[%s2509_s6 + $0xc] sm:$0xf0]  ;;  %v1724_v37 = vor.u32 %v2225_v29, %v1723_v28 }
  0x15   : > { %1417 = vmatpush.bf16.msra.mxu2 %v2443_v11  ;;  %1248 = vmatpush.bf16.msra.mxu1 %v2452_v13  ;;  %v1715_v31 = vld [vmem:[%s2509_s6] sm:$0xf]  ;;  %v2223_v35 = vld [vmem:[%s2509_s6 + $0x4] sm:$0xf]  ;;  %v2228_v42 = vld [vmem:[%s2509_s6 + $0x28] sm:$0xf0] }
  0x16   : > { %v2003_v33 = vld [vmem:[%s2509_s6 + $0x240] sm:$0xf]  ;;  %v1716_v38 = vor.u32 %v2224_v32, %v1715_v31  ;;  %v1720_v40 = vor.u32 %v2223_v35, %v1717_v36  ;;  %v1727_v43 = vld [vmem:[%s2509_s6 + $0x18] sm:$0xf]  ;;  %v2227_v44 = vld [vmem:[%s2509_s6 + $0x20] sm:$0xf0] }
  0x17   : > { %v2004_v39 = vor.u32 %v2296_v34, %v2003_v33  ;;  %v1735_v41 = vld [vmem:[%s2509_s6 + $0x20] sm:$0xf]  ;;  %v2015_v45 = vld [vmem:[%s2509_s6 + $0x258] sm:$0xf]  ;;  %v2299_v46 = vld [vmem:[%s2509_s6 + $0x260] sm:$0xf0]  ;;  %v1728_v50 = vor.u32 %v2227_v44, %v1727_v43 }
  0x18   : > { %1080 = vmatpush.bf16.msra.mxu0 %v2323_v15  ;;  %2345 = vmatpush.bf16.msra.mxu3 %v2323_v15  ;;  %v2226_v47 = vld [vmem:[%s2509_s6 + $0x1c] sm:$0xf]  ;;  %v1729_v48 = vld [vmem:[%s2509_s6 + $0x24] sm:$0xf0]  ;;  %v1736_v49 = vor.u32 %v2228_v42, %v1735_v41  ;;  %v2016_v51 = vor.u32 %v2299_v46, %v2015_v45  ;;  %v1747_v53 = vld [vmem:[%s2509_s6 + $0x38] sm:$0xf] }
  0x19   : > { %1418 = vmatpush.bf16.msra.mxu2 %v2458_v14  ;;  %1249 = vmatpush.bf16.msra.mxu1 %v2467_v16  ;;  %v1732_v52 = vor.u32 %v2226_v47, %v1729_v48  ;;  %v2231_v54 = vld [vmem:[%s2509_s6 + $0x40] sm:$0xf0]  ;;  %v1739_v55 = vld [vmem:[%s2509_s6 + $0x30] sm:$0xf]  ;;  %v2230_v56 = vld [vmem:[%s2509_s6 + $0x38] sm:$0xf0] }
  0x1a   : > { %v2027_v57 = vld [vmem:[%s2509_s6 + $0x270] sm:$0xf]  ;;  %v2302_v58 = vld [vmem:[%s2509_s6 + $0x278] sm:$0xf0]  ;;  %v2229_v59 = vld [vmem:[%s2509_s6 + $0x34] sm:$0xf]  ;;  %v1748_v61 = vor.u32 %v2231_v54, %v1747_v53  ;;  %v1740_v62 = vor.u32 %v2230_v56, %v1739_v55 }
  0x1b   : > { %v1741_v60 = vld [vmem:[%s2509_s6 + $0x3c] sm:$0xf0]  ;;  %v2028_v63 = vor.u32 %v2302_v58, %v2027_v57  ;;  %v2234_v2 = vld [vmem:[%s2509_s6 + $0x58] sm:$0xf0]  ;;  %v1751_v3 = vld [vmem:[%s2509_s6 + $0x48] sm:$0xf] }
  0x1c   : > { %1081 = vmatpush.bf16.msra.mxu0 %v2322_v18  ;;  %2346 = vmatpush.bf16.msra.mxu3 %v2322_v18  ;;  %v1744_v0 = vor.u32 %v2229_v59, %v1741_v60  ;;  %v2233_v4 = vld [vmem:[%s2509_s6 + $0x50] sm:$0xf0]  ;;  %v2039_v5 = vld [vmem:[%s2509_s6 + $0x288] sm:$0xf]  ;;  %v2232_v7 = vld [vmem:[%s2509_s6 + $0x4c] sm:$0xf] }
  0x1d   : > { %1419 = vmatpush.bf16.msra.mxu2 %v2473_v17  ;;  %1250 = vmatpush.bf16.msra.mxu1 %v2330_v19  ;;  %v2305_v6 = vld [vmem:[%s2509_s6 + $0x290] sm:$0xf0]  ;;  %v1753_v8 = vld [vmem:[%s2509_s6 + $0x54] sm:$0xf0]  ;;  %v1763_v15 = vld [vmem:[%s2509_s6 + $0x60] sm:$0xf] }
  0x1e   : > { %v1756_v12 = vor.u32 %v2232_v7, %v1753_v8  ;;  %v2308_v18 = vld [vmem:[%s2509_s6 + $0x2a8] sm:$0xf0]  ;;  %v2239_v28 = vld [vmem:[%s2509_s6 + $0x80] sm:$0xf0]  ;;  %v2063_v29 = vld [vmem:[%s2509_s6 + $0x2b8] sm:$0xf] }
  0x1f   : > { %v2238_v31 = vld [vmem:[%s2509_s6 + $0x7c] sm:$0xf]  ;;  %v1777_v32 = vld [vmem:[%s2509_s6 + $0x84] sm:$0xf0]  ;;  %v2075_v41 = vld [vmem:[%s2509_s6 + $0x2d0] sm:$0xf] }
  0x20   : > { %1082 = vmatpush.bf16.msra.mxu0 %v2321_v21  ;;  %2347 = vmatpush.bf16.msra.mxu3 %v2321_v21  ;;  %v1780_v36 = vor.u32 %v2238_v31, %v1777_v32  ;;  %v2314_v42 = vld [vmem:[%s2509_s6 + $0x2d8] sm:$0xf0]  ;;  %v2241_v43 = vld [vmem:[%s2509_s6 + $0x94] sm:$0xf]  ;;  %v1789_v44 = vld [vmem:[%s2509_s6 + $0x9c] sm:$0xf0] }
  0x21   : > { %1420 = vmatpush.bf16.msra.mxu2 %v2488_v20  ;;  %1251 = vmatpush.bf16.msra.mxu1 %v2329_v22  ;;  %v2076_v47 = vor.u32 %v2314_v42, %v2075_v41  ;;  %v1792_v48 = vor.u32 %v2241_v43, %v1789_v44  ;;  %v2087_v53 = vld [vmem:[%s2509_s6 + $0x2e8] sm:$0xf]  ;;  %v2317_v54 = vld [vmem:[%s2509_s6 + $0x2f0] sm:$0xf0]  ;;  %v2244_v55 = vld [vmem:[%s2509_s6 + $0xac] sm:$0xf] }
  0x22   : > { %v1801_v56 = vld [vmem:[%s2509_s6 + $0xb4] sm:$0xf0]  ;;  %v2088_v59 = vor.u32 %v2317_v54, %v2087_v53  ;;  %v2253_v53 = vld [vmem:[%s2509_s6 + $0xf4] sm:$0xf]  ;;  %v1837_v54 = vld [vmem:[%s2509_s6 + $0xfc] sm:$0xf0] }
  0x23   : > { %v1804_v60 = vor.u32 %v2244_v55, %v1801_v56 }
  0x24   : > { %1083 = vmatpush.bf16.msra.mxu0 %v2320_v24  ;;  %2348 = vmatpush.bf16.msra.mxu3 %v2320_v24 }
  0x25   : > { %1421 = vmatpush.bf16.msra.mxu2 %v2501_v23  ;;  %1252 = vmatpush.bf16.msra.mxu1 %v2328_v25 }
  0x28   : > { %1084 = vmatpush.bf16.msra.mxu0 %v2319_v27  ;;  %2349 = vmatpush.bf16.msra.mxu3 %v2319_v27  ;;  %v1775_v27 = vld [vmem:[%s2509_s6 + $0x78] sm:$0xf] }
  0x29   : > { %1422 = vmatpush.bf16.msra.mxu2 %v2517_v26  ;;  %1253 = vmatpush.bf16.msra.mxu1 %v2327_v30  ;;  %v1776_v34 = vor.u32 %v2239_v28, %v1775_v27  ;;  %v2250_v27 = vld [vmem:[%s2509_s6 + $0xdc] sm:$0xf]  ;;  %v1825_v28 = vld [vmem:[%s2509_s6 + $0xe4] sm:$0xf0] }
  0x2b   : > { %1085 = vmatmul.bf16.vlgmr.msra.gmra.mxu0 %v1716_v38  ;;  %1205 = vmatmul.bf16.vlgmr.msra.gmra.mxu3 %v2004_v39  ;;  %v2243_v38 = vld [vmem:[%s2509_s6 + $0xa0] sm:$0xf0]  ;;  %v1787_v39 = vld [vmem:[%s2509_s6 + $0x90] sm:$0xf] }
  0x2c   : > { %2350 = vmatpush.bf16.msrb.mxu3 %v2420_v1  ;;  %2189 = vmatmul.msk.bf16.vlgmr.msra.gmra.mxu2 %vm973_vm2, %v1724_v37  ;;  %v1759_v1 = vld [vmem:[%s2509_s6 + $0x50] sm:$0xf]  ;;  %v1795_v37 = vld [vmem:[%s2509_s6 + $0x98] sm:$0xf] }
  0x2d   : > { %1254 = vmatmul.bf16.vlgmr.msra.gmra.mxu1 %v1720_v40  ;;  %v2242_v40 = vld [vmem:[%s2509_s6 + $0x98] sm:$0xf0]  ;;  %v1796_v45 = vor.u32 %v2243_v38, %v1795_v37 }
  0x2e   : > { %v1788_v46 = vor.u32 %v2242_v40, %v1787_v39 }
  0x30   : > { %2351 = vmatpush.bf16.msrb.mxu3 %v2435_v9  ;;  %v1760_v9 = vor.u32 %v2234_v2, %v1759_v1  ;;  %v2248_v1 = vld [vmem:[%s2509_s6 + $0xc8] sm:$0xf0]  ;;  %v2295_v2 = vld [vmem:[%s2509_s6 + $0x244] sm:$0xf] }
  0x34   : > { %2352 = vmatpush.bf16.msrb.mxu3 %v2452_v13  ;;  %v1771_v13 = vld [vmem:[%s2509_s6 + $0x68] sm:$0xf] }
  0x38   : > { %2353 = vmatpush.bf16.msrb.mxu3 %v2467_v16  ;;  %v2236_v16 = vld [vmem:[%s2509_s6 + $0x68] sm:$0xf0] }
  0x3b   : > { %1090 = vmatmul.bf16.gmra.mxu0 %v1728_v50  ;;  %1210 = vmatmul.bf16.gmra.mxu3 %v2016_v51  ;;  %v2246_v50 = vld [vmem:[%s2509_s6 + $0xb8] sm:$0xf0]  ;;  %v1799_v51 = vld [vmem:[%s2509_s6 + $0xa8] sm:$0xf] }
  0x3c   : > { %2354 = vmatpush.bf16.msrb.mxu3 %v2330_v19  ;;  %2190 = vmatmul.msk.bf16.gmra.mxu2 %vm973_vm2, %v1736_v49  ;;  %v2235_v19 = vld [vmem:[%s2509_s6 + $0x64] sm:$0xf]  ;;  %v1807_v49 = vld [vmem:[%s2509_s6 + $0xb0] sm:$0xf] }
  0x3d   : > { %1259 = vmatmul.bf16.gmra.mxu1 %v1732_v52  ;;  %v2245_v52 = vld [vmem:[%s2509_s6 + $0xb0] sm:$0xf0]  ;;  %v1808_v57 = vor.u32 %v2246_v50, %v1807_v49  ;;  %v1835_v49 = vld [vmem:[%s2509_s6 + $0xf0] sm:$0xf]  ;;  %v2254_v50 = vld [vmem:[%s2509_s6 + $0xf8] sm:$0xf0] }
  0x3e   : > { %v1800_v58 = vor.u32 %v2245_v52, %v1799_v51  ;;  %v2301_v51 = vld [vmem:[%s2509_s6 + $0x274] sm:$0xf]  ;;  %v2029_v52 = vld [vmem:[%s2509_s6 + $0x27c] sm:$0xf0] }
  0x40   : > { %2355 = vmatpush.bf16.msrb.mxu3 %v2329_v22  ;;  %v1764_v22 = vor.u32 %v2236_v16, %v1763_v15 }
  0x44   : > { %2356 = vmatpush.bf16.msrb.mxu3 %v2328_v25  ;;  %v1783_v25 = vld [vmem:[%s2509_s6 + $0x80] sm:$0xf] }
  0x48   : > { %2357 = vmatpush.bf16.msrb.mxu3 %v2327_v30  ;;  %v2311_v30 = vld [vmem:[%s2509_s6 + $0x2c0] sm:$0xf0] }
  0x49   : > { %v2064_v35 = vor.u32 %v2311_v30, %v2063_v29 }
  0x4b   : > { %1095 = vmatmul.bf16.gmra.mxu0 %v1740_v62  ;;  %1215 = vmatmul.bf16.gmra.mxu3 %v2028_v63  ;;  %v1819_v62 = vld [vmem:[%s2509_s6 + $0xc8] sm:$0xf]  ;;  %v2249_v63 = vld [vmem:[%s2509_s6 + $0xd0] sm:$0xf0] }
  0x4c   : > { %2358 = vmatpush.bf16.msra.mxu3 %v2437_v10  ;;  %2191 = vmatmul.msk.bf16.gmra.mxu2 %vm973_vm2, %v1748_v61  ;;  %v1752_v10 = vor.u32 %v2233_v4, %v1751_v3  ;;  %v2613_v61 = vld [vmem:[%s3007_s2] ss:$0 sm:$0xff]  ;;  %v2005_v3 = vld [vmem:[%s2509_s6 + $0x24c] sm:$0xf0]  ;;  %v2247_v4 = vld [vmem:[%s2509_s6 + $0xc4] sm:$0xf] }
  0x4d   : > { %1264 = vmatmul.bf16.gmra.mxu1 %v1744_v0  ;;  %v1811_v0 = vld [vmem:[%s2509_s6 + $0xc0] sm:$0xf] }
  0x4e   : > { %v1812_v7 = vor.u32 %v2248_v1, %v1811_v0 }
  0x50   : > { %2359 = vmatpush.bf16.msra.mxu3 %v2443_v11  ;;  %v2040_v11 = vor.u32 %v2305_v6, %v2039_v5  ;;  %v1813_v5 = vld [vmem:[%s2509_s6 + $0xcc] sm:$0xf0]  ;;  %v1820_v6 = vor.u32 %v2249_v63, %v1819_v62  ;;  %v2032_v62 = vor.u32 %v2301_v51, %v2029_v52  ;;  %v1840_v63 = vor.u32 %v2253_v53, %v1837_v54 }
  0x54   : > { %2360 = vmatpush.bf16.msra.mxu3 %v2458_v14  ;;  %v2237_v14 = vld [vmem:[%s2509_s6 + $0x70] sm:$0xf0] }
  0x55   : > { %v1772_v21 = vor.u32 %v2237_v14, %v1771_v13 }
  0x58   : > { %2361 = vmatpush.bf16.msra.mxu3 %v2473_v17  ;;  %v2051_v17 = vld [vmem:[%s2509_s6 + $0x2a0] sm:$0xf] }
  0x5b   : > { %1100 = vmatmul.bf16.gmra.mxu0 %v1752_v10  ;;  %1220 = vmatmul.bf16.gmra.mxu3 %v2040_v11  ;;  %v1816_v10 = vor.u32 %v2247_v4, %v1813_v5 }
  0x5c   : > { %2362 = vmatpush.bf16.msra.mxu3 %v2488_v20  ;;  %2192 = vmatmul.msk.bf16.gmra.mxu2 %vm973_vm2, %v1760_v9  ;;  %v1765_v20 = vld [vmem:[%s2509_s6 + $0x6c] sm:$0xf0]  ;;  %v2008_v9 = vor.u32 %v2295_v2, %v2005_v3 }
  0x5d   : > { %1269 = vmatmul.bf16.gmra.mxu1 %v1756_v12  ;;  %v1768_v24 = vor.u32 %v2235_v19, %v1765_v20 }
  0x60   : > { %2363 = vmatpush.bf16.msra.mxu3 %v2501_v23  ;;  %v2052_v23 = vor.u32 %v2308_v18, %v2051_v17 }
  0x64   : > { %2364 = vmatpush.bf16.msra.mxu3 %v2517_v26  ;;  %v2240_v26 = vld [vmem:[%s2509_s6 + $0x88] sm:$0xf0] }
  0x65   : > { %v1784_v33 = vor.u32 %v2240_v26, %v1783_v25  ;;  %v2298_v25 = vld [vmem:[%s2509_s6 + $0x25c] sm:$0xf]  ;;  %v2017_v26 = vld [vmem:[%s2509_s6 + $0x264] sm:$0xf0] }
  0x6b   : > { %1105 = vmatmul.bf16.gmra.mxu0 %v1764_v22  ;;  %1225 = vmatmul.bf16.gmra.mxu3 %v2052_v23  ;;  %v2252_v22 = vld [vmem:[%s2509_s6 + $0xe8] sm:$0xf0]  ;;  %v1823_v23 = vld [vmem:[%s2509_s6 + $0xd8] sm:$0xf] }
  0x6c   : > { %2193 = vmatmul.msk.bf16.gmra.mxu2 %vm973_vm2, %v1772_v21  ;;  %v1831_v21 = vld [vmem:[%s2509_s6 + $0xe0] sm:$0xf] }
  0x6d   : > { %1274 = vmatmul.bf16.gmra.mxu1 %v1768_v24  ;;  %v2251_v24 = vld [vmem:[%s2509_s6 + $0xe0] sm:$0xf0]  ;;  %v1832_v32 = vor.u32 %v2252_v22, %v1831_v21 }
  0x7b   : > { %1110 = vmatmul.bf16.gmra.mxu0 %v1776_v34  ;;  %1230 = vmatmul.bf16.gmra.mxu3 %v2064_v35  ;;  %v2020_v35 = vor.u32 %v2298_v25, %v2017_v26 }
  0x7c   : > { %2194 = vmatmul.msk.bf16.gmra.mxu2 %vm973_vm2, %v1784_v33  ;;  %v1824_v33 = vor.u32 %v2251_v24, %v1823_v23 }
  0x7d   : > { %1279 = vmatmul.bf16.gmra.mxu1 %v1780_v36  ;;  %v1828_v36 = vor.u32 %v2250_v27, %v1825_v28 }
  0x8b   : > { %1115 = vmatmul.bf16.gmra.mxu0 %v1788_v46  ;;  %1235 = vmatmul.bf16.gmra.mxu3 %v2076_v47  ;;  %v1843_v47 = vld [vmem:[%s2509_s6 + $0xf8] sm:$0xf] }
  0x8c   : > { %2195 = vmatmul.msk.bf16.gmra.mxu2 %vm973_vm2, %v1796_v45 }
  0x8d   : > { %1284 = vmatmul.bf16.gmra.mxu1 %v1792_v48  ;;  %v2255_v48 = vld [vmem:[%s2509_s6 + $0x100] sm:$0xf0] }
  0x9b   : > { %1120 = vmatmul.bf16.gmra.mxu0 %v1800_v58  ;;  %1240 = vmatmul.bf16.gmra.mxu3 %v2088_v59  ;;  %v1844_v58 = vor.u32 %v2255_v48, %v1843_v47  ;;  %v1836_v59 = vor.u32 %v2254_v50, %v1835_v49 }
  0x9c   : > { %2196 = vmatmul.msk.bf16.gmra.mxu2 %vm973_vm2, %v1808_v57 }
  0x9d   : > { %1289 = vmatmul.bf16.gmra.mxu1 %v1804_v60 }
  0xa8   : > { %v1086_v8 = vpop.f32.mrf.mxu0 }
  0xa9   : > { %v1087_v11 = vadd.f32 %v2613_v61, %v1086_v8 }
  0xaa   : > { %v1255_v12 = vpop.f32.mrf.mxu1 }
  0xab   : > { %v1256_v13 = vadd.f32 %v1255_v12, %v1087_v11  ;;  %1125 = vmatmul.bf16.gmra.mxu0 %v1812_v7  ;;  %1374 = vmatmul.bf16.vlgmr.msrb.gmra.mxu3 %v2008_v9  ;;  %v2258_v11 = vld [vmem:[%s2509_s6 + $0x118] sm:$0xf0]  ;;  %v1847_v12 = vld [vmem:[%s2509_s6 + $0x108] sm:$0xf] }
  0xac   : > { %2197 = vmatmul.msk.bf16.gmra.mxu2 %vm973_vm2, %v1820_v6 }
  0xad   : > { %1294 = vmatmul.bf16.gmra.mxu1 %v1816_v10  ;;  %v1855_v10 = vld [vmem:[%s2509_s6 + $0x110] sm:$0xf] }
  0xae   : > { %v2631_v16 = vpop.f32.mrf.mxu3  ;;  %v1856_v22 = vor.u32 %v2258_v11, %v1855_v10  ;;  %v2262_v10 = vld [vmem:[%s2509_s6 + $0x13c] sm:$0xf]  ;;  %v1873_v11 = vld [vmem:[%s2509_s6 + $0x144] sm:$0xf0] }
  0xaf   : > { %v1424_v14 = vpop.f32.mrf.mxu2 }
  0xb0   : > { %v1425_v15 = vadd.f32 %v1424_v14, %v1256_v13  ;;  %v1088_v17 = vpop.f32.mrf.mxu0  ;;  %v2257_v13 = vld [vmem:[%s2509_s6 + $0x110] sm:$0xf0]  ;;  %v2304_v14 = vld [vmem:[%s2509_s6 + $0x28c] sm:$0xf] }
  0xb1   : > { %v1089_v18 = vadd.f32 %v2613_v61, %v1088_v17  ;;  %v2256_v17 = vld [vmem:[%s2509_s6 + $0x10c] sm:$0xf]  ;;  %v1848_v23 = vor.u32 %v2257_v13, %v1847_v12 }
  0xb2   : > { %1584 = vst [vmem:[%s2629_s21] sm:$0xff] %v1425_v15  ;;  %v1257_v19 = vpop.f32.mrf.mxu1  ;;  %v2041_v15 = vld [vmem:[%s2509_s6 + $0x294] sm:$0xf0] }
  0xb3   : > { %v1258_v20 = vadd.f32 %v1257_v19, %v1089_v18  ;;  %v1849_v18 = vld [vmem:[%s2509_s6 + $0x114] sm:$0xf0]  ;;  %v2044_v25 = vor.u32 %v2304_v14, %v2041_v15 }
  0xb4   : > { %v1852_v26 = vor.u32 %v2256_v17, %v1849_v18 }
  0xb6   : > { %v2643_v31 = vpop.f32.mrf.mxu3 }
  0xb7   : > { %v1426_v29 = vpop.f32.mrf.mxu2 }
  0xb8   : > { %v1427_v30 = vadd.f32 %v1426_v29, %v1258_v20  ;;  %v1091_v34 = vpop.f32.mrf.mxu0 }
  0xb9   : > { %v1092_v37 = vadd.f32 %v2613_v61, %v1091_v34 }
  0xba   : > { %1585 = vst [vmem:[%s2629_s21 + $0x8] sm:$0xff] %v1427_v30  ;;  %v1260_v38 = vpop.f32.mrf.mxu1 }
  0xbb   : > { %v1261_v39 = vadd.f32 %v1260_v38, %v1092_v37  ;;  %1130 = vmatmul.bf16.gmra.mxu0 %v1824_v33  ;;  %1379 = vmatmul.bf16.gmra.mxu3 %v2020_v35  ;;  %v1867_v38 = vld [vmem:[%s2509_s6 + $0x128] sm:$0xf] }
  0xbc   : > { %2198 = vmatmul.msk.bf16.gmra.mxu2 %vm973_vm2, %v1832_v32 }
  0xbd   : > { %1299 = vmatmul.bf16.gmra.mxu1 %v1828_v36 }
  0xbe   : > { %v2648_v42 = vpop.f32.mrf.mxu3 }
  0xbf   : > { %v1429_v40 = vpop.f32.mrf.mxu2 }
  0xc0   : > { %v1430_v41 = vadd.f32 %v1429_v40, %v1261_v39  ;;  %v1093_v43 = vpop.f32.mrf.mxu0  ;;  %v2261_v39 = vld [vmem:[%s2509_s6 + $0x130] sm:$0xf0]  ;;  %v1859_v40 = vld [vmem:[%s2509_s6 + $0x120] sm:$0xf] }
  0xc1   : > { %v1094_v44 = vadd.f32 %v2613_v61, %v1093_v43  ;;  %v2307_v43 = vld [vmem:[%s2509_s6 + $0x2a4] sm:$0xf]  ;;  %v1868_v50 = vor.u32 %v2261_v39, %v1867_v38  ;;  %v2313_v38 = vld [vmem:[%s2509_s6 + $0x2d4] sm:$0xf]  ;;  %v2077_v39 = vld [vmem:[%s2509_s6 + $0x2dc] sm:$0xf0] }
  0xc2   : > { %1586 = vst [vmem:[%s2629_s21 + $0x10] sm:$0xff] %v1430_v41  ;;  %v1262_v45 = vpop.f32.mrf.mxu1  ;;  %v2260_v41 = vld [vmem:[%s2509_s6 + $0x128] sm:$0xf0] }
  0xc3   : > { %v1263_v46 = vadd.f32 %v1262_v45, %v1094_v44  ;;  %v2053_v44 = vld [vmem:[%s2509_s6 + $0x2ac] sm:$0xf0]  ;;  %v2259_v45 = vld [vmem:[%s2509_s6 + $0x124] sm:$0xf]  ;;  %v1860_v51 = vor.u32 %v2260_v41, %v1859_v40  ;;  %v2265_v40 = vld [vmem:[%s2509_s6 + $0x154] sm:$0xf] }
  0xc4   : > { %v2056_v53 = vor.u32 %v2307_v43, %v2053_v44  ;;  %v1885_v41 = vld [vmem:[%s2509_s6 + $0x15c] sm:$0xf0] }
  0xc6   : > { %v2660_v57 = vpop.f32.mrf.mxu3 }
  0xc7   : > { %v1431_v55 = vpop.f32.mrf.mxu2 }
  0xc8   : > { %v1432_v56 = vadd.f32 %v1431_v55, %v1263_v46  ;;  %v1096_v60 = vpop.f32.mrf.mxu0  ;;  %v1861_v46 = vld [vmem:[%s2509_s6 + $0x12c] sm:$0xf0] }
  0xc9   : > { %v1097_v0 = vadd.f32 %v2613_v61, %v1096_v60  ;;  %v1864_v54 = vor.u32 %v2259_v45, %v1861_v46 }
  0xca   : > { %1587 = vst [vmem:[%s2629_s21 + $0x18] sm:$0xff] %v1432_v56  ;;  %v1265_v1 = vpop.f32.mrf.mxu1 }
  0xcb   : > { %v1266_v2 = vadd.f32 %v1265_v1, %v1097_v0  ;;  %1135 = vmatmul.bf16.gmra.mxu0 %v1836_v59  ;;  %1384 = vmatmul.bf16.gmra.mxu3 %v2032_v62 }
  0xcc   : > { %2199 = vmatmul.msk.bf16.gmra.mxu2 %vm973_vm2, %v1844_v58 }
  0xcd   : > { %1304 = vmatmul.bf16.gmra.mxu1 %v1840_v63 }
  0xce   : > { %v2665_v5 = vpop.f32.mrf.mxu3 }
  0xcf   : > { %v1434_v3 = vpop.f32.mrf.mxu2 }
  0xd0   : > { %v1435_v4 = vadd.f32 %v1434_v3, %v1266_v2  ;;  %v1098_v6 = vpop.f32.mrf.mxu0  ;;  %v1879_v3 = vld [vmem:[%s2509_s6 + $0x140] sm:$0xf] }
  0xd1   : > { %v1099_v7 = vadd.f32 %v2613_v61, %v1098_v6  ;;  %v1871_v6 = vld [vmem:[%s2509_s6 + $0x138] sm:$0xf] }
  0xd2   : > { %1588 = vst [vmem:[%s2629_s21 + $0x20] sm:$0xff] %v1435_v4  ;;  %v1267_v8 = vpop.f32.mrf.mxu1  ;;  %v2264_v4 = vld [vmem:[%s2509_s6 + $0x148] sm:$0xf0] }
  0xd3   : > { %v1268_v9 = vadd.f32 %v1267_v8, %v1099_v7  ;;  %v2263_v7 = vld [vmem:[%s2509_s6 + $0x140] sm:$0xf0]  ;;  %v2310_v8 = vld [vmem:[%s2509_s6 + $0x2bc] sm:$0xf]  ;;  %v1880_v15 = vor.u32 %v2264_v4, %v1879_v3  ;;  %v1895_v3 = vld [vmem:[%s2509_s6 + $0x168] sm:$0xf] }
  0xd4   : > { %v1872_v17 = vor.u32 %v2263_v7, %v1871_v6  ;;  %v2269_v4 = vld [vmem:[%s2509_s6 + $0x170] sm:$0xf0]  ;;  %v2316_v6 = vld [vmem:[%s2509_s6 + $0x2ec] sm:$0xf]  ;;  %v2089_v7 = vld [vmem:[%s2509_s6 + $0x2f4] sm:$0xf0] }
  0xd6   : > { %v2677_v21 = vpop.f32.mrf.mxu3 }
  0xd7   : > { %v1436_v19 = vpop.f32.mrf.mxu2 }
  0xd8   : > { %v1437_v20 = vadd.f32 %v1436_v19, %v1268_v9  ;;  %v1101_v24 = vpop.f32.mrf.mxu0  ;;  %v2065_v9 = vld [vmem:[%s2509_s6 + $0x2c4] sm:$0xf0] }
  0xd9   : > { %v1102_v27 = vadd.f32 %v2613_v61, %v1101_v24  ;;  %v2068_v19 = vor.u32 %v2310_v8, %v2065_v9  ;;  %v2268_v8 = vld [vmem:[%s2509_s6 + $0x16c] sm:$0xf]  ;;  %v1897_v9 = vld [vmem:[%s2509_s6 + $0x174] sm:$0xf0] }
  0xda   : > { %1589 = vst [vmem:[%s2629_s21 + $0x28] sm:$0xff] %v1437_v20  ;;  %v1270_v28 = vpop.f32.mrf.mxu1  ;;  %v1876_v20 = vor.u32 %v2262_v10, %v1873_v11 }
  0xdb   : > { %v1271_v29 = vadd.f32 %v1270_v28, %v1102_v27  ;;  %1140 = vmatmul.bf16.gmra.mxu0 %v1848_v23  ;;  %1389 = vmatmul.bf16.gmra.mxu3 %v2044_v25 }
  0xdc   : > { %2200 = vmatmul.msk.bf16.gmra.mxu2 %vm973_vm2, %v1856_v22 }
  0xdd   : > { %1309 = vmatmul.bf16.gmra.mxu1 %v1852_v26 }
  0xde   : > { %v2682_v33 = vpop.f32.mrf.mxu3 }
  0xdf   : > { %v1439_v30 = vpop.f32.mrf.mxu2 }
  0xe0   : > { %v1440_v32 = vadd.f32 %v1439_v30, %v1271_v29  ;;  %v1103_v34 = vpop.f32.mrf.mxu0 }
  0xe1   : > { %v1104_v35 = vadd.f32 %v2613_v61, %v1103_v34  ;;  %v1891_v34 = vld [vmem:[%s2509_s6 + $0x158] sm:$0xf] }
  0xe2   : > { %1590 = vst [vmem:[%s2629_s21 + $0x30] sm:$0xff] %v1440_v32  ;;  %v1272_v36 = vpop.f32.mrf.mxu1 }
  0xe3   : > { %v1273_v37 = vadd.f32 %v1272_v36, %v1104_v35  ;;  %v2267_v35 = vld [vmem:[%s2509_s6 + $0x160] sm:$0xf0]  ;;  %v1883_v36 = vld [vmem:[%s2509_s6 + $0x150] sm:$0xf] }
  0xe4   : > { %v1892_v46 = vor.u32 %v2267_v35, %v1891_v34  ;;  %v1915_v34 = vld [vmem:[%s2509_s6 + $0x188] sm:$0xf]  ;;  %v2273_v35 = vld [vmem:[%s2509_s6 + $0x190] sm:$0xf0] }
  0xe6   : > { %v2694_v49 = vpop.f32.mrf.mxu3 }
  0xe7   : > { %v1441_v47 = vpop.f32.mrf.mxu2 }
  0xe8   : > { %v1442_v48 = vadd.f32 %v1441_v47, %v1273_v37  ;;  %v1106_v52 = vpop.f32.mrf.mxu0  ;;  %v2266_v37 = vld [vmem:[%s2509_s6 + $0x158] sm:$0xf0] }
  0xe9   : > { %v1107_v55 = vadd.f32 %v2613_v61, %v1106_v52  ;;  %v1884_v47 = vor.u32 %v2266_v37, %v1883_v36  ;;  %v1907_v36 = vld [vmem:[%s2509_s6 + $0x180] sm:$0xf]  ;;  %v2272_v37 = vld [vmem:[%s2509_s6 + $0x188] sm:$0xf0] }
  0xea   : > { %1591 = vst [vmem:[%s2629_s21 + $0x38] sm:$0xff] %v1442_v48  ;;  %v1275_v56 = vpop.f32.mrf.mxu1 }
  0xeb   : > { %v1276_v58 = vadd.f32 %v1275_v56, %v1107_v55  ;;  %1145 = vmatmul.bf16.gmra.mxu0 %v1860_v51  ;;  %1394 = vmatmul.bf16.gmra.mxu3 %v2056_v53  ;;  %v1888_v51 = vor.u32 %v2265_v40, %v1885_v41  ;;  %v2271_v40 = vld [vmem:[%s2509_s6 + $0x184] sm:$0xf]  ;;  %v1909_v41 = vld [vmem:[%s2509_s6 + $0x18c] sm:$0xf0] }
  0xec   : > { %2201 = vmatmul.msk.bf16.gmra.mxu2 %vm973_vm2, %v1868_v50  ;;  %v2080_v50 = vor.u32 %v2313_v38, %v2077_v39  ;;  %v2023_v38 = vld [vmem:[%s2509_s6 + $0x260] sm:$0xf]  ;;  %v2300_v39 = vld [vmem:[%s2509_s6 + $0x268] sm:$0xf0] }
  0xed   : > { %1314 = vmatmul.bf16.gmra.mxu1 %v1864_v54 }
  0xee   : > { %v2699_v62 = vpop.f32.mrf.mxu3 }
  0xef   : > { %v1444_v59 = vpop.f32.mrf.mxu2 }
  0xf0   : > { %v1445_v60 = vadd.f32 %v1444_v59, %v1276_v58  ;;  %v1108_v63 = vpop.f32.mrf.mxu0 }
  0xf1   : > { %v1109_v0 = vadd.f32 %v2613_v61, %v1108_v63 }
  0xf2   : > { %1592 = vst [vmem:[%s2629_s21 + $0x40] sm:$0xff] %v1445_v60  ;;  %v1277_v1 = vpop.f32.mrf.mxu1 }
  0xf3   : > { %v1278_v2 = vadd.f32 %v1277_v1, %v1109_v0  ;;  %v1903_v1 = vld [vmem:[%s2509_s6 + $0x170] sm:$0xf] }
  0xf6   : > { %v2711_v14 = vpop.f32.mrf.mxu3 }
  0xf7   : > { %v1446_v12 = vpop.f32.mrf.mxu2 }
  0xf8   : > { %v1447_v13 = vadd.f32 %v1446_v12, %v1278_v2  ;;  %v1111_v18 = vpop.f32.mrf.mxu0  ;;  %v2270_v2 = vld [vmem:[%s2509_s6 + $0x178] sm:$0xf0] }
  0xf9   : > { %v1112_v22 = vadd.f32 %v2613_v61, %v1111_v18  ;;  %v2092_v18 = vor.u32 %v2316_v6, %v2089_v7  ;;  %v1927_v6 = vld [vmem:[%s2509_s6 + $0x1a0] sm:$0xf]  ;;  %v2276_v7 = vld [vmem:[%s2509_s6 + $0x1a8] sm:$0xf0] }
  0xfa   : > { %1593 = vst [vmem:[%s2629_s21 + $0x48] sm:$0xff] %v1447_v13  ;;  %v1280_v23 = vpop.f32.mrf.mxu1  ;;  %v1904_v13 = vor.u32 %v2270_v2, %v1903_v1 }
  0xfb   : > { %v1281_v24 = vadd.f32 %v1280_v23, %v1112_v22  ;;  %1150 = vmatmul.bf16.gmra.mxu0 %v1872_v17  ;;  %1399 = vmatmul.bf16.gmra.mxu3 %v2068_v19  ;;  %v1900_v19 = vor.u32 %v2268_v8, %v1897_v9  ;;  %v1919_v8 = vld [vmem:[%s2509_s6 + $0x198] sm:$0xf]  ;;  %v2275_v9 = vld [vmem:[%s2509_s6 + $0x1a0] sm:$0xf0] }
  0xfc   : > { %2202 = vmatmul.msk.bf16.gmra.mxu2 %vm973_vm2, %v1880_v15  ;;  %v1896_v15 = vor.u32 %v2269_v4, %v1895_v3 }
  0xfd   : > { %1319 = vmatmul.bf16.gmra.mxu1 %v1876_v20 }
  0xfe   : > { %v2716_v27 = vpop.f32.mrf.mxu3 }
  0xff   : > { %v1449_v25 = vpop.f32.mrf.mxu2 }
 0x100   : > { %v1450_v26 = vadd.f32 %v1449_v25, %v1281_v24  ;;  %v1113_v28 = vpop.f32.mrf.mxu0 }
 0x101   : > { %v1114_v29 = vadd.f32 %v2613_v61, %v1113_v28 }
 0x102   : > { %1594 = vst [vmem:[%s2629_s21 + $0x50] sm:$0xff] %v1450_v26  ;;  %v1282_v30 = vpop.f32.mrf.mxu1 }
 0x103   : > { %v1283_v32 = vadd.f32 %v1282_v30, %v1114_v29 }
 0x106   : > { %v2728_v45 = vpop.f32.mrf.mxu3 }
 0x107   : > { %v1451_v43 = vpop.f32.mrf.mxu2 }
 0x108   : > { %v1452_v44 = vadd.f32 %v1451_v43, %v1283_v32  ;;  %v1116_v48 = vpop.f32.mrf.mxu0 }
 0x109   : > { %v1117_v52 = vadd.f32 %v2613_v61, %v1116_v48  ;;  %v1908_v48 = vor.u32 %v2272_v37, %v1907_v36 }
 0x10a   : > { %1595 = vst [vmem:[%s2629_s21 + $0x58] sm:$0xff] %v1452_v44  ;;  %v1285_v53 = vpop.f32.mrf.mxu1 }
 0x10b   : > { %v1286_v54 = vadd.f32 %v1285_v53, %v1117_v52  ;;  %1155 = vmatmul.bf16.gmra.mxu0 %v1884_v47  ;;  %1404 = vmatmul.bf16.gmra.mxu3 %v2080_v50  ;;  %v1916_v47 = vor.u32 %v2273_v35, %v1915_v34  ;;  %v1912_v52 = vor.u32 %v2271_v40, %v1909_v41 }
 0x10c   : > { %2203 = vmatmul.msk.bf16.gmra.mxu2 %vm973_vm2, %v1892_v46 }
 0x10d   : > { %1324 = vmatmul.bf16.gmra.mxu1 %v1888_v51  ;;  %v2024_v51 = vor.u32 %v2300_v39, %v2023_v38 }
 0x10e   : > { %v2733_v58 = vpop.f32.mrf.mxu3 }
 0x10f   : > { %v1454_v55 = vpop.f32.mrf.mxu2 }
 0x110   : > { %v1455_v56 = vadd.f32 %v1454_v55, %v1286_v54  ;;  %v1118_v59 = vpop.f32.mrf.mxu0 }
 0x111   : > { %v1119_v60 = vadd.f32 %v2613_v61, %v1118_v59 }
 0x112   : > { %1596 = vst [vmem:[%s2629_s21 + $0x60] sm:$0xff] %v1455_v56  ;;  %v1287_v63 = vpop.f32.mrf.mxu1  ;;  %v1207_v56 = vadd.f32 %v2613_v61, %v2631_v16  ;;  %v2303_v16 = vld [vmem:[%s2509_s6 + $0x280] sm:$0xf0] }
 0x113   : > { %v1288_v0 = vadd.f32 %v1287_v63, %v1119_v60 }
 0x116   : > { %v2745_v12 = vpop.f32.mrf.mxu3 }
 0x117   : > { %v1456_v10 = vpop.f32.mrf.mxu2 }
 0x118   : > { %v1457_v11 = vadd.f32 %v1456_v10, %v1288_v0  ;;  %v1121_v17 = vpop.f32.mrf.mxu0  ;;  %v2035_v10 = vld [vmem:[%s2509_s6 + $0x278] sm:$0xf] }
 0x119   : > { %v1122_v20 = vadd.f32 %v2613_v61, %v1121_v17 }
 0x11a   : > { %1597 = vst [vmem:[%s2629_s21 + $0x68] sm:$0xff] %v1457_v11  ;;  %v1290_v22 = vpop.f32.mrf.mxu1  ;;  %v2274_v11 = vld [vmem:[%s2509_s6 + $0x19c] sm:$0xf] }
 0x11b   : > { %v1291_v23 = vadd.f32 %v1290_v22, %v1122_v20  ;;  %1160 = vmatmul.bf16.gmra.mxu0 %v1896_v15  ;;  %1409 = vmatmul.bf16.gmra.mxu3 %v2092_v18  ;;  %v1209_v15 = vadd.f32 %v2613_v61, %v2643_v31  ;;  %v1928_v20 = vor.u32 %v2276_v7, %v1927_v6 }
 0x11c   : > { %2204 = vmatmul.msk.bf16.gmra.mxu2 %vm973_vm2, %v1904_v13  ;;  %v1921_v13 = vld [vmem:[%s2509_s6 + $0x1a4] sm:$0xf0]  ;;  %v1920_v22 = vor.u32 %v2275_v9, %v1919_v8  ;;  %v1217_v7 = vadd.f32 %v2613_v61, %v2665_v5  ;;  %v2309_v5 = vld [vmem:[%s2509_s6 + $0x2b0] sm:$0xf0] }
 0x11d   : > { %1329 = vmatmul.bf16.gmra.mxu1 %v1900_v19 }
 0x11e   : > { %v2750_v26 = vpop.f32.mrf.mxu3 }
 0x11f   : > { %v1459_v24 = vpop.f32.mrf.mxu2 }
 0x120   : > { %v1460_v25 = vadd.f32 %v1459_v24, %v1291_v23  ;;  %v1123_v28 = vpop.f32.mrf.mxu0 }
 0x121   : > { %v1124_v29 = vadd.f32 %v2613_v61, %v1123_v28  ;;  %v1924_v28 = vor.u32 %v2274_v11, %v1921_v13 }
 0x122   : > { %1598 = vst [vmem:[%s2629_s21 + $0x70] sm:$0xff] %v1460_v25  ;;  %v1292_v30 = vpop.f32.mrf.mxu1  ;;  %v2036_v25 = vor.u32 %v2303_v16, %v2035_v10 }
 0x123   : > { %v1293_v32 = vadd.f32 %v1292_v30, %v1124_v29 }
 0x126   : > { %v2762_v46 = vpop.f32.mrf.mxu3 }
 0x127   : > { %v1461_v43 = vpop.f32.mrf.mxu2 }
 0x128   : > { %v1462_v44 = vadd.f32 %v1461_v43, %v1293_v32  ;;  %v1126_v50 = vpop.f32.mrf.mxu0  ;;  %v1212_v32 = vadd.f32 %v2613_v61, %v2648_v42  ;;  %v1939_v43 = vld [vmem:[%s2509_s6 + $0x1b8] sm:$0xf]  ;;  %v2306_v42 = vld [vmem:[%s2509_s6 + $0x298] sm:$0xf0] }
 0x129   : > { %v1127_v53 = vadd.f32 %v2613_v61, %v1126_v50  ;;  %v2047_v50 = vld [vmem:[%s2509_s6 + $0x290] sm:$0xf] }
 0x12a   : > { %1599 = vst [vmem:[%s2629_s21 + $0x78] sm:$0xff] %v1462_v44  ;;  %v1295_v54 = vpop.f32.mrf.mxu1  ;;  %v2279_v44 = vld [vmem:[%s2509_s6 + $0x1c0] sm:$0xf0] }
 0x12b   : > { %v1296_v55 = vadd.f32 %v1295_v54, %v1127_v53  ;;  %1165 = vmatmul.bf16.gmra.mxu0 %v1908_v48  ;;  %2214 = vmatmul.msk.bf16.vlgmr.msra.gmra.mxu3 %vm973_vm2, %v2024_v51  ;;  %v2278_v48 = vld [vmem:[%s2509_s6 + $0x1b8] sm:$0xf0]  ;;  %v2277_v51 = vld [vmem:[%s2509_s6 + $0x1b4] sm:$0xf]  ;;  %v1214_v53 = vadd.f32 %v2613_v61, %v2660_v57 }
 0x12c   : > { %2205 = vmatmul.msk.bf16.gmra.mxu2 %vm973_vm2, %v1916_v47  ;;  %v1931_v47 = vld [vmem:[%s2509_s6 + $0x1b0] sm:$0xf] }
 0x12d   : > { %1334 = vmatmul.bf16.gmra.mxu1 %v1912_v52  ;;  %v1933_v52 = vld [vmem:[%s2509_s6 + $0x1bc] sm:$0xf0] }
 0x12e   : > { %v1375_v63 = vpop.f32.mrf.mxu3 }
 0x12f   : > { %v1464_v59 = vpop.f32.mrf.mxu2  ;;  %v2770_v0 = vadd.f32 %v1375_v63, %v1207_v56 }
 0x130   : > { %v1465_v60 = vadd.f32 %v1464_v59, %v1296_v55  ;;  %v1128_v1 = vpop.f32.mrf.mxu0  ;;  %v1940_v59 = vor.u32 %v2279_v44, %v1939_v43  ;;  %v1222_v44 = vadd.f32 %v2613_v61, %v2682_v33  ;;  %v2312_v33 = vld [vmem:[%s2509_s6 + $0x2c8] sm:$0xf0] }
 0x131   : > { %v1129_v2 = vadd.f32 %v2613_v61, %v1128_v1 }
 0x132   : > { %1600 = vst [vmem:[%s2629_s21 + $0x80] sm:$0xff] %v1465_v60  ;;  %v1297_v3 = vpop.f32.mrf.mxu1  ;;  %v1932_v60 = vor.u32 %v2278_v48, %v1931_v47 }
 0x133   : > { %v1298_v4 = vadd.f32 %v1297_v3, %v1129_v2  ;;  %v2048_v2 = vor.u32 %v2306_v42, %v2047_v50  ;;  %v1936_v3 = vor.u32 %v2277_v51, %v1933_v52 }
 0x136   : > { %v1377_v19 = vpop.f32.mrf.mxu3 }
 0x137   : > { %v1466_v17 = vpop.f32.mrf.mxu2  ;;  %v2784_v23 = vadd.f32 %v1377_v19, %v1209_v15  ;;  %v2282_v19 = vld [vmem:[%s2509_s6 + $0x1d8] sm:$0xf0] }
 0x138   : > { %v1467_v18 = vadd.f32 %v1466_v17, %v1298_v4  ;;  %v1131_v24 = vpop.f32.mrf.mxu0 }
 0x139   : > { %v1132_v29 = vadd.f32 %v2613_v61, %v1131_v24  ;;  %v2059_v24 = vld [vmem:[%s2509_s6 + $0x2a8] sm:$0xf] }
 0x13a   : > { %1601 = vst [vmem:[%s2629_s21 + $0x88] sm:$0xff] %v1467_v18  ;;  %v1300_v30 = vpop.f32.mrf.mxu1  ;;  %v1951_v18 = vld [vmem:[%s2509_s6 + $0x1d0] sm:$0xf] }
 0x13b   : > { %v1301_v31 = vadd.f32 %v1300_v30, %v1132_v29  ;;  %1170 = vmatmul.bf16.gmra.mxu0 %v1920_v22  ;;  %2215 = vmatmul.msk.bf16.gmra.mxu3 %vm973_vm2, %v2036_v25  ;;  %v2281_v22 = vld [vmem:[%s2509_s6 + $0x1d0] sm:$0xf0]  ;;  %v2280_v25 = vld [vmem:[%s2509_s6 + $0x1cc] sm:$0xf]  ;;  %v1219_v29 = vadd.f32 %v2613_v61, %v2677_v21 }
 0x13c   : > { %2206 = vmatmul.msk.bf16.gmra.mxu2 %vm973_vm2, %v1928_v20  ;;  %v1943_v20 = vld [vmem:[%s2509_s6 + $0x1c8] sm:$0xf] }
 0x13d   : > { %1339 = vmatmul.bf16.gmra.mxu1 %v1924_v28  ;;  %v1945_v28 = vld [vmem:[%s2509_s6 + $0x1d4] sm:$0xf0] }
 0x13e   : > { %v1380_v36 = vpop.f32.mrf.mxu3 }
 0x13f   : > { %v1469_v34 = vpop.f32.mrf.mxu2  ;;  %v2792_v37 = vadd.f32 %v1380_v36, %v1212_v32 }
 0x140   : > { %v1470_v35 = vadd.f32 %v1469_v34, %v1301_v31  ;;  %v1133_v38 = vpop.f32.mrf.mxu0  ;;  %v1952_v34 = vor.u32 %v2282_v19, %v1951_v18  ;;  %v1227_v19 = vadd.f32 %v2613_v61, %v2699_v62  ;;  %v2315_v62 = vld [vmem:[%s2509_s6 + $0x2e0] sm:$0xf0] }
 0x141   : > { %v1134_v39 = vadd.f32 %v2613_v61, %v1133_v38 }
 0x142   : > { %1602 = vst [vmem:[%s2629_s21 + $0x90] sm:$0xff] %v1470_v35  ;;  %v1302_v40 = vpop.f32.mrf.mxu1  ;;  %v1944_v35 = vor.u32 %v2281_v22, %v1943_v20 }
 0x143   : > { %v1303_v41 = vadd.f32 %v1302_v40, %v1134_v39  ;;  %v2060_v39 = vor.u32 %v2309_v5, %v2059_v24  ;;  %v1948_v40 = vor.u32 %v2280_v25, %v1945_v28 }
 0x146   : > { %v1382_v56 = vpop.f32.mrf.mxu3 }
 0x147   : > { %v1471_v54 = vpop.f32.mrf.mxu2  ;;  %v2806_v63 = vadd.f32 %v1382_v56, %v1214_v53  ;;  %v2285_v56 = vld [vmem:[%s2509_s6 + $0x1f0] sm:$0xf0] }
 0x148   : > { %v1472_v55 = vadd.f32 %v1471_v54, %v1303_v41  ;;  %v1136_v1 = vpop.f32.mrf.mxu0 }
 0x149   : > { %v1137_v4 = vadd.f32 %v2613_v61, %v1136_v1  ;;  %v2071_v1 = vld [vmem:[%s2509_s6 + $0x2c0] sm:$0xf] }
 0x14a   : > { %1603 = vst [vmem:[%s2629_s21 + $0x98] sm:$0xff] %v1472_v55  ;;  %v1305_v6 = vpop.f32.mrf.mxu1  ;;  %v1963_v55 = vld [vmem:[%s2509_s6 + $0x1e8] sm:$0xf] }
 0x14b   : > { %v1306_v57 = vadd.f32 %v1305_v6, %v1137_v4  ;;  %1175 = vmatmul.bf16.gmra.mxu0 %v1932_v60  ;;  %2216 = vmatmul.msk.bf16.gmra.mxu3 %vm973_vm2, %v2048_v2  ;;  %v2284_v60 = vld [vmem:[%s2509_s6 + $0x1e8] sm:$0xf0]  ;;  %v2283_v2 = vld [vmem:[%s2509_s6 + $0x1e4] sm:$0xf]  ;;  %v1224_v4 = vadd.f32 %v2613_v61, %v2694_v49 }
 0x14c   : > { %2207 = vmatmul.msk.bf16.gmra.mxu2 %vm973_vm2, %v1940_v59  ;;  %v1955_v59 = vld [vmem:[%s2509_s6 + $0x1e0] sm:$0xf] }
 0x14d   : > { %1344 = vmatmul.bf16.gmra.mxu1 %v1936_v3  ;;  %v1957_v3 = vld [vmem:[%s2509_s6 + $0x1ec] sm:$0xf0] }
 0x14e   : > { %v1385_v10 = vpop.f32.mrf.mxu3 }
 0x14f   : > { %v1474_v8 = vpop.f32.mrf.mxu2  ;;  %v2814_v16 = vadd.f32 %v1385_v10, %v1217_v7 }
 0x150   : > { %v1475_v9 = vadd.f32 %v1474_v8, %v1306_v57  ;;  %v1138_v11 = vpop.f32.mrf.mxu0  ;;  %v1964_v8 = vor.u32 %v2285_v56, %v1963_v55  ;;  %v1232_v56 = vadd.f32 %v2613_v61, %v2716_v27  ;;  %v2318_v27 = vld [vmem:[%s2509_s6 + $0x2f8] sm:$0xf0] }
 0x151   : > { %v1139_v13 = vadd.f32 %v2613_v61, %v1138_v11 }
 0x152   : > { %1604 = vst [vmem:[%s2629_s21 + $0xa0] sm:$0xff] %v1475_v9  ;;  %v1307_v15 = vpop.f32.mrf.mxu1  ;;  %v1956_v9 = vor.u32 %v2284_v60, %v1955_v59 }
 0x153   : > { %v1308_v17 = vadd.f32 %v1307_v15, %v1139_v13  ;;  %v2072_v13 = vor.u32 %v2312_v33, %v2071_v1  ;;  %v1960_v15 = vor.u32 %v2283_v2, %v1957_v3 }
 0x156   : > { %v1387_v32 = vpop.f32.mrf.mxu3 }
 0x157   : > { %v1476_v30 = vpop.f32.mrf.mxu2  ;;  %v2828_v36 = vadd.f32 %v1387_v32, %v1219_v29  ;;  %v2288_v32 = vld [vmem:[%s2509_s6 + $0x208] sm:$0xf0] }
 0x158   : > { %v1477_v31 = vadd.f32 %v1476_v30, %v1308_v17  ;;  %v1141_v38 = vpop.f32.mrf.mxu0 }
 0x159   : > { %v1142_v41 = vadd.f32 %v2613_v61, %v1141_v38  ;;  %v2083_v38 = vld [vmem:[%s2509_s6 + $0x2d8] sm:$0xf] }
 0x15a   : > { %1605 = vst [vmem:[%s2629_s21 + $0xa8] sm:$0xff] %v1477_v31  ;;  %v1310_v43 = vpop.f32.mrf.mxu1  ;;  %v1975_v31 = vld [vmem:[%s2509_s6 + $0x200] sm:$0xf] }
 0x15b   : > { %v1311_v21 = vadd.f32 %v1310_v43, %v1142_v41  ;;  %1180 = vmatmul.bf16.gmra.mxu0 %v1944_v35  ;;  %2217 = vmatmul.msk.bf16.gmra.mxu3 %vm973_vm2, %v2060_v39  ;;  %v2287_v35 = vld [vmem:[%s2509_s6 + $0x200] sm:$0xf0]  ;;  %v2286_v39 = vld [vmem:[%s2509_s6 + $0x1fc] sm:$0xf]  ;;  %v1229_v41 = vadd.f32 %v2613_v61, %v2711_v14 }
 0x15c   : > { %2208 = vmatmul.msk.bf16.gmra.mxu2 %vm973_vm2, %v1952_v34  ;;  %v1967_v34 = vld [vmem:[%s2509_s6 + $0x1f8] sm:$0xf] }
 0x15d   : > { %1349 = vmatmul.bf16.gmra.mxu1 %v1948_v40  ;;  %v1969_v40 = vld [vmem:[%s2509_s6 + $0x204] sm:$0xf0] }
 0x15e   : > { %v1390_v50 = vpop.f32.mrf.mxu3 }
 0x15f   : > { %v1479_v47 = vpop.f32.mrf.mxu2  ;;  %v2836_v42 = vadd.f32 %v1390_v50, %v1222_v44 }
 0x160   : > { %v1480_v48 = vadd.f32 %v1479_v47, %v1311_v21  ;;  %v1143_v51 = vpop.f32.mrf.mxu0  ;;  %v1976_v47 = vor.u32 %v2288_v32, %v1975_v31  ;;  %v1237_v32 = vadd.f32 %v2613_v61, %v2733_v58  ;;  %v1239_v58 = vadd.f32 %v2613_v61, %v2745_v12 }
 0x161   : > { %v1144_v52 = vadd.f32 %v2613_v61, %v1143_v51 }
 0x162   : > { %1606 = vst [vmem:[%s2629_s21 + $0xb0] sm:$0xff] %v1480_v48  ;;  %v1312_v53 = vpop.f32.mrf.mxu1  ;;  %v1968_v48 = vor.u32 %v2287_v35, %v1967_v34 }
 0x163   : > { %v1313_v54 = vadd.f32 %v1312_v53, %v1144_v52  ;;  %v2084_v52 = vor.u32 %v2315_v62, %v2083_v38  ;;  %v1972_v53 = vor.u32 %v2286_v39, %v1969_v40 }
 0x166   : > { %v1392_v7 = vpop.f32.mrf.mxu3 }
 0x167   : > { %v1481_v6 = vpop.f32.mrf.mxu2  ;;  %v2850_v10 = vadd.f32 %v1392_v7, %v1224_v4  ;;  %v2291_v7 = vld [vmem:[%s2509_s6 + $0x220] sm:$0xf0] }
 0x168   : > { %v1482_v57 = vadd.f32 %v1481_v6, %v1313_v54  ;;  %v1146_v11 = vpop.f32.mrf.mxu0 }
 0x169   : > { %v1147_v17 = vadd.f32 %v2613_v61, %v1146_v11  ;;  %v2095_v11 = vld [vmem:[%s2509_s6 + $0x2f0] sm:$0xf] }
 0x16a   : > { %1607 = vst [vmem:[%s2629_s21 + $0xb8] sm:$0xff] %v1482_v57  ;;  %v1315_v18 = vpop.f32.mrf.mxu1  ;;  %v1987_v57 = vld [vmem:[%s2509_s6 + $0x218] sm:$0xf] }
 0x16b   : > { %v1316_v49 = vadd.f32 %v1315_v18, %v1147_v17  ;;  %1185 = vmatmul.bf16.gmra.mxu0 %v1956_v9  ;;  %2218 = vmatmul.msk.bf16.gmra.mxu3 %vm973_vm2, %v2072_v13  ;;  %v2290_v9 = vld [vmem:[%s2509_s6 + $0x218] sm:$0xf0]  ;;  %v2289_v13 = vld [vmem:[%s2509_s6 + $0x214] sm:$0xf]  ;;  %v1234_v17 = vadd.f32 %v2613_v61, %v2728_v45 }
 0x16c   : > { %2209 = vmatmul.msk.bf16.gmra.mxu2 %vm973_vm2, %v1964_v8  ;;  %v1979_v8 = vld [vmem:[%s2509_s6 + $0x210] sm:$0xf] }
 0x16d   : > { %1354 = vmatmul.bf16.gmra.mxu1 %v1960_v15  ;;  %v1981_v15 = vld [vmem:[%s2509_s6 + $0x21c] sm:$0xf0] }
 0x16e   : > { %v1395_v24 = vpop.f32.mrf.mxu3 }
 0x16f   : > { %v1484_v20 = vpop.f32.mrf.mxu2  ;;  %v2858_v5 = vadd.f32 %v1395_v24, %v1227_v19 }
 0x170   : > { %v1485_v22 = vadd.f32 %v1484_v20, %v1316_v49  ;;  %v1148_v25 = vpop.f32.mrf.mxu0  ;;  %v1988_v20 = vor.u32 %v2291_v7, %v1987_v57 }
 0x171   : > { %v1149_v28 = vadd.f32 %v2613_v61, %v1148_v25 }
 0x172   : > { %1608 = vst [vmem:[%s2629_s21 + $0xc0] sm:$0xff] %v1485_v22  ;;  %v1317_v29 = vpop.f32.mrf.mxu1  ;;  %v1980_v22 = vor.u32 %v2290_v9, %v1979_v8 }
 0x173   : > { %v1318_v30 = vadd.f32 %v1317_v29, %v1149_v28  ;;  %v2096_v28 = vor.u32 %v2318_v27, %v2095_v11  ;;  %v1984_v29 = vor.u32 %v2289_v13, %v1981_v15  ;;  %v2011_v15 = vld [vmem:[%s2509_s6 + $0x248] sm:$0xf] }
 0x176   : > { %v1397_v44 = vpop.f32.mrf.mxu3 }
 0x177   : > { %v1486_v43 = vpop.f32.mrf.mxu2  ;;  %v2872_v50 = vadd.f32 %v1397_v44, %v1229_v41  ;;  %v2294_v44 = vld [vmem:[%s2509_s6 + $0x238] sm:$0xf0] }
 0x178   : > { %v1487_v21 = vadd.f32 %v1486_v43, %v1318_v30  ;;  %v1151_v51 = vpop.f32.mrf.mxu0 }
 0x179   : > { %v1152_v54 = vadd.f32 %v2613_v61, %v1151_v51  ;;  %v2292_v51 = vld [vmem:[%s2509_s6 + $0x22c] sm:$0xf] }
 0x17a   : > { %1609 = vst [vmem:[%s2629_s21 + $0xc8] sm:$0xff] %v1487_v21  ;;  %v1320_v55 = vpop.f32.mrf.mxu1  ;;  %v1999_v21 = vld [vmem:[%s2509_s6 + $0x230] sm:$0xf] }
 0x17b   : > { %v1321_v14 = vadd.f32 %v1320_v55, %v1152_v54  ;;  %1190 = vmatmul.bf16.gmra.mxu0 %v1968_v48  ;;  %2219 = vmatmul.msk.bf16.gmra.mxu3 %vm973_vm2, %v2084_v52  ;;  %v2293_v48 = vld [vmem:[%s2509_s6 + $0x230] sm:$0xf0]  ;;  %v1993_v52 = vld [vmem:[%s2509_s6 + $0x234] sm:$0xf0] }
 0x17c   : > { %2210 = vmatmul.msk.bf16.gmra.mxu2 %vm973_vm2, %v1976_v47  ;;  %v1991_v47 = vld [vmem:[%s2509_s6 + $0x228] sm:$0xf] }
 0x17d   : > { %1359 = vmatmul.bf16.gmra.mxu1 %v1972_v53 }
 0x17e   : > { %v1400_v1 = vpop.f32.mrf.mxu3 }
 0x17f   : > { %v1489_v59 = vpop.f32.mrf.mxu2  ;;  %v2880_v33 = vadd.f32 %v1400_v1, %v1232_v56  ;;  %v1992_v56 = vor.u32 %v2293_v48, %v1991_v47  ;;  %v1996_v1 = vor.u32 %v2292_v51, %v1993_v52 }
 0x180   : > { %v1490_v60 = vadd.f32 %v1489_v59, %v1321_v14  ;;  %v1153_v2 = vpop.f32.mrf.mxu0  ;;  %v2000_v14 = vor.u32 %v2294_v44, %v1999_v21 }
 0x181   : > { %v1154_v3 = vadd.f32 %v2613_v61, %v1153_v2  ;;  %v2920_v2 = vld [vmem:[%s3007_s2] ss:$0 sm:$0xff] }
 0x182   : > { %1610 = vst [vmem:[%s2629_s21 + $0xd0] sm:$0xff] %v1490_v60  ;;  %v1322_v4 = vpop.f32.mrf.mxu1 }
 0x183   : > { %v1323_v6 = vadd.f32 %v1322_v4, %v1154_v3  ;;  %v1242_v4 = vadd.f32 %v2920_v2, %v2750_v26 }
 0x186   : > { %v1402_v19 = vpop.f32.mrf.mxu3 }
 0x187   : > { %v1491_v18 = vpop.f32.mrf.mxu2  ;;  %v2894_v24 = vadd.f32 %v1402_v19, %v1234_v17  ;;  %v2297_v17 = vld [vmem:[%s2509_s6 + $0x250] sm:$0xf0] }
 0x188   : > { %v1492_v49 = vadd.f32 %v1491_v18, %v1323_v6  ;;  %v1156_v25 = vpop.f32.mrf.mxu0  ;;  %v1244_v18 = vadd.f32 %v2920_v2, %v2762_v46 }
 0x189   : > { %v1157_v30 = vadd.f32 %v2613_v61, %v1156_v25 }
 0x18a   : > { %1611 = vst [vmem:[%s2629_s21 + $0xd8] sm:$0xff] %v1492_v49  ;;  %v1325_v31 = vpop.f32.mrf.mxu1 }
 0x18b   : > { %v1326_v45 = vadd.f32 %v1325_v31, %v1157_v30  ;;  %1195 = vmatmul.bf16.gmra.mxu0 %v1980_v22  ;;  %2220 = vmatmul.msk.bf16.gmra.mxu3 %vm973_vm2, %v2096_v28 }
 0x18c   : > { %2211 = vmatmul.msk.bf16.gmra.mxu2 %vm973_vm2, %v1988_v20  ;;  %v2012_v20 = vor.u32 %v2297_v17, %v2011_v15 }
 0x18d   : > { %1364 = vmatmul.bf16.gmra.mxu1 %v1984_v29 }
 0x18e   : > { %v1405_v38 = vpop.f32.mrf.mxu3 }
 0x18f   : > { %v1494_v34 = vpop.f32.mrf.mxu2  ;;  %v2902_v62 = vadd.f32 %v1405_v38, %v1237_v32 }
 0x190   : > { %v1495_v35 = vadd.f32 %v1494_v34, %v1326_v45  ;;  %v1158_v39 = vpop.f32.mrf.mxu0 }
 0x191   : > { %v1159_v40 = vadd.f32 %v2613_v61, %v1158_v39 }
 0x192   : > { %1612 = vst [vmem:[%s2629_s21 + $0xe0] sm:$0xff] %v1495_v35  ;;  %v1327_v41 = vpop.f32.mrf.mxu1 }
 0x193   : > { %v1328_v43 = vadd.f32 %v1327_v41, %v1159_v40 }
 0x196   : > { %v1407_v55 = vpop.f32.mrf.mxu3 }
 0x197   : > { %v1496_v53 = vpop.f32.mrf.mxu2  ;;  %v2914_v59 = vadd.f32 %v1407_v55, %v1239_v58 }
 0x198   : > { %v1497_v54 = vadd.f32 %v1496_v53, %v1328_v43  ;;  %v1161_v60 = vpop.f32.mrf.mxu0 }
 0x199   : > { %v1162_v3 = vadd.f32 %v2920_v2, %v1161_v60 }
 0x19a   : > { %1613 = vst [vmem:[%s2629_s21 + $0xe8] sm:$0xff] %v1497_v54  ;;  %v1330_v61 = vpop.f32.mrf.mxu1 }
 0x19b   : > { %v1331_v12 = vadd.f32 %v1330_v61, %v1162_v3  ;;  %1200 = vmatmul.bf16.gmra.mxu0 %v1992_v56 }
 0x19c   : > { %2212 = vmatmul.msk.bf16.gmra.mxu2 %vm973_vm2, %v2000_v14 }
 0x19d   : > { %1369 = vmatmul.bf16.gmra.mxu1 %v1996_v1 }
 0x19e   : > { %v1410_v7 = vpop.f32.mrf.mxu3 }
 0x19f   : > { %v1499_v6 = vpop.f32.mrf.mxu2  ;;  %v2926_v8 = vadd.f32 %v1410_v7, %v1242_v4 }
 0x1a0   : > { %v1500_v57 = vadd.f32 %v1499_v6, %v1331_v12  ;;  %v1163_v9 = vpop.f32.mrf.mxu0 }
 0x1a1   : > { %v1164_v11 = vadd.f32 %v2920_v2, %v1163_v9 }
 0x1a2   : > { %1614 = vst [vmem:[%s2629_s21 + $0xf0] sm:$0xff] %v1500_v57  ;;  %v1332_v27 = vpop.f32.mrf.mxu1 }
 0x1a3   : > { %v1333_v13 = vadd.f32 %v1332_v27, %v1164_v11 }
 0x1a6   : > { %v1412_v19 = vpop.f32.mrf.mxu3 }
 0x1a7   : > { %v1501_v49 = vpop.f32.mrf.mxu2  ;;  %v2934_v22 = vadd.f32 %v1412_v19, %v1244_v18 }
 0x1a8   : > { %v1502_v26 = vadd.f32 %v1501_v49, %v1333_v13  ;;  %v1166_v25 = vpop.f32.mrf.mxu0 }
 0x1a9   : > { %v1167_v28 = vadd.f32 %v2920_v2, %v1166_v25 }
 0x1aa   : > { %1615 = vst [vmem:[%s2629_s21 + $0xf8] sm:$0xff] %v1502_v26  ;;  %v1335_v29 = vpop.f32.mrf.mxu1 }
 0x1ab   : > { %v1336_v30 = vadd.f32 %v1335_v29, %v1167_v28 }
 0x1ac   : > { %2213 = vmatmul.msk.bf16.gmra.mxu2 %vm973_vm2, %v2012_v20 }
 0x1ae   : > { %v1549_v46 = vpop.f32.mrf.mxu3 }
 0x1af   : > { %v1504_v31 = vpop.f32.mrf.mxu2  ;;  %v1550_v32 = vadd.f32 %v1549_v46, %v2792_v37 }
 0x1b0   : > { %v1505_v45 = vadd.f32 %v1504_v31, %v1336_v30  ;;  %v1168_v34 = vpop.f32.mrf.mxu0 }
 0x1b1   : > { %v1169_v35 = vadd.f32 %v2920_v2, %v1168_v34  ;;  %1634 = vst [vmem:[%s2629_s21 + $0x190] sm:$0xff] %v1550_v32 }
 0x1b2   : > { %1616 = vst [vmem:[%s2629_s21 + $0x100] sm:$0xff] %v1505_v45  ;;  %v1337_v38 = vpop.f32.mrf.mxu1 }
 0x1b3   : > { %v1338_v39 = vadd.f32 %v1337_v38, %v1169_v35 }
 0x1b6   : > { %v1551_v43 = vpop.f32.mrf.mxu3 }
 0x1b7   : > { %v1506_v40 = vpop.f32.mrf.mxu2  ;;  %v1552_v21 = vadd.f32 %v1551_v43, %v2806_v63 }
 0x1b8   : > { %v1507_v41 = vadd.f32 %v1506_v40, %v1338_v39  ;;  %v1171_v44 = vpop.f32.mrf.mxu0 }
 0x1b9   : > { %v1172_v47 = vadd.f32 %v2920_v2, %v1171_v44  ;;  %1635 = vst [vmem:[%s2629_s21 + $0x198] sm:$0xff] %v1552_v21 }
 0x1ba   : > { %1617 = vst [vmem:[%s2629_s21 + $0x108] sm:$0xff] %v1507_v41  ;;  %v1340_v48 = vpop.f32.mrf.mxu1 }
 0x1bb   : > { %v1341_v37 = vadd.f32 %v1340_v48, %v1172_v47 }
 0x1be   : > { %v1554_v58 = vpop.f32.mrf.mxu3 }
 0x1bf   : > { %v1509_v51 = vpop.f32.mrf.mxu2  ;;  %v1555_v53 = vadd.f32 %v1554_v58, %v2814_v16 }
 0x1c0   : > { %v1510_v52 = vadd.f32 %v1509_v51, %v1341_v37  ;;  %v1173_v54 = vpop.f32.mrf.mxu0 }
 0x1c1   : > { %v1174_v55 = vadd.f32 %v2920_v2, %v1173_v54  ;;  %1636 = vst [vmem:[%s2629_s21 + $0x1a0] sm:$0xff] %v1555_v53 }
 0x1c2   : > { %1618 = vst [vmem:[%s2629_s21 + $0x110] sm:$0xff] %v1510_v52  ;;  %v1342_v14 = vpop.f32.mrf.mxu1 }
 0x1c3   : > { %v1343_v63 = vadd.f32 %v1342_v14, %v1174_v55 }
 0x1c6   : > { %v1556_v1 = vpop.f32.mrf.mxu3 }
 0x1c7   : > { %v1511_v56 = vpop.f32.mrf.mxu2  ;;  %v1557_v3 = vadd.f32 %v1556_v1, %v2828_v36 }
 0x1c8   : > { %v1512_v60 = vadd.f32 %v1511_v56, %v1343_v63  ;;  %v1176_v61 = vpop.f32.mrf.mxu0 }
 0x1c9   : > { %v1177_v12 = vadd.f32 %v2920_v2, %v1176_v61  ;;  %1637 = vst [vmem:[%s2629_s21 + $0x1a8] sm:$0xff] %v1557_v3 }
 0x1ca   : > { %1619 = vst [vmem:[%s2629_s21 + $0x118] sm:$0xff] %v1512_v60  ;;  %v1345_v4 = vpop.f32.mrf.mxu1 }
 0x1cb   : > { %v1346_v16 = vadd.f32 %v1345_v4, %v1177_v12 }
 0x1ce   : > { %v1559_v7 = vpop.f32.mrf.mxu3 }
 0x1cf   : > { %v1514_v6 = vpop.f32.mrf.mxu2  ;;  %v1560_v9 = vadd.f32 %v1559_v7, %v2836_v42 }
 0x1d0   : > { %v1515_v57 = vadd.f32 %v1514_v6, %v1346_v16  ;;  %v1178_v11 = vpop.f32.mrf.mxu0 }
 0x1d1   : > { %v1179_v27 = vadd.f32 %v2920_v2, %v1178_v11  ;;  %1638 = vst [vmem:[%s2629_s21 + $0x1b0] sm:$0xff] %v1560_v9 }
 0x1d2   : > { %1620 = vst [vmem:[%s2629_s21 + $0x120] sm:$0xff] %v1515_v57  ;;  %v1347_v13 = vpop.f32.mrf.mxu1 }
 0x1d3   : > { %v1348_v36 = vadd.f32 %v1347_v13, %v1179_v27 }
 0x1d6   : > { %v1561_v18 = vpop.f32.mrf.mxu3 }
 0x1d7   : > { %v1516_v15 = vpop.f32.mrf.mxu2  ;;  %v1562_v49 = vadd.f32 %v1561_v18, %v2850_v10 }
 0x1d8   : > { %v1517_v17 = vadd.f32 %v1516_v15, %v1348_v36  ;;  %v1181_v26 = vpop.f32.mrf.mxu0 }
 0x1d9   : > { %v1182_v19 = vadd.f32 %v2920_v2, %v1181_v26  ;;  %1639 = vst [vmem:[%s2629_s21 + $0x1b8] sm:$0xff] %v1562_v49 }
 0x1da   : > { %1621 = vst [vmem:[%s2629_s21 + $0x128] sm:$0xff] %v1517_v17  ;;  %v1350_v20 = vpop.f32.mrf.mxu1 }
 0x1db   : > { %v1351_v42 = vadd.f32 %v1350_v20, %v1182_v19 }
 0x1de   : > { %v1564_v29 = vpop.f32.mrf.mxu3 }
 0x1df   : > { %v1519_v25 = vpop.f32.mrf.mxu2  ;;  %v1565_v30 = vadd.f32 %v1564_v29, %v2858_v5 }
 0x1e0   : > { %v1520_v28 = vadd.f32 %v1519_v25, %v1351_v42  ;;  %v1183_v31 = vpop.f32.mrf.mxu0 }
 0x1e1   : > { %v1184_v45 = vadd.f32 %v2920_v2, %v1183_v31  ;;  %1640 = vst [vmem:[%s2629_s21 + $0x1c0] sm:$0xff] %v1565_v30 }
 0x1e2   : > { %1622 = vst [vmem:[%s2629_s21 + $0x130] sm:$0xff] %v1520_v28  ;;  %v1352_v46 = vpop.f32.mrf.mxu1 }
 0x1e3   : > { %v1353_v10 = vadd.f32 %v1352_v46, %v1184_v45 }
 0x1e6   : > { %v1566_v35 = vpop.f32.mrf.mxu3 }
 0x1e7   : > { %v1521_v32 = vpop.f32.mrf.mxu2  ;;  %v1567_v38 = vadd.f32 %v1566_v35, %v2872_v50 }
 0x1e8   : > { %v1522_v34 = vadd.f32 %v1521_v32, %v1353_v10  ;;  %v1186_v39 = vpop.f32.mrf.mxu0 }
 0x1e9   : > { %v1187_v40 = vadd.f32 %v2920_v2, %v1186_v39  ;;  %1641 = vst [vmem:[%s2629_s21 + $0x1c8] sm:$0xff] %v1567_v38 }
 0x1ea   : > { %1623 = vst [vmem:[%s2629_s21 + $0x138] sm:$0xff] %v1522_v34  ;;  %v1355_v41 = vpop.f32.mrf.mxu1 }
 0x1eb   : > { %v1356_v5 = vadd.f32 %v1355_v41, %v1187_v40 }
 0x1ee   : > { %v1569_v44 = vpop.f32.mrf.mxu3 }
 0x1ef   : > { %v1524_v43 = vpop.f32.mrf.mxu2  ;;  %v1570_v47 = vadd.f32 %v1569_v44, %v2880_v33 }
 0x1f0   : > { %v1525_v21 = vadd.f32 %v1524_v43, %v1356_v5  ;;  %v1188_v48 = vpop.f32.mrf.mxu0 }
 0x1f1   : > { %v1189_v37 = vadd.f32 %v2920_v2, %v1188_v48  ;;  %1642 = vst [vmem:[%s2629_s21 + $0x1d0] sm:$0xff] %v1570_v47 }
 0x1f2   : > { %1624 = vst [vmem:[%s2629_s21 + $0x140] sm:$0xff] %v1525_v21  ;;  %v1357_v51 = vpop.f32.mrf.mxu1 }
 0x1f3   : > { %v1358_v50 = vadd.f32 %v1357_v51, %v1189_v37 }
 0x1f6   : > { %v1571_v53 = vpop.f32.mrf.mxu3 }
 0x1f7   : > { %v1526_v52 = vpop.f32.mrf.mxu2  ;;  %v1572_v54 = vadd.f32 %v1571_v53, %v2894_v24 }
 0x1f8   : > { %v1527_v58 = vadd.f32 %v1526_v52, %v1358_v50  ;;  %v1191_v55 = vpop.f32.mrf.mxu0 }
 0x1f9   : > { %v1192_v14 = vadd.f32 %v2920_v2, %v1191_v55  ;;  %1643 = vst [vmem:[%s2629_s21 + $0x1d8] sm:$0xff] %v1572_v54 }
 0x1fa   : > { %1625 = vst [vmem:[%s2629_s21 + $0x148] sm:$0xff] %v1527_v58  ;;  %v1360_v63 = vpop.f32.mrf.mxu1 }
 0x1fb   : > { %v1361_v33 = vadd.f32 %v1360_v63, %v1192_v14 }
 0x1fe   : > { %v1574_v1 = vpop.f32.mrf.mxu3 }
 0x1ff   : > { %v1529_v56 = vpop.f32.mrf.mxu2  ;;  %v1575_v3 = vadd.f32 %v1574_v1, %v2902_v62 }
 0x200   : > { %v1530_v60 = vadd.f32 %v1529_v56, %v1361_v33  ;;  %v1193_v61 = vpop.f32.mrf.mxu0 }
 0x201   : > { %v1194_v12 = vadd.f32 %v2920_v2, %v1193_v61  ;;  %1644 = vst [vmem:[%s2629_s21 + $0x1e0] sm:$0xff] %v1575_v3 }
 0x202   : > { %1626 = vst [vmem:[%s2629_s21 + $0x150] sm:$0xff] %v1530_v60  ;;  %v1362_v4 = vpop.f32.mrf.mxu1 }
 0x203   : > { %v1363_v24 = vadd.f32 %v1362_v4, %v1194_v12 }
 0x206   : > { %v1576_v57 = vpop.f32.mrf.mxu3 }
 0x207   : > { %v1531_v16 = vpop.f32.mrf.mxu2  ;;  %v1577_v7 = vadd.f32 %v1576_v57, %v2914_v59 }
 0x208   : > { %v1532_v6 = vadd.f32 %v1531_v16, %v1363_v24  ;;  %v1196_v9 = vpop.f32.mrf.mxu0 }
 0x209   : > { %v1197_v11 = vadd.f32 %v2920_v2, %v1196_v9  ;;  %1645 = vst [vmem:[%s2629_s21 + $0x1e8] sm:$0xff] %v1577_v7 }
 0x20a   : > { %1627 = vst [vmem:[%s2629_s21 + $0x158] sm:$0xff] %v1532_v6  ;;  %v1365_v27 = vpop.f32.mrf.mxu1 }
 0x20b   : > { %v1366_v62 = vadd.f32 %v1365_v27, %v1197_v11 }
 0x20e   : > { %v1579_v15 = vpop.f32.mrf.mxu3 }
 0x20f   : > { %v1534_v13 = vpop.f32.mrf.mxu2  ;;  %v1580_v17 = vadd.f32 %v1579_v15, %v2926_v8 }
 0x210   : > { %v1535_v36 = vadd.f32 %v1534_v13, %v1366_v62  ;;  %v1198_v18 = vpop.f32.mrf.mxu0 }
 0x211   : > { %v1199_v49 = vadd.f32 %v2920_v2, %v1198_v18  ;;  %1646 = vst [vmem:[%s2629_s21 + $0x1f0] sm:$0xff] %v1580_v17 }
 0x212   : > { %1628 = vst [vmem:[%s2629_s21 + $0x160] sm:$0xff] %v1535_v36  ;;  %v1367_v26 = vpop.f32.mrf.mxu1 }
 0x213   : > { %v1368_v59 = vadd.f32 %v1367_v26, %v1199_v49 }
 0x216   : > { %v1581_v42 = vpop.f32.mrf.mxu3 }
 0x217   : > { %v1536_v19 = vpop.f32.mrf.mxu2  ;;  %v1582_v25 = vadd.f32 %v1581_v42, %v2934_v22 }
 0x218   : > { %v1537_v20 = vadd.f32 %v1536_v19, %v1368_v59  ;;  %v1201_v28 = vpop.f32.mrf.mxu0 }
 0x219   : > { %v1202_v29 = vadd.f32 %v2920_v2, %v1201_v28  ;;  %1647 = vst [vmem:[%s2629_s21 + $0x1f8] sm:$0xff] %v1582_v25 }
 0x21a   : > { %1629 = vst [vmem:[%s2629_s21 + $0x168] sm:$0xff] %v1537_v20  ;;  %v1370_v8 = vpop.f32.mrf.mxu1 }
 0x21b   : > { %v1371_v30 = vadd.f32 %v1370_v8, %v1202_v29 }
 0x21f   : > { %v1539_v31 = vpop.f32.mrf.mxu2 }
 0x220   : > { %v1540_v45 = vadd.f32 %v1539_v31, %v1371_v30  ;;  %v1203_v46 = vpop.f32.mrf.mxu0 }
 0x221   : > { %v1204_v10 = vadd.f32 %v2920_v2, %v1203_v46 }
 0x222   : > { %1630 = vst [vmem:[%s2629_s21 + $0x170] sm:$0xff] %v1540_v45  ;;  %v1372_v32 = vpop.f32.mrf.mxu1 }
 0x223   : > { %v1373_v34 = vadd.f32 %v1372_v32, %v1204_v10 }
 0x227   : > { %v1541_v35 = vpop.f32.mrf.mxu2 }
 0x228   : > { %v1542_v22 = vadd.f32 %v1541_v35, %v1373_v34 }
 0x22a   : > { %1631 = vst [vmem:[%s2629_s21 + $0x178] sm:$0xff] %v1542_v22 }
 0x22f   : > { %v1544_v38 = vpop.f32.mrf.mxu2 }
 0x230   : > { %v1545_v39 = vadd.f32 %v1544_v38, %v2770_v0 }
 0x232   : > { %1632 = vst [vmem:[%s2629_s21 + $0x180] sm:$0xff] %v1545_v39 }
 0x237   : > { %v1546_v40 = vpop.f32.mrf.mxu2 }
 0x238   : > { %v1547_v41 = vadd.f32 %v1546_v40, %v2784_v23 }
 0x23a   : > { %1633 = vst [vmem:[%s2629_s21 + $0x188] sm:$0xff] %v1547_v41 }
 0x23b PF: > { %s13_s12 = sadd.s32 1, %s2383_s12  }
 0x23c   : > { %p10_p4 = scmp.ge.s32.totalorder %s13_s12, 10  }
 0x23e   :  { %12 = sbr.rel (!%p10_p4) target bundleno = 1 (0x1), region = 62 }

// kernel: _lambda_.8
= control target key start
LH: loop header
LB: loop body
LE: loop exit
PB: predicated region body
PF: predicated region fallthrough
CT: control target
= control target key end

     0   :  { %s3585_s6 = smov 0   ;;  %s7214_s0 = inlined_call_operand.vmem [shape: f32[2,43,5504], index: 0, kind: input, shape index: {}]   ;;  %s7215_s1 = inlined_call_operand.vmem [shape: f32[2,41,5248], index: 1, kind: output, shape index: {}]  }
   0x1 LB: > { %s3548_s7 = sadd.s32 4294967295, %s3573_s6   ;;  %p3552_p0 = scmp.ge.s32.totalorder %s3573_s6, 1  ;;  %s3573_s6 = sphi %s3585_s6, %s11_s6  }
   0x2   : > { %p87_p1 = scmp.lt.s32.totalorder %s3573_s6, 3 }
   0x4   : > { %p88_p2 = pnand %p3552_p0, %p87_p1 }
   0x6   : > { %91 = sbr.rel (%p88_p2) target bundleno = 680 (0x2a8), region = 24 }
   0xb   : > { %p107_p3 = scmp.lt.s32.totalorder %s3548_s7, 1  ;;  %vm1113_vm0 = vcmask 1046528   ;;  %vm2057_vm1 = vcmask 1045504  }
   0xd   : > { %s8083_s7 = smov (!%p107_p3, %s3548_s7), 1 }
   0xe   : > { %s3557_s8 = smul.u32 2064, %s8083_s7 }
   0xf   : > { %s3558_s12 = smul.u32 1968, %s8083_s7 }
  0x10   : > { %s3599_s11 = scalar_lea.vmem %s7214_s0, %s3557_s8 }
  0x11   : > { %v117_v0 = vld [vmem:[%s3599_s11] sm:$0xff]  ;;  %v118_v1 = vld [vmem:[%s3599_s11 + $0x8] sm:$0xff]  ;;  %v119_v2 = vld [vmem:[%s3599_s11 + $0x10] sm:$0xff]  ;;  %s3652_s15 = scalar_lea.vmem %s7215_s1, %s3558_s12 }
  0x12   : > { %v160_v3 = vld [vmem:[%s3599_s11 + $0x158] sm:$0xff]  ;;  %v161_v4 = vld [vmem:[%s3599_s11 + $0x160] sm:$0xff]  ;;  %v162_v5 = vld [vmem:[%s3599_s11 + $0x168] sm:$0xff]  ;;  %v375_v6 = vmax.f32 %v117_v0, %v118_v1  ;;  %v376_v7 = vmax.f32 %v118_v1, %v119_v2 }
  0x13   : > { %v416_v8 = vmax.f32 %v160_v3, %v161_v4  ;;  %v120_v9 = vld [vmem:[%s3599_s11 + $0x18] sm:$0xff]  ;;  %v163_v10 = vld [vmem:[%s3599_s11 + $0x170] sm:$0xff]  ;;  %v417_v11 = vmax.f32 %v161_v4, %v162_v5  ;;  %v121_v12 = vld [vmem:[%s3599_s11 + $0x20] sm:$0xff] }
  0x14   : > { %v621_v13 = vmax.f32 %v375_v6, %v119_v2  ;;  %v622_v14 = vmax.f32 %v376_v7, %v120_v9  ;;  %v3611_v15 = vld [vmem:[%s3599_s11 + $0x178] sm:$0xff]  ;;  %v377_v16 = vmax.f32 %v119_v2, %v120_v9  ;;  %v418_v17 = vmax.f32 %v162_v5, %v163_v10  ;;  %v122_v30 = vld [vmem:[%s3599_s11 + $0x28] sm:$0xff]  ;;  %v165_v31 = vld [vmem:[%s3599_s11 + $0x180] sm:$0xff] }
  0x15   : > { %v3613_v18 = vmax.f32 %v416_v8, %v162_v5  ;;  %v3615_v19 = vmax.f32 %v417_v11, %v163_v10  ;;  %v378_v20 = vmax.f32 %v120_v9, %v121_v12  ;;  %v419_v21 = vmax.f32 %v163_v10, %v3611_v15  ;;  %v123_v52 = vld [vmem:[%s3599_s11 + $0x30] sm:$0xff]  ;;  %v166_v57 = vld [vmem:[%s3599_s11 + $0x188] sm:$0xff]  ;;  %v124_v58 = vld [vmem:[%s3599_s11 + $0x38] sm:$0xff] }
  0x16   : > { %v1114_v22 = vrot.slane %v621_v13, 1  ;;  %v2058_v23 = vrot.slane %v621_v13, 2  ;;  %v1117_v24 = vrot.slane %v622_v14, 1  ;;  %v2061_v25 = vrot.slane %v622_v14, 2  ;;  %v167_v63 = vld [vmem:[%s3599_s11 + $0x190] sm:$0xff] }
  0x17   : > { %v7286_v26 = vrot.slane %v3613_v18, 1  ;;  %v7285_v27 = vrot.slane %v3613_v18, 2  ;;  %v7282_v28 = vrot.slane %v3615_v19, 1  ;;  %v7280_v29 = vrot.slane %v3615_v19, 2 }
  0x18   : > { %v623_v32 = vmax.f32 %v377_v16, %v121_v12  ;;  %v3625_v33 = vmax.f32 %v418_v17, %v3611_v15  ;;  %v624_v34 = vmax.f32 %v378_v20, %v122_v30  ;;  %v3627_v35 = vmax.f32 %v419_v21, %v165_v31  ;;  %v125_v16 = vld [vmem:[%s3599_s11 + $0x40] sm:$0xff]  ;;  %v168_v17 = vld [vmem:[%s3599_s11 + $0x198] sm:$0xff] }
  0x19   : > { %v1116_v36 = vsel %vm1113_vm0, %v1114_v22, %v7286_v26  ;;  %v2060_v37 = vsel %vm2057_vm1, %v2058_v23, %v7285_v27  ;;  %v1119_v38 = vsel %vm1113_vm0, %v1117_v24, %v7282_v28  ;;  %v2063_v39 = vsel %vm2057_vm1, %v2061_v25, %v7280_v29  ;;  %v156_v29 = vld [vmem:[%s3599_s11 + $0x138] sm:$0xff] }
  0x1a   : > { %v1811_v40 = vmax.f32 %v621_v13, %v1116_v36  ;;  %v1812_v41 = vmax.f32 %v622_v14, %v1119_v38  ;;  %v1120_v42 = vrot.slane %v623_v32, 1  ;;  %v7279_v43 = vrot.slane %v3625_v33, 1  ;;  %v126_v36 = vld [vmem:[%s3599_s11 + $0x48] sm:$0xff] }
  0x1b   : > { %v2064_v44 = vrot.slane %v623_v32, 2  ;;  %v7276_v45 = vrot.slane %v3625_v33, 2  ;;  %v1123_v46 = vrot.slane %v624_v34, 1  ;;  %v7272_v47 = vrot.slane %v3627_v35, 1 }
  0x1c   : > { %v2755_v48 = vmax.f32 %v1811_v40, %v2060_v37  ;;  %v2756_v49 = vmax.f32 %v1812_v41, %v2063_v39  ;;  %v1122_v50 = vsel %vm1113_vm0, %v1120_v42, %v7279_v43  ;;  %v2067_v51 = vrot.slane %v624_v34, 2 }
  0x1d   : > { %v1813_v53 = vmax.f32 %v623_v32, %v1122_v50  ;;  %v2066_v54 = vsel %vm2057_vm1, %v2064_v44, %v7276_v45  ;;  %v1125_v55 = vsel %vm1113_vm0, %v1123_v46, %v7272_v47  ;;  %v7268_v56 = vrot.slane %v3627_v35, 2  ;;  %v169_v44 = vld [vmem:[%s3599_s11 + $0x1a0] sm:$0xff] }
  0x1e   : > { %v3001_v59 = vmax.f32 %v2755_v48, 0.0  ;;  %v3002_v60 = vmax.f32 %v2756_v49, 0.0  ;;  %v1814_v61 = vmax.f32 %v624_v34, %v1125_v55  ;;  %v379_v62 = vmax.f32 %v121_v12, %v122_v30 }
  0x1f   : > { %v2757_v0 = vmax.f32 %v1813_v53, %v2066_v54  ;;  %v2069_v1 = vsel %vm2057_vm1, %v2067_v51, %v7268_v56  ;;  %v420_v2 = vmax.f32 %v3611_v15, %v165_v31  ;;  %v380_v3 = vmax.f32 %v122_v30, %v123_v52 }
  0x20   : > { %3247 = vst [vmem:[%s3652_s15] sm:$0xff] %v3001_v59  ;;  %v2758_v4 = vmax.f32 %v1814_v61, %v2069_v1  ;;  %v625_v5 = vmax.f32 %v379_v62, %v123_v52  ;;  %v421_v6 = vmax.f32 %v165_v31, %v166_v57  ;;  %v381_v7 = vmax.f32 %v123_v52, %v124_v58  ;;  %v127_v59 = vld [vmem:[%s3599_s11 + $0x50] sm:$0xff] }
  0x21   : > { %3248 = vst [vmem:[%s3652_s15 + $0x8] sm:$0xff] %v3002_v60  ;;  %v3003_v8 = vmax.f32 %v2757_v0, 0.0  ;;  %v3670_v9 = vmax.f32 %v420_v2, %v166_v57  ;;  %v626_v10 = vmax.f32 %v380_v3, %v124_v58  ;;  %v422_v11 = vmax.f32 %v166_v57, %v167_v63 }
  0x22   : > { %v3004_v12 = vmax.f32 %v2758_v4, 0.0  ;;  %v1126_v13 = vrot.slane %v625_v5, 1  ;;  %v2070_v14 = vrot.slane %v625_v5, 2  ;;  %v3672_v15 = vmax.f32 %v421_v6, %v167_v63  ;;  %v170_v4 = vld [vmem:[%s3599_s11 + $0x1a8] sm:$0xff] }
  0x23   : > { %3249 = vst [vmem:[%s3652_s15 + $0x10] sm:$0xff] %v3003_v8  ;;  %v7263_v20 = vrot.slane %v3670_v9, 1  ;;  %v7260_v21 = vrot.slane %v3670_v9, 2  ;;  %v1129_v22 = vrot.slane %v626_v10, 1  ;;  %v2073_v23 = vrot.slane %v626_v10, 2 }
  0x24   : > { %3250 = vst [vmem:[%s3652_s15 + $0x18] sm:$0xff] %v3004_v12  ;;  %v7253_v24 = vrot.slane %v3672_v15, 1  ;;  %v7252_v25 = vrot.slane %v3672_v15, 2  ;;  %v627_v30 = vmax.f32 %v381_v7, %v125_v16  ;;  %v3682_v31 = vmax.f32 %v422_v11, %v168_v17  ;;  %v171_v11 = vld [vmem:[%s3599_s11 + $0x1b0] sm:$0xff] }
  0x25   : > { %v1128_v32 = vsel %vm1113_vm0, %v1126_v13, %v7263_v20  ;;  %v2072_v34 = vsel %vm2057_vm1, %v2070_v14, %v7260_v21  ;;  %v382_v37 = vmax.f32 %v124_v58, %v125_v16  ;;  %v423_v38 = vmax.f32 %v167_v63, %v168_v17  ;;  %v149_v21 = vld [vmem:[%s3599_s11 + $0x100] sm:$0xff] }
  0x26   : > { %v1815_v39 = vmax.f32 %v625_v5, %v1128_v32  ;;  %v1131_v40 = vsel %vm1113_vm0, %v1129_v22, %v7253_v24  ;;  %v2075_v41 = vsel %vm2057_vm1, %v2073_v23, %v7252_v25  ;;  %v1132_v42 = vrot.slane %v627_v30, 1  ;;  %v129_v22 = vld [vmem:[%s3599_s11 + $0x60] sm:$0xff] }
  0x27   : > { %v1816_v46 = vmax.f32 %v626_v10, %v1131_v40  ;;  %v7251_v48 = vrot.slane %v3682_v31, 1  ;;  %v2076_v49 = vrot.slane %v627_v30, 2  ;;  %v7250_v50 = vrot.slane %v3682_v31, 2  ;;  %v128_v10 = vld [vmem:[%s3599_s11 + $0x58] sm:$0xff]  ;;  %v189_v25 = vld [vmem:[%s3599_s11 + $0x240] sm:$0xff] }
  0x28   : > { %v2759_v51 = vmax.f32 %v1815_v39, %v2072_v34  ;;  %v628_v52 = vmax.f32 %v382_v37, %v126_v36  ;;  %v3700_v53 = vmax.f32 %v423_v38, %v169_v44  ;;  %v383_v54 = vmax.f32 %v125_v16, %v126_v36 }
  0x29   : > { %v2760_v55 = vmax.f32 %v1816_v46, %v2075_v41  ;;  %v1134_v57 = vsel %vm1113_vm0, %v1132_v42, %v7251_v48  ;;  %v2078_v58 = vsel %vm2057_vm1, %v2076_v49, %v7250_v50  ;;  %v424_v60 = vmax.f32 %v168_v17, %v169_v44  ;;  %v172_v46 = vld [vmem:[%s3599_s11 + $0x1b8] sm:$0xff]  ;;  %v130_v49 = vld [vmem:[%s3599_s11 + $0x68] sm:$0xff] }
  0x2a   : > { %v3005_v61 = vmax.f32 %v2759_v51, 0.0  ;;  %v1817_v62 = vmax.f32 %v627_v30, %v1134_v57  ;;  %v1135_v63 = vrot.slane %v628_v52, 1  ;;  %v7248_v0 = vrot.slane %v3700_v53, 1 }
  0x2b   : > { %v3006_v1 = vmax.f32 %v2760_v55, 0.0  ;;  %v2079_v2 = vrot.slane %v628_v52, 2  ;;  %v7244_v3 = vrot.slane %v3700_v53, 2  ;;  %v629_v5 = vmax.f32 %v383_v54, %v127_v59 }
  0x2c   : > { %3251 = vst [vmem:[%s3652_s15 + $0x20] sm:$0xff] %v3005_v61  ;;  %v2761_v6 = vmax.f32 %v1817_v62, %v2078_v58  ;;  %v1137_v7 = vsel %vm1113_vm0, %v1135_v63, %v7248_v0  ;;  %v3716_v8 = vmax.f32 %v424_v60, %v170_v4  ;;  %v384_v12 = vmax.f32 %v126_v36, %v127_v59 }
  0x2d   : > { %3252 = vst [vmem:[%s3652_s15 + $0x28] sm:$0xff] %v3006_v1  ;;  %v1818_v13 = vmax.f32 %v628_v52, %v1137_v7  ;;  %v2081_v14 = vsel %vm2057_vm1, %v2079_v2, %v7244_v3  ;;  %v1138_v16 = vrot.slane %v629_v5, 1  ;;  %v2082_v17 = vrot.slane %v629_v5, 2  ;;  %v173_v7 = vld [vmem:[%s3599_s11 + $0x1c0] sm:$0xff] }
  0x2e   : > { %v3007_v23 = vmax.f32 %v2761_v6, 0.0  ;;  %v7241_v30 = vrot.slane %v3716_v8, 1  ;;  %v7236_v32 = vrot.slane %v3716_v8, 2  ;;  %v425_v34 = vmax.f32 %v169_v44, %v170_v4 }
  0x2f   : > { %v2762_v37 = vmax.f32 %v1818_v13, %v2081_v14  ;;  %v630_v38 = vmax.f32 %v384_v12, %v128_v10  ;;  %v385_v36 = vmax.f32 %v127_v59, %v128_v10  ;;  %v426_v39 = vmax.f32 %v170_v4, %v171_v11  ;;  %v131_v14 = vld [vmem:[%s3599_s11 + $0x70] sm:$0xff] }
  0x30   : > { %3253 = vst [vmem:[%s3652_s15 + $0x30] sm:$0xff] %v3007_v23  ;;  %v1140_v40 = vsel %vm1113_vm0, %v1138_v16, %v7241_v30  ;;  %v2084_v41 = vsel %vm2057_vm1, %v2082_v17, %v7236_v32  ;;  %v3734_v42 = vmax.f32 %v425_v34, %v171_v11  ;;  %v386_v51 = vmax.f32 %v128_v10, %v129_v22  ;;  %v174_v34 = vld [vmem:[%s3599_s11 + $0x1c8] sm:$0xff]  ;;  %v184_v32 = vld [vmem:[%s3599_s11 + $0x218] sm:$0xff] }
  0x31   : > { %v3008_v44 = vmax.f32 %v2762_v37, 0.0  ;;  %v1819_v52 = vmax.f32 %v629_v5, %v1140_v40  ;;  %v1141_v54 = vrot.slane %v630_v38, 1  ;;  %v2085_v55 = vrot.slane %v630_v38, 2 }
  0x32   : > { %v7233_v57 = vrot.slane %v3734_v42, 1  ;;  %v7231_v58 = vrot.slane %v3734_v42, 2  ;;  %v631_v59 = vmax.f32 %v385_v36, %v129_v22  ;;  %v3740_v60 = vmax.f32 %v426_v39, %v172_v46 }
  0x33   : > { %3254 = vst [vmem:[%s3652_s15 + $0x38] sm:$0xff] %v3008_v44  ;;  %v2763_v61 = vmax.f32 %v1819_v52, %v2084_v41  ;;  %v427_v62 = vmax.f32 %v171_v11, %v172_v46  ;;  %v632_v63 = vmax.f32 %v386_v51, %v130_v49  ;;  %v387_v1 = vmax.f32 %v129_v22, %v130_v49 }
  0x34   : > { %v1143_v2 = vsel %vm1113_vm0, %v1141_v54, %v7233_v57  ;;  %v2087_v4 = vsel %vm2057_vm1, %v2085_v55, %v7231_v58  ;;  %v1144_v5 = vrot.slane %v631_v59, 1  ;;  %v7226_v6 = vrot.slane %v3740_v60, 1 }
  0x35   : > { %v3009_v10 = vmax.f32 %v2763_v61, 0.0  ;;  %v1820_v12 = vmax.f32 %v630_v38, %v1143_v2  ;;  %v2088_v13 = vrot.slane %v631_v59, 2  ;;  %v7225_v11 = vrot.slane %v3740_v60, 2  ;;  %v132_v61 = vld [vmem:[%s3599_s11 + $0x78] sm:$0xff] }
  0x36   : > { %v1146_v16 = vsel %vm1113_vm0, %v1144_v5, %v7226_v6  ;;  %v3756_v17 = vmax.f32 %v427_v62, %v173_v7  ;;  %v1147_v22 = vrot.slane %v632_v63, 1  ;;  %v2091_v23 = vrot.slane %v632_v63, 2  ;;  %v175_v62 = vld [vmem:[%s3599_s11 + $0x1d0] sm:$0xff] }
  0x37   : > { %3255 = vst [vmem:[%s3652_s15 + $0x40] sm:$0xff] %v3009_v10  ;;  %v2764_v37 = vmax.f32 %v1820_v12, %v2087_v4  ;;  %v1821_v36 = vmax.f32 %v631_v59, %v1146_v16  ;;  %v2090_v38 = vsel %vm2057_vm1, %v2088_v13, %v7225_v11  ;;  %v428_v39 = vmax.f32 %v172_v46, %v173_v7 }
  0x38   : > { %v7222_v40 = vrot.slane %v3756_v17, 1  ;;  %v7220_v41 = vrot.slane %v3756_v17, 2  ;;  %v633_v51 = vmax.f32 %v387_v1, %v131_v14  ;;  %v388_v44 = vmax.f32 %v130_v49, %v131_v14  ;;  %v3776_v49 = vld [vmem:[%s3599_s11 + $0x80] sm:$0xff] }
  0x39   : > { %v3010_v52 = vmax.f32 %v2764_v37, 0.0  ;;  %v2765_v54 = vmax.f32 %v1821_v36, %v2090_v38  ;;  %v3765_v55 = vmax.f32 %v428_v39, %v174_v34  ;;  %v429_v59 = vmax.f32 %v173_v7, %v174_v34  ;;  %v176_v38 = vld [vmem:[%s3599_s11 + $0x1d8] sm:$0xff] }
  0x3a   : > { %v1149_v2 = vsel %vm1113_vm0, %v1147_v22, %v7222_v40  ;;  %v2093_v46 = vsel %vm2057_vm1, %v2091_v23, %v7220_v41  ;;  %v1150_v4 = vrot.slane %v633_v51, 1  ;;  %v2094_v1 = vrot.slane %v633_v51, 2  ;;  %v136_v41 = vld [vmem:[%s3599_s11 + $0x98] sm:$0xff] }
  0x3b   : > { %3256 = vst [vmem:[%s3652_s15 + $0x48] sm:$0xff] %v3010_v52  ;;  %v3011_v5 = vmax.f32 %v2765_v54, 0.0  ;;  %v1822_v10 = vmax.f32 %v632_v63, %v1149_v2  ;;  %v7219_v12 = vrot.slane %v3765_v55, 1  ;;  %v7216_v7 = vrot.slane %v3765_v55, 2 }
  0x3c   : > { %v634_v13 = vmax.f32 %v388_v44, %v132_v61  ;;  %v3781_v16 = vmax.f32 %v429_v59, %v175_v62  ;;  %v389_v22 = vmax.f32 %v131_v14, %v132_v61  ;;  %v430_v37 = vmax.f32 %v174_v34, %v175_v62 }
  0x3d   : > { %3257 = vst [vmem:[%s3652_s15 + $0x50] sm:$0xff] %v3011_v5  ;;  %v2766_v23 = vmax.f32 %v1822_v10, %v2093_v46  ;;  %v1152_v36 = vsel %vm1113_vm0, %v1150_v4, %v7219_v12  ;;  %v2096_v63 = vsel %vm2057_vm1, %v2094_v1, %v7216_v7  ;;  %v390_v39 = vmax.f32 %v132_v61, %v3776_v49  ;;  %v134_v4 = vld [vmem:[%s3599_s11 + $0x88] sm:$0xff] }
  0x3e   : > { %v1823_v44 = vmax.f32 %v633_v51, %v1152_v36  ;;  %v1153_v52 = vrot.slane %v634_v13, 1  ;;  %v7218_v14 = vrot.slane %v3781_v16, 1  ;;  %v2097_v34 = vrot.slane %v634_v13, 2  ;;  %v177_v36 = vld [vmem:[%s3599_s11 + $0x1e0] sm:$0xff] }
  0x3f   : > { %v3012_v54 = vmax.f32 %v2766_v23, 0.0  ;;  %v7217_v59 = vrot.slane %v3781_v16, 2  ;;  %v635_v2 = vmax.f32 %v389_v22, %v3776_v49  ;;  %v3795_v46 = vmax.f32 %v430_v37, %v176_v38 }
  0x40   : > { %v2767_v1 = vmax.f32 %v1823_v44, %v2096_v63  ;;  %v1155_v61 = vsel %vm1113_vm0, %v1153_v52, %v7218_v14  ;;  %v431_v51 = vmax.f32 %v175_v62, %v176_v38  ;;  %v636_v5 = vmax.f32 %v390_v39, %v134_v4  ;;  %v135_v62 = vld [vmem:[%s3599_s11 + $0x90] sm:$0xff] }
  0x41   : > { %3258 = vst [vmem:[%s3652_s15 + $0x58] sm:$0xff] %v3012_v54  ;;  %v1824_v10 = vmax.f32 %v634_v13, %v1155_v61  ;;  %v2099_v23 = vsel %vm2057_vm1, %v2097_v34, %v7217_v59  ;;  %v1156_v22 = vrot.slane %v635_v2, 1  ;;  %v7221_v37 = vrot.slane %v3795_v46, 1  ;;  %v178_v61 = vld [vmem:[%s3599_s11 + $0x1e8] sm:$0xff] }
  0x42   : > { %v3013_v7 = vmax.f32 %v2767_v1, 0.0  ;;  %v2100_v63 = vrot.slane %v635_v2, 2  ;;  %v7223_v44 = vrot.slane %v3795_v46, 2  ;;  %v3808_v52 = vmax.f32 %v431_v51, %v177_v36 }
  0x43   : > { %v2768_v39 = vmax.f32 %v1824_v10, %v2099_v23  ;;  %v1158_v13 = vsel %vm1113_vm0, %v1156_v22, %v7221_v37  ;;  %v1159_v54 = vrot.slane %v636_v5, 1  ;;  %v2103_v34 = vrot.slane %v636_v5, 2  ;;  %v179_v22 = vld [vmem:[%s3599_s11 + $0x1f0] sm:$0xff] }
  0x44   : > { %3259 = vst [vmem:[%s3652_s15 + $0x60] sm:$0xff] %v3013_v7  ;;  %v1825_v59 = vmax.f32 %v635_v2, %v1158_v13  ;;  %v2102_v1 = vsel %vm2057_vm1, %v2100_v63, %v7223_v44  ;;  %v7224_v51 = vrot.slane %v3808_v52, 1  ;;  %v7230_v14 = vrot.slane %v3808_v52, 2 }
  0x45   : > { %v3014_v12 = vmax.f32 %v2768_v39, 0.0  ;;  %v391_v10 = vmax.f32 %v3776_v49, %v134_v4  ;;  %v432_v23 = vmax.f32 %v176_v38, %v177_v36  ;;  %v392_v37 = vmax.f32 %v134_v4, %v135_v62 }
  0x46   : > { %v2769_v40 = vmax.f32 %v1825_v59, %v2102_v1  ;;  %v1161_v7 = vsel %vm1113_vm0, %v1159_v54, %v7224_v51  ;;  %v2105_v2 = vsel %vm2057_vm1, %v2103_v34, %v7230_v14  ;;  %v433_v63 = vmax.f32 %v177_v36, %v178_v61  ;;  %v137_v36 = vld [vmem:[%s3599_s11 + $0xa0] sm:$0xff]  ;;  %v139_v14 = vld [vmem:[%s3599_s11 + $0xb0] sm:$0xff] }
  0x47   : > { %3260 = vst [vmem:[%s3652_s15 + $0x68] sm:$0xff] %v3014_v12  ;;  %v1826_v13 = vmax.f32 %v636_v5, %v1161_v7  ;;  %v637_v39 = vmax.f32 %v391_v10, %v135_v62  ;;  %v3831_v49 = vmax.f32 %v432_v23, %v178_v61  ;;  %v638_v38 = vmax.f32 %v392_v37, %v136_v41  ;;  %v180_v10 = vld [vmem:[%s3599_s11 + $0x1f8] sm:$0xff] }
  0x48   : > { %v3015_v44 = vmax.f32 %v2769_v40, 0.0  ;;  %v3833_v4 = vmax.f32 %v433_v63, %v179_v22  ;;  %v393_v59 = vmax.f32 %v135_v62, %v136_v41  ;;  %v434_v1 = vmax.f32 %v178_v61, %v179_v22 }
  0x49   : > { %v2770_v54 = vmax.f32 %v1826_v13, %v2105_v2  ;;  %v1162_v51 = vrot.slane %v637_v39, 1  ;;  %v7227_v11 = vrot.slane %v3831_v49, 1  ;;  %v2106_v6 = vrot.slane %v637_v39, 2  ;;  %v138_v13 = vld [vmem:[%s3599_s11 + $0xa8] sm:$0xff] }
  0x4a   : > { %3261 = vst [vmem:[%s3652_s15 + $0x70] sm:$0xff] %v3015_v44  ;;  %v7228_v12 = vrot.slane %v3831_v49, 2  ;;  %v1165_v5 = vrot.slane %v638_v38, 1  ;;  %v7229_v37 = vrot.slane %v3833_v4, 1  ;;  %v2109_v40 = vrot.slane %v638_v38, 2 }
  0x4b   : > { %v3016_v34 = vmax.f32 %v2770_v54, 0.0  ;;  %v1164_v62 = vsel %vm1113_vm0, %v1162_v51, %v7227_v11  ;;  %v7232_v61 = vrot.slane %v3833_v4, 2  ;;  %v639_v23 = vmax.f32 %v393_v59, %v137_v36  ;;  %v181_v54 = vld [vmem:[%s3599_s11 + $0x200] sm:$0xff] }
  0x4c   : > { %v1827_v7 = vmax.f32 %v637_v39, %v1164_v62  ;;  %v2108_v44 = vsel %vm2057_vm1, %v2106_v6, %v7228_v12  ;;  %v1167_v2 = vsel %vm1113_vm0, %v1165_v5, %v7229_v37  ;;  %v3851_v63 = vmax.f32 %v434_v1, %v180_v10 }
  0x4d   : > { %3262 = vst [vmem:[%s3652_s15 + $0x78] sm:$0xff] %v3016_v34  ;;  %v1828_v51 = vmax.f32 %v638_v38, %v1167_v2  ;;  %v2111_v59 = vsel %vm2057_vm1, %v2109_v40, %v7232_v61  ;;  %v1168_v39 = vrot.slane %v639_v23, 1  ;;  %v2112_v62 = vrot.slane %v639_v23, 2 }
  0x4e   : > { %v2771_v11 = vmax.f32 %v1827_v7, %v2108_v44  ;;  %v7235_v6 = vrot.slane %v3851_v63, 1  ;;  %v7234_v12 = vrot.slane %v3851_v63, 2  ;;  %v394_v5 = vmax.f32 %v136_v41, %v137_v36  ;;  %v182_v41 = vld [vmem:[%s3599_s11 + $0x208] sm:$0xff] }
  0x4f   : > { %v2772_v1 = vmax.f32 %v1828_v51, %v2111_v59  ;;  %v435_v37 = vmax.f32 %v179_v22, %v180_v10  ;;  %v395_v58 = vmax.f32 %v137_v36, %v138_v13  ;;  %v436_v38 = vmax.f32 %v180_v10, %v181_v54 }
  0x50   : > { %v3017_v34 = vmax.f32 %v2771_v11, 0.0  ;;  %v1170_v40 = vsel %vm1113_vm0, %v1168_v39, %v7235_v6  ;;  %v2114_v7 = vsel %vm2057_vm1, %v2112_v62, %v7234_v12  ;;  %v640_v44 = vmax.f32 %v394_v5, %v138_v13  ;;  %v141_v6 = vld [vmem:[%s3599_s11 + $0xc0] sm:$0xff] }
  0x51   : > { %v3018_v2 = vmax.f32 %v2772_v1, 0.0  ;;  %v1829_v61 = vmax.f32 %v639_v23, %v1170_v40  ;;  %v3868_v57 = vmax.f32 %v435_v37, %v181_v54  ;;  %v641_v22 = vmax.f32 %v395_v58, %v139_v14  ;;  %v140_v1 = vld [vmem:[%s3599_s11 + $0xb8] sm:$0xff]  ;;  %v183_v40 = vld [vmem:[%s3599_s11 + $0x210] sm:$0xff] }
  0x52   : > { %3263 = vst [vmem:[%s3652_s15 + $0x80] sm:$0xff] %v3017_v34  ;;  %v1171_v36 = vrot.slane %v640_v44, 1  ;;  %v2115_v10 = vrot.slane %v640_v44, 2  ;;  %v3872_v11 = vmax.f32 %v436_v38, %v182_v41  ;;  %v396_v51 = vmax.f32 %v138_v13, %v139_v14 }
  0x53   : > { %3264 = vst [vmem:[%s3652_s15 + $0x88] sm:$0xff] %v3018_v2  ;;  %v2773_v59 = vmax.f32 %v1829_v61, %v2114_v7  ;;  %v7237_v39 = vrot.slane %v3868_v57, 1  ;;  %v7240_v62 = vrot.slane %v3868_v57, 2  ;;  %v1174_v23 = vrot.slane %v641_v22, 1 }
  0x54   : > { %v7238_v37 = vrot.slane %v3872_v11, 1  ;;  %v2118_v58 = vrot.slane %v641_v22, 2  ;;  %v7239_v5 = vrot.slane %v3872_v11, 2  ;;  %v437_v34 = vmax.f32 %v181_v54, %v182_v41 }
  0x55   : > { %v3019_v38 = vmax.f32 %v2773_v59, 0.0  ;;  %v1173_v61 = vsel %vm1113_vm0, %v1171_v36, %v7237_v39  ;;  %v2117_v13 = vsel %vm2057_vm1, %v2115_v10, %v7240_v62  ;;  %v642_v7 = vmax.f32 %v396_v51, %v140_v1 }
  0x56   : > { %v1830_v2 = vmax.f32 %v640_v44, %v1173_v61  ;;  %v1176_v12 = vsel %vm1113_vm0, %v1174_v23, %v7238_v37  ;;  %v2120_v54 = vsel %vm2057_vm1, %v2118_v58, %v7239_v5  ;;  %v3893_v59 = vmax.f32 %v437_v34, %v183_v40 }
  0x57   : > { %3265 = vst [vmem:[%s3652_s15 + $0x90] sm:$0xff] %v3019_v38  ;;  %v1831_v36 = vmax.f32 %v641_v22, %v1176_v12  ;;  %v1177_v39 = vrot.slane %v642_v7, 1  ;;  %v2121_v10 = vrot.slane %v642_v7, 2  ;;  %v397_v44 = vmax.f32 %v139_v14, %v140_v1  ;;  %v142_v38 = vld [vmem:[%s3599_s11 + $0xc8] sm:$0xff] }
  0x58   : > { %v2774_v51 = vmax.f32 %v1830_v2, %v2117_v13  ;;  %v7243_v61 = vrot.slane %v3893_v59, 1  ;;  %v7242_v23 = vrot.slane %v3893_v59, 2  ;;  %v438_v37 = vmax.f32 %v182_v41, %v183_v40  ;;  %v185_v41 = vld [vmem:[%s3599_s11 + $0x220] sm:$0xff]  ;;  %v143_v13 = vld [vmem:[%s3599_s11 + $0xd0] sm:$0xff] }
  0x59   : > { %v2775_v58 = vmax.f32 %v1831_v36, %v2120_v54  ;;  %v643_v34 = vmax.f32 %v397_v44, %v141_v6  ;;  %v398_v5 = vmax.f32 %v140_v1, %v141_v6  ;;  %v439_v62 = vmax.f32 %v183_v40, %v184_v32 }
  0x5a   : > { %v3020_v30 = vmax.f32 %v2774_v51, 0.0  ;;  %v1179_v12 = vsel %vm1113_vm0, %v1177_v39, %v7243_v61  ;;  %v2123_v14 = vsel %vm2057_vm1, %v2121_v10, %v7242_v23  ;;  %v3906_v22 = vmax.f32 %v438_v37, %v184_v32  ;;  %v186_v37 = vld [vmem:[%s3599_s11 + $0x228] sm:$0xff] }
  0x5b   : > { %v3021_v2 = vmax.f32 %v2775_v58, 0.0  ;;  %v1832_v54 = vmax.f32 %v642_v7, %v1179_v12  ;;  %v1180_v1 = vrot.slane %v643_v34, 1  ;;  %v2124_v40 = vrot.slane %v643_v34, 2 }
  0x5c   : > { %3266 = vst [vmem:[%s3652_s15 + $0x98] sm:$0xff] %v3020_v30  ;;  %v7247_v36 = vrot.slane %v3906_v22, 1  ;;  %v7245_v44 = vrot.slane %v3906_v22, 2  ;;  %v644_v39 = vmax.f32 %v398_v5, %v142_v38  ;;  %v3914_v51 = vmax.f32 %v439_v62, %v185_v41 }
  0x5d   : > { %3267 = vst [vmem:[%s3652_s15 + $0xa0] sm:$0xff] %v3021_v2  ;;  %v2776_v10 = vmax.f32 %v1832_v54, %v2123_v14  ;;  %v399_v23 = vmax.f32 %v141_v6, %v142_v38  ;;  %v440_v61 = vmax.f32 %v184_v32, %v185_v41  ;;  %v400_v3 = vmax.f32 %v142_v38, %v143_v13  ;;  %v144_v54 = vld [vmem:[%s3599_s11 + $0xd8] sm:$0xff] }
  0x5e   : > { %v1182_v7 = vsel %vm1113_vm0, %v1180_v1, %v7247_v36  ;;  %v2126_v30 = vsel %vm2057_vm1, %v2124_v40, %v7245_v44  ;;  %v1183_v58 = vrot.slane %v644_v39, 1  ;;  %v7246_v62 = vrot.slane %v3914_v51, 1 }
  0x5f   : > { %v3022_v5 = vmax.f32 %v2776_v10, 0.0  ;;  %v1833_v12 = vmax.f32 %v643_v34, %v1182_v7  ;;  %v2127_v14 = vrot.slane %v644_v39, 2  ;;  %v7249_v6 = vrot.slane %v3914_v51, 2 }
  0x60   : > { %v1185_v32 = vsel %vm1113_vm0, %v1183_v58, %v7246_v62  ;;  %v645_v38 = vmax.f32 %v399_v23, %v143_v13  ;;  %v3929_v2 = vmax.f32 %v440_v61, %v186_v37  ;;  %v441_v1 = vmax.f32 %v185_v41, %v186_v37  ;;  %v187_v62 = vld [vmem:[%s3599_s11 + $0x230] sm:$0xff] }
  0x61   : > { %3268 = vst [vmem:[%s3652_s15 + $0xa8] sm:$0xff] %v3022_v5  ;;  %v2777_v40 = vmax.f32 %v1833_v12, %v2126_v30  ;;  %v1834_v44 = vmax.f32 %v644_v39, %v1185_v32  ;;  %v2129_v34 = vsel %vm2057_vm1, %v2127_v14, %v7249_v6  ;;  %v646_v10 = vmax.f32 %v400_v3, %v144_v54  ;;  %v145_v30 = vld [vmem:[%s3599_s11 + $0xe0] sm:$0xff]  ;;  %v188_v5 = vld [vmem:[%s3599_s11 + $0x238] sm:$0xff]  ;;  %v146_v6 = vld [vmem:[%s3599_s11 + $0xe8] sm:$0xff] }
  0x62   : > { %v1186_v7 = vrot.slane %v645_v38, 1  ;;  %v7254_v58 = vrot.slane %v3929_v2, 1  ;;  %v2130_v23 = vrot.slane %v645_v38, 2  ;;  %v7257_v61 = vrot.slane %v3929_v2, 2 }
  0x63   : > { %v3023_v36 = vmax.f32 %v2777_v40, 0.0  ;;  %v2778_v41 = vmax.f32 %v1834_v44, %v2129_v34  ;;  %v3939_v0 = vmax.f32 %v441_v1, %v187_v62  ;;  %v1189_v39 = vrot.slane %v646_v10, 1 }
  0x64   : > { %v1188_v3 = vsel %vm1113_vm0, %v1186_v7, %v7254_v58  ;;  %v2132_v12 = vsel %vm2057_vm1, %v2130_v23, %v7257_v61  ;;  %v2133_v14 = vrot.slane %v646_v10, 2  ;;  %v401_v32 = vmax.f32 %v143_v13, %v144_v54  ;;  %v191_v61 = vld [vmem:[%s3599_s11 + $0x250] sm:$0xff] }
  0x65   : > { %3269 = vst [vmem:[%s3652_s15 + $0xb0] sm:$0xff] %v3023_v36  ;;  %v3024_v44 = vmax.f32 %v2778_v41, 0.0  ;;  %v1835_v1 = vmax.f32 %v645_v38, %v1188_v3  ;;  %v7255_v40 = vrot.slane %v3939_v0, 1  ;;  %v7256_v34 = vrot.slane %v3939_v0, 2 }
  0x66   : > { %v442_v50 = vmax.f32 %v186_v37, %v187_v62  ;;  %v647_v48 = vmax.f32 %v401_v32, %v145_v30  ;;  %v402_v24 = vmax.f32 %v144_v54, %v145_v30  ;;  %v443_v7 = vmax.f32 %v187_v62, %v188_v5 }
  0x67   : > { %3270 = vst [vmem:[%s3652_s15 + $0xb8] sm:$0xff] %v3024_v44  ;;  %v2779_v58 = vmax.f32 %v1835_v1, %v2132_v12  ;;  %v1191_v13 = vsel %vm1113_vm0, %v1189_v39, %v7255_v40  ;;  %v2135_v36 = vsel %vm2057_vm1, %v2133_v14, %v7256_v34  ;;  %v403_v38 = vmax.f32 %v145_v30, %v146_v6  ;;  %v147_v12 = vld [vmem:[%s3599_s11 + $0xf0] sm:$0xff] }
  0x68   : > { %v1836_v23 = vmax.f32 %v646_v10, %v1191_v13  ;;  %v3961_v41 = vmax.f32 %v442_v50, %v188_v5  ;;  %v1192_v37 = vrot.slane %v647_v48, 1  ;;  %v2136_v3 = vrot.slane %v647_v48, 2 }
  0x69   : > { %v3025_v54 = vmax.f32 %v2779_v58, 0.0  ;;  %v648_v62 = vmax.f32 %v402_v24, %v146_v6  ;;  %v3963_v32 = vmax.f32 %v443_v7, %v189_v25  ;;  %v444_v44 = vmax.f32 %v188_v5, %v189_v25  ;;  %v190_v58 = vld [vmem:[%s3599_s11 + $0x248] sm:$0xff] }
  0x6a   : > { %v2780_v39 = vmax.f32 %v1836_v23, %v2135_v36  ;;  %v7258_v1 = vrot.slane %v3961_v41, 1  ;;  %v7259_v40 = vrot.slane %v3961_v41, 2  ;;  %v649_v14 = vmax.f32 %v403_v38, %v147_v12  ;;  %v148_v38 = vld [vmem:[%s3599_s11 + $0xf8] sm:$0xff] }
  0x6b   : > { %3271 = vst [vmem:[%s3652_s15 + $0xc0] sm:$0xff] %v3025_v54  ;;  %v1195_v50 = vrot.slane %v648_v62, 1  ;;  %v7261_v10 = vrot.slane %v3963_v32, 1  ;;  %v2139_v30 = vrot.slane %v648_v62, 2  ;;  %v7262_v24 = vrot.slane %v3963_v32, 2 }
  0x6c   : > { %v3026_v7 = vmax.f32 %v2780_v39, 0.0  ;;  %v1194_v5 = vsel %vm1113_vm0, %v1192_v37, %v7258_v1  ;;  %v2138_v13 = vsel %vm2057_vm1, %v2136_v3, %v7259_v40  ;;  %v3978_v36 = vmax.f32 %v444_v44, %v190_v58 }
  0x6d   : > { %v1837_v23 = vmax.f32 %v647_v48, %v1194_v5  ;;  %v1197_v54 = vsel %vm1113_vm0, %v1195_v50, %v7261_v10  ;;  %v2141_v39 = vsel %vm2057_vm1, %v2139_v30, %v7262_v24  ;;  %v1198_v34 = vrot.slane %v649_v14, 1 }
  0x6e   : > { %3272 = vst [vmem:[%s3652_s15 + $0xc8] sm:$0xff] %v3026_v7  ;;  %v1838_v37 = vmax.f32 %v648_v62, %v1197_v54  ;;  %v7266_v1 = vrot.slane %v3978_v36, 1  ;;  %v2142_v3 = vrot.slane %v649_v14, 2  ;;  %v7264_v44 = vrot.slane %v3978_v36, 2 }
  0x6f   : > { %v2781_v40 = vmax.f32 %v1837_v23, %v2138_v13  ;;  %v404_v48 = vmax.f32 %v146_v6, %v147_v12  ;;  %v445_v5 = vmax.f32 %v189_v25, %v190_v58  ;;  %v405_v50 = vmax.f32 %v147_v12, %v148_v38  ;;  %v192_v25 = vld [vmem:[%s3599_s11 + $0x258] sm:$0xff] }
  0x70   : > { %v2782_v10 = vmax.f32 %v1838_v37, %v2141_v39  ;;  %v1200_v30 = vsel %vm1113_vm0, %v1198_v34, %v7266_v1  ;;  %v2144_v62 = vsel %vm2057_vm1, %v2142_v3, %v7264_v44  ;;  %v446_v7 = vmax.f32 %v190_v58, %v191_v61 }
  0x71   : > { %v3027_v54 = vmax.f32 %v2781_v40, 0.0  ;;  %v1839_v24 = vmax.f32 %v649_v14, %v1200_v30  ;;  %v650_v20 = vmax.f32 %v404_v48, %v148_v38  ;;  %v3998_v13 = vmax.f32 %v445_v5, %v191_v61  ;;  %v150_v48 = vld [vmem:[%s3599_s11 + $0x108] sm:$0xff] }
  0x72   : > { %v3028_v6 = vmax.f32 %v2782_v10, 0.0  ;;  %v651_v12 = vmax.f32 %v405_v50, %v149_v21  ;;  %v4001_v23 = vmax.f32 %v446_v7, %v192_v25  ;;  %v406_v39 = vmax.f32 %v148_v38, %v149_v21  ;;  %v193_v50 = vld [vmem:[%s3599_s11 + $0x260] sm:$0xff] }
  0x73   : > { %3273 = vst [vmem:[%s3652_s15 + $0xd0] sm:$0xff] %v3027_v54  ;;  %v2783_v34 = vmax.f32 %v1839_v24, %v2144_v62  ;;  %v1201_v37 = vrot.slane %v650_v20, 1  ;;  %v7265_v3 = vrot.slane %v3998_v13, 1  ;;  %v2145_v44 = vrot.slane %v650_v20, 2 }
  0x74   : > { %3274 = vst [vmem:[%s3652_s15 + $0xd8] sm:$0xff] %v3028_v6  ;;  %v7267_v40 = vrot.slane %v3998_v13, 2  ;;  %v1204_v14 = vrot.slane %v651_v12, 1  ;;  %v7270_v58 = vrot.slane %v4001_v23, 1  ;;  %v2148_v10 = vrot.slane %v651_v12, 2 }
  0x75   : > { %v3029_v5 = vmax.f32 %v2783_v34, 0.0  ;;  %v1203_v24 = vsel %vm1113_vm0, %v1201_v37, %v7265_v3  ;;  %v7269_v38 = vrot.slane %v4001_v23, 2  ;;  %v447_v30 = vmax.f32 %v191_v61, %v192_v25  ;;  %v194_v61 = vld [vmem:[%s3599_s11 + $0x268] sm:$0xff] }
  0x76   : > { %v1840_v62 = vmax.f32 %v650_v20, %v1203_v24  ;;  %v2147_v7 = vsel %vm2057_vm1, %v2145_v44, %v7267_v40  ;;  %v1206_v54 = vsel %vm1113_vm0, %v1204_v14, %v7270_v58  ;;  %v652_v6 = vmax.f32 %v406_v39, %v150_v48  ;;  %v151_v20 = vld [vmem:[%s3599_s11 + $0x110] sm:$0xff] }
  0x77   : > { %3275 = vst [vmem:[%s3652_s15 + $0xe0] sm:$0xff] %v3029_v5  ;;  %v1841_v34 = vmax.f32 %v651_v12, %v1206_v54  ;;  %v2150_v37 = vsel %vm2057_vm1, %v2148_v10, %v7269_v38  ;;  %v4024_v3 = vmax.f32 %v447_v30, %v193_v50  ;;  %v407_v24 = vmax.f32 %v149_v21, %v150_v48  ;;  %v152_v30 = vld [vmem:[%s3599_s11 + $0x118] sm:$0xff]  ;;  %v195_v38 = vld [vmem:[%s3599_s11 + $0x270] sm:$0xff] }
  0x78   : > { %v2784_v1 = vmax.f32 %v1840_v62, %v2147_v7  ;;  %v1207_v44 = vrot.slane %v652_v6, 1  ;;  %v2151_v40 = vrot.slane %v652_v6, 2  ;;  %v448_v56 = vmax.f32 %v192_v25, %v193_v50 }
  0x79   : > { %v2785_v39 = vmax.f32 %v1841_v34, %v2150_v37  ;;  %v7271_v12 = vrot.slane %v4024_v3, 1  ;;  %v7275_v14 = vrot.slane %v4024_v3, 2  ;;  %v653_v5 = vmax.f32 %v407_v24, %v151_v20  ;;  %v4041_v37 = vld [vmem:[%s3599_s11 + $0x120] sm:$0xff] }
  0x7a   : > { %v3030_v54 = vmax.f32 %v2784_v1, 0.0  ;;  %v4030_v10 = vmax.f32 %v448_v56, %v194_v61  ;;  %v408_v58 = vmax.f32 %v150_v48, %v151_v20  ;;  %v449_v21 = vmax.f32 %v193_v50, %v194_v61 }
  0x7b   : > { %v3031_v62 = vmax.f32 %v2785_v39, 0.0  ;;  %v1209_v25 = vsel %vm1113_vm0, %v1207_v44, %v7271_v12  ;;  %v2153_v7 = vsel %vm2057_vm1, %v2151_v40, %v7275_v14  ;;  %v1210_v34 = vrot.slane %v653_v5, 1  ;;  %v197_v14 = vld [vmem:[%s3599_s11 + $0x280] sm:$0xff] }
  0x7c   : > { %3276 = vst [vmem:[%s3652_s15 + $0xe8] sm:$0xff] %v3030_v54  ;;  %v1842_v56 = vmax.f32 %v652_v6, %v1209_v25  ;;  %v7273_v1 = vrot.slane %v4030_v10, 1  ;;  %v2154_v24 = vrot.slane %v653_v5, 2  ;;  %v7274_v48 = vrot.slane %v4030_v10, 2  ;;  %v196_v54 = vld [vmem:[%s3599_s11 + $0x278] sm:$0xff] }
  0x7d   : > { %3277 = vst [vmem:[%s3652_s15 + $0xf0] sm:$0xff] %v3031_v62  ;;  %v654_v50 = vmax.f32 %v408_v58, %v152_v30  ;;  %v4047_v39 = vmax.f32 %v449_v21, %v195_v38  ;;  %v409_v44 = vmax.f32 %v151_v20, %v152_v30  ;;  %v450_v12 = vmax.f32 %v194_v61, %v195_v38 }
  0x7e   : > { %v2786_v47 = vmax.f32 %v1842_v56, %v2153_v7  ;;  %v1212_v40 = vsel %vm1113_vm0, %v1210_v34, %v7273_v1  ;;  %v2156_v6 = vsel %vm2057_vm1, %v2154_v24, %v7274_v48  ;;  %v410_v25 = vmax.f32 %v152_v30, %v4041_v37  ;;  %v154_v1 = vld [vmem:[%s3599_s11 + $0x128] sm:$0xff] }
  0x7f   : > { %v1843_v62 = vmax.f32 %v653_v5, %v1212_v40  ;;  %v1213_v58 = vrot.slane %v654_v50, 1  ;;  %v7278_v21 = vrot.slane %v4047_v39, 1  ;;  %v2157_v20 = vrot.slane %v654_v50, 2 }
  0x80   : > { %v3032_v61 = vmax.f32 %v2786_v47, 0.0  ;;  %v7277_v7 = vrot.slane %v4047_v39, 2  ;;  %v655_v56 = vmax.f32 %v409_v44, %v4041_v37  ;;  %v4060_v34 = vmax.f32 %v450_v12, %v196_v54 }
  0x81   : > { %v2787_v24 = vmax.f32 %v1843_v62, %v2156_v6  ;;  %v1215_v30 = vsel %vm1113_vm0, %v1213_v58, %v7278_v21  ;;  %v451_v5 = vmax.f32 %v195_v38, %v196_v54  ;;  %v656_v40 = vmax.f32 %v410_v25, %v154_v1  ;;  %v155_v38 = vld [vmem:[%s3599_s11 + $0x130] sm:$0xff] }
  0x82   : > { %7648 = vst [vmem:[#allocation2_spill] sm:$0xff] %v4060_v34  ;;  %v1844_v48 = vmax.f32 %v654_v50, %v1215_v30  ;;  %v2159_v47 = vsel %vm2057_vm1, %v2157_v20, %v7277_v7  ;;  %v1216_v44 = vrot.slane %v655_v56, 1  ;;  %v7281_v12 = vrot.slane %v4060_v34, 1  ;;  %v198_v30 = vld [vmem:[%s3599_s11 + $0x288] sm:$0xff] }
  0x83   : > { %3278 = vst [vmem:[%s3652_s15 + $0xf8] sm:$0xff] %v3032_v61  ;;  %v3033_v45 = vmax.f32 %v2787_v24, 0.0  ;;  %v2160_v6 = vrot.slane %v655_v56, 2  ;;  %v7283_v62 = vrot.slane %v4060_v34, 2  ;;  %v4073_v58 = vmax.f32 %v451_v5, %v197_v14 }
  0x84   : > { %v2788_v25 = vmax.f32 %v1844_v48, %v2159_v47  ;;  %v1218_v50 = vsel %vm1113_vm0, %v1216_v44, %v7281_v12  ;;  %v1219_v61 = vrot.slane %v656_v40, 1  ;;  %v2163_v20 = vrot.slane %v656_v40, 2  ;;  %v199_v44 = vld [vmem:[%s3599_s11 + $0x290] sm:$0xff] }
  0x85   : > { %7649 = vst [vmem:[#allocation3_spill] sm:$0xff] %v4073_v58  ;;  %v1845_v7 = vmax.f32 %v655_v56, %v1218_v50  ;;  %v2162_v24 = vsel %vm2057_vm1, %v2160_v6, %v7283_v62  ;;  %v7284_v5 = vrot.slane %v4073_v58, 1  ;;  %v7290_v21 = vrot.slane %v4073_v58, 2 }
  0x86   : > { %3279 = vst [vmem:[%s3652_s15 + $0x100] sm:$0xff] %v3033_v45  ;;  %v3034_v43 = vmax.f32 %v2788_v25, 0.0  ;;  %v411_v48 = vmax.f32 %v4041_v37, %v154_v1  ;;  %v452_v47 = vmax.f32 %v196_v54, %v197_v14  ;;  %v412_v12 = vmax.f32 %v154_v1, %v155_v38 }
  0x87   : > { %v2789_v28 = vmax.f32 %v1845_v7, %v2162_v24  ;;  %v1221_v45 = vsel %vm1113_vm0, %v1219_v61, %v7284_v5  ;;  %v2165_v56 = vsel %vm2057_vm1, %v2163_v20, %v7290_v21  ;;  %v453_v6 = vmax.f32 %v197_v14, %v198_v30 }
  0x88   : > { %3280 = vst [vmem:[%s3652_s15 + $0x108] sm:$0xff] %v3034_v43  ;;  %v1846_v50 = vmax.f32 %v656_v40, %v1221_v45  ;;  %v657_v25 = vmax.f32 %v411_v48, %v155_v38  ;;  %v4096_v37 = vmax.f32 %v452_v47, %v198_v30  ;;  %v658_v54 = vmax.f32 %v412_v12, %v156_v29  ;;  %v157_v12 = vld [vmem:[%s3599_s11 + $0x140] sm:$0xff]  ;;  %v200_v48 = vld [vmem:[%s3599_s11 + $0x298] sm:$0xff] }
  0x89   : > { %v3035_v62 = vmax.f32 %v2789_v28, 0.0  ;;  %v4098_v1 = vmax.f32 %v453_v6, %v199_v44  ;;  %v413_v7 = vmax.f32 %v155_v38, %v156_v29  ;;  %v454_v24 = vmax.f32 %v198_v30, %v199_v44 }
  0x8a   : > { %7650 = vst [vmem:[#allocation4_spill] sm:$0xff] %v4096_v37  ;;  %v2790_v61 = vmax.f32 %v1846_v50, %v2165_v56  ;;  %v1222_v5 = vrot.slane %v657_v25, 1  ;;  %v7289_v27 = vrot.slane %v4096_v37, 1  ;;  %v2166_v26 = vrot.slane %v657_v25, 2  ;;  %v158_v50 = vld [vmem:[%s3599_s11 + $0x148] sm:$0xff] }
  0x8b   : > { %7651 = vst [vmem:[#allocation5_spill] sm:$0xff] %v4098_v1  ;;  %v7287_v43 = vrot.slane %v4096_v37, 2  ;;  %v1225_v14 = vrot.slane %v658_v54, 1  ;;  %v7288_v40 = vrot.slane %v4098_v1, 1  ;;  %v2169_v28 = vrot.slane %v658_v54, 2  ;;  %v202_v37 = vld [vmem:[%s3599_s11 + $0x2a8] sm:$0xff] }
  0x8c   : > { %3281 = vst [vmem:[%s3652_s15 + $0x110] sm:$0xff] %v3035_v62  ;;  %v3036_v20 = vmax.f32 %v2790_v61, 0.0  ;;  %v1224_v38 = vsel %vm1113_vm0, %v1222_v5, %v7289_v27  ;;  %v7295_v30 = vrot.slane %v4098_v1, 2  ;;  %v659_v47 = vmax.f32 %v413_v7, %v157_v12  ;;  %v201_v61 = vld [vmem:[%s3599_s11 + $0x2a0] sm:$0xff]  ;;  %v204_v1 = vld [vmem:[%s3599_s11 + $0x2b8] sm:$0xff] }
  0x8d   : > { %v1847_v62 = vmax.f32 %v657_v25, %v1224_v38  ;;  %v2168_v45 = vsel %vm2057_vm1, %v2166_v26, %v7287_v43  ;;  %v1227_v56 = vsel %vm1113_vm0, %v1225_v14, %v7288_v40  ;;  %v4116_v6 = vmax.f32 %v454_v24, %v200_v48  ;;  %v159_v24 = vld [vmem:[%s3599_s11 + $0x150] sm:$0xff] }
  0x8e   : > { %3282 = vst [vmem:[%s3652_s15 + $0x118] sm:$0xff] %v3036_v20  ;;  %v1848_v5 = vmax.f32 %v658_v54, %v1227_v56  ;;  %v2171_v25 = vsel %vm2057_vm1, %v2169_v28, %v7295_v30  ;;  %v1228_v7 = vrot.slane %v659_v47, 1  ;;  %v2172_v38 = vrot.slane %v659_v47, 2  ;;  %v203_v56 = vld [vmem:[%s3599_s11 + $0x2b0] sm:$0xff] }
  0x8f   : > { %v2791_v26 = vmax.f32 %v1847_v62, %v2168_v45  ;;  %v7314_v43 = vrot.slane %v4116_v6, 1  ;;  %v7313_v14 = vrot.slane %v4116_v6, 2  ;;  %v414_v40 = vmax.f32 %v156_v29, %v157_v12 }
  0x90   : > { %v2792_v27 = vmax.f32 %v1848_v5, %v2171_v25  ;;  %v455_v21 = vmax.f32 %v199_v44, %v200_v48  ;;  %v415_v20 = vmax.f32 %v157_v12, %v158_v50  ;;  %v456_v54 = vmax.f32 %v200_v48, %v201_v61 }
  0x91   : > { %v3037_v28 = vmax.f32 %v2791_v26, 0.0  ;;  %v1230_v62 = vsel %vm1113_vm0, %v1228_v7, %v7314_v43  ;;  %v2174_v29 = vsel %vm2057_vm1, %v2172_v38, %v7313_v14  ;;  %v660_v45 = vmax.f32 %v414_v40, %v158_v50  ;;  %v205_v26 = vld [vmem:[%s3599_s11 + $0x2c0] sm:$0xff] }
  0x92   : > { %v3038_v30 = vmax.f32 %v2792_v27, 0.0  ;;  %v1849_v5 = vmax.f32 %v659_v47, %v1230_v62  ;;  %v4136_v44 = vmax.f32 %v455_v21, %v201_v61  ;;  %v661_v12 = vmax.f32 %v415_v20, %v159_v24 }
  0x93   : > { %3283 = vst [vmem:[%s3652_s15 + $0x120] sm:$0xff] %v3037_v28  ;;  %v1231_v48 = vrot.slane %v660_v45, 1  ;;  %v2175_v25 = vrot.slane %v660_v45, 2  ;;  %v4139_v58 = vmax.f32 %v456_v54, %v202_v37  ;;  %v457_v34 = vmax.f32 %v203_v56, %v204_v1  ;;  %v206_v37 = vld [vmem:[%s3599_s11 + $0x2c8] sm:$0xff]  ;;  %v207_v56 = vld [vmem:[%s3599_s11 + $0x2d0] sm:$0xff]  ;;  %v4158_v28 = vld [vmem:[%s3599_s11 + $0x2d8] sm:$0xff] }
  0x94   : > { %3284 = vst [vmem:[%s3652_s15 + $0x128] sm:$0xff] %v3038_v30  ;;  %v2793_v7 = vmax.f32 %v1849_v5, %v2174_v29  ;;  %v7311_v38 = vrot.slane %v4136_v44, 1  ;;  %v7300_v27 = vrot.slane %v4136_v44, 2  ;;  %v1234_v40 = vrot.slane %v661_v12, 1 }
  0x95   : > { %v7310_v21 = vrot.slane %v4139_v58, 1  ;;  %v2178_v47 = vrot.slane %v661_v12, 2  ;;  %v7301_v50 = vrot.slane %v4139_v58, 2  ;;  %v4147_v61 = vmax.f32 %v457_v34, %v205_v26 }
  0x96   : > { %v3039_v24 = vmax.f32 %v2793_v7, 0.0  ;;  %v1233_v30 = vsel %vm1113_vm0, %v1231_v48, %v7311_v38  ;;  %v2177_v20 = vsel %vm2057_vm1, %v2175_v25, %v7300_v27  ;;  %v458_v54 = vmax.f32 %v204_v1, %v205_v26 }
  0x97   : > { %v1850_v62 = vmax.f32 %v660_v45, %v1233_v30  ;;  %v1236_v34 = vsel %vm1113_vm0, %v1234_v40, %v7310_v21  ;;  %v2180_v29 = vsel %vm2057_vm1, %v2178_v47, %v7301_v50  ;;  %v7307_v5 = vrot.slane %v4147_v61, 1 }
  0x98   : > { %3285 = vst [vmem:[%s3652_s15 + $0x130] sm:$0xff] %v3039_v24  ;;  %v1851_v48 = vmax.f32 %v661_v12, %v1236_v34  ;;  %v7306_v25 = vrot.slane %v4147_v61, 2  ;;  %v4169_v1 = vmax.f32 %v458_v54, %v206_v37  ;;  %v459_v7 = vmax.f32 %v205_v26, %v206_v37 }
  0x99   : > { %v2794_v27 = vmax.f32 %v1850_v62, %v2177_v20  ;;  %v7652_v45 = vrot.slane %v3613_v18, 1  ;;  %v460_v30 = vmax.f32 %v206_v37, %v207_v56  ;;  %v461_v47 = vmax.f32 %v207_v56, %v4158_v28 }
  0x9a   : > { %v2795_v50 = vmax.f32 %v1851_v48, %v2180_v29  ;;  %v7653_v24 = vrot.slane %v3613_v18, 2  ;;  %v7303_v20 = vrot.slane %v4169_v1, 1  ;;  %v7302_v62 = vrot.slane %v4169_v1, 2  ;;  %v209_v29 = vld [vmem:[%s3599_s11 + $0x2e0] sm:$0xff] }
  0x9b   : > { %v1238_v40 = vsel %vm1113_vm0, %v7652_v45, %v7307_v5  ;;  %v3040_v54 = vmax.f32 %v2794_v27, 0.0  ;;  %v4185_v34 = vmax.f32 %v459_v7, %v207_v56  ;;  %v4188_v37 = vmax.f32 %v460_v30, %v4158_v28 }
  0x9c   : > { %v1852_v12 = vmax.f32 %v3613_v18, %v1238_v40  ;;  %v2182_v26 = vsel %vm2057_vm1, %v7653_v24, %v7306_v25  ;;  %v3041_v48 = vmax.f32 %v2795_v50, 0.0  ;;  %v7654_v18 = vrot.slane %v3615_v19, 1  ;;  %v212_v25 = vld [vmem:[%s3599_s11 + $0x2f8] sm:$0xff] }
  0x9d   : > { %v4196_v24 = vmax.f32 %v461_v47, %v209_v29  ;;  %3286 = vst [vmem:[%s3652_s15 + $0x138] sm:$0xff] %v3040_v54  ;;  %v7655_v56 = vrot.slane %v3615_v19, 2  ;;  %v7304_v7 = vrot.slane %v4185_v34, 1  ;;  %v7305_v30 = vrot.slane %v4185_v34, 2 }
  0x9e   : > { %v2796_v45 = vmax.f32 %v1852_v12, %v2182_v26  ;;  %v1240_v40 = vsel %vm1113_vm0, %v7654_v18, %v7303_v20  ;;  %3287 = vst [vmem:[%s3652_s15 + $0x140] sm:$0xff] %v3041_v48  ;;  %v7308_v47 = vrot.slane %v4188_v37, 1  ;;  %v7309_v26 = vrot.slane %v4188_v37, 2  ;;  %v211_v20 = vld [vmem:[%s3599_s11 + $0x2f0] sm:$0xff] }
  0x9f   : > { %v1853_v27 = vmax.f32 %v3615_v19, %v1240_v40  ;;  %v2184_v50 = vsel %vm2057_vm1, %v7655_v56, %v7302_v62  ;;  %v7312_v54 = vrot.slane %v4196_v24, 1  ;;  %v7656_v19 = vrot.slane %v3625_v33, 1  ;;  %v210_v62 = vld [vmem:[%s3599_s11 + $0x2e8] sm:$0xff] }
  0xa0   : > { %v3042_v12 = vmax.f32 %v2796_v45, 0.0  ;;  %v7657_v48 = vrot.slane %v3625_v33, 2  ;;  %v7374_v56 = vrot.slane %v4196_v24, 2  ;;  %v462_v21 = vmax.f32 %v4158_v28, %v209_v29 }
  0xa1   : > { %v2797_v18 = vmax.f32 %v1853_v27, %v2184_v50  ;;  %v1242_v40 = vsel %vm1113_vm0, %v7656_v19, %v7304_v7  ;;  %v7658_v50 = vrot.slane %v3627_v35, 1  ;;  %v7659_v7 = vrot.slane %v3627_v35, 2 }
  0xa2   : > { %v2186_v45 = vsel %vm2057_vm1, %v7657_v48, %v7305_v30  ;;  %3288 = vst [vmem:[%s3652_s15 + $0x148] sm:$0xff] %v3042_v12  ;;  %v1854_v27 = vmax.f32 %v3625_v33, %v1242_v40  ;;  %v7660_v30 = vrot.slane %v3670_v9, 1  ;;  %v4243_v33 = vld [vmem:[%s3599_s11 + $0x300] sm:$0xff]  ;;  %v463_v38 = vmax.f32 %v209_v29, %v210_v62 }
  0xa3   : > { %v1244_v19 = vsel %vm1113_vm0, %v7658_v50, %v7308_v47  ;;  %v2188_v48 = vsel %vm2057_vm1, %v7659_v7, %v7309_v26  ;;  %v3043_v40 = vmax.f32 %v2797_v18, 0.0  ;;  %v7661_v47 = vrot.slane %v3670_v9, 2 }
  0xa4   : > { %v1246_v12 = vsel %vm1113_vm0, %v7660_v30, %v7312_v54  ;;  %v1855_v5 = vmax.f32 %v3627_v35, %v1244_v19  ;;  %v2798_v26 = vmax.f32 %v1854_v27, %v2186_v45  ;;  %v464_v30 = vmax.f32 %v210_v62, %v211_v20 }
  0xa5   : > { %v1856_v50 = vmax.f32 %v3670_v9, %v1246_v12  ;;  %v2190_v7 = vsel %vm2057_vm1, %v7661_v47, %v7374_v56  ;;  %3289 = vst [vmem:[%s3652_s15 + $0x150] sm:$0xff] %v3043_v40  ;;  %v465_v14 = vmax.f32 %v211_v20, %v212_v25  ;;  %v466_v35 = vmax.f32 %v212_v25, %v4243_v33  ;;  %v214_v47 = vld [vmem:[%s3599_s11 + $0x308] sm:$0xff] }
  0xa6   : > { %v2799_v54 = vmax.f32 %v1855_v5, %v2188_v48  ;;  %v3044_v19 = vmax.f32 %v2798_v26, 0.0  ;;  %v4255_v12 = vmax.f32 %v462_v21, %v210_v62  ;;  %v4257_v43 = vmax.f32 %v463_v38, %v211_v20 }
  0xa7   : > { %v2800_v18 = vmax.f32 %v1856_v50, %v2190_v7  ;;  %v4259_v9 = vmax.f32 %v464_v30, %v212_v25  ;;  %v4263_v45 = vmax.f32 %v465_v14, %v4243_v33  ;;  %v4265_v5 = vmax.f32 %v466_v35, %v214_v47 }
  0xa8   : > { %v3045_v28 = vmax.f32 %v2799_v54, 0.0  ;;  %3290 = vst [vmem:[%s3652_s15 + $0x158] sm:$0xff] %v3044_v19  ;;  %v7357_v27 = vrot.slane %v4255_v12, 1  ;;  %v7356_v26 = vrot.slane %v4255_v12, 2  ;;  %v7315_v21 = vrot.slane %v4257_v43, 1 }
  0xa9   : > { %v3046_v29 = vmax.f32 %v2800_v18, 0.0  ;;  %v7317_v38 = vrot.slane %v4257_v43, 2  ;;  %v7316_v25 = vrot.slane %v4259_v9, 1  ;;  %v7319_v20 = vrot.slane %v4259_v9, 2 }
  0xaa   : > { %3291 = vst [vmem:[%s3652_s15 + $0x160] sm:$0xff] %v3045_v28  ;;  %v7318_v14 = vrot.slane %v4263_v45, 1  ;;  %v7320_v62 = vrot.slane %v4263_v45, 2  ;;  %v7662_v54 = vrot.slane %v3672_v15, 1  ;;  %v7663_v40 = vrot.slane %v3672_v15, 2 }
  0xab   : > { %3292 = vst [vmem:[%s3652_s15 + $0x168] sm:$0xff] %v3046_v29  ;;  %v7664_v7 = vrot.slane %v3682_v31, 1  ;;  %v7665_v18 = vrot.slane %v3682_v31, 2  ;;  %v7666_v29 = vrot.slane %v3700_v53, 1 }
  0xac   : > { %v1248_v48 = vsel %vm1113_vm0, %v7662_v54, %v7357_v27  ;;  %v2192_v50 = vsel %vm2057_vm1, %v7663_v40, %v7356_v26  ;;  %v7667_v40 = vrot.slane %v3700_v53, 2 }
  0xad   : > { %v1250_v30 = vsel %vm1113_vm0, %v7664_v7, %v7315_v21  ;;  %v2194_v35 = vsel %vm2057_vm1, %v7665_v18, %v7317_v38  ;;  %v1857_v19 = vmax.f32 %v3672_v15, %v1248_v48  ;;  %v1252_v54 = vsel %vm1113_vm0, %v7666_v29, %v7316_v25  ;;  %v215_v21 = vld [vmem:[%s3599_s11 + $0x310] sm:$0xff] }
  0xae   : > { %v1858_v28 = vmax.f32 %v3682_v31, %v1250_v30  ;;  %v2196_v7 = vsel %vm2057_vm1, %v7667_v40, %v7319_v20  ;;  %v1859_v18 = vmax.f32 %v3700_v53, %v1252_v54  ;;  %v7668_v15 = vrot.slane %v3716_v8, 1 }
  0xaf   : > { %v7669_v48 = vrot.slane %v3716_v8, 2  ;;  %v7325_v29 = vrot.slane %v4265_v5, 1  ;;  %v2801_v25 = vmax.f32 %v1857_v19, %v2192_v50  ;;  %v7324_v53 = vrot.slane %v4265_v5, 2  ;;  %v217_v50 = vld [vmem:[%s3599_s11 + $0x320] sm:$0xff] }
  0xb0   : > { %v1254_v31 = vsel %vm1113_vm0, %v7668_v15, %v7318_v14  ;;  %v2802_v38 = vmax.f32 %v1858_v28, %v2194_v35  ;;  %v2803_v54 = vmax.f32 %v1859_v18, %v2196_v7  ;;  %v7670_v15 = vrot.slane %v3734_v42, 1 }
  0xb1   : > { %v2198_v30 = vsel %vm2057_vm1, %v7669_v48, %v7320_v62  ;;  %v1860_v40 = vmax.f32 %v3716_v8, %v1254_v31  ;;  %v467_v20 = vmax.f32 %v4243_v33, %v214_v47  ;;  %v216_v48 = vld [vmem:[%s3599_s11 + $0x318] sm:$0xff]  ;;  %v468_v62 = vmax.f32 %v214_v47, %v215_v21  ;;  %v218_v47 = vld [vmem:[%s3599_s11 + $0x328] sm:$0xff] }
  0xb2   : > { %v1256_v14 = vsel %vm1113_vm0, %v7670_v15, %v7325_v29  ;;  %v3047_v35 = vmax.f32 %v2801_v25, 0.0  ;;  %v3048_v19 = vmax.f32 %v2802_v38, 0.0  ;;  %v3049_v31 = vmax.f32 %v2803_v54, 0.0 }
  0xb3   : > { %v2804_v8 = vmax.f32 %v1860_v40, %v2198_v30  ;;  %v1861_v28 = vmax.f32 %v3734_v42, %v1256_v14  ;;  %v7671_v7 = vrot.slane %v3734_v42, 2  ;;  %v4339_v15 = vmax.f32 %v467_v20, %v215_v21 }
  0xb4   : > { %v4341_v33 = vmax.f32 %v468_v62, %v216_v48  ;;  %3293 = vst [vmem:[%s3652_s15 + $0x170] sm:$0xff] %v3047_v35  ;;  %v469_v30 = vmax.f32 %v215_v21, %v216_v48  ;;  %v470_v14 = vmax.f32 %v216_v48, %v217_v50  ;;  %v7672_v21 = vrot.slane %v3740_v60, 1 }
  0xb5   : > { %v2200_v18 = vsel %vm2057_vm1, %v7671_v7, %v7324_v53  ;;  %v3050_v38 = vmax.f32 %v2804_v8, 0.0  ;;  %3294 = vst [vmem:[%s3652_s15 + $0x178] sm:$0xff] %v3048_v19  ;;  %v7323_v40 = vrot.slane %v4339_v15, 1  ;;  %v7321_v42 = vrot.slane %v4339_v15, 2  ;;  %v219_v8 = vld [vmem:[%s3599_s11 + $0x330] sm:$0xff] }
  0xb6   : > { %v2805_v25 = vmax.f32 %v1861_v28, %v2200_v18  ;;  %v7322_v54 = vrot.slane %v4341_v33, 1  ;;  %v7345_v20 = vrot.slane %v4341_v33, 2  ;;  %3295 = vst [vmem:[%s3652_s15 + $0x180] sm:$0xff] %v3049_v31  ;;  %v4351_v7 = vmax.f32 %v469_v30, %v217_v50 }
  0xb7   : > { %v4353_v35 = vmax.f32 %v470_v14, %v218_v47  ;;  %v471_v28 = vmax.f32 %v217_v50, %v218_v47  ;;  %3296 = vst [vmem:[%s3652_s15 + $0x188] sm:$0xff] %v3050_v38  ;;  %v1258_v48 = vsel %vm1113_vm0, %v7672_v21, %v7323_v40  ;;  %v7673_v19 = vrot.slane %v3740_v60, 2 }
  0xb8   : > { %v3051_v62 = vmax.f32 %v2805_v25, 0.0  ;;  %v7674_v18 = vrot.slane %v3756_v17, 1  ;;  %v7675_v38 = vrot.slane %v3756_v17, 2  ;;  %v1862_v30 = vmax.f32 %v3740_v60, %v1258_v48 }
  0xb9   : > { %v2202_v31 = vsel %vm2057_vm1, %v7673_v19, %v7321_v42  ;;  %v7328_v21 = vrot.slane %v4351_v7, 1  ;;  %v7326_v19 = vrot.slane %v4351_v7, 2  ;;  %v7327_v42 = vrot.slane %v4353_v35, 1 }
  0xba   : > { %v1260_v50 = vsel %vm1113_vm0, %v7674_v18, %v7322_v54  ;;  %v2204_v25 = vsel %vm2057_vm1, %v7675_v38, %v7345_v20  ;;  %3297 = vst [vmem:[%s3652_s15 + $0x190] sm:$0xff] %v3051_v62  ;;  %v7329_v18 = vrot.slane %v4353_v35, 2  ;;  %v4384_v54 = vmax.f32 %v471_v28, %v219_v8 }
  0xbb   : > { %v1863_v14 = vmax.f32 %v3756_v17, %v1260_v50  ;;  %v472_v40 = vmax.f32 %v218_v47, %v219_v8  ;;  %v2806_v53 = vmax.f32 %v1862_v30, %v2202_v31  ;;  %v7676_v60 = vrot.slane %v3765_v55, 1  ;;  %v220_v50 = vld [vmem:[%s3599_s11 + $0x338] sm:$0xff] }
  0xbc   : > { %v7677_v62 = vrot.slane %v3765_v55, 2  ;;  %v7678_v47 = vrot.slane %v3781_v16, 1  ;;  %v7679_v38 = vrot.slane %v3781_v16, 2  ;;  %v7330_v30 = vrot.slane %v4384_v54, 1 }
  0xbd   : > { %v2807_v29 = vmax.f32 %v1863_v14, %v2204_v25  ;;  %v1262_v17 = vsel %vm1113_vm0, %v7676_v60, %v7328_v21  ;;  %v221_v14 = vld [vmem:[%s3599_s11 + $0x340] sm:$0xff]  ;;  %v3052_v60 = vmax.f32 %v2806_v53, 0.0  ;;  %v4417_v21 = vmax.f32 %v472_v40, %v220_v50 }
  0xbe   : > { %v2206_v48 = vsel %vm2057_vm1, %v7677_v62, %v7326_v19  ;;  %v1864_v28 = vmax.f32 %v3765_v55, %v1262_v17  ;;  %v1264_v31 = vsel %vm1113_vm0, %v7678_v47, %v7327_v42  ;;  %v2208_v25 = vsel %vm2057_vm1, %v7679_v38, %v7329_v18  ;;  %v222_v18 = vld [vmem:[%s3599_s11 + $0x348] sm:$0xff] }
  0xbf   : > { %v3053_v62 = vmax.f32 %v2807_v29, 0.0  ;;  %v1865_v55 = vmax.f32 %v3781_v16, %v1264_v31  ;;  %v7335_v17 = vrot.slane %v4384_v54, 2  ;;  %v7680_v47 = vrot.slane %v3795_v46, 1  ;;  %3298 = vst [vmem:[%s3652_s15 + $0x198] sm:$0xff] %v3052_v60 }
  0xc0   : > { %v2808_v19 = vmax.f32 %v1864_v28, %v2206_v48  ;;  %v473_v38 = vmax.f32 %v219_v8, %v220_v50  ;;  %v7681_v16 = vrot.slane %v3795_v46, 2  ;;  %v474_v28 = vmax.f32 %v220_v50, %v221_v14 }
  0xc1   : > { %v1266_v42 = vsel %vm1113_vm0, %v7680_v47, %v7330_v30  ;;  %v2809_v53 = vmax.f32 %v1865_v55, %v2208_v25  ;;  %3299 = vst [vmem:[%s3652_s15 + $0x1a0] sm:$0xff] %v3053_v62  ;;  %v7332_v40 = vrot.slane %v4417_v21, 1  ;;  %v7331_v8 = vrot.slane %v4417_v21, 2 }
  0xc2   : > { %v1866_v29 = vmax.f32 %v3795_v46, %v1266_v42  ;;  %v2210_v48 = vsel %vm2057_vm1, %v7681_v16, %v7335_v17  ;;  %v3054_v31 = vmax.f32 %v2808_v19, 0.0  ;;  %v4430_v47 = vmax.f32 %v473_v38, %v221_v14  ;;  %v223_v42 = vld [vmem:[%s3599_s11 + $0x350] sm:$0xff]  ;;  %v226_v17 = vld [vmem:[%s3599_s11 + $0x368] sm:$0xff] }
  0xc3   : > { %v3055_v60 = vmax.f32 %v2809_v53, 0.0  ;;  %v4432_v55 = vmax.f32 %v474_v28, %v222_v18  ;;  %v475_v30 = vmax.f32 %v221_v14, %v222_v18  ;;  %v7682_v46 = vrot.slane %v3808_v52, 1 }
  0xc4   : > { %v2810_v25 = vmax.f32 %v1866_v29, %v2210_v48  ;;  %3300 = vst [vmem:[%s3652_s15 + $0x1a8] sm:$0xff] %v3054_v31  ;;  %v7683_v50 = vrot.slane %v3808_v52, 2  ;;  %v7333_v38 = vrot.slane %v4430_v47, 1  ;;  %v7334_v53 = vrot.slane %v4430_v47, 2 }
  0xc5   : > { %v1268_v19 = vsel %vm1113_vm0, %v7682_v46, %v7332_v40  ;;  %3301 = vst [vmem:[%s3652_s15 + $0x1b0] sm:$0xff] %v3055_v60  ;;  %v7336_v16 = vrot.slane %v4432_v55, 1  ;;  %v7343_v48 = vrot.slane %v4432_v55, 2  ;;  %v7684_v28 = vrot.slane %v3831_v49, 1 }
  0xc6   : > { %v2212_v62 = vsel %vm2057_vm1, %v7683_v50, %v7331_v8  ;;  %v3056_v14 = vmax.f32 %v2810_v25, 0.0  ;;  %v1867_v29 = vmax.f32 %v3808_v52, %v1268_v19  ;;  %v7685_v46 = vrot.slane %v3831_v49, 2  ;;  %v224_v52 = vld [vmem:[%s3599_s11 + $0x358] sm:$0xff]  ;;  %v225_v19 = vld [vmem:[%s3599_s11 + $0x360] sm:$0xff] }
  0xc7   : > { %v1270_v31 = vsel %vm1113_vm0, %v7684_v28, %v7333_v38  ;;  %v4462_v60 = vmax.f32 %v475_v30, %v223_v42  ;;  %v476_v25 = vmax.f32 %v222_v18, %v223_v42  ;;  %v7686_v28 = vrot.slane %v3833_v4, 1 }
  0xc8   : > { %v2214_v50 = vsel %vm2057_vm1, %v7685_v46, %v7334_v53  ;;  %3302 = vst [vmem:[%s3652_s15 + $0x1b8] sm:$0xff] %v3056_v14  ;;  %v2811_v8 = vmax.f32 %v1867_v29, %v2212_v62  ;;  %v1868_v40 = vmax.f32 %v3831_v49, %v1270_v31  ;;  %v7687_v30 = vrot.slane %v3833_v4, 2 }
  0xc9   : > { %v1272_v38 = vsel %vm1113_vm0, %v7686_v28, %v7336_v16  ;;  %v7337_v14 = vrot.slane %v4462_v60, 1  ;;  %v7338_v62 = vrot.slane %v4462_v60, 2  ;;  %v4481_v49 = vmax.f32 %v476_v25, %v224_v52 }
  0xca   : > { %v2216_v46 = vsel %vm2057_vm1, %v7687_v30, %v7343_v48  ;;  %v1869_v18 = vmax.f32 %v3833_v4, %v1272_v38  ;;  %v3057_v29 = vmax.f32 %v2811_v8, 0.0  ;;  %v2812_v31 = vmax.f32 %v1868_v40, %v2214_v50 }
  0xcb   : > { %v477_v53 = vmax.f32 %v223_v42, %v224_v52  ;;  %v478_v28 = vmax.f32 %v224_v52, %v225_v19  ;;  %v7688_v30 = vrot.slane %v3851_v63, 1  ;;  %v7689_v38 = vrot.slane %v3851_v63, 2 }
  0xcc   : > { %v2813_v16 = vmax.f32 %v1869_v18, %v2216_v46  ;;  %v7340_v40 = vrot.slane %v4481_v49, 1  ;;  %3303 = vst [vmem:[%s3652_s15 + $0x1c0] sm:$0xff] %v3057_v29  ;;  %v3058_v8 = vmax.f32 %v2812_v31, 0.0  ;;  %v7339_v50 = vrot.slane %v4481_v49, 2 }
  0xcd   : > { %v1274_v4 = vsel %vm1113_vm0, %v7688_v30, %v7337_v14  ;;  %v2218_v25 = vsel %vm2057_vm1, %v7689_v38, %v7338_v62  ;;  %v4498_v52 = vmax.f32 %v477_v53, %v225_v19  ;;  %v7690_v18 = vrot.slane %v3868_v57, 1  ;;  %v227_v38 = vld [vmem:[%s3599_s11 + $0x370] sm:$0xff] }
  0xce   : > { %v1870_v42 = vmax.f32 %v3851_v63, %v1274_v4  ;;  %v3059_v46 = vmax.f32 %v2813_v16, 0.0  ;;  %v4505_v14 = vmax.f32 %v478_v28, %v226_v17  ;;  %v479_v62 = vmax.f32 %v225_v19, %v226_v17  ;;  %3304 = vst [vmem:[%s3652_s15 + $0x1c8] sm:$0xff] %v3058_v8 }
  0xcf   : > { %v1276_v30 = vsel %vm1113_vm0, %v7690_v18, %v7340_v40  ;;  %v7691_v53 = vrot.slane %v3868_v57, 2  ;;  %v7342_v31 = vrot.slane %v4498_v52, 1  ;;  %v7341_v28 = vrot.slane %v4498_v52, 2 }
  0xd0   : > { %v2814_v29 = vmax.f32 %v1870_v42, %v2218_v25  ;;  %v1871_v63 = vmax.f32 %v3868_v57, %v1276_v30  ;;  %3305 = vst [vmem:[%s3652_s15 + $0x1d0] sm:$0xff] %v3059_v46  ;;  %v7344_v19 = vrot.slane %v4505_v14, 1  ;;  %v7354_v4 = vrot.slane %v4505_v14, 2  ;;  %v228_v30 = vld [vmem:[%s3599_s11 + $0x378] sm:$0xff]  ;;  %v229_v46 = vld [vmem:[%s3599_s11 + $0x380] sm:$0xff] }
  0xd1   : > { %v2220_v16 = vsel %vm2057_vm1, %v7691_v53, %v7339_v50  ;;  %v4520_v25 = vmax.f32 %v479_v62, %v227_v38  ;;  %v7692_v57 = vrot.slane %v3872_v11, 1  ;;  %v480_v53 = vmax.f32 %v226_v17, %v227_v38 }
  0xd2   : > { %v3060_v8 = vmax.f32 %v2814_v29, 0.0  ;;  %v2815_v42 = vmax.f32 %v1871_v63, %v2220_v16  ;;  %v7693_v40 = vrot.slane %v3872_v11, 2  ;;  %v7694_v29 = vrot.slane %v3893_v59, 1 }
  0xd3   : > { %v1278_v18 = vsel %vm1113_vm0, %v7692_v57, %v7342_v31  ;;  %v7695_v17 = vrot.slane %v3893_v59, 2  ;;  %v230_v57 = vld [vmem:[%s3599_s11 + $0x388] sm:$0xff]  ;;  %v4550_v48 = vmax.f32 %v480_v53, %v228_v30 }
  0xd4   : > { %v1872_v50 = vmax.f32 %v3872_v11, %v1278_v18  ;;  %v2222_v62 = vsel %vm2057_vm1, %v7693_v40, %v7341_v28  ;;  %v1280_v63 = vsel %vm1113_vm0, %v7694_v29, %v7344_v19  ;;  %3306 = vst [vmem:[%s3652_s15 + $0x1d8] sm:$0xff] %v3060_v8  ;;  %v3061_v18 = vmax.f32 %v2815_v42, 0.0 }
  0xd5   : > { %v2224_v16 = vsel %vm2057_vm1, %v7695_v17, %v7354_v4  ;;  %v1873_v11 = vmax.f32 %v3893_v59, %v1280_v63  ;;  %v7346_v40 = vrot.slane %v4520_v25, 1  ;;  %v7352_v28 = vrot.slane %v4520_v25, 2 }
  0xd6   : > { %v2816_v31 = vmax.f32 %v1872_v50, %v2222_v62  ;;  %v481_v29 = vmax.f32 %v227_v38, %v228_v30  ;;  %v482_v19 = vmax.f32 %v228_v30, %v229_v46  ;;  %3307 = vst [vmem:[%s3652_s15 + $0x1e0] sm:$0xff] %v3061_v18  ;;  %v7696_v17 = vrot.slane %v3906_v22, 1  ;;  %v231_v50 = vld [vmem:[%s3599_s11 + $0x390] sm:$0xff] }
  0xd7   : > { %v2817_v20 = vmax.f32 %v1873_v11, %v2224_v16  ;;  %v7697_v59 = vrot.slane %v3906_v22, 2  ;;  %v483_v53 = vmax.f32 %v229_v46, %v230_v57  ;;  %v7348_v62 = vrot.slane %v4550_v48, 1 }
  0xd8   : > { %v1282_v8 = vsel %vm1113_vm0, %v7696_v17, %v7346_v40  ;;  %v3062_v38 = vmax.f32 %v2816_v31, 0.0  ;;  %v7347_v63 = vrot.slane %v4550_v48, 2  ;;  %v4567_v18 = vmax.f32 %v481_v29, %v229_v46 }
  0xd9   : > { %v2226_v42 = vsel %vm2057_vm1, %v7697_v59, %v7352_v28  ;;  %v1874_v30 = vmax.f32 %v3906_v22, %v1282_v8  ;;  %v3063_v16 = vmax.f32 %v2817_v20, 0.0  ;;  %v4569_v11 = vmax.f32 %v482_v19, %v230_v57 }
  0xda   : > { %v4571_v17 = vmax.f32 %v483_v53, %v231_v50  ;;  %3308 = vst [vmem:[%s3652_s15 + $0x1e8] sm:$0xff] %v3062_v38  ;;  %v7698_v59 = vrot.slane %v3914_v51, 1  ;;  %v7699_v22 = vrot.slane %v3914_v51, 2  ;;  %v484_v19 = vmax.f32 %v230_v57, %v231_v50 }
  0xdb   : > { %v2818_v40 = vmax.f32 %v1874_v30, %v2226_v42  ;;  %3309 = vst [vmem:[%s3652_s15 + $0x1f0] sm:$0xff] %v3063_v16  ;;  %v7349_v29 = vrot.slane %v4567_v18, 1  ;;  %v7350_v8 = vrot.slane %v4567_v18, 2  ;;  %v7351_v42 = vrot.slane %v4569_v11, 1 }
  0xdc   : > { %v1284_v31 = vsel %vm1113_vm0, %v7698_v59, %v7348_v62  ;;  %v2228_v20 = vsel %vm2057_vm1, %v7699_v22, %v7347_v63  ;;  %v7353_v38 = vrot.slane %v4569_v11, 2  ;;  %v7355_v30 = vrot.slane %v4571_v17, 1  ;;  %v232_v62 = vld [vmem:[%s3599_s11 + $0x398] sm:$0xff] }
  0xdd   : > { %v1875_v46 = vmax.f32 %v3914_v51, %v1284_v31  ;;  %v3064_v53 = vmax.f32 %v2818_v40, 0.0  ;;  %v7365_v59 = vrot.slane %v4571_v17, 2  ;;  %v7700_v57 = vrot.slane %v3929_v2, 1 }
  0xde   : > { %v7701_v16 = vrot.slane %v3929_v2, 2  ;;  %v7702_v40 = vrot.slane %v3939_v0, 1 }
  0xdf   : > { %v2819_v22 = vmax.f32 %v1875_v46, %v2228_v20  ;;  %v1286_v51 = vsel %vm1113_vm0, %v7700_v57, %v7349_v29  ;;  %v233_v20 = vld [vmem:[%s3599_s11 + $0x3a0] sm:$0xff]  ;;  %3310 = vst [vmem:[%s3652_s15 + $0x1f8] sm:$0xff] %v3064_v53  ;;  %v7703_v29 = vrot.slane %v3939_v0, 2 }
  0xe0   : > { %v2230_v31 = vsel %vm2057_vm1, %v7701_v16, %v7350_v8  ;;  %v1288_v63 = vsel %vm1113_vm0, %v7702_v40, %v7351_v42  ;;  %v1876_v46 = vmax.f32 %v3929_v2, %v1286_v51  ;;  %v7704_v8 = vrot.slane %v3961_v41, 1  ;;  %v234_v42 = vld [vmem:[%s3599_s11 + $0x3a8] sm:$0xff] }
  0xe1   : > { %v1877_v57 = vmax.f32 %v3939_v0, %v1288_v63  ;;  %v2232_v16 = vsel %vm2057_vm1, %v7703_v29, %v7353_v38  ;;  %v3065_v28 = vmax.f32 %v2819_v22, 0.0  ;;  %v7705_v2 = vrot.slane %v3961_v41, 2 }
  0xe2   : > { %v1290_v40 = vsel %vm1113_vm0, %v7704_v8, %v7355_v30  ;;  %v4629_v0 = vmax.f32 %v484_v19, %v232_v62  ;;  %v2820_v29 = vmax.f32 %v1876_v46, %v2230_v31  ;;  %v485_v38 = vmax.f32 %v231_v50, %v232_v62  ;;  %v235_v19 = vld [vmem:[%s3599_s11 + $0x3b0] sm:$0xff] }
  0xe3   : > { %v1878_v53 = vmax.f32 %v3961_v41, %v1290_v40  ;;  %v2234_v63 = vsel %vm2057_vm1, %v7705_v2, %v7365_v59  ;;  %v2821_v51 = vmax.f32 %v1877_v57, %v2232_v16  ;;  %v486_v4 = vmax.f32 %v232_v62, %v233_v20  ;;  %3311 = vst [vmem:[%s3652_s15 + $0x200] sm:$0xff] %v3065_v28 }
  0xe4   : > { %v7364_v22 = vrot.slane %v4629_v0, 1  ;;  %v7362_v40 = vrot.slane %v4629_v0, 2  ;;  %v487_v30 = vmax.f32 %v233_v20, %v234_v42  ;;  %v3066_v26 = vmax.f32 %v2820_v29, 0.0 }
  0xe5   : > { %v2822_v8 = vmax.f32 %v1878_v53, %v2234_v63  ;;  %v3067_v41 = vmax.f32 %v2821_v51, 0.0  ;;  %v4634_v27 = vmax.f32 %v485_v38, %v233_v20  ;;  %v4636_v2 = vmax.f32 %v486_v4, %v234_v42 }
  0xe6   : > { %v7706_v28 = vrot.slane %v3963_v32, 1  ;;  %v7707_v62 = vrot.slane %v3963_v32, 2  ;;  %v4649_v57 = vmax.f32 %v487_v30, %v235_v19  ;;  %3312 = vst [vmem:[%s3652_s15 + $0x208] sm:$0xff] %v3066_v26  ;;  %v488_v29 = vmax.f32 %v234_v42, %v235_v19 }
  0xe7   : > { %v3068_v31 = vmax.f32 %v2822_v8, 0.0  ;;  %v7360_v38 = vrot.slane %v4634_v27, 1  ;;  %v7358_v20 = vrot.slane %v4634_v27, 2  ;;  %v7359_v16 = vrot.slane %v4636_v2, 1  ;;  %3313 = vst [vmem:[%s3652_s15 + $0x210] sm:$0xff] %v3067_v41 }
  0xe8   : > { %v1292_v50 = vsel %vm1113_vm0, %v7706_v28, %v7364_v22  ;;  %v2236_v46 = vsel %vm2057_vm1, %v7707_v62, %v7362_v40  ;;  %v7361_v53 = vrot.slane %v4636_v2, 2  ;;  %v7363_v63 = vrot.slane %v4649_v57, 1 }
  0xe9   : > { %v1879_v4 = vmax.f32 %v3963_v32, %v1292_v50  ;;  %v7373_v30 = vrot.slane %v4649_v57, 2  ;;  %3314 = vst [vmem:[%s3652_s15 + $0x218] sm:$0xff] %v3068_v31  ;;  %v7708_v32 = vrot.slane %v3978_v36, 1  ;;  %v7709_v8 = vrot.slane %v3978_v36, 2  ;;  %v236_v31 = vld [vmem:[%s3599_s11 + $0x3b8] sm:$0xff]  ;;  %v237_v50 = vld [vmem:[%s3599_s11 + $0x3c0] sm:$0xff] }
  0xea   : > { %v7710_v28 = vrot.slane %v3998_v13, 1  ;;  %v490_v40 = vmax.f32 %v236_v31, %v237_v50 }
  0xeb   : > { %v2823_v26 = vmax.f32 %v1879_v4, %v2236_v46  ;;  %v1294_v51 = vsel %vm1113_vm0, %v7708_v32, %v7360_v38  ;;  %v2238_v41 = vsel %vm2057_vm1, %v7709_v8, %v7358_v20  ;;  %v7711_v4 = vrot.slane %v3998_v13, 2 }
  0xec   : > { %v1296_v42 = vsel %vm1113_vm0, %v7710_v28, %v7359_v16  ;;  %v1880_v62 = vmax.f32 %v3978_v36, %v1294_v51  ;;  %v7712_v8 = vrot.slane %v4001_v23, 1  ;;  %v238_v28 = vld [vmem:[%s3599_s11 + $0x3c8] sm:$0xff]  ;;  %v7713_v36 = vrot.slane %v4001_v23, 2 }
  0xed   : > { %v1881_v46 = vmax.f32 %v3998_v13, %v1296_v42  ;;  %v2240_v32 = vsel %vm2057_vm1, %v7711_v4, %v7361_v53  ;;  %v3069_v16 = vmax.f32 %v2823_v26, 0.0  ;;  %v4697_v13 = vmax.f32 %v488_v29, %v236_v31  ;;  %v239_v29 = vld [vmem:[%s3599_s11 + $0x3d0] sm:$0xff] }
  0xee   : > { %v1298_v20 = vsel %vm1113_vm0, %v7712_v8, %v7363_v63  ;;  %v2242_v51 = vsel %vm2057_vm1, %v7713_v36, %v7373_v30  ;;  %v2824_v42 = vmax.f32 %v1880_v62, %v2238_v41  ;;  %v489_v53 = vmax.f32 %v235_v19, %v236_v31 }
  0xef   : > { %v1882_v38 = vmax.f32 %v4001_v23, %v1298_v20  ;;  %v2825_v4 = vmax.f32 %v1881_v46, %v2240_v32  ;;  %3315 = vst [vmem:[%s3652_s15 + $0x220] sm:$0xff] %v3069_v16  ;;  %v7371_v26 = vrot.slane %v4697_v13, 1  ;;  %v7369_v20 = vrot.slane %v4697_v13, 2 }
  0xf0   : > { %v491_v63 = vmax.f32 %v237_v50, %v238_v28  ;;  %v3070_v22 = vmax.f32 %v2824_v42, 0.0  ;;  %v4702_v59 = vmax.f32 %v489_v53, %v237_v50  ;;  %v4704_v36 = vmax.f32 %v490_v40, %v238_v28 }
  0xf1   : > { %v2826_v8 = vmax.f32 %v1882_v38, %v2242_v51  ;;  %v3071_v23 = vmax.f32 %v2825_v4, 0.0  ;;  %v7714_v19 = vrot.slane %v4024_v3, 1  ;;  %v7715_v16 = vrot.slane %v4024_v3, 2 }
  0xf2   : > { %v4717_v62 = vmax.f32 %v491_v63, %v239_v29  ;;  %3316 = vst [vmem:[%s3652_s15 + $0x228] sm:$0xff] %v3070_v22  ;;  %v7367_v53 = vrot.slane %v4702_v59, 1  ;;  %v7366_v50 = vrot.slane %v4702_v59, 2  ;;  %v7368_v46 = vrot.slane %v4704_v36, 1 }
  0xf3   : > { %v3072_v41 = vmax.f32 %v2826_v8, 0.0  ;;  %v1300_v38 = vsel %vm1113_vm0, %v7714_v19, %v7371_v26  ;;  %v2244_v31 = vsel %vm2057_vm1, %v7715_v16, %v7369_v20  ;;  %3317 = vst [vmem:[%s3652_s15 + $0x230] sm:$0xff] %v3071_v23  ;;  %v7370_v32 = vrot.slane %v4704_v36, 2 }
  0xf4   : > { %v1883_v40 = vmax.f32 %v4024_v3, %v1300_v38  ;;  %v7372_v51 = vrot.slane %v4717_v62, 1  ;;  %v7380_v63 = vrot.slane %v4717_v62, 2  ;;  %v492_v42 = vmax.f32 %v238_v28, %v239_v29  ;;  %v241_v38 = vld [vmem:[%s3599_s11 + $0x3e0] sm:$0xff] }
  0xf5   : > { %3318 = vst [vmem:[%s3652_s15 + $0x238] sm:$0xff] %v3072_v41  ;;  %v7716_v3 = vrot.slane %v4030_v10, 1  ;;  %v7717_v8 = vrot.slane %v4030_v10, 2  ;;  %v7718_v19 = vrot.slane %v4047_v39, 1  ;;  %v240_v41 = vld [vmem:[%s3599_s11 + $0x3d8] sm:$0xff] }
  0xf6   : > { %v2827_v22 = vmax.f32 %v1883_v40, %v2244_v31  ;;  %v7719_v40 = vrot.slane %v4047_v39, 2  ;;  %v494_v26 = vmax.f32 %v240_v41, %v241_v38 }
  0xf7   : > { %v1302_v4 = vsel %vm1113_vm0, %v7716_v3, %v7367_v53  ;;  %v2246_v23 = vsel %vm2057_vm1, %v7717_v8, %v7366_v50  ;;  %v1304_v28 = vsel %vm1113_vm0, %v7718_v19, %v7368_v46  ;;  %v7720_v8 = vld [vmem:[#allocation2_spill] sm:$0xff]  ;;  %v242_v19 = vld [vmem:[%s3599_s11 + $0x3e8] sm:$0xff] }
  0xf8   : > { %v1884_v16 = vmax.f32 %v4030_v10, %v1302_v4  ;;  %v1885_v31 = vmax.f32 %v4047_v39, %v1304_v28  ;;  %v2248_v3 = vsel %vm2057_vm1, %v7719_v40, %v7370_v32  ;;  %v7721_v50 = vrot.slane %v7720_v8, 1 }
  0xf9   : > { %v3073_v46 = vmax.f32 %v2827_v22, 0.0  ;;  %v7722_v10 = vrot.slane %v7720_v8, 2  ;;  %v4765_v39 = vmax.f32 %v492_v42, %v240_v41  ;;  %v493_v32 = vmax.f32 %v239_v29, %v240_v41  ;;  %v243_v42 = vld [vmem:[%s3599_s11 + $0x3f0] sm:$0xff]  ;;  %v7726_v29 = vld [vmem:[#allocation3_spill] sm:$0xff] }
  0xfa   : > { %v1306_v53 = vsel %vm1113_vm0, %v7721_v50, %v7372_v51  ;;  %v2828_v28 = vmax.f32 %v1884_v16, %v2246_v23  ;;  %v2829_v40 = vmax.f32 %v1885_v31, %v2248_v3  ;;  %v495_v51 = vmax.f32 %v241_v38, %v242_v19 }
  0xfb   : > { %v1886_v20 = vmax.f32 %v7720_v8, %v1306_v53  ;;  %v2250_v4 = vsel %vm2057_vm1, %v7722_v10, %v7380_v63  ;;  %7723 = vst [vmem:[#allocation2_spill] sm:$0xff] %v4765_v39  ;;  %v7376_v22 = vrot.slane %v4765_v39, 1  ;;  %v7375_v53 = vrot.slane %v4765_v39, 2 }
  0xfc   : > { %3319 = vst [vmem:[%s3652_s15 + $0x240] sm:$0xff] %v3073_v46  ;;  %v3074_v30 = vmax.f32 %v2828_v28, 0.0  ;;  %v3075_v8 = vmax.f32 %v2829_v40, 0.0  ;;  %v4770_v56 = vmax.f32 %v493_v32, %v241_v38  ;;  %v4772_v10 = vmax.f32 %v494_v26, %v242_v19 }
  0xfd   : > { %v2830_v50 = vmax.f32 %v1886_v20, %v2250_v4  ;;  %v7727_v46 = vrot.slane %v7726_v29, 1  ;;  %v7728_v41 = vrot.slane %v7726_v29, 2  ;;  %v4785_v31 = vmax.f32 %v495_v51, %v243_v42 }
  0xfe   : > { %7724 = vst [vmem:[#allocation6_spill] sm:$0xff] %v4770_v56  ;;  %v7377_v32 = vrot.slane %v4770_v56, 1  ;;  %v7378_v38 = vrot.slane %v4770_v56, 2  ;;  %v7379_v3 = vrot.slane %v4772_v10, 1  ;;  %v7381_v4 = vrot.slane %v4772_v10, 2 }
  0xff   : > { %7725 = vst [vmem:[#allocation7_spill] sm:$0xff] %v4772_v10  ;;  %v3076_v23 = vmax.f32 %v2830_v50, 0.0  ;;  %v1308_v20 = vsel %vm1113_vm0, %v7727_v46, %v7376_v22  ;;  %v2252_v16 = vsel %vm2057_vm1, %v7728_v41, %v7375_v53  ;;  %v7388_v28 = vrot.slane %v4785_v31, 1  ;;  %v7730_v50 = vld [vmem:[#allocation4_spill] sm:$0xff]  ;;  %v7733_v41 = vld [vmem:[#allocation5_spill] sm:$0xff] }
 0x100   : > { %7729 = vst [vmem:[#allocation3_spill] sm:$0xff] %v4785_v31  ;;  %v1887_v26 = vmax.f32 %v7726_v29, %v1308_v20  ;;  %v496_v40 = vmax.f32 %v242_v19, %v243_v42  ;;  %v7731_v29 = vrot.slane %v7730_v50, 1  ;;  %v7734_v53 = vrot.slane %v7733_v41, 1 }
 0x101   : > { %3320 = vst [vmem:[%s3652_s15 + $0x248] sm:$0xff] %v3074_v30 }
 0x102   : > { %3321 = vst [vmem:[%s3652_s15 + $0x250] sm:$0xff] %v3075_v8  ;;  %v2831_v30 = vmax.f32 %v1887_v26, %v2252_v16  ;;  %v1310_v46 = vsel %vm1113_vm0, %v7731_v29, %v7377_v32  ;;  %v7732_v8 = vrot.slane %v7730_v50, 2  ;;  %v1312_v19 = vsel %vm1113_vm0, %v7734_v53, %v7379_v3  ;;  %v246_v16 = vld [vmem:[%s3599_s11 + $0x408] sm:$0xff]  ;;  %v247_v26 = vld [vmem:[%s3599_s11 + $0x410] sm:$0xff]  ;;  %v248_v3 = vld [vmem:[%s3599_s11 + $0x418] sm:$0xff] }
 0x103   : > { %3322 = vst [vmem:[%s3652_s15 + $0x258] sm:$0xff] %v3076_v23  ;;  %v244_v23 = vld [vmem:[%s3599_s11 + $0x3f8] sm:$0xff]  ;;  %v1888_v22 = vmax.f32 %v7730_v50, %v1310_v46  ;;  %v1889_v29 = vmax.f32 %v7733_v41, %v1312_v19  ;;  %v7735_v32 = vrot.slane %v7733_v41, 2  ;;  %v7737_v50 = vrot.slane %v4785_v31, 2 }
 0x104   : > { %v2254_v20 = vsel %vm2057_vm1, %v7732_v8, %v7378_v38  ;;  %v7736_v38 = vrot.slane %v4116_v6, 1  ;;  %v3077_v63 = vmax.f32 %v2831_v30, 0.0  ;;  %v7738_v46 = vrot.slane %v4116_v6, 2 }
 0x105   : > { %v2256_v8 = vsel %vm2057_vm1, %v7735_v32, %v7381_v4  ;;  %v4834_v41 = vmax.f32 %v496_v40, %v244_v23  ;;  %v245_v32 = vld [vmem:[%s3599_s11 + $0x400] sm:$0xff]  ;;  %v2832_v4 = vmax.f32 %v1888_v22, %v2254_v20  ;;  %v497_v56 = vmax.f32 %v243_v42, %v244_v23 }
 0x106   : > { %v1314_v53 = vsel %vm1113_vm0, %v7736_v38, %v7388_v28  ;;  %v2258_v19 = vsel %vm2057_vm1, %v7738_v46, %v7737_v50  ;;  %v2833_v10 = vmax.f32 %v1889_v29, %v2256_v8  ;;  %v498_v39 = vmax.f32 %v246_v16, %v247_v26  ;;  %3323 = vst [vmem:[%s3652_s15 + $0x260] sm:$0xff] %v3077_v63  ;;  %v249_v22 = vld [vmem:[%s3599_s11 + $0x420] sm:$0xff] }
 0x107   : > { %v1890_v51 = vmax.f32 %v4116_v6, %v1314_v53  ;;  %v7467_v30 = vrot.slane %v4834_v41, 1  ;;  %v7396_v53 = vrot.slane %v4834_v41, 2  ;;  %v499_v28 = vmax.f32 %v247_v26, %v248_v3 }
 0x108   : > { %v3078_v6 = vmax.f32 %v2832_v4, 0.0  ;;  %v3079_v31 = vmax.f32 %v2833_v10, 0.0  ;;  %v4840_v50 = vmax.f32 %v497_v56, %v245_v32  ;;  %v4842_v40 = vmax.f32 %v498_v39, %v248_v3 }
 0x109   : > { %v2834_v38 = vmax.f32 %v1890_v51, %v2258_v19  ;;  %v7739_v63 = vrot.slane %v4136_v44, 1  ;;  %v7740_v51 = vrot.slane %v4136_v44, 2  ;;  %v4855_v10 = vmax.f32 %v499_v28, %v249_v22 }
 0x10a   : > { %3324 = vst [vmem:[%s3652_s15 + $0x268] sm:$0xff] %v3078_v6  ;;  %v7395_v39 = vrot.slane %v4840_v50, 1  ;;  %v7393_v23 = vrot.slane %v4840_v50, 2  ;;  %v7391_v16 = vrot.slane %v4842_v40, 1  ;;  %v7392_v26 = vrot.slane %v4842_v40, 2  ;;  %v250_v6 = vld [vmem:[%s3599_s11 + $0x428] sm:$0xff] }
 0x10b   : > { %v3080_v20 = vmax.f32 %v2834_v38, 0.0  ;;  %v1316_v42 = vsel %vm1113_vm0, %v7739_v63, %v7467_v30  ;;  %v2260_v4 = vsel %vm2057_vm1, %v7740_v51, %v7396_v53  ;;  %3325 = vst [vmem:[%s3652_s15 + $0x270] sm:$0xff] %v3079_v31  ;;  %v7394_v29 = vrot.slane %v4855_v10, 1 }
 0x10c   : > { %v1891_v56 = vmax.f32 %v4136_v44, %v1316_v42  ;;  %v7404_v28 = vrot.slane %v4855_v10, 2  ;;  %v500_v8 = vmax.f32 %v248_v3, %v249_v22  ;;  %v7741_v44 = vrot.slane %v4139_v58, 1 }
 0x10d   : > { %3326 = vst [vmem:[%s3652_s15 + $0x278] sm:$0xff] %v3080_v20  ;;  %v7742_v31 = vrot.slane %v4139_v58, 2  ;;  %v7743_v38 = vrot.slane %v4147_v61, 1  ;;  %v251_v20 = vld [vmem:[%s3599_s11 + $0x430] sm:$0xff]  ;;  %v7744_v51 = vrot.slane %v4147_v61, 2 }
 0x10e   : > { %v2835_v46 = vmax.f32 %v1891_v56, %v2260_v4  ;;  %v1318_v19 = vsel %vm1113_vm0, %v7741_v44, %v7395_v39  ;;  %v7745_v56 = vrot.slane %v4169_v1, 1 }
 0x10f   : > { %v2262_v32 = vsel %vm2057_vm1, %v7742_v31, %v7393_v23  ;;  %v1320_v3 = vsel %vm1113_vm0, %v7743_v38, %v7391_v16  ;;  %v1892_v63 = vmax.f32 %v4139_v58, %v1318_v19  ;;  %v2264_v4 = vsel %vm2057_vm1, %v7744_v51, %v7392_v26  ;;  %v252_v31 = vld [vmem:[%s3599_s11 + $0x438] sm:$0xff] }
 0x110   : > { %v1893_v42 = vmax.f32 %v4147_v61, %v1320_v3  ;;  %v1322_v44 = vsel %vm1113_vm0, %v7745_v56, %v7394_v29  ;;  %v3081_v38 = vmax.f32 %v2835_v46, 0.0  ;;  %v7746_v58 = vrot.slane %v4169_v1, 2 }
 0x111   : > { %v1894_v16 = vmax.f32 %v4169_v1, %v1322_v44  ;;  %v4903_v61 = vmax.f32 %v500_v8, %v250_v6  ;;  %v2836_v3 = vmax.f32 %v1892_v63, %v2262_v32  ;;  %v501_v26 = vmax.f32 %v249_v22, %v250_v6  ;;  %v253_v8 = vld [vmem:[%s3599_s11 + $0x440] sm:$0xff] }
 0x112   : > { %v2266_v19 = vsel %vm2057_vm1, %v7746_v58, %v7404_v28  ;;  %v2837_v51 = vmax.f32 %v1893_v42, %v2264_v4  ;;  %v502_v23 = vmax.f32 %v250_v6, %v251_v20  ;;  %3327 = vst [vmem:[%s3652_s15 + $0x280] sm:$0xff] %v3081_v38  ;;  %v503_v29 = vmax.f32 %v251_v20, %v252_v31 }
 0x113   : > { %v2838_v56 = vmax.f32 %v1894_v16, %v2266_v19  ;;  %v7403_v46 = vrot.slane %v4903_v61, 1  ;;  %v7401_v44 = vrot.slane %v4903_v61, 2  ;;  %v3082_v39 = vmax.f32 %v2836_v3, 0.0 }
 0x114   : > { %v3083_v1 = vmax.f32 %v2837_v51, 0.0  ;;  %v4908_v53 = vmax.f32 %v501_v26, %v251_v20  ;;  %v4910_v58 = vmax.f32 %v502_v23, %v252_v31  ;;  %v7747_v22 = vrot.slane %v4185_v34, 1 }
 0x115   : > { %v3084_v32 = vmax.f32 %v2838_v56, 0.0  ;;  %v7748_v6 = vrot.slane %v4185_v34, 2  ;;  %v4923_v42 = vmax.f32 %v503_v29, %v253_v8  ;;  %3328 = vst [vmem:[%s3652_s15 + $0x288] sm:$0xff] %v3082_v39  ;;  %v504_v3 = vmax.f32 %v252_v31, %v253_v8 }
 0x116   : > { %v1324_v16 = vsel %vm1113_vm0, %v7747_v22, %v7403_v46  ;;  %v7399_v26 = vrot.slane %v4908_v53, 1  ;;  %v7397_v20 = vrot.slane %v4908_v53, 2  ;;  %v7398_v4 = vrot.slane %v4910_v58, 1  ;;  %3329 = vst [vmem:[%s3652_s15 + $0x290] sm:$0xff] %v3083_v1 }
 0x117   : > { %v2268_v63 = vsel %vm2057_vm1, %v7748_v6, %v7401_v44  ;;  %v1895_v23 = vmax.f32 %v4185_v34, %v1324_v16  ;;  %v7400_v38 = vrot.slane %v4910_v58, 2  ;;  %v7402_v19 = vrot.slane %v4923_v42, 1  ;;  %3330 = vst [vmem:[%s3652_s15 + $0x298] sm:$0xff] %v3084_v32  ;;  %v254_v32 = vld [vmem:[%s3599_s11 + $0x448] sm:$0xff]  ;;  %v255_v16 = vld [vmem:[%s3599_s11 + $0x450] sm:$0xff] }
 0x118   : > { %v7412_v29 = vrot.slane %v4923_v42, 2  ;;  %v7749_v34 = vrot.slane %v4188_v37, 1  ;;  %v7750_v56 = vrot.slane %v4188_v37, 2  ;;  %v7751_v22 = vrot.slane %v4196_v24, 1 }
 0x119   : > { %v2839_v39 = vmax.f32 %v1895_v23, %v2268_v63  ;;  %v7752_v23 = vrot.slane %v4196_v24, 2  ;;  %v506_v44 = vmax.f32 %v254_v32, %v255_v16 }
 0x11a   : > { %v1326_v51 = vsel %vm1113_vm0, %v7749_v34, %v7399_v26  ;;  %v2270_v1 = vsel %vm2057_vm1, %v7750_v56, %v7397_v20  ;;  %v1328_v31 = vsel %vm1113_vm0, %v7751_v22, %v7398_v4  ;;  %v7753_v56 = vrot.slane %v4255_v12, 1  ;;  %v256_v22 = vld [vmem:[%s3599_s11 + $0x458] sm:$0xff] }
 0x11b   : > { %v1896_v6 = vmax.f32 %v4188_v37, %v1326_v51  ;;  %v1897_v63 = vmax.f32 %v4196_v24, %v1328_v31  ;;  %v2272_v34 = vsel %vm2057_vm1, %v7752_v23, %v7400_v38  ;;  %v3085_v4 = vmax.f32 %v2839_v39, 0.0 }
 0x11c   : > { %v1330_v20 = vsel %vm1113_vm0, %v7753_v56, %v7402_v19  ;;  %v7754_v37 = vrot.slane %v4255_v12, 2  ;;  %v4971_v24 = vmax.f32 %v504_v3, %v254_v32  ;;  %v505_v38 = vmax.f32 %v253_v8, %v254_v32  ;;  %v257_v3 = vld [vmem:[%s3599_s11 + $0x460] sm:$0xff] }
 0x11d   : > { %v1898_v26 = vmax.f32 %v4255_v12, %v1330_v20  ;;  %v2840_v31 = vmax.f32 %v1896_v6, %v2270_v1  ;;  %v2841_v23 = vmax.f32 %v1897_v63, %v2272_v34  ;;  %3331 = vst [vmem:[%s3652_s15 + $0x2a0] sm:$0xff] %v3085_v4  ;;  %v507_v19 = vmax.f32 %v255_v16, %v256_v22 }
 0x11e   : > { %v2274_v51 = vsel %vm2057_vm1, %v7754_v37, %v7412_v29  ;;  %v7411_v39 = vrot.slane %v4971_v24, 1  ;;  %v7409_v20 = vrot.slane %v4971_v24, 2  ;;  %v4976_v28 = vmax.f32 %v505_v38, %v255_v16 }
 0x11f   : > { %v2842_v56 = vmax.f32 %v1898_v26, %v2274_v51  ;;  %v3086_v46 = vmax.f32 %v2840_v31, 0.0  ;;  %v3087_v12 = vmax.f32 %v2841_v23, 0.0  ;;  %v4978_v37 = vmax.f32 %v506_v44, %v256_v22 }
 0x120   : > { %v7755_v8 = vrot.slane %v4257_v43, 1  ;;  %v7756_v4 = vrot.slane %v4257_v43, 2  ;;  %v4991_v6 = vmax.f32 %v507_v19, %v257_v3  ;;  %v7407_v38 = vrot.slane %v4976_v28, 1 }
 0x121   : > { %v3088_v1 = vmax.f32 %v2842_v56, 0.0  ;;  %3332 = vst [vmem:[%s3652_s15 + $0x2a8] sm:$0xff] %v3086_v46  ;;  %v7405_v16 = vrot.slane %v4976_v28, 2  ;;  %v7406_v63 = vrot.slane %v4978_v37, 1  ;;  %v7408_v34 = vrot.slane %v4978_v37, 2 }
 0x122   : > { %v1332_v26 = vsel %vm1113_vm0, %v7755_v8, %v7411_v39  ;;  %v2276_v32 = vsel %vm2057_vm1, %v7756_v4, %v7409_v20  ;;  %3333 = vst [vmem:[%s3652_s15 + $0x2b0] sm:$0xff] %v3087_v12  ;;  %v7410_v51 = vrot.slane %v4991_v6, 1  ;;  %v7420_v19 = vrot.slane %v4991_v6, 2 }
 0x123   : > { %v1899_v44 = vmax.f32 %v4257_v43, %v1332_v26  ;;  %v508_v31 = vmax.f32 %v256_v22, %v257_v3  ;;  %3334 = vst [vmem:[%s3652_s15 + $0x2b8] sm:$0xff] %v3088_v1  ;;  %v7757_v43 = vrot.slane %v4259_v9, 1  ;;  %v7758_v56 = vrot.slane %v4259_v9, 2  ;;  %v258_v1 = vld [vmem:[%s3599_s11 + $0x468] sm:$0xff]  ;;  %v259_v26 = vld [vmem:[%s3599_s11 + $0x470] sm:$0xff] }
 0x124   : > { %v7759_v8 = vrot.slane %v4263_v45, 1  ;;  %v510_v20 = vmax.f32 %v258_v1, %v259_v26 }
 0x125   : > { %v2843_v46 = vmax.f32 %v1899_v44, %v2276_v32  ;;  %v1334_v23 = vsel %vm1113_vm0, %v7757_v43, %v7407_v38  ;;  %v2278_v12 = vsel %vm2057_vm1, %v7758_v56, %v7405_v16  ;;  %v7760_v44 = vrot.slane %v4263_v45, 2 }
 0x126   : > { %v1336_v22 = vsel %vm1113_vm0, %v7759_v8, %v7406_v63  ;;  %v1900_v4 = vmax.f32 %v4259_v9, %v1334_v23  ;;  %v7761_v56 = vrot.slane %v4265_v5, 1  ;;  %v260_v8 = vld [vmem:[%s3599_s11 + $0x478] sm:$0xff]  ;;  %v7762_v9 = vrot.slane %v4265_v5, 2 }
 0x127   : > { %v1901_v32 = vmax.f32 %v4263_v45, %v1336_v22  ;;  %v2280_v43 = vsel %vm2057_vm1, %v7760_v44, %v7408_v34  ;;  %v3089_v63 = vmax.f32 %v2843_v46, 0.0  ;;  %v5039_v45 = vmax.f32 %v508_v31, %v258_v1  ;;  %v261_v31 = vld [vmem:[%s3599_s11 + $0x480] sm:$0xff] }
 0x128   : > { %v1338_v16 = vsel %vm1113_vm0, %v7761_v56, %v7410_v51  ;;  %v2282_v23 = vsel %vm2057_vm1, %v7762_v9, %v7420_v19  ;;  %v2844_v22 = vmax.f32 %v1900_v4, %v2278_v12  ;;  %v509_v34 = vmax.f32 %v257_v3, %v258_v1 }
 0x129   : > { %v1902_v38 = vmax.f32 %v4265_v5, %v1338_v16  ;;  %v2845_v44 = vmax.f32 %v1901_v32, %v2280_v43  ;;  %3335 = vst [vmem:[%s3652_s15 + $0x2c0] sm:$0xff] %v3089_v63  ;;  %v7419_v46 = vrot.slane %v5039_v45, 1  ;;  %v7417_v16 = vrot.slane %v5039_v45, 2 }
 0x12a   : > { %v511_v51 = vmax.f32 %v259_v26, %v260_v8  ;;  %v3090_v39 = vmax.f32 %v2844_v22, 0.0  ;;  %v5044_v29 = vmax.f32 %v509_v34, %v259_v26  ;;  %v5046_v9 = vmax.f32 %v510_v20, %v260_v8 }
 0x12b   : > { %v2846_v56 = vmax.f32 %v1902_v38, %v2282_v23  ;;  %v3091_v5 = vmax.f32 %v2845_v44, 0.0  ;;  %v7763_v3 = vrot.slane %v4339_v15, 1  ;;  %v7764_v63 = vrot.slane %v4339_v15, 2 }
 0x12c   : > { %v5059_v4 = vmax.f32 %v511_v51, %v261_v31  ;;  %3336 = vst [vmem:[%s3652_s15 + $0x2c8] sm:$0xff] %v3090_v39  ;;  %v7415_v34 = vrot.slane %v5044_v29, 1  ;;  %v7413_v26 = vrot.slane %v5044_v29, 2  ;;  %v7414_v32 = vrot.slane %v5046_v9, 1 }
 0x12d   : > { %v3092_v12 = vmax.f32 %v2846_v56, 0.0  ;;  %v1340_v38 = vsel %vm1113_vm0, %v7763_v3, %v7419_v46  ;;  %v2284_v1 = vsel %vm2057_vm1, %v7764_v63, %v7417_v16  ;;  %3337 = vst [vmem:[%s3652_s15 + $0x2d0] sm:$0xff] %v3091_v5  ;;  %v7416_v43 = vrot.slane %v5046_v9, 2 }
 0x12e   : > { %v1903_v20 = vmax.f32 %v4339_v15, %v1340_v38  ;;  %v7418_v23 = vrot.slane %v5059_v4, 1  ;;  %v7428_v51 = vrot.slane %v5059_v4, 2  ;;  %v512_v22 = vmax.f32 %v260_v8, %v261_v31  ;;  %v263_v38 = vld [vmem:[%s3599_s11 + $0x490] sm:$0xff] }
 0x12f   : > { %3338 = vst [vmem:[%s3652_s15 + $0x2d8] sm:$0xff] %v3092_v12  ;;  %v7765_v15 = vrot.slane %v4341_v33, 1  ;;  %v7766_v56 = vrot.slane %v4341_v33, 2  ;;  %v7767_v3 = vrot.slane %v4351_v7, 1  ;;  %v262_v12 = vld [vmem:[%s3599_s11 + $0x488] sm:$0xff] }
 0x130   : > { %v2847_v39 = vmax.f32 %v1903_v20, %v2284_v1  ;;  %v7768_v20 = vrot.slane %v4351_v7, 2  ;;  %v514_v16 = vmax.f32 %v262_v12, %v263_v38 }
 0x131   : > { %v1342_v44 = vsel %vm1113_vm0, %v7765_v15, %v7415_v34  ;;  %v2286_v5 = vsel %vm2057_vm1, %v7766_v56, %v7413_v26  ;;  %v1344_v8 = vsel %vm1113_vm0, %v7767_v3, %v7414_v32  ;;  %v7769_v56 = vrot.slane %v4353_v35, 1  ;;  %v264_v3 = vld [vmem:[%s3599_s11 + $0x498] sm:$0xff] }
 0x132   : > { %v1904_v63 = vmax.f32 %v4341_v33, %v1342_v44  ;;  %v1905_v1 = vmax.f32 %v4351_v7, %v1344_v8  ;;  %v2288_v15 = vsel %vm2057_vm1, %v7768_v20, %v7416_v43  ;;  %v3093_v32 = vmax.f32 %v2847_v39, 0.0 }
 0x133   : > { %v1346_v26 = vsel %vm1113_vm0, %v7769_v56, %v7418_v23  ;;  %v7770_v33 = vrot.slane %v4353_v35, 2  ;;  %v5107_v7 = vmax.f32 %v512_v22, %v262_v12  ;;  %v513_v43 = vmax.f32 %v261_v31, %v262_v12  ;;  %v265_v22 = vld [vmem:[%s3599_s11 + $0x4a0] sm:$0xff] }
 0x134   : > { %v1906_v34 = vmax.f32 %v4353_v35, %v1346_v26  ;;  %v2848_v8 = vmax.f32 %v1904_v63, %v2286_v5  ;;  %v2849_v20 = vmax.f32 %v1905_v1, %v2288_v15  ;;  %3339 = vst [vmem:[%s3652_s15 + $0x2e0] sm:$0xff] %v3093_v32  ;;  %v515_v23 = vmax.f32 %v263_v38, %v264_v3 }
 0x135   : > { %v2290_v44 = vsel %vm2057_vm1, %v7770_v33, %v7428_v51  ;;  %v7427_v39 = vrot.slane %v5107_v7, 1  ;;  %v7425_v26 = vrot.slane %v5107_v7, 2  ;;  %v5112_v19 = vmax.f32 %v513_v43, %v263_v38 }
 0x136   : > { %v2850_v56 = vmax.f32 %v1906_v34, %v2290_v44  ;;  %v3094_v46 = vmax.f32 %v2848_v8, 0.0  ;;  %v3095_v35 = vmax.f32 %v2849_v20, 0.0  ;;  %v5114_v33 = vmax.f32 %v514_v16, %v264_v3 }
 0x137   : > { %v7771_v31 = vrot.slane %v4384_v54, 1  ;;  %v7772_v32 = vrot.slane %v4384_v54, 2  ;;  %v5127_v63 = vmax.f32 %v515_v23, %v265_v22  ;;  %v7423_v43 = vrot.slane %v5112_v19, 1 }
 0x138   : > { %v3096_v5 = vmax.f32 %v2850_v56, 0.0  ;;  %3340 = vst [vmem:[%s3652_s15 + $0x2e8] sm:$0xff] %v3094_v46  ;;  %v7421_v38 = vrot.slane %v5112_v19, 2  ;;  %v7422_v1 = vrot.slane %v5114_v33, 1  ;;  %v7424_v15 = vrot.slane %v5114_v33, 2 }
 0x139   : > { %v1348_v34 = vsel %vm1113_vm0, %v7771_v31, %v7427_v39  ;;  %v2292_v12 = vsel %vm2057_vm1, %v7772_v32, %v7425_v26  ;;  %3341 = vst [vmem:[%s3652_s15 + $0x2f0] sm:$0xff] %v3095_v35  ;;  %v7426_v44 = vrot.slane %v5127_v63, 1  ;;  %v7436_v23 = vrot.slane %v5127_v63, 2 }
 0x13a   : > { %v1907_v16 = vmax.f32 %v4384_v54, %v1348_v34  ;;  %v516_v8 = vmax.f32 %v264_v3, %v265_v22  ;;  %3342 = vst [vmem:[%s3652_s15 + $0x2f8] sm:$0xff] %v3096_v5  ;;  %v7773_v54 = vrot.slane %v4417_v21, 1  ;;  %v7774_v56 = vrot.slane %v4417_v21, 2  ;;  %v266_v5 = vld [vmem:[%s3599_s11 + $0x4a8] sm:$0xff]  ;;  %v267_v34 = vld [vmem:[%s3599_s11 + $0x4b0] sm:$0xff] }
 0x13b   : > { %v7775_v31 = vrot.slane %v4430_v47, 1  ;;  %v518_v26 = vmax.f32 %v266_v5, %v267_v34 }
 0x13c   : > { %v2851_v46 = vmax.f32 %v1907_v16, %v2292_v12  ;;  %v1350_v20 = vsel %vm1113_vm0, %v7773_v54, %v7423_v43  ;;  %v2294_v35 = vsel %vm2057_vm1, %v7774_v56, %v7421_v38  ;;  %v7776_v16 = vrot.slane %v4430_v47, 2 }
 0x13d   : > { %v1352_v3 = vsel %vm1113_vm0, %v7775_v31, %v7422_v1  ;;  %v1908_v32 = vmax.f32 %v4417_v21, %v1350_v20  ;;  %v7777_v56 = vrot.slane %v4432_v55, 1  ;;  %v268_v31 = vld [vmem:[%s3599_s11 + $0x4b8] sm:$0xff]  ;;  %v7778_v21 = vrot.slane %v4432_v55, 2 }
 0x13e   : > { %v1909_v12 = vmax.f32 %v4430_v47, %v1352_v3  ;;  %v2296_v54 = vsel %vm2057_vm1, %v7776_v16, %v7424_v15  ;;  %v3097_v1 = vmax.f32 %v2851_v46, 0.0  ;;  %v5175_v47 = vmax.f32 %v516_v8, %v266_v5  ;;  %v269_v8 = vld [vmem:[%s3599_s11 + $0x4c0] sm:$0xff] }
 0x13f   : > { %v1354_v38 = vsel %vm1113_vm0, %v7777_v56, %v7426_v44  ;;  %v2298_v20 = vsel %vm2057_vm1, %v7778_v21, %v7436_v23  ;;  %v2852_v3 = vmax.f32 %v1908_v32, %v2294_v35  ;;  %v517_v15 = vmax.f32 %v265_v22, %v266_v5 }
 0x140   : > { %v1910_v43 = vmax.f32 %v4432_v55, %v1354_v38  ;;  %v2853_v16 = vmax.f32 %v1909_v12, %v2296_v54  ;;  %3343 = vst [vmem:[%s3652_s15 + $0x300] sm:$0xff] %v3097_v1  ;;  %v7435_v46 = vrot.slane %v5175_v47, 1  ;;  %v7433_v38 = vrot.slane %v5175_v47, 2 }
 0x141   : > { %v519_v44 = vmax.f32 %v267_v34, %v268_v31  ;;  %v3098_v39 = vmax.f32 %v2852_v3, 0.0  ;;  %v5180_v51 = vmax.f32 %v517_v15, %v267_v34  ;;  %v5182_v21 = vmax.f32 %v518_v26, %v268_v31 }
 0x142   : > { %v2854_v56 = vmax.f32 %v1910_v43, %v2298_v20  ;;  %v3099_v55 = vmax.f32 %v2853_v16, 0.0  ;;  %v7779_v22 = vrot.slane %v4462_v60, 1  ;;  %v7780_v1 = vrot.slane %v4462_v60, 2 }
 0x143   : > { %v5195_v32 = vmax.f32 %v519_v44, %v269_v8  ;;  %3344 = vst [vmem:[%s3652_s15 + $0x308] sm:$0xff] %v3098_v39  ;;  %v7431_v15 = vrot.slane %v5180_v51, 1  ;;  %v7429_v34 = vrot.slane %v5180_v51, 2  ;;  %v7430_v12 = vrot.slane %v5182_v21, 1 }
 0x144   : > { %v3100_v35 = vmax.f32 %v2854_v56, 0.0  ;;  %v1356_v43 = vsel %vm1113_vm0, %v7779_v22, %v7435_v46  ;;  %v2300_v5 = vsel %vm2057_vm1, %v7780_v1, %v7433_v38  ;;  %3345 = vst [vmem:[%s3652_s15 + $0x310] sm:$0xff] %v3099_v55  ;;  %v7432_v54 = vrot.slane %v5182_v21, 2 }
 0x145   : > { %v1911_v26 = vmax.f32 %v4462_v60, %v1356_v43  ;;  %v7434_v20 = vrot.slane %v5195_v32, 1  ;;  %v7444_v44 = vrot.slane %v5195_v32, 2  ;;  %v520_v3 = vmax.f32 %v268_v31, %v269_v8  ;;  %v271_v43 = vld [vmem:[%s3599_s11 + $0x4d0] sm:$0xff] }
 0x146   : > { %3346 = vst [vmem:[%s3652_s15 + $0x318] sm:$0xff] %v3100_v35  ;;  %v7781_v60 = vrot.slane %v4481_v49, 1  ;;  %v7782_v56 = vrot.slane %v4481_v49, 2  ;;  %v7783_v22 = vrot.slane %v4498_v52, 1  ;;  %v270_v35 = vld [vmem:[%s3599_s11 + $0x4c8] sm:$0xff] }
 0x147   : > { %v2855_v39 = vmax.f32 %v1911_v26, %v2300_v5  ;;  %v7784_v26 = vrot.slane %v4498_v52, 2  ;;  %v522_v38 = vmax.f32 %v270_v35, %v271_v43 }
 0x148   : > { %v1358_v16 = vsel %vm1113_vm0, %v7781_v60, %v7431_v15  ;;  %v2302_v55 = vsel %vm2057_vm1, %v7782_v56, %v7429_v34  ;;  %v1360_v31 = vsel %vm1113_vm0, %v7783_v22, %v7430_v12  ;;  %v7785_v56 = vrot.slane %v4505_v14, 1  ;;  %v272_v22 = vld [vmem:[%s3599_s11 + $0x4d8] sm:$0xff] }
 0x149   : > { %v1912_v1 = vmax.f32 %v4481_v49, %v1358_v16  ;;  %v1913_v5 = vmax.f32 %v4498_v52, %v1360_v31  ;;  %v2304_v60 = vsel %vm2057_vm1, %v7784_v26, %v7432_v54  ;;  %v3101_v12 = vmax.f32 %v2855_v39, 0.0 }
 0x14a   : > { %v1362_v34 = vsel %vm1113_vm0, %v7785_v56, %v7434_v20  ;;  %v7786_v49 = vrot.slane %v4505_v14, 2  ;;  %v5243_v52 = vmax.f32 %v520_v3, %v270_v35  ;;  %v521_v54 = vmax.f32 %v269_v8, %v270_v35  ;;  %v273_v3 = vld [vmem:[%s3599_s11 + $0x4e0] sm:$0xff] }
 0x14b   : > { %v1914_v15 = vmax.f32 %v4505_v14, %v1362_v34  ;;  %v2856_v31 = vmax.f32 %v1912_v1, %v2302_v55  ;;  %v2857_v26 = vmax.f32 %v1913_v5, %v2304_v60  ;;  %3347 = vst [vmem:[%s3652_s15 + $0x320] sm:$0xff] %v3101_v12  ;;  %v523_v20 = vmax.f32 %v271_v43, %v272_v22 }
 0x14c   : > { %v2306_v16 = vsel %vm2057_vm1, %v7786_v49, %v7444_v44  ;;  %v7443_v39 = vrot.slane %v5243_v52, 1  ;;  %v7441_v34 = vrot.slane %v5243_v52, 2  ;;  %v5248_v23 = vmax.f32 %v521_v54, %v271_v43 }
 0x14d   : > { %v2858_v56 = vmax.f32 %v1914_v15, %v2306_v16  ;;  %v3102_v46 = vmax.f32 %v2856_v31, 0.0  ;;  %v3103_v14 = vmax.f32 %v2857_v26, 0.0  ;;  %v5250_v49 = vmax.f32 %v522_v38, %v272_v22 }
 0x14e   : > { %v7787_v8 = vrot.slane %v4520_v25, 1  ;;  %v7788_v12 = vrot.slane %v4520_v25, 2  ;;  %v5263_v1 = vmax.f32 %v523_v20, %v273_v3  ;;  %v7439_v54 = vrot.slane %v5248_v23, 1 }
 0x14f   : > { %v3104_v55 = vmax.f32 %v2858_v56, 0.0  ;;  %3348 = vst [vmem:[%s3652_s15 + $0x328] sm:$0xff] %v3102_v46  ;;  %v7437_v43 = vrot.slane %v5248_v23, 2  ;;  %v7438_v5 = vrot.slane %v5250_v49, 1  ;;  %v7440_v60 = vrot.slane %v5250_v49, 2 }
 0x150   : > { %v1364_v15 = vsel %vm1113_vm0, %v7787_v8, %v7443_v39  ;;  %v2308_v35 = vsel %vm2057_vm1, %v7788_v12, %v7441_v34  ;;  %3349 = vst [vmem:[%s3652_s15 + $0x330] sm:$0xff] %v3103_v14  ;;  %v7442_v16 = vrot.slane %v5263_v1, 1  ;;  %v7452_v20 = vrot.slane %v5263_v1, 2 }
 0x151   : > { %v1915_v38 = vmax.f32 %v4520_v25, %v1364_v15  ;;  %v524_v31 = vmax.f32 %v272_v22, %v273_v3  ;;  %3350 = vst [vmem:[%s3652_s15 + $0x338] sm:$0xff] %v3104_v55  ;;  %v7789_v25 = vrot.slane %v4550_v48, 1  ;;  %v7790_v56 = vrot.slane %v4550_v48, 2  ;;  %v274_v55 = vld [vmem:[%s3599_s11 + $0x4e8] sm:$0xff]  ;;  %v275_v15 = vld [vmem:[%s3599_s11 + $0x4f0] sm:$0xff] }
 0x152   : > { %v7791_v8 = vrot.slane %v4567_v18, 1  ;;  %v526_v34 = vmax.f32 %v274_v55, %v275_v15 }
 0x153   : > { %v2859_v46 = vmax.f32 %v1915_v38, %v2308_v35  ;;  %v1366_v26 = vsel %vm1113_vm0, %v7789_v25, %v7439_v54  ;;  %v2310_v14 = vsel %vm2057_vm1, %v7790_v56, %v7437_v43  ;;  %v7792_v38 = vrot.slane %v4567_v18, 2 }
 0x154   : > { %v1368_v22 = vsel %vm1113_vm0, %v7791_v8, %v7438_v5  ;;  %v1916_v12 = vmax.f32 %v4550_v48, %v1366_v26  ;;  %v7793_v56 = vrot.slane %v4569_v11, 1  ;;  %v276_v8 = vld [vmem:[%s3599_s11 + $0x4f8] sm:$0xff]  ;;  %v7794_v48 = vrot.slane %v4569_v11, 2 }
 0x155   : > { %v1917_v35 = vmax.f32 %v4567_v18, %v1368_v22  ;;  %v2312_v25 = vsel %vm2057_vm1, %v7792_v38, %v7440_v60  ;;  %v3105_v5 = vmax.f32 %v2859_v46, 0.0  ;;  %v5311_v18 = vmax.f32 %v524_v31, %v274_v55  ;;  %v277_v31 = vld [vmem:[%s3599_s11 + $0x500] sm:$0xff] }
 0x156   : > { %v1370_v43 = vsel %vm1113_vm0, %v7793_v56, %v7442_v16  ;;  %v2314_v26 = vsel %vm2057_vm1, %v7794_v48, %v7452_v20  ;;  %v2860_v22 = vmax.f32 %v1916_v12, %v2310_v14  ;;  %v525_v60 = vmax.f32 %v273_v3, %v274_v55 }
 0x157   : > { %v1918_v54 = vmax.f32 %v4569_v11, %v1370_v43  ;;  %v2861_v38 = vmax.f32 %v1917_v35, %v2312_v25  ;;  %3351 = vst [vmem:[%s3652_s15 + $0x340] sm:$0xff] %v3105_v5  ;;  %v7451_v46 = vrot.slane %v5311_v18, 1  ;;  %v7449_v43 = vrot.slane %v5311_v18, 2 }
 0x158   : > { %v527_v16 = vmax.f32 %v275_v15, %v276_v8  ;;  %v3106_v39 = vmax.f32 %v2860_v22, 0.0  ;;  %v5316_v44 = vmax.f32 %v525_v60, %v275_v15  ;;  %v5318_v48 = vmax.f32 %v526_v34, %v276_v8 }
 0x159   : > { %v2862_v56 = vmax.f32 %v1918_v54, %v2314_v26  ;;  %v3107_v11 = vmax.f32 %v2861_v38, 0.0  ;;  %v7795_v3 = vrot.slane %v4571_v17, 1  ;;  %v7796_v5 = vrot.slane %v4571_v17, 2 }
 0x15a   : > { %v5331_v12 = vmax.f32 %v527_v16, %v277_v31  ;;  %3352 = vst [vmem:[%s3652_s15 + $0x348] sm:$0xff] %v3106_v39  ;;  %v7447_v60 = vrot.slane %v5316_v44, 1  ;;  %v7445_v15 = vrot.slane %v5316_v44, 2  ;;  %v7446_v35 = vrot.slane %v5318_v48, 1 }
 0x15b   : > { %v3108_v14 = vmax.f32 %v2862_v56, 0.0  ;;  %v1372_v54 = vsel %vm1113_vm0, %v7795_v3, %v7451_v46  ;;  %v2316_v55 = vsel %vm2057_vm1, %v7796_v5, %v7449_v43  ;;  %3353 = vst [vmem:[%s3652_s15 + $0x350] sm:$0xff] %v3107_v11  ;;  %v7448_v25 = vrot.slane %v5318_v48, 2 }
 0x15c   : > { %v1919_v34 = vmax.f32 %v4571_v17, %v1372_v54  ;;  %v7450_v26 = vrot.slane %v5331_v12, 1  ;;  %v7460_v16 = vrot.slane %v5331_v12, 2  ;;  %v528_v22 = vmax.f32 %v276_v8, %v277_v31  ;;  %v279_v54 = vld [vmem:[%s3599_s11 + $0x510] sm:$0xff] }
 0x15d   : > { %3354 = vst [vmem:[%s3652_s15 + $0x358] sm:$0xff] %v3108_v14  ;;  %v7797_v17 = vrot.slane %v4629_v0, 1  ;;  %v7798_v56 = vrot.slane %v4629_v0, 2  ;;  %v7799_v3 = vrot.slane %v4634_v27, 1  ;;  %v278_v14 = vld [vmem:[%s3599_s11 + $0x508] sm:$0xff] }
 0x15e   : > { %v2863_v39 = vmax.f32 %v1919_v34, %v2316_v55  ;;  %v7800_v34 = vrot.slane %v4634_v27, 2  ;;  %v530_v43 = vmax.f32 %v278_v14, %v279_v54 }
 0x15f   : > { %v1374_v38 = vsel %vm1113_vm0, %v7797_v17, %v7447_v60  ;;  %v2318_v11 = vsel %vm2057_vm1, %v7798_v56, %v7445_v15  ;;  %v1376_v8 = vsel %vm1113_vm0, %v7799_v3, %v7446_v35  ;;  %v7801_v56 = vrot.slane %v4636_v2, 1  ;;  %v280_v3 = vld [vmem:[%s3599_s11 + $0x518] sm:$0xff] }
 0x160   : > { %v1920_v5 = vmax.f32 %v4629_v0, %v1374_v38  ;;  %v1921_v55 = vmax.f32 %v4634_v27, %v1376_v8  ;;  %v2320_v17 = vsel %vm2057_vm1, %v7800_v34, %v7448_v25  ;;  %v3109_v35 = vmax.f32 %v2863_v39, 0.0 }
 0x161   : > { %v1378_v15 = vsel %vm1113_vm0, %v7801_v56, %v7450_v26  ;;  %v7802_v0 = vrot.slane %v4636_v2, 2  ;;  %v5379_v27 = vmax.f32 %v528_v22, %v278_v14  ;;  %v529_v25 = vmax.f32 %v277_v31, %v278_v14  ;;  %v281_v22 = vld [vmem:[%s3599_s11 + $0x520] sm:$0xff] }
 0x162   : > { %v1922_v60 = vmax.f32 %v4636_v2, %v1378_v15  ;;  %v2864_v8 = vmax.f32 %v1920_v5, %v2318_v11  ;;  %v2865_v34 = vmax.f32 %v1921_v55, %v2320_v17  ;;  %3355 = vst [vmem:[%s3652_s15 + $0x360] sm:$0xff] %v3109_v35  ;;  %v531_v26 = vmax.f32 %v279_v54, %v280_v3 }
 0x163   : > { %v2322_v38 = vsel %vm2057_vm1, %v7802_v0, %v7460_v16  ;;  %v7459_v39 = vrot.slane %v5379_v27, 1  ;;  %v7457_v15 = vrot.slane %v5379_v27, 2  ;;  %v5384_v20 = vmax.f32 %v529_v25, %v279_v54 }
 0x164   : > { %v2866_v56 = vmax.f32 %v1922_v60, %v2322_v38  ;;  %v3110_v46 = vmax.f32 %v2864_v8, 0.0  ;;  %v3111_v2 = vmax.f32 %v2865_v34, 0.0  ;;  %v5386_v0 = vmax.f32 %v530_v43, %v280_v3 }
 0x165   : > { %v7803_v31 = vrot.slane %v4649_v57, 1  ;;  %v7804_v35 = vrot.slane %v4649_v57, 2  ;;  %v5399_v5 = vmax.f32 %v531_v26, %v281_v22  ;;  %v7455_v25 = vrot.slane %v5384_v20, 1 }
 0x166   : > { %v3112_v11 = vmax.f32 %v2866_v56, 0.0  ;;  %3356 = vst [vmem:[%s3652_s15 + $0x368] sm:$0xff] %v3110_v46  ;;  %v7453_v54 = vrot.slane %v5384_v20, 2  ;;  %v7454_v55 = vrot.slane %v5386_v0, 1  ;;  %v7456_v17 = vrot.slane %v5386_v0, 2 }
 0x167   : > { %v1380_v60 = vsel %vm1113_vm0, %v7803_v31, %v7459_v39  ;;  %v2324_v14 = vsel %vm2057_vm1, %v7804_v35, %v7457_v15  ;;  %3357 = vst [vmem:[%s3652_s15 + $0x370] sm:$0xff] %v3111_v2  ;;  %v7458_v38 = vrot.slane %v5399_v5, 1  ;;  %v7466_v26 = vrot.slane %v5399_v5, 2 }
 0x168   : > { %v1923_v43 = vmax.f32 %v4649_v57, %v1380_v60  ;;  %v532_v8 = vmax.f32 %v280_v3, %v281_v22  ;;  %3358 = vst [vmem:[%s3652_s15 + $0x378] sm:$0xff] %v3112_v11  ;;  %v7805_v57 = vrot.slane %v4697_v13, 1  ;;  %v7806_v56 = vrot.slane %v4697_v13, 2  ;;  %v282_v11 = vld [vmem:[%s3599_s11 + $0x528] sm:$0xff]  ;;  %v283_v60 = vld [vmem:[%s3599_s11 + $0x530] sm:$0xff] }
 0x169   : > { %v7807_v31 = vrot.slane %v4702_v59, 1  ;;  %v534_v15 = vmax.f32 %v282_v11, %v283_v60 }
 0x16a   : > { %v2867_v46 = vmax.f32 %v1923_v43, %v2324_v14  ;;  %v1382_v34 = vsel %vm1113_vm0, %v7805_v57, %v7455_v25  ;;  %v2326_v2 = vsel %vm2057_vm1, %v7806_v56, %v7453_v54  ;;  %v7808_v43 = vrot.slane %v4702_v59, 2 }
 0x16b   : > { %v1384_v3 = vsel %vm1113_vm0, %v7807_v31, %v7454_v55  ;;  %v1924_v35 = vmax.f32 %v4697_v13, %v1382_v34  ;;  %v7809_v56 = vrot.slane %v4704_v36, 1  ;;  %v284_v31 = vld [vmem:[%s3599_s11 + $0x538] sm:$0xff]  ;;  %v7810_v13 = vrot.slane %v4704_v36, 2 }
 0x16c   : > { %v1925_v14 = vmax.f32 %v4702_v59, %v1384_v3  ;;  %v2328_v57 = vsel %vm2057_vm1, %v7808_v43, %v7456_v17  ;;  %v3113_v55 = vmax.f32 %v2867_v46, 0.0  ;;  %v5447_v59 = vmax.f32 %v532_v8, %v282_v11  ;;  %v285_v8 = vld [vmem:[%s3599_s11 + $0x540] sm:$0xff] }
 0x16d   : > { %v1386_v54 = vsel %vm1113_vm0, %v7809_v56, %v7458_v38  ;;  %v2330_v34 = vsel %vm2057_vm1, %v7810_v13, %v7466_v26  ;;  %v2868_v3 = vmax.f32 %v1924_v35, %v2326_v2  ;;  %v533_v17 = vmax.f32 %v281_v22, %v282_v11 }
 0x16e   : > { %v1926_v25 = vmax.f32 %v4704_v36, %v1386_v54  ;;  %v2869_v43 = vmax.f32 %v1925_v14, %v2328_v57  ;;  %3359 = vst [vmem:[%s3652_s15 + $0x380] sm:$0xff] %v3113_v55  ;;  %v7464_v46 = vrot.slane %v5447_v59, 1  ;;  %v7461_v54 = vrot.slane %v5447_v59, 2 }
 0x16f   : > { %v535_v38 = vmax.f32 %v283_v60, %v284_v31  ;;  %v3114_v39 = vmax.f32 %v2868_v3, 0.0  ;;  %v5452_v16 = vmax.f32 %v533_v17, %v283_v60  ;;  %v5454_v13 = vmax.f32 %v534_v15, %v284_v31 }
 0x170   : > { %v2870_v56 = vmax.f32 %v1926_v25, %v2330_v34  ;;  %v3115_v36 = vmax.f32 %v2869_v43, 0.0  ;;  %v7813_v22 = vrot.slane %v4717_v62, 1  ;;  %v7814_v55 = vrot.slane %v4717_v62, 2 }
 0x171   : > { %7811 = vst [vmem:[#allocation4_spill] sm:$0xff] %v5452_v16  ;;  %v5467_v35 = vmax.f32 %v535_v38, %v285_v8  ;;  %v7462_v17 = vrot.slane %v5452_v16, 1  ;;  %v7463_v60 = vrot.slane %v5452_v16, 2  ;;  %v7465_v14 = vrot.slane %v5454_v13, 1 }
 0x172   : > { %7812 = vst [vmem:[#allocation5_spill] sm:$0xff] %v5454_v13  ;;  %v3116_v2 = vmax.f32 %v2870_v56, 0.0  ;;  %v1388_v25 = vsel %vm1113_vm0, %v7813_v22, %v7464_v46  ;;  %v2332_v11 = vsel %vm2057_vm1, %v7814_v55, %v7461_v54  ;;  %v7468_v57 = vrot.slane %v5454_v13, 2 }
 0x173   : > { %7815 = vst [vmem:[#allocation8_spill] sm:$0xff] %v5467_v35  ;;  %v1927_v15 = vmax.f32 %v4717_v62, %v1388_v25  ;;  %v7471_v34 = vrot.slane %v5467_v35, 1  ;;  %v7483_v38 = vrot.slane %v5467_v35, 2  ;;  %v536_v3 = vmax.f32 %v284_v31, %v285_v8  ;;  %v7816_v62 = vld [vmem:[#allocation2_spill] sm:$0xff] }
 0x174   : > { %3360 = vst [vmem:[%s3652_s15 + $0x388] sm:$0xff] %v3114_v39  ;;  %v7817_v43 = vrot.slane %v7816_v62, 1  ;;  %v7819_v25 = vld [vmem:[#allocation6_spill] sm:$0xff] }
 0x175   : > { %3361 = vst [vmem:[%s3652_s15 + $0x390] sm:$0xff] %v3115_v36  ;;  %v2871_v39 = vmax.f32 %v1927_v15, %v2332_v11  ;;  %v7818_v36 = vrot.slane %v7816_v62, 2  ;;  %v7820_v55 = vrot.slane %v7819_v25, 1  ;;  %v287_v11 = vld [vmem:[%s3599_s11 + $0x550] sm:$0xff] }
 0x176   : > { %3362 = vst [vmem:[%s3652_s15 + $0x398] sm:$0xff] %v3116_v2  ;;  %v1390_v56 = vsel %vm1113_vm0, %v7817_v43, %v7462_v17  ;;  %v286_v2 = vld [vmem:[%s3599_s11 + $0x548] sm:$0xff]  ;;  %v7821_v43 = vrot.slane %v7819_v25, 2 }
 0x177   : > { %v2334_v22 = vsel %vm2057_vm1, %v7818_v36, %v7463_v60  ;;  %v1392_v31 = vsel %vm1113_vm0, %v7820_v55, %v7465_v14  ;;  %v1928_v15 = vmax.f32 %v7816_v62, %v1390_v56  ;;  %v7822_v36 = vld [vmem:[#allocation7_spill] sm:$0xff]  ;;  %v289_v55 = vld [vmem:[%s3599_s11 + $0x560] sm:$0xff]  ;;  %v3117_v26 = vmax.f32 %v2871_v39, 0.0 }
 0x178   : > { %v1929_v54 = vmax.f32 %v7819_v25, %v1392_v31  ;;  %v2336_v17 = vsel %vm2057_vm1, %v7821_v43, %v7468_v57  ;;  %v7823_v60 = vrot.slane %v7822_v36, 1  ;;  %v290_v14 = vld [vmem:[%s3599_s11 + $0x568] sm:$0xff]  ;;  %v7824_v62 = vrot.slane %v7822_v36, 2  ;;  %v288_v31 = vld [vmem:[%s3599_s11 + $0x558] sm:$0xff] }
 0x179   : > { %v5516_v25 = vmax.f32 %v536_v3, %v286_v2  ;;  %v2872_v43 = vmax.f32 %v1928_v15, %v2334_v22  ;;  %v537_v13 = vmax.f32 %v285_v8, %v286_v2  ;;  %3363 = vst [vmem:[%s3652_s15 + $0x3a0] sm:$0xff] %v3117_v26  ;;  %v539_v35 = vmax.f32 %v289_v55, %v290_v14  ;;  %v291_v22 = vld [vmem:[%s3599_s11 + $0x570] sm:$0xff]  ;;  %v7825_v8 = vld [vmem:[#allocation3_spill] sm:$0xff] }
 0x17a   : > { %v1394_v46 = vsel %vm1113_vm0, %v7823_v60, %v7471_v34  ;;  %v2338_v56 = vsel %vm2057_vm1, %v7824_v62, %v7483_v38  ;;  %v2873_v57 = vmax.f32 %v1929_v54, %v2336_v17  ;;  %v538_v60 = vmax.f32 %v286_v2, %v287_v11 }
 0x17b   : > { %v1930_v30 = vmax.f32 %v7822_v36, %v1394_v46  ;;  %v7482_v39 = vrot.slane %v5516_v25, 1  ;;  %v7480_v46 = vrot.slane %v5516_v25, 2  ;;  %v3118_v36 = vmax.f32 %v2872_v43, 0.0 }
 0x17c   : > { %v3119_v16 = vmax.f32 %v2873_v57, 0.0  ;;  %v5522_v62 = vmax.f32 %v537_v13, %v287_v11  ;;  %v5524_v3 = vmax.f32 %v538_v60, %v288_v31  ;;  %v7826_v26 = vrot.slane %v7825_v8, 1 }
 0x17d   : > { %v2874_v34 = vmax.f32 %v1930_v30, %v2338_v56  ;;  %v7827_v17 = vrot.slane %v7825_v8, 2  ;;  %v5537_v57 = vmax.f32 %v539_v35, %v291_v22  ;;  %3364 = vst [vmem:[%s3652_s15 + $0x3a8] sm:$0xff] %v3118_v36  ;;  %v540_v31 = vmax.f32 %v290_v14, %v291_v22 }
 0x17e   : > { %v1396_v30 = vsel %vm1113_vm0, %v7826_v26, %v7482_v39  ;;  %v7476_v11 = vrot.slane %v5522_v62, 2  ;;  %v7477_v15 = vrot.slane %v5524_v3, 1  ;;  %3365 = vst [vmem:[%s3652_s15 + $0x3b0] sm:$0xff] %v3119_v16  ;;  %v7479_v55 = vrot.slane %v5524_v3, 2 }
 0x17f   : > { %v3120_v54 = vmax.f32 %v2874_v34, 0.0  ;;  %v2340_v2 = vsel %vm2057_vm1, %v7827_v17, %v7480_v46  ;;  %v1931_v13 = vmax.f32 %v7825_v8, %v1396_v30  ;;  %v7478_v34 = vrot.slane %v5522_v62, 1  ;;  %v293_v30 = vld [vmem:[%s3599_s11 + $0x580] sm:$0xff] }
 0x180   : > { %v7481_v56 = vrot.slane %v5537_v57, 1  ;;  %v7491_v35 = vrot.slane %v5537_v57, 2  ;;  %v7828_v60 = vrot.slane %v4834_v41, 1  ;;  %v7829_v16 = vrot.slane %v4834_v41, 2 }
 0x181   : > { %3366 = vst [vmem:[%s3652_s15 + $0x3b8] sm:$0xff] %v3120_v54  ;;  %v2875_v43 = vmax.f32 %v1931_v13, %v2340_v2  ;;  %v7830_v26 = vrot.slane %v4840_v50, 1  ;;  %v292_v54 = vld [vmem:[%s3599_s11 + $0x578] sm:$0xff]  ;;  %v7831_v13 = vrot.slane %v4840_v50, 2 }
 0x182   : > { %v1398_v36 = vsel %vm1113_vm0, %v7828_v60, %v7478_v34  ;;  %v2342_v8 = vsel %vm2057_vm1, %v7829_v16, %v7476_v11  ;;  %v7832_v16 = vrot.slane %v4842_v40, 1  ;;  %v542_v46 = vmax.f32 %v292_v54, %v293_v30 }
 0x183   : > { %v1400_v14 = vsel %vm1113_vm0, %v7830_v26, %v7477_v15  ;;  %v1932_v17 = vmax.f32 %v4834_v41, %v1398_v36  ;;  %v2344_v60 = vsel %vm2057_vm1, %v7831_v13, %v7479_v55  ;;  %v294_v26 = vld [vmem:[%s3599_s11 + $0x588] sm:$0xff]  ;;  %v3121_v15 = vmax.f32 %v2875_v43, 0.0 }
 0x184   : > { %v1933_v2 = vmax.f32 %v4840_v50, %v1400_v14  ;;  %v1402_v11 = vsel %vm1113_vm0, %v7832_v16, %v7481_v56  ;;  %v7833_v41 = vrot.slane %v4842_v40, 2  ;;  %v5585_v50 = vmax.f32 %v540_v31, %v292_v54  ;;  %v295_v31 = vld [vmem:[%s3599_s11 + $0x590] sm:$0xff] }
 0x185   : > { %v1934_v34 = vmax.f32 %v4842_v40, %v1402_v11  ;;  %v2876_v14 = vmax.f32 %v1932_v17, %v2342_v8  ;;  %v541_v55 = vmax.f32 %v291_v22, %v292_v54  ;;  %3367 = vst [vmem:[%s3652_s15 + $0x3c0] sm:$0xff] %v3121_v15  ;;  %v543_v56 = vmax.f32 %v293_v30, %v294_v26 }
 0x186   : > { %v2346_v36 = vsel %vm2057_vm1, %v7833_v41, %v7491_v35  ;;  %v2877_v13 = vmax.f32 %v1933_v2, %v2344_v60  ;;  %v7490_v43 = vrot.slane %v5585_v50, 1  ;;  %v7488_v11 = vrot.slane %v5585_v50, 2 }
 0x187   : > { %v2878_v16 = vmax.f32 %v1934_v34, %v2346_v36  ;;  %v3122_v39 = vmax.f32 %v2876_v14, 0.0  ;;  %v5590_v38 = vmax.f32 %v541_v55, %v293_v30  ;;  %v5592_v41 = vmax.f32 %v542_v46, %v294_v26 }
 0x188   : > { %v3123_v40 = vmax.f32 %v2877_v13, 0.0  ;;  %v7834_v22 = vrot.slane %v4855_v10, 1  ;;  %v7835_v15 = vrot.slane %v4855_v10, 2  ;;  %v5605_v17 = vmax.f32 %v543_v56, %v295_v31 }
 0x189   : > { %v3124_v8 = vmax.f32 %v2878_v16, 0.0  ;;  %3368 = vst [vmem:[%s3652_s15 + $0x3c8] sm:$0xff] %v3122_v39  ;;  %v7486_v55 = vrot.slane %v5590_v38, 1  ;;  %v7484_v30 = vrot.slane %v5590_v38, 2  ;;  %v7485_v2 = vrot.slane %v5592_v41, 1 }
 0x18a   : > { %v1404_v34 = vsel %vm1113_vm0, %v7834_v22, %v7490_v43  ;;  %v2348_v54 = vsel %vm2057_vm1, %v7835_v15, %v7488_v11  ;;  %3369 = vst [vmem:[%s3652_s15 + $0x3d0] sm:$0xff] %v3123_v40  ;;  %v7487_v60 = vrot.slane %v5592_v41, 2  ;;  %v7489_v36 = vrot.slane %v5605_v17, 1 }
 0x18b   : > { %v1935_v46 = vmax.f32 %v4855_v10, %v1404_v34  ;;  %v7499_v56 = vrot.slane %v5605_v17, 2  ;;  %v544_v14 = vmax.f32 %v294_v26, %v295_v31  ;;  %3370 = vst [vmem:[%s3652_s15 + $0x3d8] sm:$0xff] %v3124_v8  ;;  %v7836_v10 = vrot.slane %v4903_v61, 1  ;;  %v296_v8 = vld [vmem:[%s3599_s11 + $0x598] sm:$0xff]  ;;  %v297_v34 = vld [vmem:[%s3599_s11 + $0x5a0] sm:$0xff] }
 0x18c   : > { %v7837_v16 = vrot.slane %v4903_v61, 2  ;;  %v7838_v22 = vrot.slane %v4908_v53, 1  ;;  %v546_v11 = vmax.f32 %v296_v8, %v297_v34 }
 0x18d   : > { %v2879_v39 = vmax.f32 %v1935_v46, %v2348_v54  ;;  %v1406_v13 = vsel %vm1113_vm0, %v7836_v10, %v7486_v55  ;;  %v7839_v46 = vrot.slane %v4908_v53, 2 }
 0x18e   : > { %v2350_v40 = vsel %vm2057_vm1, %v7837_v16, %v7484_v30  ;;  %v1408_v26 = vsel %vm1113_vm0, %v7838_v22, %v7485_v2  ;;  %v1936_v15 = vmax.f32 %v4903_v61, %v1406_v13  ;;  %v7840_v16 = vrot.slane %v4910_v58, 1  ;;  %v298_v22 = vld [vmem:[%s3599_s11 + $0x5a8] sm:$0xff] }
 0x18f   : > { %v1937_v54 = vmax.f32 %v4908_v53, %v1408_v26  ;;  %v2352_v10 = vsel %vm2057_vm1, %v7839_v46, %v7487_v60  ;;  %v3125_v2 = vmax.f32 %v2879_v39, 0.0  ;;  %v7841_v61 = vrot.slane %v4910_v58, 2 }
 0x190   : > { %v1410_v30 = vsel %vm1113_vm0, %v7840_v16, %v7489_v36  ;;  %v5653_v53 = vmax.f32 %v544_v14, %v296_v8  ;;  %v2880_v26 = vmax.f32 %v1936_v15, %v2350_v40  ;;  %v545_v60 = vmax.f32 %v295_v31, %v296_v8  ;;  %v299_v14 = vld [vmem:[%s3599_s11 + $0x5b0] sm:$0xff] }
 0x191   : > { %v1938_v55 = vmax.f32 %v4910_v58, %v1410_v30  ;;  %v2354_v13 = vsel %vm2057_vm1, %v7841_v61, %v7499_v56  ;;  %v2881_v46 = vmax.f32 %v1937_v54, %v2352_v10  ;;  %3371 = vst [vmem:[%s3652_s15 + $0x3e0] sm:$0xff] %v3125_v2  ;;  %v547_v36 = vmax.f32 %v297_v34, %v298_v22 }
 0x192   : > { %v7498_v39 = vrot.slane %v5653_v53, 1  ;;  %v7496_v30 = vrot.slane %v5653_v53, 2  ;;  %v3126_v43 = vmax.f32 %v2880_v26, 0.0  ;;  %v5658_v35 = vmax.f32 %v545_v60, %v297_v34 }
 0x193   : > { %v2882_v16 = vmax.f32 %v1938_v55, %v2354_v13  ;;  %v3127_v58 = vmax.f32 %v2881_v46, 0.0  ;;  %v5660_v61 = vmax.f32 %v546_v11, %v298_v22  ;;  %v7842_v31 = vrot.slane %v4923_v42, 1 }
 0x194   : > { %v7843_v2 = vrot.slane %v4923_v42, 2  ;;  %v5673_v15 = vmax.f32 %v547_v36, %v299_v14  ;;  %3372 = vst [vmem:[%s3652_s15 + $0x3e8] sm:$0xff] %v3126_v43  ;;  %v7494_v60 = vrot.slane %v5658_v35, 1  ;;  %v7492_v34 = vrot.slane %v5658_v35, 2 }
 0x195   : > { %v3128_v40 = vmax.f32 %v2882_v16, 0.0  ;;  %v1412_v55 = vsel %vm1113_vm0, %v7842_v31, %v7498_v39  ;;  %v7493_v54 = vrot.slane %v5660_v61, 1  ;;  %3373 = vst [vmem:[%s3652_s15 + $0x3f0] sm:$0xff] %v3127_v58  ;;  %v7495_v10 = vrot.slane %v5660_v61, 2 }
 0x196   : > { %v2356_v8 = vsel %vm2057_vm1, %v7843_v2, %v7496_v30  ;;  %v1939_v11 = vmax.f32 %v4923_v42, %v1412_v55  ;;  %v7497_v13 = vrot.slane %v5673_v15, 1  ;;  %v7507_v36 = vrot.slane %v5673_v15, 2  ;;  %v301_v55 = vld [vmem:[%s3599_s11 + $0x5c0] sm:$0xff] }
 0x197   : > { %v548_v26 = vmax.f32 %v298_v22, %v299_v14  ;;  %3374 = vst [vmem:[%s3652_s15 + $0x3f8] sm:$0xff] %v3128_v40  ;;  %v7844_v42 = vrot.slane %v4971_v24, 1  ;;  %v7845_v16 = vrot.slane %v4971_v24, 2  ;;  %v7846_v31 = vrot.slane %v4976_v28, 1  ;;  %v300_v40 = vld [vmem:[%s3599_s11 + $0x5b8] sm:$0xff] }
 0x198   : > { %v2883_v43 = vmax.f32 %v1939_v11, %v2356_v8  ;;  %v7847_v11 = vrot.slane %v4976_v28, 2  ;;  %v550_v30 = vmax.f32 %v300_v40, %v301_v55 }
 0x199   : > { %v1414_v46 = vsel %vm1113_vm0, %v7844_v42, %v7494_v60  ;;  %v2358_v58 = vsel %vm2057_vm1, %v7845_v16, %v7492_v34  ;;  %v1416_v22 = vsel %vm1113_vm0, %v7846_v31, %v7493_v54  ;;  %v7848_v16 = vrot.slane %v4978_v37, 1  ;;  %v302_v31 = vld [vmem:[%s3599_s11 + $0x5c8] sm:$0xff] }
 0x19a   : > { %v1940_v2 = vmax.f32 %v4971_v24, %v1414_v46  ;;  %v1941_v8 = vmax.f32 %v4976_v28, %v1416_v22  ;;  %v2360_v42 = vsel %vm2057_vm1, %v7847_v11, %v7495_v10  ;;  %v3129_v54 = vmax.f32 %v2883_v43, 0.0 }
 0x19b   : > { %v1418_v34 = vsel %vm1113_vm0, %v7848_v16, %v7497_v13  ;;  %v7849_v24 = vrot.slane %v4978_v37, 2  ;;  %v5721_v28 = vmax.f32 %v548_v26, %v300_v40  ;;  %v549_v10 = vmax.f32 %v299_v14, %v300_v40  ;;  %v303_v26 = vld [vmem:[%s3599_s11 + $0x5d0] sm:$0xff] }
 0x19c   : > { %v1942_v60 = vmax.f32 %v4978_v37, %v1418_v34  ;;  %v2884_v22 = vmax.f32 %v1940_v2, %v2358_v58  ;;  %v2885_v11 = vmax.f32 %v1941_v8, %v2360_v42  ;;  %3375 = vst [vmem:[%s3652_s15 + $0x400] sm:$0xff] %v3129_v54  ;;  %v551_v13 = vmax.f32 %v301_v55, %v302_v31 }
 0x19d   : > { %v2362_v46 = vsel %vm2057_vm1, %v7849_v24, %v7507_v36  ;;  %v7506_v43 = vrot.slane %v5721_v28, 1  ;;  %v7504_v34 = vrot.slane %v5721_v28, 2  ;;  %v5726_v56 = vmax.f32 %v549_v10, %v301_v55 }
 0x19e   : > { %v2886_v16 = vmax.f32 %v1942_v60, %v2362_v46  ;;  %v3130_v39 = vmax.f32 %v2884_v22, 0.0  ;;  %v3131_v37 = vmax.f32 %v2885_v11, 0.0  ;;  %v5728_v24 = vmax.f32 %v550_v30, %v302_v31 }
 0x19f   : > { %v7850_v14 = vrot.slane %v4991_v6, 1  ;;  %v7851_v54 = vrot.slane %v4991_v6, 2  ;;  %v5741_v2 = vmax.f32 %v551_v13, %v303_v26  ;;  %v7502_v10 = vrot.slane %v5726_v56, 1 }
 0x1a0   : > { %v3132_v58 = vmax.f32 %v2886_v16, 0.0  ;;  %3376 = vst [vmem:[%s3652_s15 + $0x408] sm:$0xff] %v3130_v39  ;;  %v7500_v55 = vrot.slane %v5726_v56, 2  ;;  %v7501_v8 = vrot.slane %v5728_v24, 1  ;;  %v7503_v42 = vrot.slane %v5728_v24, 2 }
 0x1a1   : > { %v1420_v60 = vsel %vm1113_vm0, %v7850_v14, %v7506_v43  ;;  %v2364_v40 = vsel %vm2057_vm1, %v7851_v54, %v7504_v34  ;;  %3377 = vst [vmem:[%s3652_s15 + $0x410] sm:$0xff] %v3131_v37  ;;  %v7505_v46 = vrot.slane %v5741_v2, 1  ;;  %v7515_v13 = vrot.slane %v5741_v2, 2 }
 0x1a2   : > { %v1943_v30 = vmax.f32 %v4991_v6, %v1420_v60  ;;  %v552_v22 = vmax.f32 %v302_v31, %v303_v26  ;;  %3378 = vst [vmem:[%s3652_s15 + $0x418] sm:$0xff] %v3132_v58  ;;  %v7852_v6 = vrot.slane %v5039_v45, 1  ;;  %v7853_v16 = vrot.slane %v5039_v45, 2  ;;  %v304_v58 = vld [vmem:[%s3599_s11 + $0x5d8] sm:$0xff]  ;;  %v305_v60 = vld [vmem:[%s3599_s11 + $0x5e0] sm:$0xff] }
 0x1a3   : > { %v7854_v14 = vrot.slane %v5044_v29, 1  ;;  %v554_v34 = vmax.f32 %v304_v58, %v305_v60 }
 0x1a4   : > { %v2887_v39 = vmax.f32 %v1943_v30, %v2364_v40  ;;  %v1422_v11 = vsel %vm1113_vm0, %v7852_v6, %v7502_v10  ;;  %v2366_v37 = vsel %vm2057_vm1, %v7853_v16, %v7500_v55  ;;  %v7855_v30 = vrot.slane %v5044_v29, 2 }
 0x1a5   : > { %v1424_v31 = vsel %vm1113_vm0, %v7854_v14, %v7501_v8  ;;  %v1944_v54 = vmax.f32 %v5039_v45, %v1422_v11  ;;  %v7856_v16 = vrot.slane %v5046_v9, 1  ;;  %v306_v14 = vld [vmem:[%s3599_s11 + $0x5e8] sm:$0xff]  ;;  %v7857_v45 = vrot.slane %v5046_v9, 2 }
 0x1a6   : > { %v1945_v40 = vmax.f32 %v5044_v29, %v1424_v31  ;;  %v2368_v6 = vsel %vm2057_vm1, %v7855_v30, %v7503_v42  ;;  %v3133_v8 = vmax.f32 %v2887_v39, 0.0  ;;  %v5789_v29 = vmax.f32 %v552_v22, %v304_v58  ;;  %v307_v22 = vld [vmem:[%s3599_s11 + $0x5f0] sm:$0xff] }
 0x1a7   : > { %v1426_v55 = vsel %vm1113_vm0, %v7856_v16, %v7505_v46  ;;  %v2370_v11 = vsel %vm2057_vm1, %v7857_v45, %v7515_v13  ;;  %v2888_v31 = vmax.f32 %v1944_v54, %v2366_v37  ;;  %v553_v42 = vmax.f32 %v303_v26, %v304_v58 }
 0x1a8   : > { %v1946_v10 = vmax.f32 %v5046_v9, %v1426_v55  ;;  %v2889_v30 = vmax.f32 %v1945_v40, %v2368_v6  ;;  %3379 = vst [vmem:[%s3652_s15 + $0x420] sm:$0xff] %v3133_v8  ;;  %v7514_v39 = vrot.slane %v5789_v29, 1  ;;  %v7512_v55 = vrot.slane %v5789_v29, 2 }
 0x1a9   : > { %v555_v46 = vmax.f32 %v305_v60, %v306_v14  ;;  %v3134_v43 = vmax.f32 %v2888_v31, 0.0  ;;  %v5794_v36 = vmax.f32 %v553_v42, %v305_v60  ;;  %v5796_v45 = vmax.f32 %v554_v34, %v306_v14 }
 0x1aa   : > { %v2890_v16 = vmax.f32 %v1946_v10, %v2370_v11  ;;  %v3135_v9 = vmax.f32 %v2889_v30, 0.0  ;;  %v7858_v26 = vrot.slane %v5059_v4, 1  ;;  %v7859_v8 = vrot.slane %v5059_v4, 2 }
 0x1ab   : > { %v5809_v54 = vmax.f32 %v555_v46, %v307_v22  ;;  %3380 = vst [vmem:[%s3652_s15 + $0x428] sm:$0xff] %v3134_v43  ;;  %v7510_v42 = vrot.slane %v5794_v36, 1  ;;  %v7508_v60 = vrot.slane %v5794_v36, 2  ;;  %v7509_v40 = vrot.slane %v5796_v45, 1 }
 0x1ac   : > { %v3136_v37 = vmax.f32 %v2890_v16, 0.0  ;;  %v1428_v10 = vsel %vm1113_vm0, %v7858_v26, %v7514_v39  ;;  %v2372_v58 = vsel %vm2057_vm1, %v7859_v8, %v7512_v55  ;;  %3381 = vst [vmem:[%s3652_s15 + $0x430] sm:$0xff] %v3135_v9  ;;  %v7511_v6 = vrot.slane %v5796_v45, 2 }
 0x1ad   : > { %v1947_v34 = vmax.f32 %v5059_v4, %v1428_v10  ;;  %v7513_v11 = vrot.slane %v5809_v54, 1  ;;  %v7523_v46 = vrot.slane %v5809_v54, 2  ;;  %v556_v31 = vmax.f32 %v306_v14, %v307_v22  ;;  %v309_v10 = vld [vmem:[%s3599_s11 + $0x600] sm:$0xff] }
 0x1ae   : > { %3382 = vst [vmem:[%s3652_s15 + $0x438] sm:$0xff] %v3136_v37  ;;  %v7860_v4 = vrot.slane %v5107_v7, 1  ;;  %v7861_v16 = vrot.slane %v5107_v7, 2  ;;  %v7862_v26 = vrot.slane %v5112_v19, 1  ;;  %v308_v37 = vld [vmem:[%s3599_s11 + $0x5f8] sm:$0xff] }
 0x1af   : > { %v2891_v43 = vmax.f32 %v1947_v34, %v2372_v58  ;;  %v7863_v34 = vrot.slane %v5112_v19, 2  ;;  %v558_v55 = vmax.f32 %v308_v37, %v309_v10 }
 0x1b0   : > { %v1430_v30 = vsel %vm1113_vm0, %v7860_v4, %v7510_v42  ;;  %v2374_v9 = vsel %vm2057_vm1, %v7861_v16, %v7508_v60  ;;  %v1432_v14 = vsel %vm1113_vm0, %v7862_v26, %v7509_v40  ;;  %v7864_v16 = vrot.slane %v5114_v33, 1  ;;  %v310_v26 = vld [vmem:[%s3599_s11 + $0x608] sm:$0xff] }
 0x1b1   : > { %v1948_v8 = vmax.f32 %v5107_v7, %v1430_v30  ;;  %v1949_v58 = vmax.f32 %v5112_v19, %v1432_v14  ;;  %v2376_v4 = vsel %vm2057_vm1, %v7863_v34, %v7511_v6  ;;  %v3137_v40 = vmax.f32 %v2891_v43, 0.0 }
 0x1b2   : > { %v1434_v60 = vsel %vm1113_vm0, %v7864_v16, %v7513_v11  ;;  %v7865_v7 = vrot.slane %v5114_v33, 2  ;;  %v5857_v19 = vmax.f32 %v556_v31, %v308_v37  ;;  %v557_v6 = vmax.f32 %v307_v22, %v308_v37  ;;  %v311_v31 = vld [vmem:[%s3599_s11 + $0x610] sm:$0xff] }
 0x1b3   : > { %v1950_v42 = vmax.f32 %v5114_v33, %v1434_v60  ;;  %v2892_v14 = vmax.f32 %v1948_v8, %v2374_v9  ;;  %v2893_v34 = vmax.f32 %v1949_v58, %v2376_v4  ;;  %3383 = vst [vmem:[%s3652_s15 + $0x440] sm:$0xff] %v3137_v40  ;;  %v559_v11 = vmax.f32 %v309_v10, %v310_v26 }
 0x1b4   : > { %v2378_v30 = vsel %vm2057_vm1, %v7865_v7, %v7523_v46  ;;  %v7522_v43 = vrot.slane %v5857_v19, 1  ;;  %v7520_v60 = vrot.slane %v5857_v19, 2  ;;  %v5862_v13 = vmax.f32 %v557_v6, %v309_v10 }
 0x1b5   : > { %v2894_v16 = vmax.f32 %v1950_v42, %v2378_v30  ;;  %v3138_v39 = vmax.f32 %v2892_v14, 0.0  ;;  %v3139_v33 = vmax.f32 %v2893_v34, 0.0  ;;  %v5864_v7 = vmax.f32 %v558_v55, %v310_v26 }
 0x1b6   : > { %v7866_v22 = vrot.slane %v5127_v63, 1  ;;  %v7867_v40 = vrot.slane %v5127_v63, 2  ;;  %v5877_v8 = vmax.f32 %v559_v11, %v311_v31  ;;  %v7518_v6 = vrot.slane %v5862_v13, 1 }
 0x1b7   : > { %v3140_v9 = vmax.f32 %v2894_v16, 0.0  ;;  %3384 = vst [vmem:[%s3652_s15 + $0x448] sm:$0xff] %v3138_v39  ;;  %v7516_v10 = vrot.slane %v5862_v13, 2  ;;  %v7517_v58 = vrot.slane %v5864_v7, 1  ;;  %v7519_v4 = vrot.slane %v5864_v7, 2 }
 0x1b8   : > { %v1436_v42 = vsel %vm1113_vm0, %v7866_v22, %v7522_v43  ;;  %v2380_v37 = vsel %vm2057_vm1, %v7867_v40, %v7520_v60  ;;  %3385 = vst [vmem:[%s3652_s15 + $0x450] sm:$0xff] %v3139_v33  ;;  %v7521_v30 = vrot.slane %v5877_v8, 1  ;;  %v7531_v11 = vrot.slane %v5877_v8, 2 }
 0x1b9   : > { %v1951_v55 = vmax.f32 %v5127_v63, %v1436_v42  ;;  %v560_v14 = vmax.f32 %v310_v26, %v311_v31  ;;  %3386 = vst [vmem:[%s3652_s15 + $0x458] sm:$0xff] %v3140_v9  ;;  %v7868_v63 = vrot.slane %v5175_v47, 1  ;;  %v7869_v16 = vrot.slane %v5175_v47, 2  ;;  %v312_v9 = vld [vmem:[%s3599_s11 + $0x618] sm:$0xff]  ;;  %v313_v42 = vld [vmem:[%s3599_s11 + $0x620] sm:$0xff] }
 0x1ba   : > { %v7870_v22 = vrot.slane %v5180_v51, 1  ;;  %v562_v60 = vmax.f32 %v312_v9, %v313_v42 }
 0x1bb   : > { %v2895_v39 = vmax.f32 %v1951_v55, %v2380_v37  ;;  %v1438_v34 = vsel %vm1113_vm0, %v7868_v63, %v7518_v6  ;;  %v2382_v33 = vsel %vm2057_vm1, %v7869_v16, %v7516_v10  ;;  %v7871_v55 = vrot.slane %v5180_v51, 2 }
 0x1bc   : > { %v1440_v26 = vsel %vm1113_vm0, %v7870_v22, %v7517_v58  ;;  %v1952_v40 = vmax.f32 %v5175_v47, %v1438_v34  ;;  %v7872_v16 = vrot.slane %v5182_v21, 1  ;;  %v314_v22 = vld [vmem:[%s3599_s11 + $0x628] sm:$0xff]  ;;  %v7873_v47 = vrot.slane %v5182_v21, 2 }
 0x1bd   : > { %v1953_v37 = vmax.f32 %v5180_v51, %v1440_v26  ;;  %v2384_v63 = vsel %vm2057_vm1, %v7871_v55, %v7519_v4  ;;  %v3141_v58 = vmax.f32 %v2895_v39, 0.0  ;;  %v5925_v51 = vmax.f32 %v560_v14, %v312_v9  ;;  %v315_v14 = vld [vmem:[%s3599_s11 + $0x630] sm:$0xff] }
 0x1be   : > { %v1442_v10 = vsel %vm1113_vm0, %v7872_v16, %v7521_v30  ;;  %v2386_v34 = vsel %vm2057_vm1, %v7873_v47, %v7531_v11  ;;  %v2896_v26 = vmax.f32 %v1952_v40, %v2382_v33  ;;  %v561_v4 = vmax.f32 %v311_v31, %v312_v9 }
 0x1bf   : > { %v1954_v6 = vmax.f32 %v5182_v21, %v1442_v10  ;;  %v2897_v55 = vmax.f32 %v1953_v37, %v2384_v63  ;;  %3387 = vst [vmem:[%s3652_s15 + $0x460] sm:$0xff] %v3141_v58  ;;  %v7530_v39 = vrot.slane %v5925_v51, 1  ;;  %v7528_v10 = vrot.slane %v5925_v51, 2 }
 0x1c0   : > { %v563_v30 = vmax.f32 %v313_v42, %v314_v22  ;;  %v3142_v43 = vmax.f32 %v2896_v26, 0.0  ;;  %v5930_v46 = vmax.f32 %v561_v4, %v313_v42  ;;  %v5932_v47 = vmax.f32 %v562_v60, %v314_v22 }
 0x1c1   : > { %v2898_v16 = vmax.f32 %v1954_v6, %v2386_v34  ;;  %v3143_v21 = vmax.f32 %v2897_v55, 0.0  ;;  %v7874_v31 = vrot.slane %v5195_v32, 1  ;;  %v7875_v58 = vrot.slane %v5195_v32, 2 }
 0x1c2   : > { %v5945_v40 = vmax.f32 %v563_v30, %v315_v14  ;;  %3388 = vst [vmem:[%s3652_s15 + $0x468] sm:$0xff] %v3142_v43  ;;  %v7526_v4 = vrot.slane %v5930_v46, 1  ;;  %v7524_v42 = vrot.slane %v5930_v46, 2  ;;  %v7525_v37 = vrot.slane %v5932_v47, 1 }
 0x1c3   : > { %v3144_v33 = vmax.f32 %v2898_v16, 0.0  ;;  %v1444_v6 = vsel %vm1113_vm0, %v7874_v31, %v7530_v39  ;;  %v2388_v9 = vsel %vm2057_vm1, %v7875_v58, %v7528_v10  ;;  %3389 = vst [vmem:[%s3652_s15 + $0x470] sm:$0xff] %v3143_v21  ;;  %v7527_v63 = vrot.slane %v5932_v47, 2 }
 0x1c4   : > { %v1955_v60 = vmax.f32 %v5195_v32, %v1444_v6  ;;  %v7529_v34 = vrot.slane %v5945_v40, 1  ;;  %v7539_v30 = vrot.slane %v5945_v40, 2  ;;  %v564_v26 = vmax.f32 %v314_v22, %v315_v14  ;;  %v317_v6 = vld [vmem:[%s3599_s11 + $0x640] sm:$0xff] }
 0x1c5   : > { %3390 = vst [vmem:[%s3652_s15 + $0x478] sm:$0xff] %v3144_v33  ;;  %v7876_v32 = vrot.slane %v5243_v52, 1  ;;  %v7877_v16 = vrot.slane %v5243_v52, 2  ;;  %v7878_v31 = vrot.slane %v5248_v23, 1  ;;  %v316_v33 = vld [vmem:[%s3599_s11 + $0x638] sm:$0xff] }
 0x1c6   : > { %v2899_v43 = vmax.f32 %v1955_v60, %v2388_v9  ;;  %v7879_v60 = vrot.slane %v5248_v23, 2  ;;  %v566_v10 = vmax.f32 %v316_v33, %v317_v6 }
 0x1c7   : > { %v1446_v55 = vsel %vm1113_vm0, %v7876_v32, %v7526_v4  ;;  %v2390_v21 = vsel %vm2057_vm1, %v7877_v16, %v7524_v42  ;;  %v1448_v22 = vsel %vm1113_vm0, %v7878_v31, %v7525_v37  ;;  %v7880_v16 = vrot.slane %v5250_v49, 1  ;;  %v318_v31 = vld [vmem:[%s3599_s11 + $0x648] sm:$0xff] }
 0x1c8   : > { %v1956_v58 = vmax.f32 %v5243_v52, %v1446_v55  ;;  %v1957_v9 = vmax.f32 %v5248_v23, %v1448_v22  ;;  %v2392_v32 = vsel %vm2057_vm1, %v7879_v60, %v7527_v63  ;;  %v3145_v37 = vmax.f32 %v2899_v43, 0.0 }
 0x1c9   : > { %v1450_v42 = vsel %vm1113_vm0, %v7880_v16, %v7529_v34  ;;  %v7881_v52 = vrot.slane %v5250_v49, 2  ;;  %v5993_v23 = vmax.f32 %v564_v26, %v316_v33  ;;  %v565_v63 = vmax.f32 %v315_v14, %v316_v33  ;;  %v319_v26 = vld [vmem:[%s3599_s11 + $0x650] sm:$0xff] }
 0x1ca   : > { %v1958_v4 = vmax.f32 %v5250_v49, %v1450_v42  ;;  %v2900_v22 = vmax.f32 %v1956_v58, %v2390_v21  ;;  %v2901_v60 = vmax.f32 %v1957_v9, %v2392_v32  ;;  %3391 = vst [vmem:[%s3652_s15 + $0x480] sm:$0xff] %v3145_v37  ;;  %v567_v34 = vmax.f32 %v317_v6, %v318_v31 }
 0x1cb   : > { %v2394_v55 = vsel %vm2057_vm1, %v7881_v52, %v7539_v30  ;;  %v7538_v43 = vrot.slane %v5993_v23, 1  ;;  %v7536_v42 = vrot.slane %v5993_v23, 2  ;;  %v5998_v11 = vmax.f32 %v565_v63, %v317_v6 }
 0x1cc   : > { %v2902_v16 = vmax.f32 %v1958_v4, %v2394_v55  ;;  %v3146_v39 = vmax.f32 %v2900_v22, 0.0  ;;  %v3147_v49 = vmax.f32 %v2901_v60, 0.0  ;;  %v6000_v52 = vmax.f32 %v566_v10, %v318_v31 }
 0x1cd   : > { %v7882_v14 = vrot.slane %v5263_v1, 1  ;;  %v7883_v37 = vrot.slane %v5263_v1, 2  ;;  %v6013_v58 = vmax.f32 %v567_v34, %v319_v26  ;;  %v7534_v63 = vrot.slane %v5998_v11, 1 }
 0x1ce   : > { %v3148_v21 = vmax.f32 %v2902_v16, 0.0  ;;  %3392 = vst [vmem:[%s3652_s15 + $0x488] sm:$0xff] %v3146_v39  ;;  %v7532_v6 = vrot.slane %v5998_v11, 2  ;;  %v7533_v9 = vrot.slane %v6000_v52, 1  ;;  %v7535_v32 = vrot.slane %v6000_v52, 2 }
 0x1cf   : > { %v1452_v4 = vsel %vm1113_vm0, %v7882_v14, %v7538_v43  ;;  %v2396_v33 = vsel %vm2057_vm1, %v7883_v37, %v7536_v42  ;;  %3393 = vst [vmem:[%s3652_s15 + $0x490] sm:$0xff] %v3147_v49  ;;  %v7537_v55 = vrot.slane %v6013_v58, 1  ;;  %v7547_v34 = vrot.slane %v6013_v58, 2 }
 0x1d0   : > { %v1959_v10 = vmax.f32 %v5263_v1, %v1452_v4  ;;  %v568_v22 = vmax.f32 %v318_v31, %v319_v26  ;;  %3394 = vst [vmem:[%s3652_s15 + $0x498] sm:$0xff] %v3148_v21  ;;  %v7884_v1 = vrot.slane %v5311_v18, 1  ;;  %v7885_v16 = vrot.slane %v5311_v18, 2  ;;  %v320_v21 = vld [vmem:[%s3599_s11 + $0x658] sm:$0xff]  ;;  %v321_v4 = vld [vmem:[%s3599_s11 + $0x660] sm:$0xff] }
 0x1d1   : > { %v7886_v14 = vrot.slane %v5316_v44, 1  ;;  %v570_v42 = vmax.f32 %v320_v21, %v321_v4 }
 0x1d2   : > { %v2903_v39 = vmax.f32 %v1959_v10, %v2396_v33  ;;  %v1454_v60 = vsel %vm1113_vm0, %v7884_v1, %v7534_v63  ;;  %v2398_v49 = vsel %vm2057_vm1, %v7885_v16, %v7532_v6  ;;  %v7887_v10 = vrot.slane %v5316_v44, 2 }
 0x1d3   : > { %v1456_v31 = vsel %vm1113_vm0, %v7886_v14, %v7533_v9  ;;  %v1960_v37 = vmax.f32 %v5311_v18, %v1454_v60  ;;  %v7888_v16 = vrot.slane %v5318_v48, 1  ;;  %v322_v14 = vld [vmem:[%s3599_s11 + $0x668] sm:$0xff]  ;;  %v7889_v18 = vrot.slane %v5318_v48, 2 }
 0x1d4   : > { %v1961_v33 = vmax.f32 %v5316_v44, %v1456_v31  ;;  %v2400_v1 = vsel %vm2057_vm1, %v7887_v10, %v7535_v32  ;;  %v3149_v9 = vmax.f32 %v2903_v39, 0.0  ;;  %v6061_v44 = vmax.f32 %v568_v22, %v320_v21  ;;  %v323_v22 = vld [vmem:[%s3599_s11 + $0x670] sm:$0xff] }
 0x1d5   : > { %v1458_v6 = vsel %vm1113_vm0, %v7888_v16, %v7537_v55  ;;  %v2402_v60 = vsel %vm2057_vm1, %v7889_v18, %v7547_v34  ;;  %v2904_v31 = vmax.f32 %v1960_v37, %v2398_v49  ;;  %v569_v32 = vmax.f32 %v319_v26, %v320_v21 }
 0x1d6   : > { %v1962_v63 = vmax.f32 %v5318_v48, %v1458_v6  ;;  %v2905_v10 = vmax.f32 %v1961_v33, %v2400_v1  ;;  %3395 = vst [vmem:[%s3652_s15 + $0x4a0] sm:$0xff] %v3149_v9  ;;  %v7546_v39 = vrot.slane %v6061_v44, 1  ;;  %v7544_v6 = vrot.slane %v6061_v44, 2 }
 0x1d7   : > { %v571_v55 = vmax.f32 %v321_v4, %v322_v14  ;;  %v3150_v43 = vmax.f32 %v2904_v31, 0.0  ;;  %v6066_v30 = vmax.f32 %v569_v32, %v321_v4  ;;  %v6068_v18 = vmax.f32 %v570_v42, %v322_v14 }
 0x1d8   : > { %v2906_v16 = vmax.f32 %v1962_v63, %v2402_v60  ;;  %v3151_v48 = vmax.f32 %v2905_v10, 0.0  ;;  %v7890_v26 = vrot.slane %v5331_v12, 1  ;;  %v7891_v9 = vrot.slane %v5331_v12, 2 }
 0x1d9   : > { %v6081_v37 = vmax.f32 %v571_v55, %v323_v22  ;;  %3396 = vst [vmem:[%s3652_s15 + $0x4a8] sm:$0xff] %v3150_v43  ;;  %v7542_v32 = vrot.slane %v6066_v30, 1  ;;  %v7540_v4 = vrot.slane %v6066_v30, 2  ;;  %v7541_v33 = vrot.slane %v6068_v18, 1 }
 0x1da   : > { %v3152_v49 = vmax.f32 %v2906_v16, 0.0  ;;  %v1460_v63 = vsel %vm1113_vm0, %v7890_v26, %v7546_v39  ;;  %v2404_v21 = vsel %vm2057_vm1, %v7891_v9, %v7544_v6  ;;  %3397 = vst [vmem:[%s3652_s15 + $0x4b0] sm:$0xff] %v3151_v48  ;;  %v7543_v1 = vrot.slane %v6068_v18, 2 }
 0x1db   : > { %v1963_v42 = vmax.f32 %v5331_v12, %v1460_v63  ;;  %v7545_v60 = vrot.slane %v6081_v37, 1  ;;  %v7554_v55 = vrot.slane %v6081_v37, 2  ;;  %v572_v31 = vmax.f32 %v322_v14, %v323_v22  ;;  %v325_v63 = vld [vmem:[%s3599_s11 + $0x680] sm:$0xff] }
 0x1dc   : > { %3398 = vst [vmem:[%s3652_s15 + $0x4b8] sm:$0xff] %v3152_v49  ;;  %v7892_v12 = vrot.slane %v5379_v27, 1  ;;  %v7893_v16 = vrot.slane %v5379_v27, 2  ;;  %v7894_v26 = vrot.slane %v5384_v20, 1  ;;  %v324_v49 = vld [vmem:[%s3599_s11 + $0x678] sm:$0xff] }
 0x1dd   : > { %v2907_v43 = vmax.f32 %v1963_v42, %v2404_v21  ;;  %v7895_v42 = vrot.slane %v5384_v20, 2  ;;  %v574_v6 = vmax.f32 %v324_v49, %v325_v63 }
 0x1de   : > { %v1462_v10 = vsel %vm1113_vm0, %v7892_v12, %v7542_v32  ;;  %v2406_v48 = vsel %vm2057_vm1, %v7893_v16, %v7540_v4  ;;  %v1464_v14 = vsel %vm1113_vm0, %v7894_v26, %v7541_v33  ;;  %v7896_v16 = vrot.slane %v5386_v0, 1  ;;  %v326_v26 = vld [vmem:[%s3599_s11 + $0x688] sm:$0xff] }
 0x1df   : > { %v1964_v9 = vmax.f32 %v5379_v27, %v1462_v10  ;;  %v1965_v21 = vmax.f32 %v5384_v20, %v1464_v14  ;;  %v2408_v12 = vsel %vm2057_vm1, %v7895_v42, %v7543_v1  ;;  %v3153_v33 = vmax.f32 %v2907_v43, 0.0 }
 0x1e0   : > { %v1466_v4 = vsel %vm1113_vm0, %v7896_v16, %v7545_v60  ;;  %v7897_v27 = vrot.slane %v5386_v0, 2  ;;  %v6129_v20 = vmax.f32 %v572_v31, %v324_v49  ;;  %v573_v1 = vmax.f32 %v323_v22, %v324_v49  ;;  %v327_v31 = vld [vmem:[%s3599_s11 + $0x690] sm:$0xff] }
 0x1e1   : > { %v1966_v32 = vmax.f32 %v5386_v0, %v1466_v4  ;;  %v2908_v14 = vmax.f32 %v1964_v9, %v2406_v48  ;;  %v2909_v42 = vmax.f32 %v1965_v21, %v2408_v12  ;;  %3399 = vst [vmem:[%s3652_s15 + $0x4c0] sm:$0xff] %v3153_v33  ;;  %v575_v60 = vmax.f32 %v325_v63, %v326_v26 }
 0x1e2   : > { %v2410_v10 = vsel %vm2057_vm1, %v7897_v27, %v7554_v55  ;;  %v7552_v43 = vrot.slane %v6129_v20, 1  ;;  %v7551_v4 = vrot.slane %v6129_v20, 2  ;;  %v6134_v34 = vmax.f32 %v573_v1, %v325_v63 }
 0x1e3   : > { %v2910_v16 = vmax.f32 %v1966_v32, %v2410_v10  ;;  %v3154_v39 = vmax.f32 %v2908_v14, 0.0  ;;  %v3155_v0 = vmax.f32 %v2909_v42, 0.0  ;;  %v6136_v27 = vmax.f32 %v574_v6, %v326_v26 }
 0x1e4   : > { %v7899_v22 = vrot.slane %v5399_v5, 1  ;;  %v7900_v33 = vrot.slane %v5399_v5, 2  ;;  %v6149_v9 = vmax.f32 %v575_v60, %v327_v31  ;;  %v7549_v1 = vrot.slane %v6134_v34, 1 }
 0x1e5   : > { %7898 = vst [vmem:[#allocation2_spill] sm:$0xff] %v6136_v27  ;;  %v3156_v48 = vmax.f32 %v2910_v16, 0.0  ;;  %v7548_v63 = vrot.slane %v6134_v34, 2  ;;  %v7550_v21 = vrot.slane %v6136_v27, 1  ;;  %v7553_v12 = vrot.slane %v6136_v27, 2  ;;  %v331_v27 = vld [vmem:[%s3599_s11 + $0x6b0] sm:$0xff] }
 0x1e6   : > { %v1468_v32 = vsel %vm1113_vm0, %v7899_v22, %v7552_v43  ;;  %v2412_v49 = vsel %vm2057_vm1, %v7900_v33, %v7551_v4  ;;  %3400 = vst [vmem:[%s3652_s15 + $0x4c8] sm:$0xff] %v3154_v39  ;;  %v7557_v10 = vrot.slane %v6149_v9, 1  ;;  %v7558_v60 = vrot.slane %v6149_v9, 2  ;;  %v7903_v22 = vld [vmem:[#allocation4_spill] sm:$0xff]  ;;  %v329_v33 = vld [vmem:[%s3599_s11 + $0x6a0] sm:$0xff] }
 0x1e7   : > { %v1967_v6 = vmax.f32 %v5399_v5, %v1468_v32  ;;  %3401 = vst [vmem:[%s3652_s15 + $0x4d0] sm:$0xff] %v3155_v0  ;;  %v576_v14 = vmax.f32 %v326_v26, %v327_v31  ;;  %v7901_v5 = vrot.slane %v5447_v59, 1  ;;  %v7902_v16 = vrot.slane %v5447_v59, 2 }
 0x1e8   : > { %3402 = vst [vmem:[%s3652_s15 + $0x4d8] sm:$0xff] %v3156_v48  ;;  %v7904_v32 = vrot.slane %v7903_v22, 1  ;;  %v328_v48 = vld [vmem:[%s3599_s11 + $0x698] sm:$0xff] }
 0x1e9   : > { %v2911_v39 = vmax.f32 %v1967_v6, %v2412_v49  ;;  %v1470_v42 = vsel %vm1113_vm0, %v7901_v5, %v7549_v1  ;;  %v2414_v0 = vsel %vm2057_vm1, %v7902_v16, %v7548_v63  ;;  %v7905_v5 = vrot.slane %v7903_v22, 2  ;;  %v7906_v63 = vld [vmem:[#allocation5_spill] sm:$0xff] }
 0x1ea   : > { %v1472_v26 = vsel %vm1113_vm0, %v7904_v32, %v7550_v21  ;;  %v1968_v49 = vmax.f32 %v5447_v59, %v1470_v42  ;;  %v7907_v1 = vrot.slane %v7906_v63, 1  ;;  %v330_v21 = vld [vmem:[%s3599_s11 + $0x6a8] sm:$0xff]  ;;  %v7908_v59 = vrot.slane %v7906_v63, 2 }
 0x1eb   : > { %v1969_v6 = vmax.f32 %v7903_v22, %v1472_v26  ;;  %v2416_v16 = vsel %vm2057_vm1, %v7905_v5, %v7553_v12  ;;  %v3157_v4 = vmax.f32 %v2911_v39, 0.0  ;;  %v6197_v22 = vmax.f32 %v576_v14, %v328_v48 }
 0x1ec   : > { %v1474_v32 = vsel %vm1113_vm0, %v7907_v1, %v7557_v10  ;;  %v2418_v42 = vsel %vm2057_vm1, %v7908_v59, %v7558_v60  ;;  %v2912_v26 = vmax.f32 %v1968_v49, %v2414_v0  ;;  %v577_v12 = vmax.f32 %v327_v31, %v328_v48  ;;  %v332_v0 = vld [vmem:[%s3599_s11 + $0x6b8] sm:$0x7]  ;;  %v333_v31 = vld [vmem:[%s3599_s11 + $0x6c0] sm:$0x7] }
 0x1ed   : > { %v1970_v43 = vmax.f32 %v7906_v63, %v1474_v32  ;;  %v2913_v5 = vmax.f32 %v1969_v6, %v2416_v16  ;;  %v578_v55 = vmax.f32 %v328_v48, %v329_v33  ;;  %3403 = vst [vmem:[%s3652_s15 + $0x4e0] sm:$0xff] %v3157_v4  ;;  %v7564_v39 = vrot.slane %v6197_v22, 1  ;;  %v7910_v4 = vld [vmem:[#allocation8_spill] sm:$0xff] }
 0x1ee   : > { %v7562_v32 = vrot.slane %v6197_v22, 2  ;;  %v579_v10 = vmax.f32 %v329_v33, %v330_v21  ;;  %v3158_v63 = vmax.f32 %v2912_v26, 0.0  ;;  %v6203_v60 = vmax.f32 %v577_v12, %v329_v33 }
 0x1ef   : > { %v2914_v1 = vmax.f32 %v1970_v43, %v2418_v42  ;;  %v3159_v59 = vmax.f32 %v2913_v5, 0.0  ;;  %v6205_v14 = vmax.f32 %v578_v55, %v330_v21  ;;  %v7911_v43 = vrot.slane %v7910_v4, 1 }
 0x1f0   : > { %v7912_v6 = vrot.slane %v7910_v4, 2  ;;  %v6219_v12 = vmax.f32 %v579_v10, %v331_v27  ;;  %3404 = vst [vmem:[%s3652_s15 + $0x4e8] sm:$0xff] %v3158_v63  ;;  %v7559_v21 = vrot.slane %v6203_v60, 1  ;;  %v7560_v33 = vrot.slane %v6203_v60, 2 }
 0x1f1   : > { %7909 = vst [vmem:[#allocation6_spill] sm:$0xff] %v6205_v14  ;;  %v3160_v48 = vmax.f32 %v2914_v1, 0.0  ;;  %v1476_v49 = vsel %vm1113_vm0, %v7911_v43, %v7564_v39  ;;  %v7561_v42 = vrot.slane %v6205_v14, 1  ;;  %v7563_v26 = vrot.slane %v6205_v14, 2 }
 0x1f2   : > { %v2420_v16 = vsel %vm2057_vm1, %v7912_v6, %v7562_v32  ;;  %7913 = vst [vmem:[#allocation7_spill] sm:$0xff] %v6219_v12  ;;  %v1971_v55 = vmax.f32 %v7910_v4, %v1476_v49  ;;  %v7565_v5 = vrot.slane %v6219_v12, 1  ;;  %v7570_v27 = vrot.slane %v6219_v12, 2  ;;  %v335_v6 = vld [vmem:[%s3599_s11 + $0x6d0] sm:$0x7] }
 0x1f3   : > { %3405 = vst [vmem:[%s3652_s15 + $0x4f0] sm:$0xff] %v3159_v59  ;;  %v580_v10 = vmax.f32 %v332_v0, %v333_v31  ;;  %v7914_v63 = vrot.slane %v5516_v25, 1  ;;  %v7915_v59 = vrot.slane %v5516_v25, 2  ;;  %v7916_v49 = vrot.slane %v5522_v62, 1 }
 0x1f4   : > { %3406 = vst [vmem:[%s3652_s15 + $0x4f8] sm:$0xff] %v3160_v48  ;;  %v2915_v1 = vmax.f32 %v1971_v55, %v2420_v16  ;;  %v334_v48 = vld [vmem:[%s3599_s11 + $0x6c8] sm:$0x7] }
 0x1f5   : > { %v1478_v4 = vsel %vm1113_vm0, %v7914_v63, %v7559_v21  ;;  %v2422_v43 = vsel %vm2057_vm1, %v7915_v59, %v7560_v33  ;;  %v1480_v0 = vsel %vm1113_vm0, %v7916_v49, %v7561_v42  ;;  %v7917_v63 = vrot.slane %v5522_v62, 2  ;;  %v336_v49 = vld [vmem:[%s3599_s11 + $0x6d8] sm:$0x7] }
 0x1f6   : > { %v1972_v16 = vmax.f32 %v5516_v25, %v1478_v4  ;;  %v1973_v55 = vmax.f32 %v5522_v62, %v1480_v0  ;;  %v7918_v59 = vrot.slane %v5524_v3, 1  ;;  %v3161_v42 = vmax.f32 %v2915_v1, 0.0 }
 0x1f7   : > { %v2424_v21 = vsel %vm2057_vm1, %v7917_v63, %v7563_v26  ;;  %v7919_v25 = vrot.slane %v5524_v3, 2  ;;  %v6267_v62 = vmax.f32 %v580_v10, %v334_v48  ;;  %v581_v26 = vmax.f32 %v333_v31, %v334_v48  ;;  %v337_v10 = vld [vmem:[%s3599_s11 + $0x6e0] sm:$0x7] }
 0x1f8   : > { %v1482_v33 = vsel %vm1113_vm0, %v7918_v59, %v7565_v5  ;;  %v2916_v0 = vmax.f32 %v1972_v16, %v2422_v43  ;;  %v2917_v63 = vmax.f32 %v1973_v55, %v2424_v21  ;;  %v582_v39 = vmax.f32 %v334_v48, %v335_v6  ;;  %3407 = vst [vmem:[%s3652_s15 + $0x500] sm:$0xff] %v3161_v42 }
 0x1f9   : > { %v1974_v32 = vmax.f32 %v5524_v3, %v1482_v33  ;;  %v2426_v4 = vsel %vm2057_vm1, %v7919_v25, %v7570_v27  ;;  %v7577_v1 = vrot.slane %v6267_v62, 1  ;;  %v7572_v33 = vrot.slane %v6267_v62, 2 }
 0x1fa   : > { %v583_v5 = vmax.f32 %v335_v6, %v336_v49  ;;  %v3162_v12 = vmax.f32 %v2916_v0, 0.0  ;;  %v3163_v3 = vmax.f32 %v2917_v63, 0.0  ;;  %v6272_v14 = vmax.f32 %v581_v26, %v335_v6 }
 0x1fb   : > { %v2918_v59 = vmax.f32 %v1974_v32, %v2426_v4  ;;  %v6274_v25 = vmax.f32 %v582_v39, %v336_v49  ;;  %v7920_v31 = vrot.slane %v5537_v57, 1  ;;  %v7921_v42 = vrot.slane %v5537_v57, 2 }
 0x1fc   : > { %v6287_v48 = vmax.f32 %v583_v5, %v337_v10  ;;  %3408 = vst [vmem:[%s3652_s15 + $0x508] sm:$0xff] %v3162_v12  ;;  %v7576_v26 = vrot.slane %v6272_v14, 1  ;;  %v7571_v6 = vrot.slane %v6272_v14, 2  ;;  %v584_v0 = vmax.f32 %v336_v49, %v337_v10 }
 0x1fd   : > { %v3164_v21 = vmax.f32 %v2918_v59, 0.0  ;;  %v1484_v32 = vsel %vm1113_vm0, %v7920_v31, %v7577_v1  ;;  %v2428_v43 = vsel %vm2057_vm1, %v7921_v42, %v7572_v33  ;;  %v7574_v16 = vrot.slane %v6274_v25, 1  ;;  %3409 = vst [vmem:[%s3652_s15 + $0x510] sm:$0xff] %v3163_v3 }
 0x1fe   : > { %v1975_v39 = vmax.f32 %v5537_v57, %v1484_v32  ;;  %v7573_v55 = vrot.slane %v6274_v25, 2  ;;  %v7575_v4 = vrot.slane %v6287_v48, 1  ;;  %v7580_v5 = vrot.slane %v6287_v48, 2  ;;  %v339_v32 = vld [vmem:[%s3599_s11 + $0x6f0] sm:$0x7] }
 0x1ff   : > { %3410 = vst [vmem:[%s3652_s15 + $0x518] sm:$0xff] %v3164_v21  ;;  %v7922_v57 = vrot.slane %v5585_v50, 1  ;;  %v7923_v59 = vrot.slane %v5585_v50, 2  ;;  %v7924_v31 = vrot.slane %v5590_v38, 1  ;;  %v338_v21 = vld [vmem:[%s3599_s11 + $0x6e8] sm:$0x7] }
 0x200   : > { %v2919_v12 = vmax.f32 %v1975_v39, %v2428_v43  ;;  %v7925_v39 = vrot.slane %v5590_v38, 2 }
 0x201   : > { %v1486_v63 = vsel %vm1113_vm0, %v7922_v57, %v7576_v26  ;;  %v2430_v3 = vsel %vm2057_vm1, %v7923_v59, %v7571_v6  ;;  %v1488_v49 = vsel %vm1113_vm0, %v7924_v31, %v7574_v16  ;;  %v7926_v59 = vrot.slane %v5592_v41, 1  ;;  %v340_v31 = vld [vmem:[%s3599_s11 + $0x6f8] sm:$0x7] }
 0x202   : > { %v1976_v42 = vmax.f32 %v5585_v50, %v1486_v63  ;;  %v1977_v43 = vmax.f32 %v5590_v38, %v1488_v49  ;;  %v2432_v57 = vsel %vm2057_vm1, %v7925_v39, %v7573_v55  ;;  %v3165_v6 = vmax.f32 %v2919_v12, 0.0 }
 0x203   : > { %v1490_v27 = vsel %vm1113_vm0, %v7926_v59, %v7575_v4  ;;  %v7927_v50 = vrot.slane %v5592_v41, 2  ;;  %v6335_v38 = vmax.f32 %v584_v0, %v338_v21  ;;  %v585_v55 = vmax.f32 %v337_v10, %v338_v21  ;;  %v341_v0 = vld [vmem:[%s3599_s11 + $0x700] sm:$0x7] }
 0x204   : > { %v1978_v33 = vmax.f32 %v5592_v41, %v1490_v27  ;;  %v2920_v49 = vmax.f32 %v1976_v42, %v2430_v3  ;;  %v2921_v39 = vmax.f32 %v1977_v43, %v2432_v57  ;;  %v586_v16 = vmax.f32 %v338_v21, %v339_v32  ;;  %3411 = vst [vmem:[%s3652_s15 + $0x520] sm:$0xff] %v3165_v6 }
 0x205   : > { %v2434_v63 = vsel %vm2057_vm1, %v7927_v50, %v7580_v5  ;;  %v7585_v12 = vrot.slane %v6335_v38, 1  ;;  %v7579_v27 = vrot.slane %v6335_v38, 2  ;;  %v587_v4 = vmax.f32 %v339_v32, %v340_v31 }
 0x206   : > { %v2922_v59 = vmax.f32 %v1978_v33, %v2434_v63  ;;  %v3166_v26 = vmax.f32 %v2920_v49, 0.0  ;;  %v3167_v41 = vmax.f32 %v2921_v39, 0.0  ;;  %v6340_v1 = vmax.f32 %v585_v55, %v339_v32 }
 0x207   : > { %v6342_v50 = vmax.f32 %v586_v16, %v340_v31  ;;  %v7928_v10 = vrot.slane %v5605_v17, 1  ;;  %v7929_v6 = vrot.slane %v5605_v17, 2  ;;  %v6355_v42 = vmax.f32 %v587_v4, %v341_v0 }
 0x208   : > { %v3168_v3 = vmax.f32 %v2922_v59, 0.0  ;;  %3412 = vst [vmem:[%s3652_s15 + $0x528] sm:$0xff] %v3166_v26  ;;  %v7584_v55 = vrot.slane %v6340_v1, 1  ;;  %v7578_v32 = vrot.slane %v6340_v1, 2  ;;  %v588_v49 = vmax.f32 %v340_v31, %v341_v0 }
 0x209   : > { %v1492_v33 = vsel %vm1113_vm0, %v7928_v10, %v7585_v12  ;;  %v2436_v21 = vsel %vm2057_vm1, %v7929_v6, %v7579_v27  ;;  %v7582_v43 = vrot.slane %v6342_v50, 1  ;;  %3413 = vst [vmem:[%s3652_s15 + $0x530] sm:$0xff] %v3167_v41  ;;  %v7581_v57 = vrot.slane %v6342_v50, 2 }
 0x20a   : > { %v1979_v16 = vmax.f32 %v5605_v17, %v1492_v33  ;;  %v7583_v63 = vrot.slane %v6355_v42, 1  ;;  %v7590_v4 = vrot.slane %v6355_v42, 2  ;;  %3414 = vst [vmem:[%s3652_s15 + $0x538] sm:$0xff] %v3168_v3  ;;  %v7930_v17 = vrot.slane %v5653_v53, 1  ;;  %v342_v3 = vld [vmem:[%s3599_s11 + $0x708] sm:$0x7] }
 0x20b   : > { %v7931_v59 = vrot.slane %v5653_v53, 2  ;;  %v7932_v10 = vrot.slane %v5658_v35, 1  ;;  %v343_v33 = vld [vmem:[%s3599_s11 + $0x710] sm:$0x7] }
 0x20c   : > { %v2923_v26 = vmax.f32 %v1979_v16, %v2436_v21  ;;  %v1494_v39 = vsel %vm1113_vm0, %v7930_v17, %v7584_v55  ;;  %v7933_v16 = vrot.slane %v5658_v35, 2 }
 0x20d   : > { %v2438_v41 = vsel %vm2057_vm1, %v7931_v59, %v7578_v32  ;;  %v1496_v31 = vsel %vm1113_vm0, %v7932_v10, %v7582_v43  ;;  %v1980_v6 = vmax.f32 %v5653_v53, %v1494_v39  ;;  %v7934_v59 = vrot.slane %v5660_v61, 1  ;;  %v344_v10 = vld [vmem:[%s3599_s11 + $0x718] sm:$0x7] }
 0x20e   : > { %v1981_v21 = vmax.f32 %v5658_v35, %v1496_v31  ;;  %v2440_v17 = vsel %vm2057_vm1, %v7933_v16, %v7581_v57  ;;  %v3169_v27 = vmax.f32 %v2923_v26, 0.0  ;;  %v7935_v53 = vrot.slane %v5660_v61, 2 }
 0x20f   : > { %v1498_v32 = vsel %vm1113_vm0, %v7934_v59, %v7583_v63  ;;  %v6403_v35 = vmax.f32 %v588_v49, %v342_v3  ;;  %v2924_v31 = vmax.f32 %v1980_v6, %v2438_v41  ;;  %v589_v57 = vmax.f32 %v341_v0, %v342_v3  ;;  %v345_v49 = vld [vmem:[%s3599_s11 + $0x720] sm:$0x7] }
 0x210   : > { %v1982_v5 = vmax.f32 %v5660_v61, %v1498_v32  ;;  %v2442_v39 = vsel %vm2057_vm1, %v7935_v53, %v7590_v4  ;;  %v2925_v16 = vmax.f32 %v1981_v21, %v2440_v17  ;;  %v590_v43 = vmax.f32 %v342_v3, %v343_v33  ;;  %3415 = vst [vmem:[%s3652_s15 + $0x540] sm:$0xff] %v3169_v27 }
 0x211   : > { %v7593_v26 = vrot.slane %v6403_v35, 1  ;;  %v7588_v32 = vrot.slane %v6403_v35, 2  ;;  %v591_v63 = vmax.f32 %v343_v33, %v344_v10  ;;  %v3170_v55 = vmax.f32 %v2924_v31, 0.0 }
 0x212   : > { %v2926_v59 = vmax.f32 %v1982_v5, %v2442_v39  ;;  %v3171_v61 = vmax.f32 %v2925_v16, 0.0  ;;  %v6408_v12 = vmax.f32 %v589_v57, %v343_v33  ;;  %v6410_v53 = vmax.f32 %v590_v43, %v344_v10 }
 0x213   : > { %v7936_v27 = vrot.slane %v5673_v15, 1  ;;  %v7937_v0 = vrot.slane %v5673_v15, 2  ;;  %v6423_v6 = vmax.f32 %v591_v63, %v345_v49  ;;  %3416 = vst [vmem:[%s3652_s15 + $0x548] sm:$0xff] %v3170_v55  ;;  %v592_v31 = vmax.f32 %v344_v10, %v345_v49 }
 0x214   : > { %v3172_v41 = vmax.f32 %v2926_v59, 0.0  ;;  %v7592_v57 = vrot.slane %v6408_v12, 1  ;;  %v7586_v33 = vrot.slane %v6408_v12, 2  ;;  %v7587_v21 = vrot.slane %v6410_v53, 1  ;;  %3417 = vst [vmem:[%s3652_s15 + $0x550] sm:$0xff] %v3171_v61 }
 0x215   : > { %v1500_v5 = vsel %vm1113_vm0, %v7936_v27, %v7593_v26  ;;  %v2444_v3 = vsel %vm2057_vm1, %v7937_v0, %v7588_v32  ;;  %v7589_v17 = vrot.slane %v6410_v53, 2  ;;  %v7591_v39 = vrot.slane %v6423_v6, 1 }
 0x216   : > { %v1983_v43 = vmax.f32 %v5673_v15, %v1500_v5  ;;  %v7596_v63 = vrot.slane %v6423_v6, 2  ;;  %3418 = vst [vmem:[%s3652_s15 + $0x558] sm:$0xff] %v3172_v41  ;;  %v7938_v15 = vrot.slane %v5721_v28, 1  ;;  %v7939_v59 = vrot.slane %v5721_v28, 2  ;;  %v346_v41 = vld [vmem:[%s3599_s11 + $0x728] sm:$0x7] }
 0x217   : > { %v7940_v27 = vrot.slane %v5726_v56, 1  ;;  %v347_v5 = vld [vmem:[%s3599_s11 + $0x730] sm:$0x7] }
 0x218   : > { %v2927_v55 = vmax.f32 %v1983_v43, %v2444_v3  ;;  %v1502_v16 = vsel %vm1113_vm0, %v7938_v15, %v7592_v57  ;;  %v2446_v61 = vsel %vm2057_vm1, %v7939_v59, %v7586_v33  ;;  %v7941_v43 = vrot.slane %v5726_v56, 2 }
 0x219   : > { %v1504_v10 = vsel %vm1113_vm0, %v7940_v27, %v7587_v21  ;;  %v1984_v0 = vmax.f32 %v5721_v28, %v1502_v16  ;;  %v7942_v59 = vrot.slane %v5728_v24, 1  ;;  %v348_v27 = vld [vmem:[%s3599_s11 + $0x738] sm:$0x7]  ;;  %v7943_v28 = vrot.slane %v5728_v24, 2 }
 0x21a   : > { %v1985_v3 = vmax.f32 %v5726_v56, %v1504_v10  ;;  %v2448_v15 = vsel %vm2057_vm1, %v7941_v43, %v7589_v17  ;;  %v3173_v21 = vmax.f32 %v2927_v55, 0.0  ;;  %v6471_v56 = vmax.f32 %v592_v31, %v346_v41  ;;  %v349_v31 = vld [vmem:[%s3599_s11 + $0x740] sm:$0x7] }
 0x21b   : > { %v1506_v33 = vsel %vm1113_vm0, %v7942_v59, %v7591_v39  ;;  %v2450_v16 = vsel %vm2057_vm1, %v7943_v28, %v7596_v63  ;;  %v2928_v10 = vmax.f32 %v1984_v0, %v2446_v61  ;;  %v593_v17 = vmax.f32 %v345_v49, %v346_v41 }
 0x21c   : > { %v1986_v32 = vmax.f32 %v5728_v24, %v1506_v33  ;;  %v2929_v43 = vmax.f32 %v1985_v3, %v2448_v15  ;;  %v594_v4 = vmax.f32 %v346_v41, %v347_v5  ;;  %3419 = vst [vmem:[%s3652_s15 + $0x560] sm:$0xff] %v3173_v21  ;;  %v7601_v55 = vrot.slane %v6471_v56, 1 }
 0x21d   : > { %v7595_v33 = vrot.slane %v6471_v56, 2  ;;  %v595_v39 = vmax.f32 %v347_v5, %v348_v27  ;;  %v3174_v57 = vmax.f32 %v2928_v10, 0.0  ;;  %v6476_v26 = vmax.f32 %v593_v17, %v347_v5 }
 0x21e   : > { %v2930_v59 = vmax.f32 %v1986_v32, %v2450_v16  ;;  %v3175_v24 = vmax.f32 %v2929_v43, 0.0  ;;  %v6478_v28 = vmax.f32 %v594_v4, %v348_v27  ;;  %v7944_v49 = vrot.slane %v5741_v2, 1 }
 0x21f   : > { %v7945_v21 = vrot.slane %v5741_v2, 2  ;;  %v6491_v0 = vmax.f32 %v595_v39, %v349_v31  ;;  %3420 = vst [vmem:[%s3652_s15 + $0x568] sm:$0xff] %v3174_v57  ;;  %v7600_v17 = vrot.slane %v6476_v26, 1  ;;  %v7594_v5 = vrot.slane %v6476_v26, 2 }
 0x220   : > { %v3176_v61 = vmax.f32 %v2930_v59, 0.0  ;;  %v1508_v32 = vsel %vm1113_vm0, %v7944_v49, %v7601_v55  ;;  %v7598_v3 = vrot.slane %v6478_v28, 1  ;;  %3421 = vst [vmem:[%s3652_s15 + $0x570] sm:$0xff] %v3175_v24  ;;  %v7597_v15 = vrot.slane %v6478_v28, 2 }
 0x221   : > { %v2452_v41 = vsel %vm2057_vm1, %v7945_v21, %v7595_v33  ;;  %v1987_v4 = vmax.f32 %v5741_v2, %v1508_v32  ;;  %v7599_v16 = vrot.slane %v6491_v0, 1  ;;  %v7606_v39 = vrot.slane %v6491_v0, 2  ;;  %v351_v32 = vld [vmem:[%s3599_s11 + $0x750] sm:$0x7] }
 0x222   : > { %v596_v10 = vmax.f32 %v348_v27, %v349_v31  ;;  %3422 = vst [vmem:[%s3652_s15 + $0x578] sm:$0xff] %v3176_v61  ;;  %v7946_v2 = vrot.slane %v5789_v29, 1  ;;  %v7947_v59 = vrot.slane %v5789_v29, 2  ;;  %v7948_v49 = vrot.slane %v5794_v36, 1  ;;  %v350_v61 = vld [vmem:[%s3599_s11 + $0x748] sm:$0x7] }
 0x223   : > { %v2931_v57 = vmax.f32 %v1987_v4, %v2452_v41  ;;  %v7949_v4 = vrot.slane %v5794_v36, 2 }
 0x224   : > { %v1510_v43 = vsel %vm1113_vm0, %v7946_v2, %v7600_v17  ;;  %v2454_v24 = vsel %vm2057_vm1, %v7947_v59, %v7594_v5  ;;  %v1512_v27 = vsel %vm1113_vm0, %v7948_v49, %v7598_v3  ;;  %v7950_v59 = vrot.slane %v5796_v45, 1  ;;  %v352_v49 = vld [vmem:[%s3599_s11 + $0x758] sm:$0x7] }
 0x225   : > { %v1988_v21 = vmax.f32 %v5789_v29, %v1510_v43  ;;  %v1989_v41 = vmax.f32 %v5794_v36, %v1512_v27  ;;  %v2456_v2 = vsel %vm2057_vm1, %v7949_v4, %v7597_v15  ;;  %v3177_v33 = vmax.f32 %v2931_v57, 0.0 }
 0x226   : > { %v1514_v5 = vsel %vm1113_vm0, %v7950_v59, %v7599_v16  ;;  %v7951_v29 = vrot.slane %v5796_v45, 2  ;;  %v6539_v36 = vmax.f32 %v596_v10, %v350_v61  ;;  %v597_v15 = vmax.f32 %v349_v31, %v350_v61  ;;  %v353_v10 = vld [vmem:[%s3599_s11 + $0x760] sm:$0x7] }
 0x227   : > { %v1990_v63 = vmax.f32 %v5796_v45, %v1514_v5  ;;  %v2932_v27 = vmax.f32 %v1988_v21, %v2454_v24  ;;  %v2933_v4 = vmax.f32 %v1989_v41, %v2456_v2  ;;  %v598_v3 = vmax.f32 %v350_v61, %v351_v32  ;;  %3423 = vst [vmem:[%s3652_s15 + $0x580] sm:$0xff] %v3177_v33 }
 0x228   : > { %v2458_v43 = vsel %vm2057_vm1, %v7951_v29, %v7606_v39  ;;  %v7609_v57 = vrot.slane %v6539_v36, 1  ;;  %v7602_v5 = vrot.slane %v6539_v36, 2  ;;  %v599_v16 = vmax.f32 %v351_v32, %v352_v49 }
 0x229   : > { %v2934_v59 = vmax.f32 %v1990_v63, %v2458_v43  ;;  %v3178_v17 = vmax.f32 %v2932_v27, 0.0  ;;  %v3179_v45 = vmax.f32 %v2933_v4, 0.0  ;;  %v6544_v55 = vmax.f32 %v597_v15, %v351_v32 }
 0x22a   : > { %v6546_v29 = vmax.f32 %v598_v3, %v352_v49  ;;  %v7952_v33 = vrot.slane %v5809_v54, 1  ;;  %v7953_v31 = vrot.slane %v5809_v54, 2  ;;  %v6559_v21 = vmax.f32 %v599_v16, %v353_v10 }
 0x22b   : > { %v3180_v24 = vmax.f32 %v2934_v59, 0.0  ;;  %3424 = vst [vmem:[%s3652_s15 + $0x588] sm:$0xff] %v3178_v17  ;;  %v7608_v15 = vrot.slane %v6544_v55, 1  ;;  %v7604_v32 = vrot.slane %v6544_v55, 2  ;;  %v600_v27 = vmax.f32 %v352_v49, %v353_v10 }
 0x22c   : > { %v1516_v63 = vsel %vm1113_vm0, %v7952_v33, %v7609_v57  ;;  %v2460_v61 = vsel %vm2057_vm1, %v7953_v31, %v7602_v5  ;;  %v7603_v41 = vrot.slane %v6546_v29, 1  ;;  %3425 = vst [vmem:[%s3652_s15 + $0x590] sm:$0xff] %v3179_v45  ;;  %v7605_v2 = vrot.slane %v6546_v29, 2 }
 0x22d   : > { %v1991_v3 = vmax.f32 %v5809_v54, %v1516_v63  ;;  %v7607_v43 = vrot.slane %v6559_v21, 1  ;;  %v7614_v16 = vrot.slane %v6559_v21, 2  ;;  %3426 = vst [vmem:[%s3652_s15 + $0x598] sm:$0xff] %v3180_v24  ;;  %v7954_v54 = vrot.slane %v5857_v19, 1  ;;  %v354_v24 = vld [vmem:[%s3599_s11 + $0x768] sm:$0x7] }
 0x22e   : > { %v7955_v59 = vrot.slane %v5857_v19, 2  ;;  %v7956_v33 = vrot.slane %v5862_v13, 1  ;;  %v355_v63 = vld [vmem:[%s3599_s11 + $0x770] sm:$0x7] }
 0x22f   : > { %v2935_v17 = vmax.f32 %v1991_v3, %v2460_v61  ;;  %v1518_v4 = vsel %vm1113_vm0, %v7954_v54, %v7608_v15  ;;  %v7957_v3 = vrot.slane %v5862_v13, 2  ;;  %v602_v39 = vmax.f32 %v354_v24, %v355_v63 }
 0x230   : > { %v2462_v45 = vsel %vm2057_vm1, %v7955_v59, %v7604_v32  ;;  %v1520_v49 = vsel %vm1113_vm0, %v7956_v33, %v7603_v41  ;;  %v1992_v31 = vmax.f32 %v5857_v19, %v1518_v4  ;;  %v7958_v59 = vrot.slane %v5864_v7, 1  ;;  %v356_v33 = vld [vmem:[%s3599_s11 + $0x778] sm:$0x7] }
 0x231   : > { %v1993_v61 = vmax.f32 %v5862_v13, %v1520_v49  ;;  %v2464_v54 = vsel %vm2057_vm1, %v7957_v3, %v7605_v2  ;;  %v3181_v41 = vmax.f32 %v2935_v17, 0.0  ;;  %v7959_v19 = vrot.slane %v5864_v7, 2 }
 0x232   : > { %v1522_v5 = vsel %vm1113_vm0, %v7958_v59, %v7607_v43  ;;  %v6607_v13 = vmax.f32 %v600_v27, %v354_v24  ;;  %v2936_v49 = vmax.f32 %v1992_v31, %v2462_v45  ;;  %v601_v2 = vmax.f32 %v353_v10, %v354_v24  ;;  %v357_v27 = vld [vmem:[%s3599_s11 + $0x780] sm:$0x7] }
 0x233   : > { %v1994_v32 = vmax.f32 %v5864_v7, %v1522_v5  ;;  %v2466_v4 = vsel %vm2057_vm1, %v7959_v19, %v7614_v16  ;;  %v2937_v3 = vmax.f32 %v1993_v61, %v2464_v54  ;;  %3427 = vst [vmem:[%s3652_s15 + $0x5a0] sm:$0xff] %v3181_v41  ;;  %v603_v43 = vmax.f32 %v355_v63, %v356_v33 }
 0x234   : > { %v7617_v17 = vrot.slane %v6607_v13, 1  ;;  %v7611_v5 = vrot.slane %v6607_v13, 2  ;;  %v3182_v15 = vmax.f32 %v2936_v49, 0.0  ;;  %v6612_v57 = vmax.f32 %v601_v2, %v355_v63 }
 0x235   : > { %v2938_v59 = vmax.f32 %v1994_v32, %v2466_v4  ;;  %v3183_v7 = vmax.f32 %v2937_v3, 0.0  ;;  %v6614_v19 = vmax.f32 %v602_v39, %v356_v33  ;;  %v7960_v10 = vrot.slane %v5877_v8, 1 }
 0x236   : > { %v7961_v41 = vrot.slane %v5877_v8, 2  ;;  %v6627_v31 = vmax.f32 %v603_v43, %v357_v27  ;;  %3428 = vst [vmem:[%s3652_s15 + $0x5a8] sm:$0xff] %v3182_v15  ;;  %v7616_v2 = vrot.slane %v6612_v57, 1  ;;  %v7610_v63 = vrot.slane %v6612_v57, 2 }
 0x237   : > { %v3184_v45 = vmax.f32 %v2938_v59, 0.0  ;;  %v1524_v32 = vsel %vm1113_vm0, %v7960_v10, %v7617_v17  ;;  %v7612_v61 = vrot.slane %v6614_v19, 1  ;;  %3429 = vst [vmem:[%s3652_s15 + $0x5b0] sm:$0xff] %v3183_v7  ;;  %v7613_v54 = vrot.slane %v6614_v19, 2 }
 0x238   : > { %v2468_v24 = vsel %vm2057_vm1, %v7961_v41, %v7611_v5  ;;  %v1995_v39 = vmax.f32 %v5877_v8, %v1524_v32  ;;  %v7615_v4 = vrot.slane %v6627_v31, 1  ;;  %v7620_v43 = vrot.slane %v6627_v31, 2  ;;  %v359_v32 = vld [vmem:[%s3599_s11 + $0x790] sm:$0x7] }
 0x239   : > { %v604_v49 = vmax.f32 %v356_v33, %v357_v27  ;;  %3430 = vst [vmem:[%s3652_s15 + $0x5b8] sm:$0xff] %v3184_v45  ;;  %v7962_v8 = vrot.slane %v5925_v51, 1  ;;  %v7963_v59 = vrot.slane %v5925_v51, 2  ;;  %v7964_v10 = vrot.slane %v5930_v46, 1  ;;  %v358_v45 = vld [vmem:[%s3599_s11 + $0x788] sm:$0x7] }
 0x23a   : > { %v2939_v15 = vmax.f32 %v1995_v39, %v2468_v24  ;;  %v7965_v39 = vrot.slane %v5930_v46, 2  ;;  %v606_v16 = vmax.f32 %v358_v45, %v359_v32 }
 0x23b   : > { %v1526_v3 = vsel %vm1113_vm0, %v7962_v8, %v7616_v2  ;;  %v2470_v7 = vsel %vm2057_vm1, %v7963_v59, %v7610_v63  ;;  %v1528_v33 = vsel %vm1113_vm0, %v7964_v10, %v7612_v61  ;;  %v7966_v59 = vrot.slane %v5932_v47, 1  ;;  %v360_v10 = vld [vmem:[%s3599_s11 + $0x798] sm:$0x7] }
 0x23c   : > { %v1996_v41 = vmax.f32 %v5925_v51, %v1526_v3  ;;  %v1997_v24 = vmax.f32 %v5930_v46, %v1528_v33  ;;  %v2472_v8 = vsel %vm2057_vm1, %v7965_v39, %v7613_v54  ;;  %v3185_v5 = vmax.f32 %v2939_v15, 0.0 }
 0x23d   : > { %v1530_v63 = vsel %vm1113_vm0, %v7966_v59, %v7615_v4  ;;  %v7967_v51 = vrot.slane %v5932_v47, 2  ;;  %v6675_v46 = vmax.f32 %v604_v49, %v358_v45  ;;  %v605_v54 = vmax.f32 %v357_v27, %v358_v45  ;;  %v361_v49 = vld [vmem:[%s3599_s11 + $0x7a0] sm:$0x7] }
 0x23e   : > { %v1998_v61 = vmax.f32 %v5932_v47, %v1530_v63  ;;  %v2940_v33 = vmax.f32 %v1996_v41, %v2470_v7  ;;  %v2941_v39 = vmax.f32 %v1997_v24, %v2472_v8  ;;  %3431 = vst [vmem:[%s3652_s15 + $0x5c0] sm:$0xff] %v3185_v5  ;;  %v607_v4 = vmax.f32 %v359_v32, %v360_v10 }
 0x23f   : > { %v2474_v3 = vsel %vm2057_vm1, %v7967_v51, %v7620_v43  ;;  %v7625_v15 = vrot.slane %v6675_v46, 1  ;;  %v7619_v63 = vrot.slane %v6675_v46, 2  ;;  %v6680_v17 = vmax.f32 %v605_v54, %v359_v32 }
 0x240   : > { %v2942_v59 = vmax.f32 %v1998_v61, %v2474_v3  ;;  %v3186_v2 = vmax.f32 %v2940_v33, 0.0  ;;  %v3187_v47 = vmax.f32 %v2941_v39, 0.0  ;;  %v6682_v51 = vmax.f32 %v606_v16, %v360_v10 }
 0x241   : > { %v7968_v5 = vrot.slane %v5945_v40, 1  ;;  %v7969_v61 = vrot.slane %v5945_v40, 2  ;;  %v6695_v41 = vmax.f32 %v607_v4, %v361_v49  ;;  %v7624_v54 = vrot.slane %v6680_v17, 1 }
 0x242   : > { %v3188_v7 = vmax.f32 %v2942_v59, 0.0  ;;  %3432 = vst [vmem:[%s3652_s15 + $0x5c8] sm:$0xff] %v3186_v2  ;;  %v7618_v32 = vrot.slane %v6680_v17, 2  ;;  %v7622_v24 = vrot.slane %v6682_v51, 1  ;;  %v7621_v8 = vrot.slane %v6682_v51, 2 }
 0x243   : > { %v1532_v27 = vsel %vm1113_vm0, %v7968_v5, %v7625_v15  ;;  %v2476_v45 = vsel %vm2057_vm1, %v7969_v61, %v7619_v63  ;;  %3433 = vst [vmem:[%s3652_s15 + $0x5d0] sm:$0xff] %v3187_v47  ;;  %v7623_v3 = vrot.slane %v6695_v41, 1  ;;  %v7628_v4 = vrot.slane %v6695_v41, 2 }
 0x244   : > { %v1999_v16 = vmax.f32 %v5945_v40, %v1532_v27  ;;  %v608_v33 = vmax.f32 %v360_v10, %v361_v49  ;;  %3434 = vst [vmem:[%s3652_s15 + $0x5d8] sm:$0xff] %v3188_v7  ;;  %v7970_v40 = vrot.slane %v5993_v23, 1  ;;  %v7971_v59 = vrot.slane %v5993_v23, 2  ;;  %v362_v7 = vld [vmem:[%s3599_s11 + $0x7a8] sm:$0x7] }
 0x245   : > { %v7972_v5 = vrot.slane %v5998_v11, 1  ;;  %v363_v27 = vld [vmem:[%s3599_s11 + $0x7b0] sm:$0x7] }
 0x246   : > { %v2943_v2 = vmax.f32 %v1999_v16, %v2476_v45  ;;  %v1534_v39 = vsel %vm1113_vm0, %v7970_v40, %v7624_v54  ;;  %v2478_v47 = vsel %vm2057_vm1, %v7971_v59, %v7618_v32  ;;  %v7973_v16 = vrot.slane %v5998_v11, 2 }
 0x247   : > { %v1536_v10 = vsel %vm1113_vm0, %v7972_v5, %v7622_v24  ;;  %v2000_v61 = vmax.f32 %v5993_v23, %v1534_v39  ;;  %v7974_v59 = vrot.slane %v6000_v52, 1  ;;  %v364_v5 = vld [vmem:[%s3599_s11 + $0x7b8] sm:$0x7]  ;;  %v7975_v23 = vrot.slane %v6000_v52, 2 }
 0x248   : > { %v2001_v45 = vmax.f32 %v5998_v11, %v1536_v10  ;;  %v2480_v40 = vsel %vm2057_vm1, %v7973_v16, %v7621_v8  ;;  %v3189_v63 = vmax.f32 %v2943_v2, 0.0  ;;  %v6743_v11 = vmax.f32 %v608_v33, %v362_v7  ;;  %v365_v33 = vld [vmem:[%s3599_s11 + $0x7c0] sm:$0x7] }
 0x249   : > { %v1538_v32 = vsel %vm1113_vm0, %v7974_v59, %v7623_v3  ;;  %v2482_v39 = vsel %vm2057_vm1, %v7975_v23, %v7628_v4  ;;  %v2944_v10 = vmax.f32 %v2000_v61, %v2478_v47  ;;  %v609_v8 = vmax.f32 %v361_v49, %v362_v7 }
 0x24a   : > { %v2002_v43 = vmax.f32 %v6000_v52, %v1538_v32  ;;  %v2945_v16 = vmax.f32 %v2001_v45, %v2480_v40  ;;  %v610_v24 = vmax.f32 %v362_v7, %v363_v27  ;;  %3435 = vst [vmem:[%s3652_s15 + $0x5e0] sm:$0xff] %v3189_v63  ;;  %v7633_v2 = vrot.slane %v6743_v11, 1 }
 0x24b   : > { %v7627_v32 = vrot.slane %v6743_v11, 2  ;;  %v611_v3 = vmax.f32 %v363_v27, %v364_v5  ;;  %v3190_v54 = vmax.f32 %v2944_v10, 0.0  ;;  %v6748_v15 = vmax.f32 %v609_v8, %v363_v27 }
 0x24c   : > { %v2946_v59 = vmax.f32 %v2002_v43, %v2482_v39  ;;  %v3191_v52 = vmax.f32 %v2945_v16, 0.0  ;;  %v6750_v23 = vmax.f32 %v610_v24, %v364_v5  ;;  %v7976_v63 = vrot.slane %v6013_v58, 1 }
 0x24d   : > { %v7977_v49 = vrot.slane %v6013_v58, 2  ;;  %v6763_v61 = vmax.f32 %v611_v3, %v365_v33  ;;  %3436 = vst [vmem:[%s3652_s15 + $0x5e8] sm:$0xff] %v3190_v54  ;;  %v7632_v8 = vrot.slane %v6748_v15, 1  ;;  %v7626_v27 = vrot.slane %v6748_v15, 2 }
 0x24e   : > { %v3192_v47 = vmax.f32 %v2946_v59, 0.0  ;;  %v1540_v43 = vsel %vm1113_vm0, %v7976_v63, %v7633_v2  ;;  %v7630_v45 = vrot.slane %v6750_v23, 1  ;;  %3437 = vst [vmem:[%s3652_s15 + $0x5f0] sm:$0xff] %v3191_v52  ;;  %v7629_v40 = vrot.slane %v6750_v23, 2 }
 0x24f   : > { %v2484_v7 = vsel %vm2057_vm1, %v7977_v49, %v7627_v32  ;;  %v2003_v24 = vmax.f32 %v6013_v58, %v1540_v43  ;;  %v7631_v39 = vrot.slane %v6763_v61, 1  ;;  %v7636_v3 = vrot.slane %v6763_v61, 2  ;;  %v367_v43 = vld [vmem:[%s3599_s11 + $0x7d0] sm:$0x7] }
 0x250   : > { %v612_v10 = vmax.f32 %v364_v5, %v365_v33  ;;  %3438 = vst [vmem:[%s3652_s15 + $0x5f8] sm:$0xff] %v3192_v47  ;;  %v7978_v58 = vrot.slane %v6061_v44, 1  ;;  %v7979_v59 = vrot.slane %v6061_v44, 2  ;;  %v7980_v63 = vrot.slane %v6066_v30, 1  ;;  %v366_v47 = vld [vmem:[%s3599_s11 + $0x7c8] sm:$0x7] }
 0x251   : > { %v2947_v54 = vmax.f32 %v2003_v24, %v2484_v7  ;;  %v7981_v24 = vrot.slane %v6066_v30, 2 }
 0x252   : > { %v1542_v16 = vsel %vm1113_vm0, %v7978_v58, %v7632_v8  ;;  %v2486_v52 = vsel %vm2057_vm1, %v7979_v59, %v7626_v27  ;;  %v1544_v5 = vsel %vm1113_vm0, %v7980_v63, %v7630_v45  ;;  %v7982_v59 = vrot.slane %v6068_v18, 1  ;;  %v368_v63 = vld [vmem:[%s3599_s11 + $0x7d8] sm:$0x7] }
 0x253   : > { %v2004_v49 = vmax.f32 %v6061_v44, %v1542_v16  ;;  %v2005_v7 = vmax.f32 %v6066_v30, %v1544_v5  ;;  %v2488_v58 = vsel %vm2057_vm1, %v7981_v24, %v7629_v40  ;;  %v3193_v32 = vmax.f32 %v2947_v54, 0.0 }
 0x254   : > { %v1546_v27 = vsel %vm1113_vm0, %v7982_v59, %v7631_v39  ;;  %v7983_v44 = vrot.slane %v6068_v18, 2  ;;  %v6811_v30 = vmax.f32 %v612_v10, %v366_v47  ;;  %v613_v40 = vmax.f32 %v365_v33, %v366_v47  ;;  %v369_v10 = vld [vmem:[%s3599_s11 + $0x7e0] sm:$0x7] }
 0x255   : > { %v2006_v4 = vmax.f32 %v6068_v18, %v1546_v27  ;;  %v2948_v5 = vmax.f32 %v2004_v49, %v2486_v52  ;;  %v2949_v24 = vmax.f32 %v2005_v7, %v2488_v58  ;;  %v614_v45 = vmax.f32 %v366_v47, %v367_v43  ;;  %3439 = vst [vmem:[%s3652_s15 + $0x600] sm:$0xff] %v3193_v32 }
 0x256   : > { %v2490_v16 = vsel %vm2057_vm1, %v7983_v44, %v7636_v3  ;;  %v7641_v54 = vrot.slane %v6811_v30, 1  ;;  %v7635_v27 = vrot.slane %v6811_v30, 2  ;;  %v615_v39 = vmax.f32 %v367_v43, %v368_v63 }
 0x257   : > { %v2950_v59 = vmax.f32 %v2006_v4, %v2490_v16  ;;  %v3194_v8 = vmax.f32 %v2948_v5, 0.0  ;;  %v3195_v18 = vmax.f32 %v2949_v24, 0.0  ;;  %v6816_v2 = vmax.f32 %v613_v40, %v367_v43 }
 0x258   : > { %v6818_v44 = vmax.f32 %v614_v45, %v368_v63  ;;  %v7984_v32 = vrot.slane %v6081_v37, 1  ;;  %v7985_v33 = vrot.slane %v6081_v37, 2  ;;  %v6831_v49 = vmax.f32 %v615_v39, %v369_v10 }
 0x259   : > { %v3196_v52 = vmax.f32 %v2950_v59, 0.0  ;;  %3440 = vst [vmem:[%s3652_s15 + $0x608] sm:$0xff] %v3194_v8  ;;  %v7639_v40 = vrot.slane %v6816_v2, 1  ;;  %v7634_v43 = vrot.slane %v6816_v2, 2  ;;  %v616_v5 = vmax.f32 %v368_v63, %v369_v10 }
 0x25a   : > { %v1548_v4 = vsel %vm1113_vm0, %v7984_v32, %v7641_v54  ;;  %v2492_v47 = vsel %vm2057_vm1, %v7985_v33, %v7635_v27  ;;  %7986 = vst [vmem:[#allocation3_spill] sm:$0xff] %v6831_v49  ;;  %v7637_v7 = vrot.slane %v6818_v44, 1  ;;  %v7638_v58 = vrot.slane %v6818_v44, 2 }
 0x25b   : > { %v2007_v45 = vmax.f32 %v6081_v37, %v1548_v4  ;;  %3441 = vst [vmem:[%s3652_s15 + $0x610] sm:$0xff] %v3195_v18  ;;  %v7640_v16 = vrot.slane %v6831_v49, 1  ;;  %v2497_v39 = vrot.slane %v6831_v49, 2  ;;  %v7987_v37 = vrot.slane %v6129_v20, 1  ;;  %v371_v4 = vld [vmem:[%s3599_s11 + $0x7f0] sm:$0x7] }
 0x25c   : > { %3442 = vst [vmem:[%s3652_s15 + $0x618] sm:$0xff] %v3196_v52  ;;  %v7988_v59 = vrot.slane %v6129_v20, 2  ;;  %v7989_v32 = vrot.slane %v6134_v34, 1  ;;  %v370_v52 = vld [vmem:[%s3599_s11 + $0x7e8] sm:$0x7] }
 0x25d   : > { %v2951_v8 = vmax.f32 %v2007_v45, %v2492_v47  ;;  %v1550_v24 = vsel %vm1113_vm0, %v7987_v37, %v7639_v40  ;;  %v7990_v45 = vrot.slane %v6134_v34, 2  ;;  %v618_v40 = vmax.f32 %v370_v52, %v371_v4 }
 0x25e   : > { %v2494_v18 = vsel %vm2057_vm1, %v7988_v59, %v7634_v43  ;;  %v1552_v63 = vsel %vm1113_vm0, %v7989_v32, %v7637_v7  ;;  %v2008_v33 = vmax.f32 %v6129_v20, %v1550_v24  ;;  %v7991_v59 = vld [vmem:[#allocation2_spill] sm:$0xff]  ;;  %v372_v32 = vld [vmem:[%s3599_s11 + $0x7f8] sm:$0x7] }
 0x25f   : > { %v2009_v47 = vmax.f32 %v6134_v34, %v1552_v63  ;;  %v2496_v37 = vsel %vm2057_vm1, %v7990_v45, %v7638_v58  ;;  %v7992_v43 = vrot.slane %v7991_v59, 1  ;;  %v3197_v3 = vmax.f32 %v2951_v8, 0.0 }
 0x260   : > { %v7993_v20 = vrot.slane %v7991_v59, 2  ;;  %v6879_v34 = vmax.f32 %v616_v5, %v370_v52  ;;  %v2952_v63 = vmax.f32 %v2008_v33, %v2494_v18  ;;  %v617_v58 = vmax.f32 %v369_v10, %v370_v52  ;;  %v373_v18 = vld [vmem:[%s3599_s11 + $0x800] sm:$0x7] }
 0x261   : > { %v1554_v27 = vsel %vm1113_vm0, %v7992_v43, %v7640_v16  ;;  %v2953_v45 = vmax.f32 %v2009_v47, %v2496_v37  ;;  %3443 = vst [vmem:[%s3652_s15 + $0x620] sm:$0xff] %v3197_v3  ;;  %v619_v16 = vmax.f32 %v371_v4, %v372_v32  ;;  %v6886_v5 = vmax.f32 %v618_v40, %v372_v32 }
 0x262   : > { %v2010_v7 = vmax.f32 %v7991_v59, %v1554_v27  ;;  %v2498_v24 = vsel %vm2057_vm1, %v7993_v20, %v2497_v39  ;;  %v1555_v8 = vrot.slane %v6879_v34, 1  ;;  %v7645_v27 = vrot.slane %v6879_v34, 2 }
 0x263   : > { %v3198_v54 = vmax.f32 %v2952_v63, 0.0  ;;  %v3199_v59 = vmax.f32 %v2953_v45, 0.0  ;;  %v6884_v49 = vmax.f32 %v617_v58, %v371_v4  ;;  %v7994_v3 = vrot.slane %v6149_v9, 1  ;;  %v374_v45 = vld [vmem:[%s3599_s11 + $0x808] sm:$0x7] }
 0x264   : > { %v2954_v43 = vmax.f32 %v2010_v7, %v2498_v24  ;;  %v7995_v52 = vrot.slane %v6149_v9, 2  ;;  %v6899_v58 = vmax.f32 %v619_v16, %v373_v18  ;;  %v1559_v37 = vrot.slane %v6886_v5, 1 }
 0x265   : > { %v1556_v7 = vsel %vm1113_vm0, %v7994_v3, %v1555_v8  ;;  %3444 = vst [vmem:[%s3652_s15 + $0x628] sm:$0xff] %v3198_v54  ;;  %v1557_v4 = vrot.slane %v6884_v49, 1  ;;  %v7644_v47 = vrot.slane %v6884_v49, 2  ;;  %v7646_v20 = vrot.slane %v6886_v5, 2 }
 0x266   : > { %v3200_v10 = vmax.f32 %v2954_v43, 0.0  ;;  %v2500_v33 = vsel %vm2057_vm1, %v7995_v52, %v7645_v27  ;;  %v2011_v40 = vmax.f32 %v6149_v9, %v1556_v7  ;;  %3445 = vst [vmem:[%s3652_s15 + $0x630] sm:$0xff] %v3199_v59  ;;  %v7647_v24 = vrot.slane %v6899_v58, 1 }
 0x267   : > { %v2505_v63 = vrot.slane %v6899_v58, 2  ;;  %v620_v43 = vmax.f32 %v372_v32, %v373_v18  ;;  %v7996_v9 = vrot.slane %v6197_v22, 1  ;;  %v7997_v59 = vrot.slane %v6197_v22, 2 }
 0x268   : > { %3446 = vst [vmem:[%s3652_s15 + $0x638] sm:$0xff] %v3200_v10  ;;  %v2955_v16 = vmax.f32 %v2011_v40, %v2500_v33  ;;  %v7998_v7 = vrot.slane %v6203_v60, 1  ;;  %v7999_v52 = vrot.slane %v6203_v60, 2  ;;  %v8000_v40 = vld [vmem:[#allocation6_spill] sm:$0xff] }
 0x269   : > { %v1558_v54 = vsel %vm1113_vm0, %v7996_v9, %v1557_v4  ;;  %v2502_v3 = vsel %vm2057_vm1, %v7997_v59, %v7644_v47  ;;  %v8001_v9 = vrot.slane %v8000_v40, 1 }
 0x26a   : > { %v1560_v32 = vsel %vm1113_vm0, %v7998_v7, %v1559_v37  ;;  %v2012_v18 = vmax.f32 %v6197_v22, %v1558_v54  ;;  %v2504_v33 = vsel %vm2057_vm1, %v7999_v52, %v7646_v20  ;;  %v3201_v47 = vmax.f32 %v2955_v16, 0.0 }
 0x26b   : > { %v2013_v10 = vmax.f32 %v6203_v60, %v1560_v32  ;;  %v1562_v59 = vsel %vm1113_vm0, %v8001_v9, %v7647_v24  ;;  %v8002_v22 = vrot.slane %v8000_v40, 2  ;;  %v6945_v7 = vmax.f32 %v620_v43, %v374_v45 }
 0x26c   : > { %v2014_v27 = vmax.f32 %v8000_v40, %v1562_v59  ;;  %v2956_v60 = vmax.f32 %v2012_v18, %v2502_v3  ;;  %v8003_v52 = vrot.slane %v6267_v62, 1  ;;  %v8004_v9 = vrot.slane %v6272_v14, 1  ;;  %3447 = vst [vmem:[%s3652_s15 + $0x640] sm:$0xff] %v3201_v47 }
 0x26d   : > { %v2506_v54 = vsel %vm2057_vm1, %v8002_v22, %v2505_v63  ;;  %v2957_v32 = vmax.f32 %v2013_v10, %v2504_v33  ;;  %v1563_v24 = vrot.slane %v6945_v7, 1  ;;  %v2507_v40 = vrot.slane %v6945_v7, 2 }
 0x26e   : > { %v2016_v20 = vmax.f32 %v6267_v62, %v8003_v52  ;;  %v2017_v16 = vmax.f32 %v6272_v14, %v8004_v9  ;;  %v2958_v59 = vmax.f32 %v2014_v27, %v2506_v54  ;;  %v8005_v45 = vrot.slane %v6274_v25, 1  ;;  %v8008_v27 = vld [vmem:[#allocation7_spill] sm:$0xff] }
 0x26f   : > { %v3202_v3 = vmax.f32 %v2956_v60, 0.0  ;;  %v3203_v18 = vmax.f32 %v2957_v32, 0.0  ;;  %v8006_v10 = vrot.slane %v6267_v62, 2  ;;  %v8007_v22 = vrot.slane %v6272_v14, 2 }
 0x270   : > { %v2018_v43 = vmax.f32 %v6274_v25, %v8005_v45  ;;  %v3204_v47 = vmax.f32 %v2958_v59, 0.0  ;;  %v8009_v54 = vrot.slane %v8008_v27, 1  ;;  %v8010_v45 = vrot.slane %v8008_v27, 2 }
 0x271   : > { %v2960_v33 = vmax.f32 %v2016_v20, %v8006_v10  ;;  %v2961_v52 = vmax.f32 %v2017_v16, %v8007_v22  ;;  %v8011_v62 = vrot.slane %v6274_v25, 2  ;;  %3448 = vst [vmem:[%s3652_s15 + $0x648] sm:$0xff] %v3202_v3  ;;  %v8012_v59 = vrot.slane %v6287_v48, 1 }
 0x272   : > { %v1564_v9 = vsel %vm1113_vm0, %v8009_v54, %v1563_v24  ;;  %v2508_v60 = vsel %vm2057_vm1, %v8010_v45, %v2507_v40  ;;  %3449 = vst [vmem:[%s3652_s15 + $0x650] sm:$0xff] %v3203_v18  ;;  %v8013_v54 = vrot.slane %v6335_v38, 1  ;;  %v8014_v25 = vrot.slane %v6340_v1, 1 }
 0x273   : > { %v2962_v20 = vmax.f32 %v2018_v43, %v8011_v62  ;;  %v2015_v14 = vmax.f32 %v8008_v27, %v1564_v9  ;;  %v3206_v32 = vmax.f32 %v2960_v33, 0.0  ;;  %v3207_v16 = vmax.f32 %v2961_v52, 0.0  ;;  %3450 = vst [vmem:[%s3652_s15 + $0x658] sm:$0xff] %v3204_v47 }
 0x274   : > { %v2019_v10 = vmax.f32 %v6287_v48, %v8012_v59  ;;  %v2020_v45 = vmax.f32 %v6335_v38, %v8013_v54  ;;  %v2021_v43 = vmax.f32 %v6340_v1, %v8014_v25  ;;  %v8015_v3 = vrot.slane %v6342_v50, 1 }
 0x275   : > { %v3208_v22 = vmax.f32 %v2962_v20, 0.0  ;;  %v2959_v52 = vmax.f32 %v2015_v14, %v2508_v60  ;;  %v8016_v27 = vrot.slane %v6287_v48, 2  ;;  %v8017_v9 = vrot.slane %v6355_v42, 1  ;;  %3452 = vst [vmem:[%s3652_s15 + $0x668] sm:$0x1] %v3206_v32 }
 0x276   : > { %v2022_v33 = vmax.f32 %v6342_v50, %v8015_v3  ;;  %v8018_v20 = vrot.slane %v6403_v35, 1  ;;  %v8019_v54 = vrot.slane %v6335_v38, 2  ;;  %v8020_v3 = vrot.slane %v6340_v1, 2  ;;  %3453 = vst [vmem:[%s3652_s15 + $0x670] sm:$0x1] %v3207_v16 }
 0x277   : > { %v2963_v18 = vmax.f32 %v2019_v10, %v8016_v27  ;;  %v2023_v62 = vmax.f32 %v6355_v42, %v8017_v9  ;;  %v8021_v60 = vrot.slane %v6342_v50, 2  ;;  %v8022_v14 = vrot.slane %v6408_v12, 1  ;;  %3454 = vst [vmem:[%s3652_s15 + $0x678] sm:$0x1] %v3208_v22 }
 0x278   : > { %v2024_v59 = vmax.f32 %v6403_v35, %v8018_v20  ;;  %v2964_v25 = vmax.f32 %v2020_v45, %v8019_v54  ;;  %v2965_v47 = vmax.f32 %v2021_v43, %v8020_v3  ;;  %v3205_v27 = vmax.f32 %v2959_v52, 0.0 }
 0x279   : > { %v2966_v48 = vmax.f32 %v2022_v33, %v8021_v60  ;;  %v2025_v10 = vmax.f32 %v6408_v12, %v8022_v14  ;;  %v3209_v9 = vmax.f32 %v2963_v18, 0.0  ;;  %v8023_v20 = vrot.slane %v6355_v42, 2 }
 0x27a   : > { %v8024_v38 = vrot.slane %v6403_v35, 2  ;;  %v3210_v1 = vmax.f32 %v2964_v25, 0.0  ;;  %v3211_v43 = vmax.f32 %v2965_v47, 0.0  ;;  %v8025_v50 = vrot.slane %v6408_v12, 2  ;;  %3451 = vst [vmem:[%s3652_s15 + $0x660] sm:$0xff] %v3205_v27 }
 0x27b   : > { %v2967_v32 = vmax.f32 %v2023_v62, %v8023_v20  ;;  %v3212_v54 = vmax.f32 %v2966_v48, 0.0  ;;  %v8026_v16 = vrot.slane %v6410_v53, 1  ;;  %v8027_v42 = vrot.slane %v6423_v6, 1  ;;  %3455 = vst [vmem:[%s3652_s15 + $0x680] sm:$0x1] %v3209_v9 }
 0x27c   : > { %v2968_v45 = vmax.f32 %v2024_v59, %v8024_v38  ;;  %v2969_v33 = vmax.f32 %v2025_v10, %v8025_v50  ;;  %v8028_v18 = vrot.slane %v6471_v56, 1  ;;  %v8029_v62 = vrot.slane %v6476_v26, 1  ;;  %3456 = vst [vmem:[%s3652_s15 + $0x688] sm:$0x1] %v3210_v1 }
 0x27d   : > { %v3213_v3 = vmax.f32 %v2967_v32, 0.0  ;;  %v2026_v52 = vmax.f32 %v6410_v53, %v8026_v16  ;;  %v2027_v35 = vmax.f32 %v6423_v6, %v8027_v42  ;;  %v8030_v25 = vrot.slane %v6478_v28, 1  ;;  %3457 = vst [vmem:[%s3652_s15 + $0x690] sm:$0x1] %v3211_v43 }
 0x27e   : > { %v3214_v22 = vmax.f32 %v2968_v45, 0.0  ;;  %v2028_v12 = vmax.f32 %v6471_v56, %v8028_v18  ;;  %v2029_v59 = vmax.f32 %v6476_v26, %v8029_v62  ;;  %v8031_v60 = vrot.slane %v6410_v53, 2  ;;  %3458 = vst [vmem:[%s3652_s15 + $0x698] sm:$0x1] %v3212_v54 }
 0x27f   : > { %v2030_v47 = vmax.f32 %v6478_v28, %v8030_v25  ;;  %v8032_v14 = vrot.slane %v6423_v6, 2  ;;  %v8033_v27 = vrot.slane %v6491_v0, 1  ;;  %v8034_v20 = vrot.slane %v6539_v36, 1  ;;  %3459 = vst [vmem:[%s3652_s15 + $0x6a0] sm:$0x1] %v3213_v3 }
 0x280   : > { %v2970_v48 = vmax.f32 %v2026_v52, %v8031_v60  ;;  %v3215_v38 = vmax.f32 %v2969_v33, 0.0  ;;  %v8035_v45 = vrot.slane %v6471_v56, 2  ;;  %v8036_v53 = vrot.slane %v6476_v26, 2  ;;  %3460 = vst [vmem:[%s3652_s15 + $0x6a8] sm:$0x1] %v3214_v22 }
 0x281   : > { %v2971_v10 = vmax.f32 %v2027_v35, %v8032_v14  ;;  %v2031_v9 = vmax.f32 %v6491_v0, %v8033_v27  ;;  %v2032_v32 = vmax.f32 %v6539_v36, %v8034_v20  ;;  %v8037_v6 = vrot.slane %v6544_v55, 1 }
 0x282   : > { %v2972_v1 = vmax.f32 %v2028_v12, %v8035_v45  ;;  %v2973_v50 = vmax.f32 %v2029_v59, %v8036_v53  ;;  %v3216_v52 = vmax.f32 %v2970_v48, 0.0  ;;  %v8038_v42 = vrot.slane %v6478_v28, 2  ;;  %3461 = vst [vmem:[%s3652_s15 + $0x6b0] sm:$0x1] %v3215_v38 }
 0x283   : > { %v2033_v16 = vmax.f32 %v6544_v55, %v8037_v6  ;;  %v3217_v43 = vmax.f32 %v2971_v10, 0.0  ;;  %v8039_v33 = vrot.slane %v6491_v0, 2  ;;  %v8040_v18 = vrot.slane %v6544_v55, 2 }
 0x284   : > { %v2974_v35 = vmax.f32 %v2030_v47, %v8038_v42  ;;  %v3218_v12 = vmax.f32 %v2972_v1, 0.0  ;;  %v8041_v62 = vrot.slane %v6539_v36, 2  ;;  %v8042_v54 = vrot.slane %v6546_v29, 1  ;;  %3462 = vst [vmem:[%s3652_s15 + $0x6b8] sm:$0x1] %v3216_v52 }
 0x285   : > { %v2975_v56 = vmax.f32 %v2031_v9, %v8039_v33  ;;  %v2977_v26 = vmax.f32 %v2033_v16, %v8040_v18  ;;  %v8043_v3 = vrot.slane %v6559_v21, 1  ;;  %v3219_v0 = vmax.f32 %v2973_v50, 0.0  ;;  %3463 = vst [vmem:[%s3652_s15 + $0x6c0] sm:$0x1] %v3217_v43 }
 0x286   : > { %v2976_v59 = vmax.f32 %v2032_v32, %v8041_v62  ;;  %v2034_v28 = vmax.f32 %v6546_v29, %v8042_v54  ;;  %v8044_v55 = vrot.slane %v6607_v13, 1  ;;  %v8045_v47 = vrot.slane %v6612_v57, 1  ;;  %3464 = vst [vmem:[%s3652_s15 + $0x6c8] sm:$0x1] %v3218_v12 }
 0x287   : > { %v2035_v25 = vmax.f32 %v6559_v21, %v8043_v3  ;;  %v3220_v60 = vmax.f32 %v2974_v35, 0.0  ;;  %v8046_v48 = vrot.slane %v6546_v29, 2  ;;  %v8047_v10 = vrot.slane %v6559_v21, 2  ;;  %3465 = vst [vmem:[%s3652_s15 + $0x6d0] sm:$0x1] %v3219_v0 }
 0x288   : > { %v2036_v22 = vmax.f32 %v6607_v13, %v8044_v55  ;;  %v2037_v36 = vmax.f32 %v6612_v57, %v8045_v47  ;;  %v8048_v9 = vrot.slane %v6614_v19, 1  ;;  %v3221_v32 = vmax.f32 %v2975_v56, 0.0 }
 0x289   : > { %v2978_v14 = vmax.f32 %v2034_v28, %v8046_v48  ;;  %v2979_v27 = vmax.f32 %v2035_v25, %v8047_v10  ;;  %v8049_v38 = vrot.slane %v6607_v13, 2  ;;  %v8050_v1 = vrot.slane %v6627_v31, 1  ;;  %3466 = vst [vmem:[%s3652_s15 + $0x6d8] sm:$0x1] %v3220_v60 }
 0x28a   : > { %v2038_v20 = vmax.f32 %v6614_v19, %v8048_v9  ;;  %v3222_v29 = vmax.f32 %v2976_v59, 0.0  ;;  %v8051_v21 = vrot.slane %v6675_v46, 1  ;;  %v3223_v6 = vmax.f32 %v2977_v26, 0.0  ;;  %3467 = vst [vmem:[%s3652_s15 + $0x6e0] sm:$0x1] %v3221_v32 }
 0x28b   : > { %v2980_v45 = vmax.f32 %v2036_v22, %v8049_v38  ;;  %v2039_v53 = vmax.f32 %v6627_v31, %v8050_v1  ;;  %v8052_v16 = vrot.slane %v6612_v57, 2  ;;  %v8053_v13 = vrot.slane %v6680_v17, 1 }
 0x28c   : > { %v2040_v50 = vmax.f32 %v6675_v46, %v8051_v21  ;;  %v3224_v35 = vmax.f32 %v2978_v14, 0.0  ;;  %v8054_v43 = vrot.slane %v6614_v19, 2  ;;  %v8055_v56 = vrot.slane %v6682_v51, 1  ;;  %3468 = vst [vmem:[%s3652_s15 + $0x6e8] sm:$0x1] %v3222_v29 }
 0x28d   : > { %v2981_v52 = vmax.f32 %v2037_v36, %v8052_v16  ;;  %v2041_v42 = vmax.f32 %v6680_v17, %v8053_v13  ;;  %v3225_v26 = vmax.f32 %v2979_v27, 0.0  ;;  %v8056_v57 = vrot.slane %v6627_v31, 2  ;;  %3469 = vst [vmem:[%s3652_s15 + $0x6f0] sm:$0x1] %v3223_v6 }
 0x28e   : > { %v2982_v33 = vmax.f32 %v2038_v20, %v8054_v43  ;;  %v2042_v18 = vmax.f32 %v6682_v51, %v8055_v56  ;;  %v8057_v62 = vrot.slane %v6695_v41, 1  ;;  %v3226_v54 = vmax.f32 %v2980_v45, 0.0  ;;  %3470 = vst [vmem:[%s3652_s15 + $0x6f8] sm:$0x1] %v3224_v35  ;;  %v8073_v43 = vld [vmem:[#allocation3_spill] sm:$0xff] }
 0x28f   : > { %v2983_v12 = vmax.f32 %v2039_v53, %v8056_v57  ;;  %v8058_v19 = vrot.slane %v6675_v46, 2  ;;  %v8059_v3 = vrot.slane %v6743_v11, 1  ;;  %v3227_v0 = vmax.f32 %v2981_v52, 0.0  ;;  %3471 = vst [vmem:[%s3652_s15 + $0x700] sm:$0x1] %v3225_v26 }
 0x290   : > { %v2043_v59 = vmax.f32 %v6695_v41, %v8057_v62  ;;  %v8060_v31 = vrot.slane %v6680_v17, 2  ;;  %v8061_v22 = vrot.slane %v6748_v15, 1  ;;  %v3228_v36 = vmax.f32 %v2982_v33, 0.0  ;;  %3472 = vst [vmem:[%s3652_s15 + $0x708] sm:$0x1] %v3226_v54 }
 0x291   : > { %v2984_v28 = vmax.f32 %v2040_v50, %v8058_v19  ;;  %v2044_v25 = vmax.f32 %v6743_v11, %v8059_v3  ;;  %v8062_v46 = vrot.slane %v6682_v51, 2  ;;  %v8063_v48 = vrot.slane %v6750_v23, 1  ;;  %3473 = vst [vmem:[%s3652_s15 + $0x710] sm:$0x1] %v3227_v0 }
 0x292   : > { %v2985_v55 = vmax.f32 %v2041_v42, %v8060_v31  ;;  %v2045_v47 = vmax.f32 %v6748_v15, %v8061_v22  ;;  %v3229_v10 = vmax.f32 %v2983_v12, 0.0  ;;  %v8064_v17 = vrot.slane %v6695_v41, 2  ;;  %3474 = vst [vmem:[%s3652_s15 + $0x718] sm:$0x1] %v3228_v36 }
 0x293   : > { %v2986_v60 = vmax.f32 %v2042_v18, %v8062_v46  ;;  %v2046_v14 = vmax.f32 %v6750_v23, %v8063_v48  ;;  %v8065_v9 = vrot.slane %v6763_v61, 1  ;;  %v3230_v32 = vmax.f32 %v2984_v28, 0.0 }
 0x294   : > { %v2987_v27 = vmax.f32 %v2043_v59, %v8064_v17  ;;  %v8066_v51 = vrot.slane %v6743_v11, 2  ;;  %v8067_v45 = vrot.slane %v6811_v30, 1  ;;  %v3231_v53 = vmax.f32 %v2985_v55, 0.0  ;;  %3475 = vst [vmem:[%s3652_s15 + $0x720] sm:$0x1] %v3229_v10 }
 0x295   : > { %v2047_v20 = vmax.f32 %v6763_v61, %v8065_v9  ;;  %v8068_v41 = vrot.slane %v6748_v15, 2  ;;  %v8069_v21 = vrot.slane %v6816_v2, 1  ;;  %v3232_v6 = vmax.f32 %v2986_v60, 0.0  ;;  %3476 = vst [vmem:[%s3652_s15 + $0x728] sm:$0x1] %v3230_v32 }
 0x296   : > { %v2988_v38 = vmax.f32 %v2044_v25, %v8066_v51  ;;  %v2048_v1 = vmax.f32 %v6811_v30, %v8067_v45  ;;  %v8070_v11 = vrot.slane %v6750_v23, 2  ;;  %v8071_v52 = vrot.slane %v6818_v44, 1  ;;  %3477 = vst [vmem:[%s3652_s15 + $0x730] sm:$0x1] %v3231_v53 }
 0x297   : > { %v2989_v29 = vmax.f32 %v2045_v47, %v8068_v41  ;;  %v2049_v50 = vmax.f32 %v6816_v2, %v8069_v21  ;;  %v3233_v42 = vmax.f32 %v2987_v27, 0.0  ;;  %v8072_v15 = vrot.slane %v6763_v61, 2  ;;  %3478 = vst [vmem:[%s3652_s15 + $0x738] sm:$0x1] %v3232_v6 }
 0x298   : > { %v2990_v16 = vmax.f32 %v2046_v14, %v8070_v11  ;;  %v2050_v13 = vmax.f32 %v6818_v44, %v8071_v52  ;;  %v8074_v33 = vrot.slane %v8073_v43, 1  ;;  %v3234_v18 = vmax.f32 %v2988_v38, 0.0 }
 0x299   : > { %v2991_v35 = vmax.f32 %v2047_v20, %v8072_v15  ;;  %v8075_v23 = vrot.slane %v6811_v30, 2  ;;  %v2052_v57 = vmax.f32 %v6879_v34, %v1555_v8  ;;  %v3235_v12 = vmax.f32 %v2989_v29, 0.0  ;;  %3479 = vst [vmem:[%s3652_s15 + $0x740] sm:$0x1] %v3233_v42 }
 0x29a   : > { %v2051_v56 = vmax.f32 %v8073_v43, %v8074_v33  ;;  %v8076_v61 = vrot.slane %v6816_v2, 2  ;;  %v2053_v59 = vmax.f32 %v6884_v49, %v1557_v4  ;;  %v3236_v54 = vmax.f32 %v2990_v16, 0.0  ;;  %3480 = vst [vmem:[%s3652_s15 + $0x748] sm:$0x1] %v3234_v18 }
 0x29b   : > { %v2992_v26 = vmax.f32 %v2048_v1, %v8075_v23  ;;  %v8077_v30 = vrot.slane %v6818_v44, 2  ;;  %v2054_v8 = vmax.f32 %v6886_v5, %v1559_v37  ;;  %v3237_v28 = vmax.f32 %v2991_v35, 0.0  ;;  %3481 = vst [vmem:[%s3652_s15 + $0x750] sm:$0x1] %v3235_v12 }
 0x29c   : > { %v2993_v62 = vmax.f32 %v2049_v50, %v8076_v61  ;;  %v2995_v2 = vmax.f32 %v2051_v56, %v2497_v39  ;;  %v8078_v3 = vrot.slane %v6899_v58, 1  ;;  %v8079_v44 = vrot.slane %v6879_v34, 2  ;;  %3482 = vst [vmem:[%s3652_s15 + $0x758] sm:$0x1] %v3236_v54 }
 0x29d   : > { %v2994_v19 = vmax.f32 %v2050_v13, %v8077_v30  ;;  %v3238_v25 = vmax.f32 %v2992_v26, 0.0  ;;  %v2056_v37 = vmax.f32 %v6945_v7, %v1563_v24  ;;  %v8080_v39 = vrot.slane %v6884_v49, 2  ;;  %3483 = vst [vmem:[%s3652_s15 + $0x760] sm:$0x1] %v3237_v28 }
 0x29e   : > { %v2055_v4 = vmax.f32 %v6899_v58, %v8078_v3  ;;  %v2996_v0 = vmax.f32 %v2052_v57, %v8079_v44  ;;  %v3239_v31 = vmax.f32 %v2993_v62, 0.0  ;;  %v8081_v47 = vrot.slane %v6886_v5, 2 }
 0x29f   : > { %v2997_v55 = vmax.f32 %v2053_v59, %v8080_v39  ;;  %v3240_v22 = vmax.f32 %v2994_v19, 0.0  ;;  %v3241_v34 = vmax.f32 %v2995_v2, 0.0  ;;  %3484 = vst [vmem:[%s3652_s15 + $0x768] sm:$0x1] %v3238_v25  ;;  %v3000_v49 = vmax.f32 %v2056_v37, %v2507_v40 }
 0x2a0   : > { %v2998_v36 = vmax.f32 %v2054_v8, %v8081_v47  ;;  %v2999_v24 = vmax.f32 %v2055_v4, %v2505_v63  ;;  %v3242_v46 = vmax.f32 %v2996_v0, 0.0  ;;  %3485 = vst [vmem:[%s3652_s15 + $0x770] sm:$0x1] %v3239_v31 }
 0x2a1   : > { %v3243_v60 = vmax.f32 %v2997_v55, 0.0  ;;  %3486 = vst [vmem:[%s3652_s15 + $0x778] sm:$0x1] %v3240_v22  ;;  %v3246_v14 = vmax.f32 %v3000_v49, 0.0 }
 0x2a2   : > { %v3244_v48 = vmax.f32 %v2998_v36, 0.0  ;;  %3487 = vst [vmem:[%s3652_s15 + $0x780] sm:$0x1] %v3241_v34  ;;  %v3245_v5 = vmax.f32 %v2999_v24, 0.0 }
 0x2a3   : > { %3488 = vst [vmem:[%s3652_s15 + $0x788] sm:$0x1] %v3242_v46 }
 0x2a4   : > { %3489 = vst [vmem:[%s3652_s15 + $0x790] sm:$0x1] %v3243_v60 }
 0x2a5   : > { %3490 = vst [vmem:[%s3652_s15 + $0x798] sm:$0x1] %v3244_v48 }
 0x2a6   : > { %3491 = vst [vmem:[%s3652_s15 + $0x7a0] sm:$0x1] %v3245_v5 }
 0x2a7   : > { %3492 = vst [vmem:[%s3652_s15 + $0x7a8] sm:$0x1] %v3246_v14 }
 0x2a8 PF: > { %s11_s6 = sadd.s32 1, %s3573_s6  }
 0x2a9   : > { %p8_p4 = scmp.ge.s32.totalorder %s11_s6, 4  }
 0x2ab   :  { %10 = sbr.rel (!%p8_p4) target bundleno = 1 (0x1), region = 54 }

// kernel: _lambda_.9
= control target key start
LH: loop header
LB: loop body
LE: loop exit
PB: predicated region body
PF: predicated region fallthrough
CT: control target
= control target key end

     0   :  { %vm1578_vm0 = vcmask 1043456   ;;  %vm1466_vm1 = vcmask 719872   ;;  %s5786_s1 = inlined_call_operand.vmem [shape: bf16[600,128], index: 1, kind: input, shape index: {}]   ;;  %s5787_s2 = inlined_call_operand.vmem [shape: f32[1,128], index: 2, kind: input, shape index: {}]   ;;  %s5788_s0 = inlined_call_operand.vmem [shape: bf16[592,600], index: 0, kind: input, shape index: {}]   ;;  %s5789_s3 = inlined_call_operand.vmem [shape: f32[592,128], index: 3, kind: output, shape index: {}]  }
   0x1   :  { %v3747_v0 = vld [vmem:[%s5786_s1 + $0x38] sm:$0xff]  ;;  %v3746_v1 = vld [vmem:[%s5786_s1 + $0x30] sm:$0xff]  ;;  %v3745_v2 = vld [vmem:[%s5786_s1 + $0x28] sm:$0xff] }
   0x2   :  { %3777 = vmatpush.bf16.msra.mxu1 %v3747_v0  ;;  %3778 = vmatpush.bf16.msra.mxu2 %v3747_v0  ;;  %v3744_v3 = vld [vmem:[%s5786_s1 + $0x20] sm:$0xff]  ;;  %v3743_v4 = vld [vmem:[%s5786_s1 + $0x18] sm:$0xff]  ;;  %v3742_v5 = vld [vmem:[%s5786_s1 + $0x10] sm:$0xff] }
   0x3   :  { %1582 = vmatpush.bf16.msra.mxu0 %v3747_v0  ;;  %3779 = vmatpush.bf16.msra.mxu3 %v3747_v0  ;;  %v311_v6 = vld [vmem:[%s5786_s1 + $0x128] sm:$0xf]  ;;  %v3740_v9 = vld [vmem:[%s5786_s1] sm:$0xff]  ;;  %v2832_v10 = vld [vmem:[%s5788_s0 + $0x190] sm:$0xf] }
   0x4   :  { %v1390_v7 = vunpack.c.l.b16 %v311_v6  ;;  %v3741_v8 = vld [vmem:[%s5786_s1 + $0x8] sm:$0xff]  ;;  %v3607_v12 = vld [vmem:[%s5788_s0 + $0x1a0] sm:$0xf0]  ;;  %v3032_v13 = vld [vmem:[%s5788_s0 + $0x320] sm:$0xf] }
   0x5   :  { %v3657_v14 = vld [vmem:[%s5788_s0 + $0x330] sm:$0xf0]  ;;  %v3763_v15 = vld [vmem:[%s5786_s1 + $0xb8] sm:$0xff]  ;;  %v2632_v16 = vld [vmem:[%s5788_s0] sm:$0xf]  ;;  %v2833_v19 = vor.u32 %v3607_v12, %v2832_v10 }
   0x6   :  { %3780 = vmatpush.bf16.msra.mxu1 %v3746_v1  ;;  %3781 = vmatpush.bf16.msra.mxu2 %v3746_v1  ;;  %v1428_v11 = vpack.c.b16 %v1390_v7, %v1390_v7  ;;  %v3557_v17 = vld [vmem:[%s5788_s0 + $0x10] sm:$0xf0]  ;;  %v3755_v18 = vld [vmem:[%s5786_s1 + $0x78] sm:$0xff]  ;;  %v3033_v20 = vor.u32 %v3657_v14, %v3032_v13  ;;  %v3776_v25 = vld [vmem:[%s5786_s1 + $0x120] sm:$0xff] }
   0x7   :  { %1583 = vmatpush.bf16.msra.mxu0 %v3746_v1  ;;  %3782 = vmatpush.bf16.msra.mxu3 %v3746_v1  ;;  %v2633_v22 = vor.u32 %v3557_v17, %v2632_v16  ;;  %v3762_v23 = vld [vmem:[%s5786_s1 + $0xb0] sm:$0xff]  ;;  %v3761_v27 = vld [vmem:[%s5786_s1 + $0xa8] sm:$0xff]  ;;  %v3707_v28 = vld [vmem:[%s5788_s0 + $0x4c0] sm:$0xf0] }
   0x8   :  { %v1580_v21 = vsel %vm1578_vm0, %v1428_v11, 0  ;;  %v3754_v24 = vld [vmem:[%s5786_s1 + $0x70] sm:$0xff]  ;;  %v3753_v30 = vld [vmem:[%s5786_s1 + $0x68] sm:$0xff]  ;;  %v2852_v31 = vld [vmem:[%s5788_s0 + $0x1b8] sm:$0xf] }
   0x9   :  { %v3232_v26 = vld [vmem:[%s5788_s0 + $0x4b0] sm:$0xf]  ;;  %v3612_v32 = vld [vmem:[%s5788_s0 + $0x1c8] sm:$0xf0]  ;;  %v3052_v33 = vld [vmem:[%s5788_s0 + $0x348] sm:$0xf] }
   0xa   :  { %3783 = vmatpush.bf16.msra.mxu1 %v3745_v2  ;;  %3784 = vmatpush.bf16.msra.mxu2 %v3745_v2  ;;  %v3233_v29 = vor.u32 %v3707_v28, %v3232_v26  ;;  %v3662_v34 = vld [vmem:[%s5788_s0 + $0x358] sm:$0xf0]  ;;  %v2652_v35 = vld [vmem:[%s5788_s0 + $0x28] sm:$0xf]  ;;  %v2853_v37 = vor.u32 %v3612_v32, %v2852_v31  ;;  %v3252_v41 = vld [vmem:[%s5788_s0 + $0x4d8] sm:$0xf] }
   0xb   :  { %1584 = vmatpush.bf16.msra.mxu0 %v3745_v2  ;;  %3785 = vmatpush.bf16.msra.mxu3 %v3745_v2  ;;  %v3562_v36 = vld [vmem:[%s5788_s0 + $0x38] sm:$0xf0]  ;;  %v3053_v38 = vor.u32 %v3662_v34, %v3052_v33  ;;  %v3712_v42 = vld [vmem:[%s5788_s0 + $0x4e8] sm:$0xf0]  ;;  %v3760_v44 = vld [vmem:[%s5786_s1 + $0xa0] sm:$0xff] }
   0xc   :  { %v2653_v39 = vor.u32 %v3562_v36, %v2652_v35  ;;  %v3771_v40 = vld [vmem:[%s5786_s1 + $0xf8] sm:$0xff]  ;;  %v3253_v43 = vor.u32 %v3712_v42, %v3252_v41  ;;  %v2872_v45 = vld [vmem:[%s5788_s0 + $0x1e0] sm:$0xf]  ;;  %v3617_v46 = vld [vmem:[%s5788_s0 + $0x1f0] sm:$0xf0] }
   0xd   :  { %v3072_v47 = vld [vmem:[%s5788_s0 + $0x370] sm:$0xf]  ;;  %v3667_v48 = vld [vmem:[%s5788_s0 + $0x380] sm:$0xf0]  ;;  %v2873_v51 = vor.u32 %v3617_v46, %v2872_v45  ;;  %v3775_v56 = vld [vmem:[%s5786_s1 + $0x118] sm:$0xff] }
   0xe   :  { %3786 = vmatpush.bf16.msra.mxu1 %v3744_v3  ;;  %3787 = vmatpush.bf16.msra.mxu2 %v3744_v3  ;;  %v2672_v49 = vld [vmem:[%s5788_s0 + $0x50] sm:$0xf]  ;;  %v3567_v50 = vld [vmem:[%s5788_s0 + $0x60] sm:$0xf0]  ;;  %v3073_v52 = vor.u32 %v3667_v48, %v3072_v47  ;;  %v3272_v57 = vld [vmem:[%s5788_s0 + $0x500] sm:$0xf] }
   0xf   :  { %1585 = vmatpush.bf16.msra.mxu0 %v3744_v3  ;;  %3788 = vmatpush.bf16.msra.mxu3 %v3744_v3  ;;  %v2673_v53 = vor.u32 %v3567_v50, %v2672_v49  ;;  %v3752_v54 = vld [vmem:[%s5786_s1 + $0x60] sm:$0xff]  ;;  %v3770_v55 = vld [vmem:[%s5786_s1 + $0xf0] sm:$0xff]  ;;  %v3769_v60 = vld [vmem:[%s5786_s1 + $0xe8] sm:$0xff] }
  0x10   :  { %v3717_v58 = vld [vmem:[%s5788_s0 + $0x510] sm:$0xf0]  ;;  %v2892_v61 = vld [vmem:[%s5788_s0 + $0x208] sm:$0xf]  ;;  %v3622_v62 = vld [vmem:[%s5788_s0 + $0x218] sm:$0xf0] }
  0x11   :  { %v3273_v59 = vor.u32 %v3717_v58, %v3272_v57  ;;  %v3092_v63 = vld [vmem:[%s5788_s0 + $0x398] sm:$0xf]  ;;  %v3672_v0 = vld [vmem:[%s5788_s0 + $0x3a8] sm:$0xf0]  ;;  %v2893_v3 = vor.u32 %v3622_v62, %v2892_v61  ;;  %v3774_v11 = vld [vmem:[%s5786_s1 + $0x110] sm:$0xff] }
  0x12   :  { %3789 = vmatpush.bf16.msra.mxu1 %v3743_v4  ;;  %3790 = vmatpush.bf16.msra.mxu2 %v3743_v4  ;;  %v2692_v1 = vld [vmem:[%s5788_s0 + $0x78] sm:$0xf]  ;;  %v3572_v2 = vld [vmem:[%s5788_s0 + $0x88] sm:$0xf0]  ;;  %v3768_v12 = vld [vmem:[%s5786_s1 + $0xe0] sm:$0xff] }
  0x13   :  { %1586 = vmatpush.bf16.msra.mxu0 %v3743_v4  ;;  %3791 = vmatpush.bf16.msra.mxu3 %v3743_v4  ;;  %v3093_v4 = vor.u32 %v3672_v0, %v3092_v63  ;;  %v3759_v6 = vld [vmem:[%s5786_s1 + $0x98] sm:$0xff]  ;;  %v2912_v13 = vld [vmem:[%s5788_s0 + $0x230] sm:$0xf]  ;;  %v3627_v14 = vld [vmem:[%s5788_s0 + $0x240] sm:$0xf0] }
  0x14   :  { %v3751_v7 = vld [vmem:[%s5786_s1 + $0x58] sm:$0xff]  ;;  %v3677_v16 = vld [vmem:[%s5788_s0 + $0x3d0] sm:$0xf0]  ;;  %v2712_v17 = vld [vmem:[%s5788_s0 + $0xa0] sm:$0xf] }
  0x15   :  { %v3767_v26 = vld [vmem:[%s5786_s1 + $0xd8] sm:$0xff]  ;;  %v2732_v32 = vld [vmem:[%s5788_s0 + $0xc8] sm:$0xf]  ;;  %v3732_v41 = vld [vmem:[%s5788_s0 + $0x588] sm:$0xf0] }
  0x16   :  { %3792 = vmatpush.bf16.msra.mxu1 %v3742_v5  ;;  %3793 = vmatpush.bf16.msra.mxu2 %v3742_v5  ;;  %v2932_v28 = vld [vmem:[%s5788_s0 + $0x258] sm:$0xf]  ;;  %v3682_v31 = vld [vmem:[%s5788_s0 + $0x3f8] sm:$0xf0]  ;;  %v3749_v42 = vld [vmem:[%s5786_s1 + $0x48] sm:$0xff] }
  0x17   :  { %1587 = vmatpush.bf16.msra.mxu0 %v3742_v5  ;;  %3794 = vmatpush.bf16.msra.mxu3 %v3742_v5  ;;  %v2693_v5 = vor.u32 %v3572_v2, %v2692_v1  ;;  %v3582_v33 = vld [vmem:[%s5788_s0 + $0xd8] sm:$0xf0]  ;;  %v3637_v45 = vld [vmem:[%s5788_s0 + $0x290] sm:$0xf0]  ;;  %v3152_v46 = vld [vmem:[%s5788_s0 + $0x410] sm:$0xf] }
  0x18   :  { %v2733_v36 = vor.u32 %v3582_v33, %v2732_v32  ;;  %v3687_v47 = vld [vmem:[%s5788_s0 + $0x420] sm:$0xf0]  ;;  %v2752_v48 = vld [vmem:[%s5788_s0 + $0xf0] sm:$0xf]  ;;  %v3642_v58 = vld [vmem:[%s5788_s0 + $0x2b8] sm:$0xf0] }
  0x19   :  { %v3587_v49 = vld [vmem:[%s5788_s0 + $0x100] sm:$0xf0]  ;;  %v2772_v61 = vld [vmem:[%s5788_s0 + $0x118] sm:$0xf]  ;;  %v3592_v62 = vld [vmem:[%s5788_s0 + $0x128] sm:$0xf0] }
  0x1a   :  { %3795 = vmatpush.bf16.msra.mxu1 %v3741_v8  ;;  %3796 = vmatpush.bf16.msra.mxu2 %v3741_v8  ;;  %v3756_v1 = vld [vmem:[%s5786_s1 + $0x80] sm:$0xff]  ;;  %v2773_v2 = vor.u32 %v3592_v62, %v2772_v61 }
  0x1b   :  { %1588 = vmatpush.bf16.msra.mxu0 %v3741_v8  ;;  %3797 = vmatpush.bf16.msra.mxu3 %v3741_v8  ;;  %v3292_v8 = vld [vmem:[%s5788_s0 + $0x528] sm:$0xf] }
  0x1e   :  { %3798 = vmatpush.bf16.msra.mxu1 %v3740_v9  ;;  %3799 = vmatpush.bf16.msra.mxu2 %v3740_v9 }
  0x1f   :  { %1589 = vmatpush.bf16.msra.mxu0 %v3740_v9  ;;  %3800 = vmatpush.bf16.msra.mxu3 %v3740_v9  ;;  %v3722_v9 = vld [vmem:[%s5788_s0 + $0x538] sm:$0xf0] }
  0x20   :  { %v3293_v10 = vor.u32 %v3722_v9, %v3292_v8  ;;  %v2992_v8 = vld [vmem:[%s5788_s0 + $0x2d0] sm:$0xf] }
  0x21   :  { %1640 = vmatmul.bf16.vlgmr.msra.gmra.mxu1 %v2833_v19  ;;  %1690 = vmatmul.bf16.vlgmr.msra.gmra.mxu2 %v3033_v20  ;;  %v2913_v19 = vor.u32 %v3627_v14, %v2912_v13  ;;  %v2792_v13 = vld [vmem:[%s5788_s0 + $0x140] sm:$0xf]  ;;  %v3597_v14 = vld [vmem:[%s5788_s0 + $0x150] sm:$0xf0] }
  0x22   :  { %1970 = vmatpush.bf16.msrb.mxu2 %v3763_v15  ;;  %1776 = vmatpush.bf16.msrb.mxu1 %v3755_v18  ;;  %v3112_v15 = vld [vmem:[%s5788_s0 + $0x3c0] sm:$0xf]  ;;  %v3577_v18 = vld [vmem:[%s5788_s0 + $0xb0] sm:$0xf0] }
  0x23   :  { %2360 = vmatpush.bf16.msrb.mxu0 %v1580_v21  ;;  %1740 = vmatmul.bf16.vlgmr.msra.gmra.mxu3 %v3233_v29  ;;  %v3113_v20 = vor.u32 %v3677_v16, %v3112_v15  ;;  %v2713_v21 = vor.u32 %v3577_v18, %v2712_v17  ;;  %v3632_v29 = vld [vmem:[%s5788_s0 + $0x268] sm:$0xf0]  ;;  %v2793_v18 = vor.u32 %v3597_v14, %v2792_v13 }
  0x24   :  { %1590 = vmatmul.bf16.vlgmr.msra.gmra.mxu0 %v2633_v22  ;;  %2164 = vmatpush.bf16.msrb.mxu3 %v3771_v40  ;;  %v3758_v22 = vld [vmem:[%s5786_s1 + $0x90] sm:$0xff]  ;;  %v2933_v34 = vor.u32 %v3632_v29, %v2932_v28  ;;  %v3332_v40 = vld [vmem:[%s5788_s0 + $0x578] sm:$0xf]  ;;  %v3212_v28 = vld [vmem:[%s5788_s0 + $0x488] sm:$0xf] }
  0x25   :  { %v3702_v29 = vld [vmem:[%s5788_s0 + $0x498] sm:$0xf0] }
  0x26   :  { %1971 = vmatpush.bf16.msrb.mxu2 %v3762_v23  ;;  %1777 = vmatpush.bf16.msrb.mxu1 %v3754_v24  ;;  %v3750_v23 = vld [vmem:[%s5786_s1 + $0x50] sm:$0xff] }
  0x27   :  { %2361 = vmatpush.bf16.msrb.mxu0 %v3776_v25  ;;  %v3312_v24 = vld [vmem:[%s5788_s0 + $0x550] sm:$0xf]  ;;  %v3727_v25 = vld [vmem:[%s5788_s0 + $0x560] sm:$0xf0] }
  0x28   :  { %2165 = vmatpush.bf16.msrb.mxu3 %v3770_v55  ;;  %v3737_v55 = vld [vmem:[%s5788_s0 + $0x5b0] sm:$0xf0] }
  0x2a   :  { %1972 = vmatpush.bf16.msrb.mxu2 %v3761_v27  ;;  %1778 = vmatpush.bf16.msrb.mxu1 %v3753_v30  ;;  %v3313_v27 = vor.u32 %v3727_v25, %v3312_v24  ;;  %v3132_v30 = vld [vmem:[%s5788_s0 + $0x3e8] sm:$0xf]  ;;  %v3012_v25 = vld [vmem:[%s5788_s0 + $0x2f8] sm:$0xf] }
  0x2b   :  { %2362 = vmatpush.bf16.msrb.mxu0 %v3775_v56  ;;  %v3133_v35 = vor.u32 %v3682_v31, %v3132_v30  ;;  %v2972_v56 = vld [vmem:[%s5788_s0 + $0x2a8] sm:$0xf]  ;;  %v3602_v31 = vld [vmem:[%s5788_s0 + $0x178] sm:$0xf0] }
  0x2c   :  { %2166 = vmatpush.bf16.msrb.mxu3 %v3769_v60  ;;  %v3692_v60 = vld [vmem:[%s5788_s0 + $0x448] sm:$0xf0]  ;;  %v2973_v63 = vor.u32 %v3642_v58, %v2972_v56  ;;  %v2662_v24 = vld [vmem:[%s5788_s0 + $0x44] sm:$0xf0] }
  0x2d   :  { %v2812_v30 = vld [vmem:[%s5788_s0 + $0x168] sm:$0xf] }
  0x2e   :  { %1973 = vmatpush.bf16.msrb.mxu2 %v3760_v44  ;;  %1779 = vmatpush.bf16.msrb.mxu1 %v3752_v54  ;;  %v2952_v44 = vld [vmem:[%s5788_s0 + $0x280] sm:$0xf] }
  0x2f   :  { %2363 = vmatpush.bf16.msrb.mxu0 %v3774_v11  ;;  %v2953_v50 = vor.u32 %v3637_v45, %v2952_v44  ;;  %v3352_v54 = vld [vmem:[%s5788_s0 + $0x5a0] sm:$0xf]  ;;  %v2682_v44 = vld [vmem:[%s5788_s0 + $0x6c] sm:$0xf0]  ;;  %v3555_v45 = vld [vmem:[%s5788_s0 + $0x4] sm:$0xf] }
  0x30   :  { %2167 = vmatpush.bf16.msrb.mxu3 %v3768_v12  ;;  %v3353_v57 = vor.u32 %v3737_v55, %v3352_v54  ;;  %v3192_v11 = vld [vmem:[%s5788_s0 + $0x460] sm:$0xf]  ;;  %v3697_v12 = vld [vmem:[%s5788_s0 + $0x470] sm:$0xf0] }
  0x31   :  { %1645 = vmatmul.bf16.gmra.mxu1 %v2853_v37  ;;  %1695 = vmatmul.bf16.gmra.mxu2 %v3053_v38  ;;  %v3773_v37 = vld [vmem:[%s5786_s1 + $0x108] sm:$0xff]  ;;  %v3193_v16 = vor.u32 %v3697_v12, %v3192_v11 }
  0x32   :  { %1974 = vmatpush.bf16.msrb.mxu2 %v3759_v6  ;;  %1780 = vmatpush.bf16.msrb.mxu1 %v3751_v7  ;;  %v3757_v38 = vld [vmem:[%s5786_s1 + $0x88] sm:$0xff]  ;;  %v2642_v7 = vld [vmem:[%s5788_s0 + $0x1c] sm:$0xf0] }
  0x33   :  { %1745 = vmatmul.bf16.gmra.mxu3 %v3253_v43  ;;  %2364 = vmatpush.bf16.msrb.mxu0 %v3773_v37  ;;  %v3333_v43 = vor.u32 %v3732_v41, %v3332_v40  ;;  %v3556_v6 = vld [vmem:[%s5788_s0 + $0xc] sm:$0xf] }
  0x34   :  { %1595 = vmatmul.bf16.gmra.mxu0 %v2653_v39  ;;  %2168 = vmatpush.bf16.msrb.mxu3 %v3767_v26  ;;  %v3766_v39 = vld [vmem:[%s5786_s1 + $0xd0] sm:$0xff]  ;;  %v2645_v9 = vor.u32 %v3556_v6, %v2642_v7  ;;  %v2668_v6 = vld [vmem:[%s5788_s0 + $0x38] sm:$0xf]  ;;  %v3564_v7 = vld [vmem:[%s5788_s0 + $0x48] sm:$0xf0] }
  0x35   :  { %v2669_v12 = vor.u32 %v3564_v7, %v2668_v6 }
  0x36   :  { %1975 = vmatpush.bf16.msrb.mxu2 %v3758_v22  ;;  %1781 = vmatpush.bf16.msrb.mxu1 %v3750_v23  ;;  %v3561_v23 = vld [vmem:[%s5788_s0 + $0x34] sm:$0xf] }
  0x37   :  { %v2665_v26 = vor.u32 %v3561_v23, %v2662_v24  ;;  %v3576_v24 = vld [vmem:[%s5788_s0 + $0xac] sm:$0xf] }
  0x38   :  { %2169 = vmatpush.bf16.msrb.mxu3 %v3766_v39 }
  0x3a   :  { %1976 = vmatpush.bf16.msrb.mxu2 %v3757_v38  ;;  %1782 = vmatpush.bf16.msrb.mxu1 %v3749_v42 }
  0x3e   :  { %1977 = vmatpush.bf16.msrb.mxu2 %v3756_v1  ;;  %v3560_v1 = vld [vmem:[%s5788_s0 + $0x2c] sm:$0xf] }
  0x41   :  { %1650 = vmatmul.bf16.gmra.mxu1 %v2873_v51  ;;  %1700 = vmatmul.bf16.gmra.mxu2 %v3073_v52  ;;  %v3153_v51 = vor.u32 %v3687_v47, %v3152_v46  ;;  %v2753_v52 = vor.u32 %v3587_v49, %v2752_v48  ;;  %v2634_v47 = vld [vmem:[%s5788_s0 + $0x14] sm:$0xf0]  ;;  %v2640_v48 = vld [vmem:[%s5788_s0 + $0x8] sm:$0xf]  ;;  %v3558_v49 = vld [vmem:[%s5788_s0 + $0x18] sm:$0xf0] }
  0x42   :  { %v2641_v54 = vor.u32 %v3558_v49, %v2640_v48 }
  0x43   :  { %1750 = vmatmul.bf16.gmra.mxu3 %v3273_v59  ;;  %v3172_v59 = vld [vmem:[%s5788_s0 + $0x438] sm:$0xf] }
  0x44   :  { %1600 = vmatmul.bf16.gmra.mxu0 %v2673_v53  ;;  %v3765_v53 = vld [vmem:[%s5786_s1 + $0xc8] sm:$0xff]  ;;  %v3173_v0 = vor.u32 %v3692_v60, %v3172_v59 }
  0x45   :  { %2170 = vmatpush.bf16.msrb.mxu3 %v3765_v53  ;;  %v2637_v53 = vor.u32 %v3555_v45, %v2634_v47 }
  0x51   :  { %1655 = vmatmul.bf16.gmra.mxu1 %v2893_v3  ;;  %1705 = vmatmul.bf16.gmra.mxu2 %v3093_v4  ;;  %v3748_v3 = vld [vmem:[%s5786_s1 + $0x40] sm:$0xff] }
  0x52   :  { %v3772_v4 = vld [vmem:[%s5786_s1 + $0x100] sm:$0xff]  ;;  %1783 = vmatpush.bf16.msrb.mxu1 %v3748_v3 }
  0x53   :  { %1755 = vmatmul.bf16.gmra.mxu3 %v3293_v10  ;;  %2365 = vmatpush.bf16.msrb.mxu0 %v3772_v4  ;;  %v3647_v10 = vld [vmem:[%s5788_s0 + $0x2e0] sm:$0xf0]  ;;  %v2654_v3 = vld [vmem:[%s5788_s0 + $0x3c] sm:$0xf0]  ;;  %v2660_v4 = vld [vmem:[%s5788_s0 + $0x30] sm:$0xf] }
  0x54   :  { %1605 = vmatmul.bf16.gmra.mxu0 %v2693_v5  ;;  %v3764_v5 = vld [vmem:[%s5786_s1 + $0xc0] sm:$0xff]  ;;  %v2993_v15 = vor.u32 %v3647_v10, %v2992_v8 }
  0x55   :  { %2171 = vmatpush.bf16.msrb.mxu3 %v3764_v5  ;;  %v3563_v5 = vld [vmem:[%s5788_s0 + $0x40] sm:$0xf0] }
  0x56   :  { %v2661_v10 = vor.u32 %v3563_v5, %v2660_v4  ;;  %v3574_v4 = vld [vmem:[%s5788_s0 + $0x98] sm:$0xf0] }
  0x61   :  { %1660 = vmatmul.bf16.gmra.mxu1 %v2913_v19  ;;  %1710 = vmatmul.bf16.gmra.mxu2 %v3113_v20 }
  0x63   :  { %1760 = vmatmul.bf16.gmra.mxu3 %v3313_v27  ;;  %v3652_v27 = vld [vmem:[%s5788_s0 + $0x308] sm:$0xf0] }
  0x64   :  { %1610 = vmatmul.bf16.gmra.mxu0 %v2713_v21  ;;  %v3013_v33 = vor.u32 %v3652_v27, %v3012_v25  ;;  %v2722_v25 = vld [vmem:[%s5788_s0 + $0xbc] sm:$0xf0] }
  0x65   :  { %v2725_v27 = vor.u32 %v3576_v24, %v2722_v25 }
  0x71   :  { %1665 = vmatmul.bf16.gmra.mxu1 %v2933_v34  ;;  %1715 = vmatmul.bf16.gmra.mxu2 %v3133_v35  ;;  %v3213_v34 = vor.u32 %v3702_v29, %v3212_v28  ;;  %v2674_v28 = vld [vmem:[%s5788_s0 + $0x64] sm:$0xf0]  ;;  %v2680_v29 = vld [vmem:[%s5788_s0 + $0x58] sm:$0xf] }
  0x73   :  { %1765 = vmatmul.bf16.gmra.mxu3 %v3333_v43  ;;  %v3566_v43 = vld [vmem:[%s5788_s0 + $0x5c] sm:$0xf] }
  0x74   :  { %1615 = vmatmul.bf16.gmra.mxu0 %v2733_v36  ;;  %v2813_v36 = vor.u32 %v3602_v31, %v2812_v30  ;;  %v2685_v46 = vor.u32 %v3566_v43, %v2682_v44  ;;  %v3568_v30 = vld [vmem:[%s5788_s0 + $0x68] sm:$0xf0]  ;;  %v2688_v31 = vld [vmem:[%s5788_s0 + $0x60] sm:$0xf] }
  0x75   :  { %v2681_v43 = vor.u32 %v3568_v30, %v2680_v29  ;;  %v3586_v29 = vld [vmem:[%s5788_s0 + $0xfc] sm:$0xf]  ;;  %v2762_v30 = vld [vmem:[%s5788_s0 + $0x10c] sm:$0xf0] }
  0x81   :  { %1670 = vmatmul.bf16.gmra.mxu1 %v2953_v50  ;;  %1720 = vmatmul.bf16.gmra.mxu2 %v3153_v51  ;;  %v2648_v50 = vld [vmem:[%s5788_s0 + $0x10] sm:$0xf]  ;;  %v3559_v51 = vld [vmem:[%s5788_s0 + $0x20] sm:$0xf0] }
  0x82   :  { %v2649_v56 = vor.u32 %v3559_v51, %v2648_v50 }
  0x83   :  { %1770 = vmatmul.bf16.gmra.mxu3 %v3353_v57 }
  0x84   :  { %1620 = vmatmul.bf16.gmra.mxu0 %v2753_v52 }
  0x91   :  { %1675 = vmatmul.bf16.gmra.mxu1 %v2973_v63  ;;  %1725 = vmatmul.bf16.gmra.mxu2 %v3173_v0  ;;  %v3571_v63 = vld [vmem:[%s5788_s0 + $0x84] sm:$0xf]  ;;  %v2702_v0 = vld [vmem:[%s5788_s0 + $0x94] sm:$0xf0] }
  0x93   :  { %2172 = vmatmul.bf16.vlgmr.msrb.gmra.mxu3 %v2645_v9  ;;  %v2657_v9 = vor.u32 %v3560_v1, %v2654_v3  ;;  %v2700_v1 = vld [vmem:[%s5788_s0 + $0x80] sm:$0xf]  ;;  %v2708_v3 = vld [vmem:[%s5788_s0 + $0x88] sm:$0xf] }
  0x94   :  { %1625 = vmatmul.bf16.gmra.mxu0 %v2773_v2  ;;  %v2705_v2 = vor.u32 %v3571_v63, %v2702_v0  ;;  %v2694_v0 = vld [vmem:[%s5788_s0 + $0x8c] sm:$0xf0] }
  0x9e   :  { %v4148_v17 = vpop.f32.mrf.mxu1 }
  0xa1   :  { %v4150_v19 = vpop.f32.mrf.mxu0  ;;  %1680 = vmatmul.bf16.gmra.mxu1 %v2993_v15  ;;  %1730 = vmatmul.bf16.gmra.mxu2 %v3193_v16 }
  0xa3   :  { %2177 = vmatmul.bf16.gmra.mxu3 %v2665_v26  ;;  %v3565_v26 = vld [vmem:[%s5788_s0 + $0x54] sm:$0xf] }
  0xa4   :  { %1630 = vmatmul.bf16.gmra.mxu0 %v2793_v18  ;;  %v4152_v20 = vpop.f32.mrf.mxu2 }
  0xa5   :  { %5790 = vst [vmem:[#allocation2_spill] sm:$0xff] %v4152_v20 }
  0xa6   :  { %v4154_v21 = vpop.f32.mrf.mxu1  ;;  %v4186_v37 = vpop.f32.mrf.mxu3 }
  0xa7   :  { %5792 = vst [vmem:[#allocation4_spill] sm:$0xff] %v4186_v37 }
  0xa9   :  { %v4156_v22 = vpop.f32.mrf.mxu0 }
  0xac   :  { %v4182_v32 = vpop.f32.mrf.mxu2 }
  0xad   :  { %5791 = vst [vmem:[#allocation3_spill] sm:$0xff] %v4182_v32 }
  0xae   :  { %v4184_v35 = vpop.f32.mrf.mxu1  ;;  %v4194_v41 = vpop.f32.mrf.mxu3 }
  0xaf   :  { %5794 = vst [vmem:[#allocation6_spill] sm:$0xff] %v4194_v41 }
  0xb1   :  { %v4188_v38 = vpop.f32.mrf.mxu0  ;;  %1685 = vmatmul.bf16.gmra.mxu1 %v3013_v33  ;;  %1735 = vmatmul.bf16.gmra.mxu2 %v3213_v34  ;;  %v3569_v33 = vld [vmem:[%s5788_s0 + $0x70] sm:$0xf0] }
  0xb2   :  { %v2689_v45 = vor.u32 %v3569_v33, %v2688_v31  ;;  %v3575_v31 = vld [vmem:[%s5788_s0 + $0xa4] sm:$0xf]  ;;  %v2765_v33 = vor.u32 %v3586_v29, %v2762_v30 }
  0xb3   :  { %2182 = vmatmul.bf16.gmra.mxu3 %v2685_v46  ;;  %v3591_v30 = vld [vmem:[%s5788_s0 + $0x124] sm:$0xf] }
  0xb4   :  { %1635 = vmatmul.bf16.gmra.mxu0 %v2813_v36  ;;  %v4190_v39 = vpop.f32.mrf.mxu2  ;;  %v2677_v36 = vor.u32 %v3565_v26, %v2674_v28 }
  0xb5   :  { %5793 = vst [vmem:[#allocation5_spill] sm:$0xff] %v4190_v39 }
  0xb6   :  { %v4192_v40 = vpop.f32.mrf.mxu1  ;;  %v4226_v57 = vpop.f32.mrf.mxu3 }
  0xb7   :  { %5796 = vst [vmem:[#allocation8_spill] sm:$0xff] %v4226_v57 }
  0xb9   :  { %v4196_v42 = vpop.f32.mrf.mxu0 }
  0xbc   :  { %v4222_v52 = vpop.f32.mrf.mxu2 }
  0xbd   :  { %5795 = vst [vmem:[#allocation7_spill] sm:$0xff] %v4222_v52 }
  0xbe   :  { %v4224_v55 = vpop.f32.mrf.mxu1  ;;  %v4235_v61 = vpop.f32.mrf.mxu3 }
  0xbf   :  { %5798 = vst [vmem:[#allocation10_spill] sm:$0xff] %v4235_v61 }
  0xc1   :  { %v4228_v58 = vpop.f32.mrf.mxu0  ;;  %1784 = vmatmul.bf16.vlgmr.msrb.gmra.mxu1 %v2637_v53  ;;  %1978 = vmatmul.bf16.vlgmr.msrb.gmra.mxu2 %v2641_v54  ;;  %v3581_v53 = vld [vmem:[%s5788_s0 + $0xd4] sm:$0xf]  ;;  %v2742_v54 = vld [vmem:[%s5788_s0 + $0xe4] sm:$0xf0] }
  0xc2   :  { %v2745_v63 = vor.u32 %v3581_v53, %v2742_v54  ;;  %v2728_v53 = vld [vmem:[%s5788_s0 + $0xb0] sm:$0xf]  ;;  %v3579_v54 = vld [vmem:[%s5788_s0 + $0xc0] sm:$0xf0] }
  0xc3   :  { %2187 = vmatmul.bf16.gmra.mxu3 %v2705_v2  ;;  %v3573_v2 = vld [vmem:[%s5788_s0 + $0x90] sm:$0xf0] }
  0xc4   :  { %3518 = vmatmul.msk.bf16.vlgmr.msrb.gmra.mxu0 %vm1466_vm1, %v2649_v56  ;;  %v4231_v59 = vpop.f32.mrf.mxu2  ;;  %v3570_v56 = vld [vmem:[%s5788_s0 + $0x7c] sm:$0xf]  ;;  %v2701_v7 = vor.u32 %v3573_v2, %v2700_v1  ;;  %v2729_v2 = vor.u32 %v3579_v54, %v2728_v53  ;;  %v3583_v53 = vld [vmem:[%s5788_s0 + $0xe0] sm:$0xf0]  ;;  %v2748_v54 = vld [vmem:[%s5788_s0 + $0xd8] sm:$0xf] }
  0xc5   :  { %5797 = vst [vmem:[#allocation9_spill] sm:$0xff] %v4231_v59  ;;  %v2697_v6 = vor.u32 %v3570_v56, %v2694_v0 }
  0xc6   :  { %v4233_v60 = vpop.f32.mrf.mxu1  ;;  %v4267_v13 = vpop.f32.mrf.mxu3 }
  0xc7   :  { %5800 = vst [vmem:[#allocation12_spill] sm:$0xff] %v4267_v13 }
  0xc9   :  { %v4237_v62 = vpop.f32.mrf.mxu0 }
  0xcc   :  { %v4263_v8 = vpop.f32.mrf.mxu2 }
  0xcd   :  { %5799 = vst [vmem:[#allocation11_spill] sm:$0xff] %v4263_v8 }
  0xce   :  { %v4265_v11 = vpop.f32.mrf.mxu1  ;;  %v4276_v18 = vpop.f32.mrf.mxu3 }
  0xcf   :  { %5802 = vst [vmem:[#allocation14_spill] sm:$0xff] %v4276_v18 }
  0xd1   :  { %v4269_v14 = vpop.f32.mrf.mxu0  ;;  %1789 = vmatmul.bf16.gmra.mxu1 %v2657_v9  ;;  %1983 = vmatmul.bf16.gmra.mxu2 %v2661_v10  ;;  %v2709_v10 = vor.u32 %v3574_v4, %v2708_v3 }
  0xd3   :  { %2192 = vmatmul.bf16.gmra.mxu3 %v2725_v27 }
  0xd4   :  { %3519 = vmatmul.msk.bf16.gmra.mxu0 %vm1466_vm1, %v2669_v12  ;;  %v4272_v15 = vpop.f32.mrf.mxu2 }
  0xd5   :  { %5801 = vst [vmem:[#allocation13_spill] sm:$0xff] %v4272_v15  ;;  %v4555_v15 = vld [vmem:[%s5787_s2] ss:$0 sm:$0xff] }
  0xd6   :  { %v4274_v16 = vpop.f32.mrf.mxu1  ;;  %v4308_v46 = vpop.f32.mrf.mxu3  ;;  %v1592_v59 = vadd.f32 %v4555_v15, %v4150_v19  ;;  %v2862_v19 = vld [vmem:[%s5788_s0 + $0x1d4] sm:$0xf0] }
  0xd7   :  { %5804 = vst [vmem:[#allocation16_spill] sm:$0xff] %v4308_v46 }
  0xd9   :  { %v4278_v23 = vpop.f32.mrf.mxu0 }
  0xdc   :  { %v4304_v34 = vpop.f32.mrf.mxu2 }
  0xdd   :  { %5803 = vst [vmem:[#allocation15_spill] sm:$0xff] %v4304_v34 }
  0xde   :  { %v4306_v44 = vpop.f32.mrf.mxu1  ;;  %v4317_v50 = vpop.f32.mrf.mxu3 }
  0xdf   :  { %5806 = vst [vmem:[#allocation18_spill] sm:$0xff] %v4317_v50 }
  0xe1   :  { %v4310_v47 = vpop.f32.mrf.mxu0  ;;  %1794 = vmatmul.bf16.gmra.mxu1 %v2677_v36  ;;  %1988 = vmatmul.bf16.gmra.mxu2 %v2681_v43  ;;  %v2714_v36 = vld [vmem:[%s5788_s0 + $0xb4] sm:$0xf0]  ;;  %v2720_v43 = vld [vmem:[%s5788_s0 + $0xa8] sm:$0xf] }
  0xe3   :  { %2197 = vmatmul.bf16.gmra.mxu3 %v2745_v63  ;;  %v2717_v63 = vor.u32 %v3575_v31, %v2714_v36  ;;  %v2782_v31 = vld [vmem:[%s5788_s0 + $0x134] sm:$0xf0] }
  0xe4   :  { %3520 = vmatmul.msk.bf16.gmra.mxu0 %vm1466_vm1, %v2689_v45  ;;  %v4313_v48 = vpop.f32.mrf.mxu2  ;;  %v3578_v45 = vld [vmem:[%s5788_s0 + $0xb8] sm:$0xf0]  ;;  %v2785_v36 = vor.u32 %v3591_v30, %v2782_v31 }
  0xe5   :  { %5805 = vst [vmem:[#allocation17_spill] sm:$0xff] %v4313_v48  ;;  %v2721_v0 = vor.u32 %v3578_v45, %v2720_v43  ;;  %v2734_v43 = vld [vmem:[%s5788_s0 + $0xdc] sm:$0xf0]  ;;  %v2740_v45 = vld [vmem:[%s5788_s0 + $0xd0] sm:$0xf] }
  0xe6   :  { %v4315_v49 = vpop.f32.mrf.mxu1  ;;  %v4349_v12 = vpop.f32.mrf.mxu3  ;;  %v2741_v30 = vor.u32 %v3583_v53, %v2740_v45  ;;  %v2754_v53 = vld [vmem:[%s5788_s0 + $0x104] sm:$0xf0] }
  0xe7   :  { %5808 = vst [vmem:[#allocation20_spill] sm:$0xff] %v4349_v12 }
  0xe9   :  { %v4319_v51 = vpop.f32.mrf.mxu0 }
  0xec   :  { %v4345_v5 = vpop.f32.mrf.mxu2 }
  0xed   :  { %5807 = vst [vmem:[#allocation19_spill] sm:$0xff] %v4345_v5 }
  0xee   :  { %v4347_v9 = vpop.f32.mrf.mxu1  ;;  %v4358_v27 = vpop.f32.mrf.mxu3 }
  0xef   :  { %5810 = vst [vmem:[#allocation22_spill] sm:$0xff] %v4358_v27 }
  0xf1   :  { %v4351_v24 = vpop.f32.mrf.mxu0  ;;  %1799 = vmatmul.bf16.gmra.mxu1 %v2697_v6  ;;  %1993 = vmatmul.bf16.gmra.mxu2 %v2701_v7 }
  0xf3   :  { %2202 = vmatmul.bf16.gmra.mxu3 %v2765_v33  ;;  %v3580_v33 = vld [vmem:[%s5788_s0 + $0xcc] sm:$0xf] }
  0xf4   :  { %3521 = vmatmul.msk.bf16.gmra.mxu0 %vm1466_vm1, %v2709_v10  ;;  %v4354_v25 = vpop.f32.mrf.mxu2 }
  0xf5   :  { %5809 = vst [vmem:[#allocation21_spill] sm:$0xff] %v4354_v25 }
  0xf6   :  { %v4356_v26 = vpop.f32.mrf.mxu1  ;;  %v4390_v3 = vpop.f32.mrf.mxu3 }
  0xf7   :  { %5812 = vst [vmem:[#allocation24_spill] sm:$0xff] %v4390_v3 }
  0xf9   :  { %v4360_v28 = vpop.f32.mrf.mxu0 }
  0xfc   :  { %v4386_v56 = vpop.f32.mrf.mxu2 }
  0xfd   :  { %5811 = vst [vmem:[#allocation23_spill] sm:$0xff] %v4386_v56 }
  0xfe   :  { %v4388_v1 = vpop.f32.mrf.mxu1  ;;  %v4399_v10 = vpop.f32.mrf.mxu3 }
  0xff   :  { %5814 = vst [vmem:[#allocation26_spill] sm:$0xff] %v4399_v10 }
 0x101   :  { %v4392_v4 = vpop.f32.mrf.mxu0  ;;  %1804 = vmatmul.bf16.gmra.mxu1 %v2717_v63  ;;  %1998 = vmatmul.bf16.gmra.mxu2 %v2721_v0  ;;  %v3584_v63 = vld [vmem:[%s5788_s0 + $0xe8] sm:$0xf0] }
 0x102   :  { %v2749_v10 = vor.u32 %v3584_v63, %v2748_v54  ;;  %v2760_v54 = vld [vmem:[%s5788_s0 + $0xf8] sm:$0xf]  ;;  %v3588_v63 = vld [vmem:[%s5788_s0 + $0x108] sm:$0xf0] }
 0x103   :  { %2207 = vmatmul.bf16.gmra.mxu3 %v2785_v36 }
 0x104   :  { %3522 = vmatmul.msk.bf16.gmra.mxu0 %vm1466_vm1, %v2729_v2  ;;  %v4395_v6 = vpop.f32.mrf.mxu2  ;;  %v2737_v2 = vor.u32 %v3580_v33, %v2734_v43  ;;  %v3596_v33 = vld [vmem:[%s5788_s0 + $0x14c] sm:$0xf]  ;;  %v2802_v43 = vld [vmem:[%s5788_s0 + $0x15c] sm:$0xf0] }
 0x105   :  { %5813 = vst [vmem:[#allocation25_spill] sm:$0xff] %v4395_v6  ;;  %v2805_v45 = vor.u32 %v3596_v33, %v2802_v43 }
 0x106   :  { %v4397_v7 = vpop.f32.mrf.mxu1  ;;  %v4431_v3 = vpop.f32.mrf.mxu3 }
 0x107   :  { %5816 = vst [vmem:[#allocation28_spill] sm:$0xff] %v4431_v3 }
 0x109   :  { %v4401_v29 = vpop.f32.mrf.mxu0 }
 0x10c   :  { %v4427_v0 = vpop.f32.mrf.mxu2 }
 0x10d   :  { %5815 = vst [vmem:[#allocation27_spill] sm:$0xff] %v4427_v0 }
 0x10e   :  { %v4429_v31 = vpop.f32.mrf.mxu1  ;;  %v4440_v36 = vpop.f32.mrf.mxu3 }
 0x10f   :  { %5818 = vst [vmem:[#allocation30_spill] sm:$0xff] %v4440_v36  ;;  %v2761_v36 = vor.u32 %v3588_v63, %v2760_v54  ;;  %v2774_v54 = vld [vmem:[%s5788_s0 + $0x12c] sm:$0xf0]  ;;  %v2780_v63 = vld [vmem:[%s5788_s0 + $0x120] sm:$0xf] }
 0x111   :  { %v4433_v27 = vpop.f32.mrf.mxu0  ;;  %1809 = vmatmul.bf16.gmra.mxu1 %v2737_v2  ;;  %2003 = vmatmul.bf16.gmra.mxu2 %v2741_v30  ;;  %v2768_v2 = vld [vmem:[%s5788_s0 + $0x100] sm:$0xf]  ;;  %v3589_v30 = vld [vmem:[%s5788_s0 + $0x110] sm:$0xf0] }
 0x112   :  { %v2769_v18 = vor.u32 %v3589_v30, %v2768_v2  ;;  %v3593_v2 = vld [vmem:[%s5788_s0 + $0x130] sm:$0xf0]  ;;  %v2788_v30 = vld [vmem:[%s5788_s0 + $0x128] sm:$0xf] }
 0x113   :  { %2212 = vmatmul.bf16.gmra.mxu3 %v2805_v45 }
 0x114   :  { %3523 = vmatmul.msk.bf16.gmra.mxu0 %vm1466_vm1, %v2749_v10  ;;  %v4436_v12 = vpop.f32.mrf.mxu2  ;;  %v3585_v10 = vld [vmem:[%s5788_s0 + $0xf4] sm:$0xf] }
 0x115   :  { %5817 = vst [vmem:[#allocation29_spill] sm:$0xff] %v4436_v12  ;;  %v2757_v43 = vor.u32 %v3585_v10, %v2754_v53  ;;  %v3601_v10 = vld [vmem:[%s5788_s0 + $0x174] sm:$0xf]  ;;  %v2822_v53 = vld [vmem:[%s5788_s0 + $0x184] sm:$0xf0] }
 0x116   :  { %v4438_v50 = vpop.f32.mrf.mxu1  ;;  %v2173_v13 = vpop.f32.mrf.mxu3 }
 0x119   :  { %v4442_v46 = vpop.f32.mrf.mxu0 }
 0x11c   :  { %v4468_v33 = vpop.f32.mrf.mxu2 }
 0x11d   :  { %5819 = vst [vmem:[#allocation31_spill] sm:$0xff] %v4468_v33 }
 0x11e   :  { %v4470_v3 = vpop.f32.mrf.mxu1  ;;  %v4479_v37 = vpop.f32.mrf.mxu3 }
 0x121   :  { %v4472_v61 = vpop.f32.mrf.mxu0  ;;  %1814 = vmatmul.bf16.gmra.mxu1 %v2757_v43  ;;  %2008 = vmatmul.bf16.gmra.mxu2 %v2761_v36  ;;  %v2825_v36 = vor.u32 %v3601_v10, %v2822_v53  ;;  %v3594_v43 = vld [vmem:[%s5788_s0 + $0x138] sm:$0xf0] }
 0x122   :  { %v2789_v12 = vor.u32 %v3594_v43, %v2788_v30  ;;  %v3598_v30 = vld [vmem:[%s5788_s0 + $0x158] sm:$0xf0]  ;;  %v2808_v43 = vld [vmem:[%s5788_s0 + $0x150] sm:$0xf] }
 0x123   :  { %2217 = vmatmul.bf16.gmra.mxu3 %v2825_v36 }
 0x124   :  { %3524 = vmatmul.msk.bf16.gmra.mxu0 %vm1466_vm1, %v2769_v18  ;;  %v4475_v57 = vpop.f32.mrf.mxu2  ;;  %v3590_v18 = vld [vmem:[%s5788_s0 + $0x11c] sm:$0xf] }
 0x125   :  { %5820 = vst [vmem:[#allocation32_spill] sm:$0xff] %v4475_v57  ;;  %v2777_v53 = vor.u32 %v3590_v18, %v2774_v54  ;;  %v2781_v57 = vor.u32 %v3593_v2, %v2780_v63  ;;  %v3606_v18 = vld [vmem:[%s5788_s0 + $0x19c] sm:$0xf]  ;;  %v2842_v54 = vld [vmem:[%s5788_s0 + $0x1ac] sm:$0xf0] }
 0x126   :  { %v4477_v41 = vpop.f32.mrf.mxu1  ;;  %v4511_v0 = vpop.f32.mrf.mxu3  ;;  %v2794_v63 = vld [vmem:[%s5788_s0 + $0x154] sm:$0xf0]  ;;  %v2800_v2 = vld [vmem:[%s5788_s0 + $0x148] sm:$0xf] }
 0x129   :  { %v4481_v45 = vpop.f32.mrf.mxu0 }
 0x12c   :  { %v4507_v10 = vpop.f32.mrf.mxu2 }
 0x12d   :  { %5821 = vst [vmem:[#allocation33_spill] sm:$0xff] %v4507_v10 }
 0x12e   :  { %v4509_v33 = vpop.f32.mrf.mxu1  ;;  %v4520_v36 = vpop.f32.mrf.mxu3 }
 0x131   :  { %v4513_v6 = vpop.f32.mrf.mxu0  ;;  %1819 = vmatmul.bf16.gmra.mxu1 %v2777_v53  ;;  %2013 = vmatmul.bf16.gmra.mxu2 %v2781_v57  ;;  %v3595_v57 = vld [vmem:[%s5788_s0 + $0x144] sm:$0xf] }
 0x132   :  { %v3599_v53 = vld [vmem:[%s5788_s0 + $0x160] sm:$0xf0] }
 0x133   :  { %v2809_v48 = vor.u32 %v3599_v53, %v2808_v43 }
 0x134   :  { %3525 = vmatmul.msk.bf16.gmra.mxu0 %vm1466_vm1, %v2789_v12  ;;  %v4516_v56 = vpop.f32.mrf.mxu2  ;;  %v2845_v12 = vor.u32 %v3606_v18, %v2842_v54  ;;  %v2797_v54 = vor.u32 %v3595_v57, %v2794_v63 }
 0x135   :  { %5822 = vst [vmem:[#allocation34_spill] sm:$0xff] %v4516_v56  ;;  %v2801_v56 = vor.u32 %v3598_v30, %v2800_v2 }
 0x136   :  { %v4518_v25 = vpop.f32.mrf.mxu1  ;;  %2222 = vmatmul.bf16.gmra.mxu3 %v2845_v12  ;;  %v4550_v34 = vpop.f32.mrf.mxu3 }
 0x139   :  { %v4522_v10 = vpop.f32.mrf.mxu0 }
 0x13c   :  { %v4548_v18 = vpop.f32.mrf.mxu2 }
 0x13d   :  { %5823 = vst [vmem:[#allocation35_spill] sm:$0xff] %v4548_v18  ;;  %v3611_v18 = vld [vmem:[%s5788_s0 + $0x1c4] sm:$0xf] }
 0x13e   :  { %v1785_v5 = vpop.f32.mrf.mxu1  ;;  %v4560_v30 = vpop.f32.mrf.mxu3 }
 0x13f   :  { %v1786_v12 = vadd.f32 %v1785_v5, %v1592_v59  ;;  %v3600_v59 = vld [vmem:[%s5788_s0 + $0x16c] sm:$0xf]  ;;  %v2865_v5 = vor.u32 %v3611_v18, %v2862_v19 }
 0x140   :  { %v3604_v18 = vld [vmem:[%s5788_s0 + $0x188] sm:$0xf0] }
 0x141   :  { %v2367_v8 = vpop.f32.mrf.mxu0  ;;  %1824 = vmatmul.bf16.gmra.mxu1 %v2797_v54  ;;  %2018 = vmatmul.bf16.gmra.mxu2 %v2801_v56  ;;  %v1594_v56 = vadd.f32 %v4555_v15, %v4156_v22  ;;  %v2820_v54 = vld [vmem:[%s5788_s0 + $0x170] sm:$0xf] }
 0x144   :  { %3526 = vmatmul.msk.bf16.gmra.mxu0 %vm1466_vm1, %v2809_v48  ;;  %v1979_v57 = vpop.f32.mrf.mxu2 }
 0x145   :  { %v1980_v63 = vadd.f32 %v1979_v57, %v1786_v12  ;;  %v3603_v12 = vld [vmem:[%s5788_s0 + $0x180] sm:$0xf0] }
 0x146   :  { %v1787_v2 = vpop.f32.mrf.mxu1  ;;  %2227 = vmatmul.bf16.gmra.mxu3 %v2865_v5  ;;  %v2821_v19 = vor.u32 %v3603_v12, %v2820_v54  ;;  %v4591_v32 = vpop.f32.mrf.mxu3 }
 0x147   :  { %v2174_v43 = vadd.f32 %v2173_v13, %v1980_v63  ;;  %v2814_v13 = vld [vmem:[%s5788_s0 + $0x17c] sm:$0xf0]  ;;  %v1788_v22 = vadd.f32 %v1787_v2, %v1594_v56  ;;  %v1597_v56 = vadd.f32 %v4555_v15, %v4188_v38  ;;  %v3616_v38 = vld [vmem:[%s5788_s0 + $0x1ec] sm:$0xf] }
 0x149   :  { %v2369_v53 = vpop.f32.mrf.mxu0  ;;  %v2368_v48 = vadd.f32 %v2367_v8, %v2174_v43  ;;  %v2828_v8 = vld [vmem:[%s5788_s0 + $0x178] sm:$0xf]  ;;  %v2817_v43 = vor.u32 %v3600_v59, %v2814_v13 }
 0x14a   :  { %v2829_v39 = vor.u32 %v3604_v18, %v2828_v8  ;;  %v2840_v18 = vld [vmem:[%s5788_s0 + $0x198] sm:$0xf] }
 0x14b   :  { %2552 = vst [vmem:[%s5789_s3] sm:$0xff] %v2368_v48 }
 0x14c   :  { %v1981_v57 = vpop.f32.mrf.mxu2 }
 0x14d   :  { %v1982_v63 = vadd.f32 %v1981_v57, %v1788_v22  ;;  %v3608_v57 = vld [vmem:[%s5788_s0 + $0x1a8] sm:$0xf0] }
 0x14e   :  { %v1790_v52 = vpop.f32.mrf.mxu1  ;;  %v4600_v12 = vpop.f32.mrf.mxu3 }
 0x14f   :  { %v2176_v48 = vadd.f32 %v4479_v37, %v1982_v63  ;;  %v1791_v59 = vadd.f32 %v1790_v52, %v1597_v56  ;;  %v2848_v63 = vld [vmem:[%s5788_s0 + $0x1a0] sm:$0xf]  ;;  %v2841_v56 = vor.u32 %v3608_v57, %v2840_v18  ;;  %v1604_v57 = vadd.f32 %v4555_v15, %v4237_v62 }
 0x151   :  { %v2372_v2 = vpop.f32.mrf.mxu0  ;;  %v2370_v20 = vadd.f32 %v2369_v53, %v2176_v48  ;;  %1829 = vmatmul.bf16.gmra.mxu1 %v2817_v43  ;;  %2023 = vmatmul.bf16.gmra.mxu2 %v2821_v19  ;;  %v3605_v53 = vld [vmem:[%s5788_s0 + $0x194] sm:$0xf] }
 0x152   :  { %v3609_v43 = vld [vmem:[%s5788_s0 + $0x1b0] sm:$0xf0] }
 0x153   :  { %2553 = vst [vmem:[%s5789_s3 + $0x8] sm:$0xff] %v2370_v20  ;;  %v1599_v20 = vadd.f32 %v4555_v15, %v4196_v42 }
 0x154   :  { %3527 = vmatmul.msk.bf16.gmra.mxu0 %vm1466_vm1, %v2829_v39  ;;  %v1984_v5 = vpop.f32.mrf.mxu2  ;;  %v2882_v39 = vld [vmem:[%s5788_s0 + $0x1fc] sm:$0xf0] }
 0x155   :  { %v1985_v13 = vadd.f32 %v1984_v5, %v1791_v59  ;;  %v2885_v8 = vor.u32 %v3616_v38, %v2882_v39  ;;  %v2849_v5 = vor.u32 %v3609_v43, %v2848_v63  ;;  %v1602_v38 = vadd.f32 %v4555_v15, %v4228_v58  ;;  %v3621_v58 = vld [vmem:[%s5788_s0 + $0x214] sm:$0xf]  ;;  %v3610_v63 = vld [vmem:[%s5788_s0 + $0x1bc] sm:$0xf] }
 0x156   :  { %v1792_v54 = vpop.f32.mrf.mxu1 }
 0x157   :  { %v2179_v37 = vadd.f32 %v4511_v0, %v1985_v13  ;;  %v2834_v0 = vld [vmem:[%s5788_s0 + $0x1a4] sm:$0xf0]  ;;  %v1793_v42 = vadd.f32 %v1792_v54, %v1599_v20  ;;  %2232 = vmatmul.bf16.gmra.mxu3 %v2885_v8  ;;  %v4632_v13 = vpop.f32.mrf.mxu3 }
 0x159   :  { %v2374_v22 = vpop.f32.mrf.mxu0  ;;  %v2373_v52 = vadd.f32 %v2372_v2, %v2179_v37  ;;  %v2837_v2 = vor.u32 %v3605_v53, %v2834_v0 }
 0x15b   :  { %2554 = vst [vmem:[%s5789_s3 + $0x10] sm:$0xff] %v2373_v52 }
 0x15c   :  { %v1986_v19 = vpop.f32.mrf.mxu2 }
 0x15d   :  { %v1987_v48 = vadd.f32 %v1986_v19, %v1793_v42  ;;  %v2860_v19 = vld [vmem:[%s5788_s0 + $0x1c0] sm:$0xf] }
 0x15e   :  { %v1795_v59 = vpop.f32.mrf.mxu1 }
 0x15f   :  { %v2181_v37 = vadd.f32 %v4520_v36, %v1987_v48  ;;  %v1796_v20 = vadd.f32 %v1795_v59, %v1602_v38  ;;  %v4641_v0 = vpop.f32.mrf.mxu3  ;;  %v3613_v48 = vld [vmem:[%s5788_s0 + $0x1d0] sm:$0xf0] }
 0x161   :  { %v2377_v54 = vpop.f32.mrf.mxu0  ;;  %v2375_v39 = vadd.f32 %v2374_v22, %v2181_v37  ;;  %1834 = vmatmul.bf16.gmra.mxu1 %v2837_v2  ;;  %2028 = vmatmul.bf16.gmra.mxu2 %v2841_v56  ;;  %v2902_v22 = vld [vmem:[%s5788_s0 + $0x224] sm:$0xf0]  ;;  %v3614_v56 = vld [vmem:[%s5788_s0 + $0x1d8] sm:$0xf0] }
 0x162   :  { %v2905_v43 = vor.u32 %v3621_v58, %v2902_v22  ;;  %v2868_v2 = vld [vmem:[%s5788_s0 + $0x1c8] sm:$0xf] }
 0x163   :  { %2555 = vst [vmem:[%s5789_s3 + $0x18] sm:$0xff] %v2375_v39  ;;  %v2869_v39 = vor.u32 %v3614_v56, %v2868_v2  ;;  %v2880_v2 = vld [vmem:[%s5788_s0 + $0x1e8] sm:$0xf]  ;;  %v3618_v56 = vld [vmem:[%s5788_s0 + $0x1f8] sm:$0xf0] }
 0x164   :  { %3528 = vmatmul.msk.bf16.gmra.mxu0 %vm1466_vm1, %v2849_v5  ;;  %v1989_v52 = vpop.f32.mrf.mxu2 }
 0x165   :  { %v1990_v53 = vadd.f32 %v1989_v52, %v1796_v20 }
 0x166   :  { %v1797_v8 = vpop.f32.mrf.mxu1 }
 0x167   :  { %v2184_v36 = vadd.f32 %v4550_v34, %v1990_v53  ;;  %v2854_v34 = vld [vmem:[%s5788_s0 + $0x1cc] sm:$0xf0]  ;;  %v1798_v62 = vadd.f32 %v1797_v8, %v1604_v57  ;;  %2237 = vmatmul.bf16.gmra.mxu3 %v2905_v43  ;;  %v4673_v20 = vpop.f32.mrf.mxu3  ;;  %v1607_v8 = vadd.f32 %v4555_v15, %v4269_v14  ;;  %v3626_v14 = vld [vmem:[%s5788_s0 + $0x23c] sm:$0xf] }
 0x168   :  { %v2857_v37 = vor.u32 %v3610_v63, %v2854_v34  ;;  %v1609_v34 = vadd.f32 %v4555_v15, %v4278_v23 }
 0x169   :  { %v2379_v18 = vpop.f32.mrf.mxu0  ;;  %v2378_v42 = vadd.f32 %v2377_v54, %v2184_v36  ;;  %v2861_v54 = vor.u32 %v3613_v48, %v2860_v19  ;;  %v3615_v48 = vld [vmem:[%s5788_s0 + $0x1e4] sm:$0xf] }
 0x16b   :  { %2556 = vst [vmem:[%s5789_s3 + $0x20] sm:$0xff] %v2378_v42 }
 0x16c   :  { %v1991_v59 = vpop.f32.mrf.mxu2 }
 0x16d   :  { %v1992_v5 = vadd.f32 %v1991_v59, %v1798_v62  ;;  %v2888_v59 = vld [vmem:[%s5788_s0 + $0x1f0] sm:$0xf] }
 0x16e   :  { %v1800_v38 = vpop.f32.mrf.mxu1 }
 0x16f   :  { %v2186_v52 = vadd.f32 %v4560_v30, %v1992_v5  ;;  %v1801_v58 = vadd.f32 %v1800_v38, %v1607_v8  ;;  %v4682_v63 = vpop.f32.mrf.mxu3  ;;  %v3619_v5 = vld [vmem:[%s5788_s0 + $0x200] sm:$0xf0] }
 0x171   :  { %v2382_v53 = vpop.f32.mrf.mxu0  ;;  %v2380_v36 = vadd.f32 %v2379_v18, %v2186_v52  ;;  %1839 = vmatmul.bf16.gmra.mxu1 %v2857_v37  ;;  %2033 = vmatmul.bf16.gmra.mxu2 %v2861_v54  ;;  %v2922_v18 = vld [vmem:[%s5788_s0 + $0x24c] sm:$0xf0] }
 0x172   :  { %v2925_v62 = vor.u32 %v3626_v14, %v2922_v18 }
 0x173   :  { %2557 = vst [vmem:[%s5789_s3 + $0x28] sm:$0xff] %v2380_v36 }
 0x174   :  { %3529 = vmatmul.msk.bf16.gmra.mxu0 %vm1466_vm1, %v2869_v39  ;;  %v1994_v22 = vpop.f32.mrf.mxu2  ;;  %v2881_v39 = vor.u32 %v3618_v56, %v2880_v2  ;;  %v2900_v56 = vld [vmem:[%s5788_s0 + $0x210] sm:$0xf] }
 0x175   :  { %v1995_v57 = vadd.f32 %v1994_v22, %v1801_v58  ;;  %v1612_v22 = vadd.f32 %v4555_v15, %v4310_v47  ;;  %v3631_v47 = vld [vmem:[%s5788_s0 + $0x264] sm:$0xf] }
 0x176   :  { %v1802_v42 = vpop.f32.mrf.mxu1 }
 0x177   :  { %v2189_v30 = vadd.f32 %v4591_v32, %v1995_v57  ;;  %v2874_v32 = vld [vmem:[%s5788_s0 + $0x1f4] sm:$0xf0]  ;;  %v1803_v23 = vadd.f32 %v1802_v42, %v1609_v34  ;;  %2242 = vmatmul.bf16.gmra.mxu3 %v2925_v62  ;;  %v4714_v8 = vpop.f32.mrf.mxu3 }
 0x178   :  { %v2877_v38 = vor.u32 %v3615_v48, %v2874_v32  ;;  %v1614_v48 = vadd.f32 %v4555_v15, %v4319_v51  ;;  %v3620_v32 = vld [vmem:[%s5788_s0 + $0x20c] sm:$0xf] }
 0x179   :  { %v2384_v43 = vpop.f32.mrf.mxu0  ;;  %v2383_v19 = vadd.f32 %v2382_v53, %v2189_v30  ;;  %v2889_v53 = vor.u32 %v3619_v5, %v2888_v59  ;;  %v2908_v59 = vld [vmem:[%s5788_s0 + $0x218] sm:$0xf]  ;;  %v3624_v5 = vld [vmem:[%s5788_s0 + $0x228] sm:$0xf0] }
 0x17b   :  { %2558 = vst [vmem:[%s5789_s3 + $0x30] sm:$0xff] %v2383_v19 }
 0x17c   :  { %v1996_v37 = vpop.f32.mrf.mxu2 }
 0x17d   :  { %v1997_v54 = vadd.f32 %v1996_v37, %v1803_v23  ;;  %v3623_v23 = vld [vmem:[%s5788_s0 + $0x220] sm:$0xf0] }
 0x17e   :  { %v1805_v52 = vpop.f32.mrf.mxu1 }
 0x17f   :  { %v2191_v36 = vadd.f32 %v4600_v12, %v1997_v54  ;;  %v1806_v42 = vadd.f32 %v1805_v52, %v1612_v22  ;;  %v4723_v34 = vpop.f32.mrf.mxu3 }
 0x181   :  { %v2387_v58 = vpop.f32.mrf.mxu0  ;;  %v2385_v57 = vadd.f32 %v2384_v43, %v2191_v36  ;;  %1844 = vmatmul.bf16.gmra.mxu1 %v2877_v38  ;;  %2038 = vmatmul.bf16.gmra.mxu2 %v2881_v39  ;;  %v2942_v43 = vld [vmem:[%s5788_s0 + $0x274] sm:$0xf0]  ;;  %v2901_v39 = vor.u32 %v3623_v23, %v2900_v56  ;;  %v3628_v56 = vld [vmem:[%s5788_s0 + $0x248] sm:$0xf0]  ;;  %v2928_v23 = vld [vmem:[%s5788_s0 + $0x240] sm:$0xf] }
 0x182   :  { %v2945_v2 = vor.u32 %v3631_v47, %v2942_v43 }
 0x183   :  { %2559 = vst [vmem:[%s5789_s3 + $0x38] sm:$0xff] %v2385_v57  ;;  %v1617_v57 = vadd.f32 %v4555_v15, %v4351_v24  ;;  %v3636_v24 = vld [vmem:[%s5788_s0 + $0x28c] sm:$0xf] }
 0x184   :  { %3530 = vmatmul.msk.bf16.gmra.mxu0 %vm1466_vm1, %v2889_v53  ;;  %v1999_v30 = vpop.f32.mrf.mxu2  ;;  %v2909_v53 = vor.u32 %v3624_v5, %v2908_v59 }
 0x185   :  { %v2000_v14 = vadd.f32 %v1999_v30, %v1806_v42 }
 0x186   :  { %v1807_v18 = vpop.f32.mrf.mxu1 }
 0x187   :  { %v2194_v12 = vadd.f32 %v4632_v13, %v2000_v14  ;;  %v2894_v13 = vld [vmem:[%s5788_s0 + $0x21c] sm:$0xf0]  ;;  %v1808_v51 = vadd.f32 %v1807_v18, %v1614_v48  ;;  %2247 = vmatmul.bf16.gmra.mxu3 %v2945_v2  ;;  %v4755_v36 = vpop.f32.mrf.mxu3  ;;  %v1619_v48 = vadd.f32 %v4555_v15, %v4360_v28 }
 0x188   :  { %v2897_v38 = vor.u32 %v3620_v32, %v2894_v13  ;;  %v3625_v32 = vld [vmem:[%s5788_s0 + $0x234] sm:$0xf]  ;;  %v2920_v13 = vld [vmem:[%s5788_s0 + $0x238] sm:$0xf] }
 0x189   :  { %v2389_v19 = vpop.f32.mrf.mxu0  ;;  %v2388_v62 = vadd.f32 %v2387_v58, %v2194_v12 }
 0x18b   :  { %2560 = vst [vmem:[%s5789_s3 + $0x40] sm:$0xff] %v2388_v62 }
 0x18c   :  { %v2001_v37 = vpop.f32.mrf.mxu2 }
 0x18d   :  { %v2002_v54 = vadd.f32 %v2001_v37, %v1808_v51  ;;  %v3629_v51 = vld [vmem:[%s5788_s0 + $0x250] sm:$0xf0] }
 0x18e   :  { %v1810_v52 = vpop.f32.mrf.mxu1 }
 0x18f   :  { %v2196_v58 = vadd.f32 %v4641_v0, %v2002_v54  ;;  %v1811_v30 = vadd.f32 %v1810_v52, %v1617_v57  ;;  %v4764_v47 = vpop.f32.mrf.mxu3  ;;  %v2921_v54 = vor.u32 %v3628_v56, %v2920_v13  ;;  %v3634_v13 = vld [vmem:[%s5788_s0 + $0x278] sm:$0xf0] }
 0x191   :  { %v2392_v22 = vpop.f32.mrf.mxu0  ;;  %v2390_v42 = vadd.f32 %v2389_v19, %v2196_v58  ;;  %1849 = vmatmul.bf16.gmra.mxu1 %v2897_v38  ;;  %2043 = vmatmul.bf16.gmra.mxu2 %v2901_v39  ;;  %v2962_v19 = vld [vmem:[%s5788_s0 + $0x29c] sm:$0xf0]  ;;  %v2929_v39 = vor.u32 %v3629_v51, %v2928_v23 }
 0x192   :  { %v2965_v2 = vor.u32 %v3636_v24, %v2962_v19  ;;  %v1624_v24 = vadd.f32 %v4555_v15, %v4401_v29 }
 0x193   :  { %2561 = vst [vmem:[%s5789_s3 + $0x48] sm:$0xff] %v2390_v42 }
 0x194   :  { %3531 = vmatmul.msk.bf16.gmra.mxu0 %vm1466_vm1, %v2909_v53  ;;  %v2004_v14 = vpop.f32.mrf.mxu2 }
 0x195   :  { %v2005_v18 = vadd.f32 %v2004_v14, %v1811_v30 }
 0x196   :  { %v1812_v12 = vpop.f32.mrf.mxu1 }
 0x197   :  { %v2199_v0 = vadd.f32 %v4673_v20, %v2005_v18  ;;  %v2914_v20 = vld [vmem:[%s5788_s0 + $0x244] sm:$0xf0]  ;;  %v1813_v28 = vadd.f32 %v1812_v12, %v1619_v48  ;;  %2252 = vmatmul.bf16.gmra.mxu3 %v2965_v2  ;;  %v4796_v52 = vpop.f32.mrf.mxu3  ;;  %v3630_v48 = vld [vmem:[%s5788_s0 + $0x25c] sm:$0xf]  ;;  %v3633_v2 = vld [vmem:[%s5788_s0 + $0x270] sm:$0xf0] }
 0x198   :  { %v2917_v37 = vor.u32 %v3625_v32, %v2914_v20  ;;  %v2940_v32 = vld [vmem:[%s5788_s0 + $0x260] sm:$0xf]  ;;  %v2948_v20 = vld [vmem:[%s5788_s0 + $0x268] sm:$0xf] }
 0x199   :  { %v2394_v43 = vpop.f32.mrf.mxu0  ;;  %v2393_v62 = vadd.f32 %v2392_v22, %v2199_v0  ;;  %v1622_v22 = vadd.f32 %v4555_v15, %v4392_v4  ;;  %v3641_v4 = vld [vmem:[%s5788_s0 + $0x2b4] sm:$0xf]  ;;  %v2941_v51 = vor.u32 %v3633_v2, %v2940_v32 }
 0x19b   :  { %2562 = vst [vmem:[%s5789_s3 + $0x50] sm:$0xff] %v2393_v62 }
 0x19c   :  { %v2006_v59 = vpop.f32.mrf.mxu2 }
 0x19d   :  { %v2007_v5 = vadd.f32 %v2006_v59, %v1813_v28 }
 0x19e   :  { %v1815_v38 = vpop.f32.mrf.mxu1 }
 0x19f   :  { %v2201_v53 = vadd.f32 %v4682_v63, %v2007_v5  ;;  %v1816_v42 = vadd.f32 %v1815_v38, %v1622_v22  ;;  %v4805_v12 = vpop.f32.mrf.mxu3  ;;  %v2949_v5 = vor.u32 %v3634_v13, %v2948_v20 }
 0x1a1   :  { %v2397_v58 = vpop.f32.mrf.mxu0  ;;  %v2395_v57 = vadd.f32 %v2394_v43, %v2201_v53  ;;  %1854 = vmatmul.bf16.gmra.mxu1 %v2917_v37  ;;  %2048 = vmatmul.bf16.gmra.mxu2 %v2921_v54  ;;  %v2982_v43 = vld [vmem:[%s5788_s0 + $0x2c4] sm:$0xf0] }
 0x1a2   :  { %v2985_v62 = vor.u32 %v3641_v4, %v2982_v43  ;;  %v3635_v4 = vld [vmem:[%s5788_s0 + $0x284] sm:$0xf] }
 0x1a3   :  { %2563 = vst [vmem:[%s5789_s3 + $0x58] sm:$0xff] %v2395_v57 }
 0x1a4   :  { %3532 = vmatmul.msk.bf16.gmra.mxu0 %vm1466_vm1, %v2929_v39  ;;  %v2009_v30 = vpop.f32.mrf.mxu2  ;;  %v1627_v39 = vadd.f32 %v4555_v15, %v4433_v27  ;;  %v3646_v27 = vld [vmem:[%s5788_s0 + $0x2dc] sm:$0xf] }
 0x1a5   :  { %v2010_v14 = vadd.f32 %v2009_v30, %v1816_v42 }
 0x1a6   :  { %v1817_v18 = vpop.f32.mrf.mxu1 }
 0x1a7   :  { %v2204_v63 = vadd.f32 %v4714_v8, %v2010_v14  ;;  %v2934_v8 = vld [vmem:[%s5788_s0 + $0x26c] sm:$0xf0]  ;;  %v1818_v29 = vadd.f32 %v1817_v18, %v1624_v24  ;;  %2257 = vmatmul.bf16.gmra.mxu3 %v2985_v62  ;;  %v4837_v37 = vpop.f32.mrf.mxu3  ;;  %v2960_v24 = vld [vmem:[%s5788_s0 + $0x288] sm:$0xf]  ;;  %v3639_v62 = vld [vmem:[%s5788_s0 + $0x2a0] sm:$0xf0] }
 0x1a8   :  { %v2937_v23 = vor.u32 %v3630_v48, %v2934_v8  ;;  %v3002_v18 = vld [vmem:[%s5788_s0 + $0x2ec] sm:$0xf0] }
 0x1a9   :  { %v2399_v0 = vpop.f32.mrf.mxu0  ;;  %v2398_v19 = vadd.f32 %v2397_v58, %v2204_v63  ;;  %v1629_v63 = vadd.f32 %v4555_v15, %v4442_v46  ;;  %v3005_v43 = vor.u32 %v3646_v27, %v3002_v18  ;;  %v2968_v48 = vld [vmem:[%s5788_s0 + $0x290] sm:$0xf]  ;;  %v3643_v18 = vld [vmem:[%s5788_s0 + $0x2c0] sm:$0xf0] }
 0x1aa   :  { %v2969_v13 = vor.u32 %v3639_v62, %v2968_v48  ;;  %v2980_v27 = vld [vmem:[%s5788_s0 + $0x2b0] sm:$0xf] }
 0x1ab   :  { %2564 = vst [vmem:[%s5789_s3 + $0x60] sm:$0xff] %v2398_v19  ;;  %v3638_v19 = vld [vmem:[%s5788_s0 + $0x298] sm:$0xf0] }
 0x1ac   :  { %v2011_v56 = vpop.f32.mrf.mxu2 }
 0x1ad   :  { %v2012_v28 = vadd.f32 %v2011_v56, %v1818_v29  ;;  %v2961_v29 = vor.u32 %v3638_v19, %v2960_v24  ;;  %v2981_v24 = vor.u32 %v3643_v18, %v2980_v27 }
 0x1ae   :  { %v1820_v59 = vpop.f32.mrf.mxu1 }
 0x1af   :  { %v2206_v54 = vadd.f32 %v4723_v34, %v2012_v28  ;;  %v1821_v58 = vadd.f32 %v1820_v59, %v1627_v39  ;;  %v4846_v30 = vpop.f32.mrf.mxu3 }
 0x1b1   :  { %v2402_v38 = vpop.f32.mrf.mxu0  ;;  %v2400_v53 = vadd.f32 %v2399_v0, %v2206_v54  ;;  %1859 = vmatmul.bf16.gmra.mxu1 %v2937_v23  ;;  %2053 = vmatmul.bf16.gmra.mxu2 %v2941_v51  ;;  %v1632_v51 = vadd.f32 %v4555_v15, %v4472_v61  ;;  %v3651_v61 = vld [vmem:[%s5788_s0 + $0x304] sm:$0xf] }
 0x1b3   :  { %2565 = vst [vmem:[%s5789_s3 + $0x68] sm:$0xff] %v2400_v53 }
 0x1b4   :  { %3533 = vmatmul.msk.bf16.gmra.mxu0 %vm1466_vm1, %v2949_v5  ;;  %v2014_v22 = vpop.f32.mrf.mxu2 }
 0x1b5   :  { %v2015_v57 = vadd.f32 %v2014_v22, %v1821_v58  ;;  %v3022_v22 = vld [vmem:[%s5788_s0 + $0x314] sm:$0xf0] }
 0x1b6   :  { %v1822_v42 = vpop.f32.mrf.mxu1 }
 0x1b7   :  { %v2209_v34 = vadd.f32 %v4755_v36, %v2015_v57  ;;  %v2954_v36 = vld [vmem:[%s5788_s0 + $0x294] sm:$0xf0]  ;;  %v1823_v46 = vadd.f32 %v1822_v42, %v1629_v63  ;;  %2262 = vmatmul.bf16.gmra.mxu3 %v3005_v43  ;;  %v1634_v57 = vadd.f32 %v4555_v15, %v4481_v45 }
 0x1b8   :  { %v2957_v2 = vor.u32 %v3635_v4, %v2954_v36  ;;  %v2988_v63 = vld [vmem:[%s5788_s0 + $0x2b8] sm:$0xf] }
 0x1b9   :  { %v2404_v14 = vpop.f32.mrf.mxu0  ;;  %v2403_v0 = vadd.f32 %v2402_v38, %v2209_v34  ;;  %v4878_v56 = vpop.f32.mrf.mxu3  ;;  %v3640_v34 = vld [vmem:[%s5788_s0 + $0x2ac] sm:$0xf] }
 0x1bb   :  { %2566 = vst [vmem:[%s5789_s3 + $0x70] sm:$0xff] %v2403_v0  ;;  %v3644_v0 = vld [vmem:[%s5788_s0 + $0x2c8] sm:$0xf0] }
 0x1bc   :  { %v2016_v8 = vpop.f32.mrf.mxu2 }
 0x1bd   :  { %v2017_v32 = vadd.f32 %v2016_v8, %v1823_v46  ;;  %v2989_v46 = vor.u32 %v3644_v0, %v2988_v63  ;;  %v1642_v0 = vadd.f32 %v4555_v15, %v4148_v17  ;;  %v3661_v17 = vld [vmem:[%s5788_s0 + $0x354] sm:$0xf] }
 0x1be   :  { %v1825_v20 = vpop.f32.mrf.mxu1 }
 0x1bf   :  { %v2211_v28 = vadd.f32 %v4764_v47, %v2017_v32  ;;  %v1826_v5 = vadd.f32 %v1825_v20, %v1632_v51  ;;  %v1637_v32 = vadd.f32 %v4555_v15, %v4513_v6  ;;  %v3656_v6 = vld [vmem:[%s5788_s0 + $0x32c] sm:$0xf] }
 0x1c1   :  { %v2407_v23 = vpop.f32.mrf.mxu0  ;;  %v2405_v59 = vadd.f32 %v2404_v14, %v2211_v28  ;;  %1864 = vmatmul.bf16.gmra.mxu1 %v2957_v2  ;;  %2058 = vmatmul.bf16.gmra.mxu2 %v2961_v29  ;;  %v4887_v53 = vpop.f32.mrf.mxu3  ;;  %v3025_v14 = vor.u32 %v3651_v61, %v3022_v22  ;;  %v3008_v61 = vld [vmem:[%s5788_s0 + $0x2e0] sm:$0xf]  ;;  %v3649_v22 = vld [vmem:[%s5788_s0 + $0x2f0] sm:$0xf0] }
 0x1c2   :  { %v3009_v27 = vor.u32 %v3649_v22, %v3008_v61 }
 0x1c3   :  { %2567 = vst [vmem:[%s5789_s3 + $0x78] sm:$0xff] %v2405_v59  ;;  %v3042_v59 = vld [vmem:[%s5788_s0 + $0x33c] sm:$0xf0] }
 0x1c4   :  { %3534 = vmatmul.msk.bf16.gmra.mxu0 %vm1466_vm1, %v2969_v13  ;;  %v2019_v54 = vpop.f32.mrf.mxu2 }
 0x1c5   :  { %v2020_v38 = vadd.f32 %v2019_v54, %v1826_v5  ;;  %v1639_v5 = vadd.f32 %v4555_v15, %v4522_v10 }
 0x1c6   :  { %v1827_v39 = vpop.f32.mrf.mxu1 }
 0x1c7   :  { %v2214_v47 = vadd.f32 %v4796_v52, %v2020_v38  ;;  %v2974_v52 = vld [vmem:[%s5788_s0 + $0x2bc] sm:$0xf0]  ;;  %v1828_v45 = vadd.f32 %v1827_v39, %v1634_v57  ;;  %2267 = vmatmul.bf16.gmra.mxu3 %v3025_v14  ;;  %v3645_v38 = vld [vmem:[%s5788_s0 + $0x2d4] sm:$0xf]  ;;  %v3045_v39 = vor.u32 %v3656_v6, %v3042_v59 }
 0x1c8   :  { %v2977_v36 = vor.u32 %v3640_v34, %v2974_v52 }
 0x1c9   :  { %v2409_v58 = vpop.f32.mrf.mxu0  ;;  %v2408_v42 = vadd.f32 %v2407_v23, %v2214_v47  ;;  %v4919_v48 = vpop.f32.mrf.mxu3  ;;  %v3000_v47 = vld [vmem:[%s5788_s0 + $0x2d8] sm:$0xf] }
 0x1cb   :  { %2568 = vst [vmem:[%s5789_s3 + $0x80] sm:$0xff] %v2408_v42 }
 0x1cc   :  { %v2021_v4 = vpop.f32.mrf.mxu2 }
 0x1cd   :  { %v2022_v43 = vadd.f32 %v2021_v4, %v1828_v45 }
 0x1ce   :  { %v1830_v19 = vpop.f32.mrf.mxu1 }
 0x1cf   :  { %v2216_v62 = vadd.f32 %v4805_v12, %v2022_v43  ;;  %v1831_v29 = vadd.f32 %v1830_v19, %v1637_v32  ;;  %v1644_v32 = vadd.f32 %v4555_v15, %v4154_v21 }
 0x1d1   :  { %v2412_v8 = vpop.f32.mrf.mxu0  ;;  %v2410_v2 = vadd.f32 %v2409_v58, %v2216_v62  ;;  %1869 = vmatmul.bf16.gmra.mxu1 %v2977_v36  ;;  %2063 = vmatmul.bf16.gmra.mxu2 %v2981_v24  ;;  %v4928_v23 = vpop.f32.mrf.mxu3  ;;  %v3648_v58 = vld [vmem:[%s5788_s0 + $0x2e8] sm:$0xf0] }
 0x1d2   :  { %v3001_v14 = vor.u32 %v3648_v58, %v3000_v47 }
 0x1d3   :  { %2569 = vst [vmem:[%s5789_s3 + $0x88] sm:$0xff] %v2410_v2 }
 0x1d4   :  { %3535 = vmatmul.msk.bf16.gmra.mxu0 %vm1466_vm1, %v2989_v46  ;;  %v2024_v20 = vpop.f32.mrf.mxu2 }
 0x1d5   :  { %v2025_v13 = vadd.f32 %v2024_v20, %v1831_v29  ;;  %v3650_v29 = vld [vmem:[%s5788_s0 + $0x2fc] sm:$0xf] }
 0x1d6   :  { %v1832_v28 = vpop.f32.mrf.mxu1 }
 0x1d7   :  { %v2219_v12 = vadd.f32 %v4837_v37, %v2025_v13  ;;  %v2994_v37 = vld [vmem:[%s5788_s0 + $0x2e4] sm:$0xf0]  ;;  %v1833_v10 = vadd.f32 %v1832_v28, %v1639_v5  ;;  %2272 = vmatmul.bf16.gmra.mxu3 %v3045_v39  ;;  %v3020_v13 = vld [vmem:[%s5788_s0 + $0x300] sm:$0xf]  ;;  %v3653_v28 = vld [vmem:[%s5788_s0 + $0x310] sm:$0xf0] }
 0x1d8   :  { %v2997_v34 = vor.u32 %v3645_v38, %v2994_v37 }
 0x1d9   :  { %v2414_v51 = vpop.f32.mrf.mxu0  ;;  %v2413_v54 = vadd.f32 %v2412_v8, %v2219_v12  ;;  %v3062_v8 = vld [vmem:[%s5788_s0 + $0x364] sm:$0xf0] }
 0x1da   :  { %v4960_v18 = vpop.f32.mrf.mxu3  ;;  %v3065_v20 = vor.u32 %v3661_v17, %v3062_v8  ;;  %v3028_v12 = vld [vmem:[%s5788_s0 + $0x308] sm:$0xf] }
 0x1db   :  { %2570 = vst [vmem:[%s5789_s3 + $0x90] sm:$0xff] %v2413_v54  ;;  %v3021_v54 = vor.u32 %v3653_v28, %v3020_v13  ;;  %v1652_v13 = vadd.f32 %v4555_v15, %v4224_v55  ;;  %v3671_v55 = vld [vmem:[%s5788_s0 + $0x3a4] sm:$0xf] }
 0x1dc   :  { %v2026_v57 = vpop.f32.mrf.mxu2 }
 0x1dd   :  { %v2027_v42 = vadd.f32 %v2026_v57, %v1833_v10  ;;  %v1647_v10 = vadd.f32 %v4555_v15, %v4184_v35  ;;  %v3666_v35 = vld [vmem:[%s5788_s0 + $0x37c] sm:$0xf] }
 0x1de   :  { %v1835_v52 = vpop.f32.mrf.mxu1 }
 0x1df   :  { %v2221_v45 = vadd.f32 %v4846_v30, %v2027_v42  ;;  %v1836_v43 = vadd.f32 %v1835_v52, %v1642_v0  ;;  %v3655_v0 = vld [vmem:[%s5788_s0 + $0x324] sm:$0xf] }
 0x1e1   :  { %v2417_v63 = vpop.f32.mrf.mxu0  ;;  %v2415_v4 = vadd.f32 %v2414_v51, %v2221_v45  ;;  %1874 = vmatmul.bf16.gmra.mxu1 %v2997_v34  ;;  %2068 = vmatmul.bf16.gmra.mxu2 %v3001_v14  ;;  %v3654_v51 = vld [vmem:[%s5788_s0 + $0x318] sm:$0xf0]  ;;  %v1649_v45 = vadd.f32 %v4555_v15, %v4192_v40 }
 0x1e2   :  { %v4969_v46 = vpop.f32.mrf.mxu3  ;;  %v3029_v39 = vor.u32 %v3654_v51, %v3028_v12 }
 0x1e3   :  { %2571 = vst [vmem:[%s5789_s3 + $0x98] sm:$0xff] %v2415_v4 }
 0x1e4   :  { %3536 = vmatmul.msk.bf16.gmra.mxu0 %vm1466_vm1, %v3009_v27  ;;  %v2029_v36 = vpop.f32.mrf.mxu2  ;;  %v3082_v27 = vld [vmem:[%s5788_s0 + $0x38c] sm:$0xf0] }
 0x1e5   :  { %v2030_v24 = vadd.f32 %v2029_v36, %v1836_v43  ;;  %v3085_v4 = vor.u32 %v3666_v35, %v3082_v27  ;;  %v3040_v43 = vld [vmem:[%s5788_s0 + $0x328] sm:$0xf]  ;;  %v3658_v36 = vld [vmem:[%s5788_s0 + $0x338] sm:$0xf0] }
 0x1e6   :  { %v1837_v19 = vpop.f32.mrf.mxu1  ;;  %v3041_v8 = vor.u32 %v3658_v36, %v3040_v43 }
 0x1e7   :  { %v2224_v30 = vadd.f32 %v4878_v56, %v2030_v24  ;;  %v3014_v56 = vld [vmem:[%s5788_s0 + $0x30c] sm:$0xf0]  ;;  %v1838_v21 = vadd.f32 %v1837_v19, %v1644_v32  ;;  %2277 = vmatmul.bf16.gmra.mxu3 %v3065_v20  ;;  %v3659_v19 = vld [vmem:[%s5788_s0 + $0x340] sm:$0xf0] }
 0x1e8   :  { %v3017_v5 = vor.u32 %v3650_v29, %v3014_v56  ;;  %v3048_v24 = vld [vmem:[%s5788_s0 + $0x330] sm:$0xf] }
 0x1e9   :  { %v2419_v62 = vpop.f32.mrf.mxu0  ;;  %v2418_v2 = vadd.f32 %v2417_v63, %v2224_v30 }
 0x1ea   :  { %v5001_v37 = vpop.f32.mrf.mxu3 }
 0x1eb   :  { %2572 = vst [vmem:[%s5789_s3 + $0xa0] sm:$0xff] %v2418_v2  ;;  %v3049_v2 = vor.u32 %v3659_v19, %v3048_v24 }
 0x1ec   :  { %v2031_v6 = vpop.f32.mrf.mxu2 }
 0x1ed   :  { %v2032_v59 = vadd.f32 %v2031_v6, %v1838_v21 }
 0x1ee   :  { %v1840_v38 = vpop.f32.mrf.mxu1 }
 0x1ef   :  { %v2226_v47 = vadd.f32 %v4887_v53, %v2032_v59  ;;  %v1841_v22 = vadd.f32 %v1840_v38, %v1647_v10  ;;  %v1654_v38 = vadd.f32 %v4555_v15, %v4233_v60  ;;  %v3060_v10 = vld [vmem:[%s5788_s0 + $0x350] sm:$0xf] }
 0x1f1   :  { %v2422_v58 = vpop.f32.mrf.mxu0  ;;  %v2420_v61 = vadd.f32 %v2419_v62, %v2226_v47  ;;  %1879 = vmatmul.bf16.gmra.mxu1 %v3017_v5  ;;  %2073 = vmatmul.bf16.gmra.mxu2 %v3021_v54  ;;  %v3102_v54 = vld [vmem:[%s5788_s0 + $0x3b4] sm:$0xf0]  ;;  %v3660_v47 = vld [vmem:[%s5788_s0 + $0x34c] sm:$0xf] }
 0x1f2   :  { %v5010_v14 = vpop.f32.mrf.mxu3 }
 0x1f3   :  { %2573 = vst [vmem:[%s5789_s3 + $0xa8] sm:$0xff] %v2420_v61  ;;  %v3663_v61 = vld [vmem:[%s5788_s0 + $0x360] sm:$0xf0] }
 0x1f4   :  { %3537 = vmatmul.msk.bf16.gmra.mxu0 %vm1466_vm1, %v3029_v39  ;;  %v2034_v57 = vpop.f32.mrf.mxu2 }
 0x1f5   :  { %v2035_v42 = vadd.f32 %v2034_v57, %v1841_v22  ;;  %v3068_v22 = vld [vmem:[%s5788_s0 + $0x358] sm:$0xf]  ;;  %v3664_v57 = vld [vmem:[%s5788_s0 + $0x368] sm:$0xf0] }
 0x1f6   :  { %v1842_v34 = vpop.f32.mrf.mxu1  ;;  %v3069_v27 = vor.u32 %v3664_v57, %v3068_v22  ;;  %v5145_v57 = vld [vmem:[%s5787_s2] ss:$0 sm:$0xff] }
 0x1f7   :  { %v2229_v53 = vadd.f32 %v4919_v48, %v2035_v42  ;;  %v3034_v48 = vld [vmem:[%s5788_s0 + $0x334] sm:$0xf0]  ;;  %v1843_v40 = vadd.f32 %v1842_v34, %v1649_v45  ;;  %2282 = vmatmul.bf16.gmra.mxu3 %v3085_v4  ;;  %v1657_v4 = vadd.f32 %v4555_v15, %v4265_v11  ;;  %v3676_v11 = vld [vmem:[%s5788_s0 + $0x3cc] sm:$0xf] }
 0x1f8   :  { %v3037_v17 = vor.u32 %v3655_v0, %v3034_v48 }
 0x1f9   :  { %v2424_v52 = vpop.f32.mrf.mxu0  ;;  %v2423_v63 = vadd.f32 %v2422_v58, %v2229_v53  ;;  %v3105_v58 = vor.u32 %v3671_v55, %v3102_v54 }
 0x1fa   :  { %v5042_v29 = vpop.f32.mrf.mxu3 }
 0x1fb   :  { %2574 = vst [vmem:[%s5789_s3 + $0xb0] sm:$0xff] %v2423_v63 }
 0x1fc   :  { %v2036_v30 = vpop.f32.mrf.mxu2 }
 0x1fd   :  { %v2037_v62 = vadd.f32 %v2036_v30, %v1843_v40 }
 0x1fe   :  { %v1845_v32 = vpop.f32.mrf.mxu1 }
 0x1ff   :  { %v2231_v20 = vadd.f32 %v4928_v23, %v2037_v62  ;;  %v1846_v21 = vadd.f32 %v1845_v32, %v1652_v13  ;;  %v3122_v62 = vld [vmem:[%s5788_s0 + $0x3dc] sm:$0xf0]  ;;  %v3665_v32 = vld [vmem:[%s5788_s0 + $0x374] sm:$0xf] }
 0x200   :  { %v3088_v13 = vld [vmem:[%s5788_s0 + $0x380] sm:$0xf] }
 0x201   :  { %v2427_v56 = vpop.f32.mrf.mxu0  ;;  %v2425_v28 = vadd.f32 %v2424_v52, %v2231_v20  ;;  %1884 = vmatmul.bf16.gmra.mxu1 %v3037_v17  ;;  %2078 = vmatmul.bf16.gmra.mxu2 %v3041_v8  ;;  %v3061_v52 = vor.u32 %v3663_v61, %v3060_v10  ;;  %v1659_v17 = vadd.f32 %v4555_v15, %v4274_v16  ;;  %v3080_v20 = vld [vmem:[%s5788_s0 + $0x378] sm:$0xf] }
 0x202   :  { %v5051_v59 = vpop.f32.mrf.mxu3 }
 0x203   :  { %2575 = vst [vmem:[%s5789_s3 + $0xb8] sm:$0xff] %v2425_v28  ;;  %v3669_v28 = vld [vmem:[%s5788_s0 + $0x390] sm:$0xf0] }
 0x204   :  { %3538 = vmatmul.msk.bf16.gmra.mxu0 %vm1466_vm1, %v3049_v2  ;;  %v2039_v12 = vpop.f32.mrf.mxu2  ;;  %v3125_v2 = vor.u32 %v3676_v11, %v3122_v62  ;;  %v1667_v62 = vadd.f32 %v5145_v57, %v4347_v9  ;;  %v3686_v9 = vld [vmem:[%s5788_s0 + $0x41c] sm:$0xf] }
 0x205   :  { %v2040_v51 = vadd.f32 %v2039_v12, %v1846_v21 }
 0x206   :  { %v1847_v6 = vpop.f32.mrf.mxu1 }
 0x207   :  { %v2234_v23 = vadd.f32 %v4960_v18, %v2040_v51  ;;  %v3054_v18 = vld [vmem:[%s5788_s0 + $0x35c] sm:$0xf0]  ;;  %v1848_v60 = vadd.f32 %v1847_v6, %v1654_v38  ;;  %2287 = vmatmul.bf16.gmra.mxu3 %v3105_v58 }
 0x208   :  { %v3057_v53 = vor.u32 %v3660_v47, %v3054_v18 }
 0x209   :  { %v2429_v5 = vpop.f32.mrf.mxu0  ;;  %v2428_v39 = vadd.f32 %v2427_v56, %v2234_v23  ;;  %v3668_v56 = vld [vmem:[%s5788_s0 + $0x388] sm:$0xf0] }
 0x20a   :  { %v5083_v45 = vpop.f32.mrf.mxu3  ;;  %v3081_v6 = vor.u32 %v3668_v56, %v3080_v20 }
 0x20b   :  { %2576 = vst [vmem:[%s5789_s3 + $0xc0] sm:$0xff] %v2428_v39  ;;  %v1662_v39 = vadd.f32 %v4555_v15, %v4306_v44  ;;  %v3681_v15 = vld [vmem:[%s5788_s0 + $0x3f4] sm:$0xf]  ;;  %v3142_v44 = vld [vmem:[%s5788_s0 + $0x404] sm:$0xf0] }
 0x20c   :  { %v2041_v42 = vpop.f32.mrf.mxu2 }
 0x20d   :  { %v2042_v34 = vadd.f32 %v2041_v42, %v1848_v60  ;;  %v1664_v42 = vadd.f32 %v5145_v57, %v4315_v49 }
 0x20e   :  { %v1850_v35 = vpop.f32.mrf.mxu1 }
 0x20f   :  { %v2236_v63 = vadd.f32 %v4969_v46, %v2042_v34  ;;  %v1851_v43 = vadd.f32 %v1850_v35, %v1657_v4  ;;  %v3100_v35 = vld [vmem:[%s5788_s0 + $0x3a0] sm:$0xf] }
 0x211   :  { %v2432_v0 = vpop.f32.mrf.mxu0  ;;  %v2430_v48 = vadd.f32 %v2429_v5, %v2236_v63  ;;  %1889 = vmatmul.bf16.gmra.mxu1 %v3057_v53  ;;  %2083 = vmatmul.bf16.gmra.mxu2 %v3061_v52  ;;  %v3089_v5 = vor.u32 %v3669_v28, %v3088_v13  ;;  %v3145_v53 = vor.u32 %v3681_v15, %v3142_v44  ;;  %v3094_v52 = vld [vmem:[%s5788_s0 + $0x3ac] sm:$0xf0]  ;;  %v3108_v63 = vld [vmem:[%s5788_s0 + $0x3a8] sm:$0xf] }
 0x212   :  { %v5092_v19 = vpop.f32.mrf.mxu3  ;;  %v1669_v13 = vadd.f32 %v5145_v57, %v4356_v26 }
 0x213   :  { %2577 = vst [vmem:[%s5789_s3 + $0xc8] sm:$0xff] %v2430_v48 }
 0x214   :  { %3539 = vmatmul.msk.bf16.gmra.mxu0 %vm1466_vm1, %v3069_v27  ;;  %v2044_v36 = vpop.f32.mrf.mxu2  ;;  %v3673_v27 = vld [vmem:[%s5788_s0 + $0x3b0] sm:$0xf0] }
 0x215   :  { %v2045_v40 = vadd.f32 %v2044_v36, %v1851_v43  ;;  %v3101_v36 = vor.u32 %v3673_v27, %v3100_v35  ;;  %v3182_v35 = vld [vmem:[%s5788_s0 + $0x454] sm:$0xf0]  ;;  %v1674_v27 = vadd.f32 %v5145_v57, %v4397_v7 }
 0x216   :  { %v1852_v24 = vpop.f32.mrf.mxu1 }
 0x217   :  { %v2239_v46 = vadd.f32 %v5001_v37, %v2045_v40  ;;  %v3074_v37 = vld [vmem:[%s5788_s0 + $0x384] sm:$0xf0]  ;;  %v1853_v16 = vadd.f32 %v1852_v24, %v1659_v17  ;;  %2292 = vmatmul.bf16.gmra.mxu3 %v3125_v2 }
 0x218   :  { %v3077_v51 = vor.u32 %v3665_v32, %v3074_v37 }
 0x219   :  { %v2434_v30 = vpop.f32.mrf.mxu0  ;;  %v2433_v8 = vadd.f32 %v2432_v0, %v2239_v46  ;;  %v3674_v0 = vld [vmem:[%s5788_s0 + $0x3b8] sm:$0xf0] }
 0x21a   :  { %v5124_v55 = vpop.f32.mrf.mxu3  ;;  %v3109_v24 = vor.u32 %v3674_v0, %v3108_v63  ;;  %v3680_v63 = vld [vmem:[%s5788_s0 + $0x3ec] sm:$0xf] }
 0x21b   :  { %2578 = vst [vmem:[%s5789_s3 + $0xd0] sm:$0xff] %v2433_v8 }
 0x21c   :  { %v2046_v21 = vpop.f32.mrf.mxu2 }
 0x21d   :  { %v2047_v12 = vadd.f32 %v2046_v21, %v1853_v16  ;;  %v3162_v16 = vld [vmem:[%s5788_s0 + $0x42c] sm:$0xf0]  ;;  %v3675_v21 = vld [vmem:[%s5788_s0 + $0x3c4] sm:$0xf] }
 0x21e   :  { %v1855_v23 = vpop.f32.mrf.mxu1 }
 0x21f   :  { %v2241_v54 = vadd.f32 %v5010_v14, %v2047_v12  ;;  %v1856_v58 = vadd.f32 %v1855_v23, %v1662_v39  ;;  %v3165_v12 = vor.u32 %v3686_v9, %v3162_v16  ;;  %v3128_v23 = vld [vmem:[%s5788_s0 + $0x3d0] sm:$0xf] }
 0x221   :  { %v2437_v38 = vpop.f32.mrf.mxu0  ;;  %v2435_v47 = vadd.f32 %v2434_v30, %v2241_v54  ;;  %1894 = vmatmul.bf16.gmra.mxu1 %v3077_v51  ;;  %2088 = vmatmul.bf16.gmra.mxu2 %v3081_v6  ;;  %v3120_v51 = vld [vmem:[%s5788_s0 + $0x3c8] sm:$0xf]  ;;  %v3678_v6 = vld [vmem:[%s5788_s0 + $0x3d8] sm:$0xf0] }
 0x222   :  { %v5133_v60 = vpop.f32.mrf.mxu3 }
 0x223   :  { %2579 = vst [vmem:[%s5789_s3 + $0xd8] sm:$0xff] %v2435_v47  ;;  %v3121_v47 = vor.u32 %v3678_v6, %v3120_v51  ;;  %v3685_v6 = vld [vmem:[%s5788_s0 + $0x414] sm:$0xf] }
 0x224   :  { %3540 = vmatmul.msk.bf16.gmra.mxu0 %vm1466_vm1, %v3089_v5  ;;  %v2049_v18 = vpop.f32.mrf.mxu2  ;;  %v3679_v5 = vld [vmem:[%s5788_s0 + $0x3e0] sm:$0xf0] }
 0x225   :  { %v2050_v10 = vadd.f32 %v2049_v18, %v1856_v58  ;;  %v3129_v18 = vor.u32 %v3679_v5, %v3128_v23  ;;  %v3160_v23 = vld [vmem:[%s5788_s0 + $0x418] sm:$0xf]  ;;  %v3688_v5 = vld [vmem:[%s5788_s0 + $0x428] sm:$0xf0] }
 0x226   :  { %v1857_v61 = vpop.f32.mrf.mxu1 }
 0x227   :  { %v2244_v14 = vadd.f32 %v5042_v29, %v2050_v10  ;;  %v3670_v29 = vld [vmem:[%s5788_s0 + $0x39c] sm:$0xf]  ;;  %v1858_v49 = vadd.f32 %v1857_v61, %v1664_v42  ;;  %2297 = vmatmul.bf16.gmra.mxu3 %v3145_v53 }
 0x228   :  { %v3097_v43 = vor.u32 %v3670_v29, %v3094_v52 }
 0x229   :  { %v2439_v22 = vpop.f32.mrf.mxu0  ;;  %v2438_v34 = vadd.f32 %v2437_v38, %v2244_v14 }
 0x22a   :  { %v5170_v46 = vpop.f32.mrf.mxu3 }
 0x22b   :  { %2580 = vst [vmem:[%s5789_s3 + $0xe0] sm:$0xff] %v2438_v34 }
 0x22c   :  { %v2051_v4 = vpop.f32.mrf.mxu2 }
 0x22d   :  { %v2052_v48 = vadd.f32 %v2051_v4, %v1858_v49  ;;  %v3140_v4 = vld [vmem:[%s5788_s0 + $0x3f0] sm:$0xf] }
 0x22e   :  { %v1860_v40 = vpop.f32.mrf.mxu1 }
 0x22f   :  { %v2246_v30 = vadd.f32 %v5051_v59, %v2052_v48  ;;  %v1861_v8 = vadd.f32 %v1860_v40, %v1667_v62  ;;  %v3683_v48 = vld [vmem:[%s5788_s0 + $0x400] sm:$0xf0] }
 0x231   :  { %v2442_v11 = vpop.f32.mrf.mxu0  ;;  %v2440_v17 = vadd.f32 %v2439_v22, %v2246_v30  ;;  %1899 = vmatmul.bf16.gmra.mxu1 %v3097_v43  ;;  %2093 = vmatmul.bf16.gmra.mxu2 %v3101_v36  ;;  %v1672_v22 = vadd.f32 %v5145_v57, %v4388_v1  ;;  %v3691_v1 = vld [vmem:[%s5788_s0 + $0x444] sm:$0xf]  ;;  %v3148_v43 = vld [vmem:[%s5788_s0 + $0x3f8] sm:$0xf]  ;;  %v3684_v36 = vld [vmem:[%s5788_s0 + $0x408] sm:$0xf0] }
 0x232   :  { %v5179_v20 = vpop.f32.mrf.mxu3  ;;  %v3185_v0 = vor.u32 %v3691_v1, %v3182_v35 }
 0x233   :  { %2581 = vst [vmem:[%s5789_s3 + $0xe8] sm:$0xff] %v2440_v17  ;;  %v3149_v17 = vor.u32 %v3684_v36, %v3148_v43  ;;  %v3188_v43 = vld [vmem:[%s5788_s0 + $0x448] sm:$0xf]  ;;  %v3694_v36 = vld [vmem:[%s5788_s0 + $0x458] sm:$0xf0] }
 0x234   :  { %3541 = vmatmul.msk.bf16.gmra.mxu0 %vm1466_vm1, %v3109_v24  ;;  %v2054_v32 = vpop.f32.mrf.mxu2 }
 0x235   :  { %v2055_v2 = vadd.f32 %v2054_v32, %v1861_v8 }
 0x236   :  { %v1862_v37 = vpop.f32.mrf.mxu1 }
 0x237   :  { %v2249_v59 = vadd.f32 %v5083_v45, %v2055_v2  ;;  %v3114_v45 = vld [vmem:[%s5788_s0 + $0x3d4] sm:$0xf0]  ;;  %v1863_v26 = vadd.f32 %v1862_v37, %v1669_v13  ;;  %2302 = vmatmul.bf16.gmra.mxu3 %v3165_v12  ;;  %v1677_v37 = vadd.f32 %v5145_v57, %v4429_v31  ;;  %v3696_v31 = vld [vmem:[%s5788_s0 + $0x46c] sm:$0xf]  ;;  %v3202_v12 = vld [vmem:[%s5788_s0 + $0x47c] sm:$0xf0] }
 0x238   :  { %v3117_v39 = vor.u32 %v3675_v21, %v3114_v45  ;;  %v1679_v45 = vadd.f32 %v5145_v57, %v4438_v50 }
 0x239   :  { %v2444_v56 = vpop.f32.mrf.mxu0  ;;  %v2443_v28 = vadd.f32 %v2442_v11, %v2249_v59  ;;  %v3141_v11 = vor.u32 %v3683_v48, %v3140_v4  ;;  %v3180_v48 = vld [vmem:[%s5788_s0 + $0x440] sm:$0xf] }
 0x23a   :  { %v5211_v10 = vpop.f32.mrf.mxu3 }
 0x23b   :  { %2582 = vst [vmem:[%s5789_s3 + $0xf0] sm:$0xff] %v2443_v28 }
 0x23c   :  { %v2056_v54 = vpop.f32.mrf.mxu2 }
 0x23d   :  { %v2057_v38 = vadd.f32 %v2056_v54, %v1863_v26  ;;  %v3205_v26 = vor.u32 %v3696_v31, %v3202_v12  ;;  %v3168_v54 = vld [vmem:[%s5788_s0 + $0x420] sm:$0xf]  ;;  %v3242_v12 = vld [vmem:[%s5788_s0 + $0x4cc] sm:$0xf0] }
 0x23e   :  { %v1865_v58 = vpop.f32.mrf.mxu1 }
 0x23f   :  { %v2251_v61 = vadd.f32 %v5092_v19, %v2057_v38  ;;  %v1866_v44 = vadd.f32 %v1865_v58, %v1672_v22  ;;  %v3689_v38 = vld [vmem:[%s5788_s0 + $0x430] sm:$0xf0] }
 0x241   :  { %v2447_v14 = vpop.f32.mrf.mxu0  ;;  %v2445_v15 = vadd.f32 %v2444_v56, %v2251_v61  ;;  %1904 = vmatmul.bf16.gmra.mxu1 %v3117_v39  ;;  %2098 = vmatmul.bf16.gmra.mxu2 %v3121_v47 }
 0x242   :  { %v5220_v53 = vpop.f32.mrf.mxu3 }
 0x243   :  { %2583 = vst [vmem:[%s5789_s3 + $0xf8] sm:$0xff] %v2445_v15 }
 0x244   :  { %3542 = vmatmul.msk.bf16.gmra.mxu0 %vm1466_vm1, %v3129_v18  ;;  %v2059_v42 = vpop.f32.mrf.mxu2  ;;  %v3161_v18 = vor.u32 %v3688_v5, %v3160_v23  ;;  %v3698_v23 = vld [vmem:[%s5788_s0 + $0x478] sm:$0xf0]  ;;  %v3208_v5 = vld [vmem:[%s5788_s0 + $0x470] sm:$0xf] }
 0x245   :  { %v2060_v34 = vadd.f32 %v2059_v42, %v1866_v44  ;;  %v1682_v42 = vadd.f32 %v5145_v57, %v4470_v3  ;;  %v3701_v3 = vld [vmem:[%s5788_s0 + $0x494] sm:$0xf] }
 0x246   :  { %v1867_v29 = vpop.f32.mrf.mxu1 }
 0x247   :  { %v2254_v19 = vadd.f32 %v5124_v55, %v2060_v34  ;;  %v3134_v55 = vld [vmem:[%s5788_s0 + $0x3fc] sm:$0xf0]  ;;  %v1868_v7 = vadd.f32 %v1867_v29, %v1674_v27  ;;  %2307 = vmatmul.bf16.gmra.mxu3 %v3185_v0 }
 0x248   :  { %v3137_v30 = vor.u32 %v3680_v63, %v3134_v55  ;;  %v1684_v63 = vadd.f32 %v5145_v57, %v4477_v41  ;;  %v3690_v55 = vld [vmem:[%s5788_s0 + $0x43c] sm:$0xf] }
 0x249   :  { %v2449_v52 = vpop.f32.mrf.mxu0  ;;  %v2448_v49 = vadd.f32 %v2447_v14, %v2254_v19  ;;  %v3169_v14 = vor.u32 %v3689_v38, %v3168_v54 }
 0x24a   :  { %v5252_v8 = vpop.f32.mrf.mxu3 }
 0x24b   :  { %2584 = vst [vmem:[%s5789_s3 + $0x100] sm:$0xff] %v2448_v49  ;;  %v3222_v49 = vld [vmem:[%s5788_s0 + $0x4a4] sm:$0xf0] }
 0x24c   :  { %v2061_v40 = vpop.f32.mrf.mxu2  ;;  %v3225_v4 = vor.u32 %v3701_v3, %v3222_v49  ;;  %v3711_v3 = vld [vmem:[%s5788_s0 + $0x4e4] sm:$0xf]  ;;  %v3262_v49 = vld [vmem:[%s5788_s0 + $0x4f4] sm:$0xf0] }
 0x24d   :  { %v2062_v24 = vadd.f32 %v2061_v40, %v1868_v7  ;;  %v3693_v7 = vld [vmem:[%s5788_s0 + $0x450] sm:$0xf0] }
 0x24e   :  { %v1870_v62 = vpop.f32.mrf.mxu1 }
 0x24f   :  { %v2256_v32 = vadd.f32 %v5133_v60, %v2062_v24  ;;  %v1871_v56 = vadd.f32 %v1870_v62, %v1677_v37 }
 0x251   :  { %v2452_v2 = vpop.f32.mrf.mxu0  ;;  %v2450_v59 = vadd.f32 %v2449_v52, %v2256_v32  ;;  %1909 = vmatmul.bf16.gmra.mxu1 %v3137_v30  ;;  %2103 = vmatmul.bf16.gmra.mxu2 %v3141_v11  ;;  %v3181_v11 = vor.u32 %v3693_v7, %v3180_v48  ;;  %v3220_v48 = vld [vmem:[%s5788_s0 + $0x490] sm:$0xf]  ;;  %v3703_v7 = vld [vmem:[%s5788_s0 + $0x4a0] sm:$0xf0] }
 0x252   :  { %v5261_v28 = vpop.f32.mrf.mxu3 }
 0x253   :  { %2585 = vst [vmem:[%s5789_s3 + $0x108] sm:$0xff] %v2450_v59  ;;  %v1687_v59 = vadd.f32 %v5145_v57, %v4509_v33  ;;  %v3706_v33 = vld [vmem:[%s5788_s0 + $0x4bc] sm:$0xf] }
 0x254   :  { %3543 = vmatmul.msk.bf16.gmra.mxu0 %vm1466_vm1, %v3149_v17  ;;  %v2064_v9 = vpop.f32.mrf.mxu2  ;;  %v3189_v17 = vor.u32 %v3694_v36, %v3188_v43  ;;  %v3228_v43 = vld [vmem:[%s5788_s0 + $0x498] sm:$0xf]  ;;  %v3704_v36 = vld [vmem:[%s5788_s0 + $0x4a8] sm:$0xf0] }
 0x255   :  { %v2065_v16 = vadd.f32 %v2064_v9, %v1871_v56 }
 0x256   :  { %v1872_v13 = vpop.f32.mrf.mxu1 }
 0x257   :  { %v2259_v60 = vadd.f32 %v5170_v46, %v2065_v16  ;;  %v3154_v46 = vld [vmem:[%s5788_s0 + $0x424] sm:$0xf0]  ;;  %v1873_v50 = vadd.f32 %v1872_v13, %v1679_v45  ;;  %2312 = vmatmul.bf16.gmra.mxu3 %v3205_v26  ;;  %v1689_v45 = vadd.f32 %v5145_v57, %v4518_v25  ;;  %v3245_v26 = vor.u32 %v3706_v33, %v3242_v12 }
 0x258   :  { %v3157_v58 = vor.u32 %v3685_v6, %v3154_v46  ;;  %v3695_v6 = vld [vmem:[%s5788_s0 + $0x464] sm:$0xf]  ;;  %v3200_v46 = vld [vmem:[%s5788_s0 + $0x468] sm:$0xf] }
 0x259   :  { %v2454_v21 = vpop.f32.mrf.mxu0  ;;  %v2453_v51 = vadd.f32 %v2452_v2, %v2259_v60 }
 0x25a   :  { %v5293_v22 = vpop.f32.mrf.mxu3 }
 0x25b   :  { %2586 = vst [vmem:[%s5789_s3 + $0x110] sm:$0xff] %v2453_v51 }
 0x25c   :  { %v2066_v39 = vpop.f32.mrf.mxu2 }
 0x25d   :  { %v2067_v47 = vadd.f32 %v2066_v39, %v1873_v50  ;;  %v3699_v50 = vld [vmem:[%s5788_s0 + $0x480] sm:$0xf0] }
 0x25e   :  { %v1875_v61 = vpop.f32.mrf.mxu1 }
 0x25f   :  { %v2261_v15 = vadd.f32 %v5179_v20, %v2067_v47  ;;  %v1876_v29 = vadd.f32 %v1875_v61, %v1682_v42  ;;  %v3201_v47 = vor.u32 %v3698_v23, %v3200_v46  ;;  %v3705_v46 = vld [vmem:[%s5788_s0 + $0x4b4] sm:$0xf] }
 0x261   :  { %v2457_v44 = vpop.f32.mrf.mxu0  ;;  %v2455_v34 = vadd.f32 %v2454_v21, %v2261_v15  ;;  %1914 = vmatmul.bf16.gmra.mxu1 %v3157_v58  ;;  %2108 = vmatmul.bf16.gmra.mxu2 %v3161_v18  ;;  %v3209_v18 = vor.u32 %v3699_v50, %v3208_v5  ;;  %v3708_v5 = vld [vmem:[%s5788_s0 + $0x4c8] sm:$0xf0] }
 0x262   :  { %v5302_v35 = vpop.f32.mrf.mxu3 }
 0x263   :  { %2587 = vst [vmem:[%s5789_s3 + $0x118] sm:$0xff] %v2455_v34 }
 0x264   :  { %3544 = vmatmul.msk.bf16.gmra.mxu0 %vm1466_vm1, %v3169_v14  ;;  %v2069_v19 = vpop.f32.mrf.mxu2 }
 0x265   :  { %v2070_v52 = vadd.f32 %v2069_v19, %v1876_v29 }
 0x266   :  { %v1877_v1 = vpop.f32.mrf.mxu1 }
 0x267   :  { %v2264_v20 = vadd.f32 %v5211_v10, %v2070_v52  ;;  %v3174_v10 = vld [vmem:[%s5788_s0 + $0x44c] sm:$0xf0]  ;;  %v1878_v41 = vadd.f32 %v1877_v1, %v1684_v63  ;;  %2317 = vmatmul.bf16.gmra.mxu3 %v3225_v4  ;;  %v5825_v63 = vld [vmem:[#allocation3_spill] sm:$0xff] }
 0x268   :  { %v3177_v30 = vor.u32 %v3690_v55, %v3174_v10  ;;  %v3700_v4 = vld [vmem:[%s5788_s0 + $0x48c] sm:$0xf]  ;;  %v3265_v10 = vor.u32 %v3711_v3, %v3262_v49 }
 0x269   :  { %v2459_v27 = vpop.f32.mrf.mxu0  ;;  %v2458_v0 = vadd.f32 %v2457_v44, %v2264_v20  ;;  %v5824_v44 = vld [vmem:[#allocation2_spill] sm:$0xff] }
 0x26a   :  { %v5334_v32 = vpop.f32.mrf.mxu3  ;;  %v1692_v42 = vadd.f32 %v5145_v57, %v5824_v44 }
 0x26b   :  { %2588 = vst [vmem:[%s5789_s3 + $0x120] sm:$0xff] %v2458_v0  ;;  %v1694_v0 = vadd.f32 %v5145_v57, %v5825_v63 }
 0x26c   :  { %v2071_v40 = vpop.f32.mrf.mxu2 }
 0x26d   :  { %v2072_v24 = vadd.f32 %v2071_v40, %v1878_v41 }
 0x26e   :  { %v1880_v62 = vpop.f32.mrf.mxu1 }
 0x26f   :  { %v2266_v2 = vadd.f32 %v5220_v53, %v2072_v24  ;;  %v1881_v9 = vadd.f32 %v1880_v62, %v1687_v59 }
 0x271   :  { %v2462_v37 = vpop.f32.mrf.mxu0  ;;  %v2460_v56 = vadd.f32 %v2459_v27, %v2266_v2  ;;  %1919 = vmatmul.bf16.gmra.mxu1 %v3177_v30  ;;  %2113 = vmatmul.bf16.gmra.mxu2 %v3181_v11  ;;  %v3221_v11 = vor.u32 %v3703_v7, %v3220_v48  ;;  %v3710_v48 = vld [vmem:[%s5788_s0 + $0x4dc] sm:$0xf] }
 0x272   :  { %v5343_v21 = vpop.f32.mrf.mxu3 }
 0x273   :  { %2589 = vst [vmem:[%s5789_s3 + $0x128] sm:$0xff] %v2460_v56  ;;  %v5826_v56 = vld [vmem:[#allocation5_spill] sm:$0xff] }
 0x274   :  { %3545 = vmatmul.msk.bf16.gmra.mxu0 %vm1466_vm1, %v3189_v17  ;;  %v2074_v16 = vpop.f32.mrf.mxu2  ;;  %v3229_v17 = vor.u32 %v3704_v36, %v3228_v43  ;;  %v3713_v43 = vld [vmem:[%s5788_s0 + $0x4f0] sm:$0xf0] }
 0x275   :  { %v2075_v13 = vadd.f32 %v2074_v16, %v1881_v9  ;;  %v1697_v9 = vadd.f32 %v5145_v57, %v5826_v56 }
 0x276   :  { %v1882_v60 = vpop.f32.mrf.mxu1 }
 0x277   :  { %v2269_v53 = vadd.f32 %v5252_v8, %v2075_v13  ;;  %v3194_v8 = vld [vmem:[%s5788_s0 + $0x474] sm:$0xf0]  ;;  %v1883_v25 = vadd.f32 %v1882_v60, %v1689_v45  ;;  %2322 = vmatmul.bf16.gmra.mxu3 %v3245_v26  ;;  %v3716_v45 = vld [vmem:[%s5788_s0 + $0x50c] sm:$0xf] }
 0x278   :  { %v3197_v39 = vor.u32 %v3695_v6, %v3194_v8  ;;  %v5827_v6 = vld [vmem:[#allocation7_spill] sm:$0xff] }
 0x279   :  { %v2464_v31 = vpop.f32.mrf.mxu0  ;;  %v2463_v51 = vadd.f32 %v2462_v37, %v2269_v53  ;;  %v1699_v26 = vadd.f32 %v5145_v57, %v5827_v6 }
 0x27a   :  { %v5375_v61 = vpop.f32.mrf.mxu3 }
 0x27b   :  { %2590 = vst [vmem:[%s5789_s3 + $0x130] sm:$0xff] %v2463_v51  ;;  %v3282_v51 = vld [vmem:[%s5788_s0 + $0x51c] sm:$0xf0] }
 0x27c   :  { %v2076_v54 = vpop.f32.mrf.mxu2  ;;  %v3285_v23 = vor.u32 %v3716_v45, %v3282_v51 }
 0x27d   :  { %v2077_v38 = vadd.f32 %v2076_v54, %v1883_v25  ;;  %v3240_v25 = vld [vmem:[%s5788_s0 + $0x4b8] sm:$0xf]  ;;  %v3248_v54 = vld [vmem:[%s5788_s0 + $0x4c0] sm:$0xf] }
 0x27e   :  { %v1885_v58 = vpop.f32.mrf.mxu1 }
 0x27f   :  { %v2271_v14 = vadd.f32 %v5261_v28, %v2077_v38  ;;  %v1886_v29 = vadd.f32 %v1885_v58, %v1692_v42  ;;  %v3709_v38 = vld [vmem:[%s5788_s0 + $0x4d0] sm:$0xf0] }
 0x281   :  { %v2467_v15 = vpop.f32.mrf.mxu0  ;;  %v2465_v34 = vadd.f32 %v2464_v31, %v2271_v14  ;;  %1924 = vmatmul.bf16.gmra.mxu1 %v3197_v39  ;;  %2118 = vmatmul.bf16.gmra.mxu2 %v3201_v47 }
 0x282   :  { %v5384_v20 = vpop.f32.mrf.mxu3 }
 0x283   :  { %2591 = vst [vmem:[%s5789_s3 + $0x138] sm:$0xff] %v2465_v34 }
 0x284   :  { %3546 = vmatmul.msk.bf16.gmra.mxu0 %vm1466_vm1, %v3209_v18  ;;  %v2079_v19 = vpop.f32.mrf.mxu2  ;;  %v3241_v18 = vor.u32 %v3708_v5, %v3240_v25  ;;  %v3715_v25 = vld [vmem:[%s5788_s0 + $0x504] sm:$0xf] }
 0x285   :  { %v2080_v52 = vadd.f32 %v2079_v19, %v1886_v29  ;;  %v5828_v29 = vld [vmem:[#allocation9_spill] sm:$0xff] }
 0x286   :  { %v1887_v1 = vpop.f32.mrf.mxu1  ;;  %v1702_v19 = vadd.f32 %v5145_v57, %v5828_v29 }
 0x287   :  { %v2274_v28 = vadd.f32 %v5293_v22, %v2080_v52  ;;  %v3214_v22 = vld [vmem:[%s5788_s0 + $0x49c] sm:$0xf0]  ;;  %v1888_v41 = vadd.f32 %v1887_v1, %v1694_v0  ;;  %2327 = vmatmul.bf16.gmra.mxu3 %v3265_v10  ;;  %v3721_v0 = vld [vmem:[%s5788_s0 + $0x534] sm:$0xf] }
 0x288   :  { %v3217_v30 = vor.u32 %v3700_v4, %v3214_v22  ;;  %v5829_v4 = vld [vmem:[#allocation11_spill] sm:$0xff] }
 0x289   :  { %v2469_v27 = vpop.f32.mrf.mxu0  ;;  %v2468_v55 = vadd.f32 %v2467_v15, %v2274_v28  ;;  %v3249_v15 = vor.u32 %v3709_v38, %v3248_v54  ;;  %v1704_v10 = vadd.f32 %v5145_v57, %v5829_v4  ;;  %v3718_v54 = vld [vmem:[%s5788_s0 + $0x518] sm:$0xf0] }
 0x28a   :  { %v5416_v2 = vpop.f32.mrf.mxu3 }
 0x28b   :  { %2592 = vst [vmem:[%s5789_s3 + $0x140] sm:$0xff] %v2468_v55  ;;  %v3302_v55 = vld [vmem:[%s5788_s0 + $0x544] sm:$0xf0] }
 0x28c   :  { %v2081_v40 = vpop.f32.mrf.mxu2  ;;  %v3305_v7 = vor.u32 %v3721_v0, %v3302_v55 }
 0x28d   :  { %v2082_v24 = vadd.f32 %v2081_v40, %v1888_v41  ;;  %v3260_v41 = vld [vmem:[%s5788_s0 + $0x4e0] sm:$0xf]  ;;  %v3268_v40 = vld [vmem:[%s5788_s0 + $0x4e8] sm:$0xf] }
 0x28e   :  { %v1890_v62 = vpop.f32.mrf.mxu1 }
 0x28f   :  { %v2276_v37 = vadd.f32 %v5302_v35, %v2082_v24  ;;  %v1891_v13 = vadd.f32 %v1890_v62, %v1697_v9  ;;  %v3714_v24 = vld [vmem:[%s5788_s0 + $0x4f8] sm:$0xf0] }
 0x291   :  { %v2472_v59 = vpop.f32.mrf.mxu0  ;;  %v2470_v16 = vadd.f32 %v2469_v27, %v2276_v37  ;;  %1929 = vmatmul.bf16.gmra.mxu1 %v3217_v30  ;;  %2123 = vmatmul.bf16.gmra.mxu2 %v3221_v11 }
 0x292   :  { %v5425_v33 = vpop.f32.mrf.mxu3 }
 0x293   :  { %2593 = vst [vmem:[%s5789_s3 + $0x148] sm:$0xff] %v2470_v16 }
 0x294   :  { %3547 = vmatmul.msk.bf16.gmra.mxu0 %vm1466_vm1, %v3229_v17  ;;  %v2084_v60 = vpop.f32.mrf.mxu2  ;;  %v3261_v17 = vor.u32 %v3713_v43, %v3260_v41  ;;  %v3720_v41 = vld [vmem:[%s5788_s0 + $0x52c] sm:$0xf] }
 0x295   :  { %v2085_v53 = vadd.f32 %v2084_v60, %v1891_v13  ;;  %v5830_v13 = vld [vmem:[#allocation13_spill] sm:$0xff] }
 0x296   :  { %v1892_v31 = vpop.f32.mrf.mxu1  ;;  %v1707_v60 = vadd.f32 %v5145_v57, %v5830_v13 }
 0x297   :  { %v2279_v35 = vadd.f32 %v5334_v32, %v2085_v53  ;;  %v3234_v32 = vld [vmem:[%s5788_s0 + $0x4c4] sm:$0xf0]  ;;  %v1893_v50 = vadd.f32 %v1892_v31, %v1699_v26  ;;  %2332 = vmatmul.bf16.gmra.mxu3 %v3285_v23  ;;  %v3726_v26 = vld [vmem:[%s5788_s0 + $0x55c] sm:$0xf] }
 0x298   :  { %v3237_v58 = vor.u32 %v3705_v46, %v3234_v32  ;;  %v5831_v46 = vld [vmem:[#allocation15_spill] sm:$0xff] }
 0x299   :  { %v2474_v12 = vpop.f32.mrf.mxu0  ;;  %v2473_v8 = vadd.f32 %v2472_v59, %v2279_v35  ;;  %v3269_v59 = vor.u32 %v3714_v24, %v3268_v40  ;;  %v1709_v23 = vadd.f32 %v5145_v57, %v5831_v46  ;;  %v3723_v40 = vld [vmem:[%s5788_s0 + $0x540] sm:$0xf0]  ;;  %v3736_v46 = vld [vmem:[%s5788_s0 + $0x5ac] sm:$0xf] }
 0x29a   :  { %v5457_v44 = vpop.f32.mrf.mxu3 }
 0x29b   :  { %2594 = vst [vmem:[%s5789_s3 + $0x150] sm:$0xff] %v2473_v8  ;;  %v3322_v8 = vld [vmem:[%s5788_s0 + $0x56c] sm:$0xf0] }
 0x29c   :  { %v2086_v39 = vpop.f32.mrf.mxu2  ;;  %v3325_v5 = vor.u32 %v3726_v26, %v3322_v8 }
 0x29d   :  { %v2087_v47 = vadd.f32 %v2086_v39, %v1893_v50  ;;  %v3280_v50 = vld [vmem:[%s5788_s0 + $0x508] sm:$0xf]  ;;  %v3288_v39 = vld [vmem:[%s5788_s0 + $0x510] sm:$0xf] }
 0x29e   :  { %v1895_v14 = vpop.f32.mrf.mxu1 }
 0x29f   :  { %v2281_v42 = vadd.f32 %v5343_v21, %v2087_v47  ;;  %v1896_v1 = vadd.f32 %v1895_v14, %v1702_v19  ;;  %v3719_v47 = vld [vmem:[%s5788_s0 + $0x520] sm:$0xf0] }
 0x2a1   :  { %v2477_v34 = vpop.f32.mrf.mxu0  ;;  %v2475_v52 = vadd.f32 %v2474_v12, %v2281_v42  ;;  %1934 = vmatmul.bf16.gmra.mxu1 %v3237_v58  ;;  %2128 = vmatmul.bf16.gmra.mxu2 %v3241_v18 }
 0x2a2   :  { %v5466_v49 = vpop.f32.mrf.mxu3 }
 0x2a3   :  { %2595 = vst [vmem:[%s5789_s3 + $0x158] sm:$0xff] %v2475_v52 }
 0x2a4   :  { %3548 = vmatmul.msk.bf16.gmra.mxu0 %vm1466_vm1, %v3249_v15  ;;  %v2089_v28 = vpop.f32.mrf.mxu2  ;;  %v3281_v15 = vor.u32 %v3718_v54, %v3280_v50  ;;  %v3320_v54 = vld [vmem:[%s5788_s0 + $0x558] sm:$0xf] }
 0x2a5   :  { %v2090_v27 = vadd.f32 %v2089_v28, %v1896_v1  ;;  %v5832_v1 = vld [vmem:[#allocation17_spill] sm:$0xff] }
 0x2a6   :  { %v1897_v3 = vpop.f32.mrf.mxu1  ;;  %v1712_v28 = vadd.f32 %v5145_v57, %v5832_v1 }
 0x2a7   :  { %v2284_v21 = vadd.f32 %v5375_v61, %v2090_v27  ;;  %v3254_v61 = vld [vmem:[%s5788_s0 + $0x4ec] sm:$0xf0]  ;;  %v1898_v36 = vadd.f32 %v1897_v3, %v1704_v10  ;;  %2337 = vmatmul.bf16.gmra.mxu3 %v3305_v7  ;;  %v3731_v10 = vld [vmem:[%s5788_s0 + $0x584] sm:$0xf] }
 0x2a8   :  { %v3257_v62 = vor.u32 %v3710_v48, %v3254_v61  ;;  %v5833_v48 = vld [vmem:[#allocation19_spill] sm:$0xff] }
 0x2a9   :  { %v2479_v63 = vpop.f32.mrf.mxu0  ;;  %v2478_v22 = vadd.f32 %v2477_v34, %v2284_v21  ;;  %v3289_v34 = vor.u32 %v3719_v47, %v3288_v39  ;;  %v1714_v7 = vadd.f32 %v5145_v57, %v5833_v48  ;;  %v5837_v48 = vld [vmem:[#allocation27_spill] sm:$0xff] }
 0x2aa   :  { %v5498_v56 = vpop.f32.mrf.mxu3 }
 0x2ab   :  { %2596 = vst [vmem:[%s5789_s3 + $0x160] sm:$0xff] %v2478_v22  ;;  %v3342_v22 = vld [vmem:[%s5788_s0 + $0x594] sm:$0xf0] }
 0x2ac   :  { %v2091_v30 = vpop.f32.mrf.mxu2  ;;  %v3345_v43 = vor.u32 %v3731_v10, %v3342_v22 }
 0x2ad   :  { %v2092_v11 = vadd.f32 %v2091_v30, %v1898_v36  ;;  %v3300_v36 = vld [vmem:[%s5788_s0 + $0x530] sm:$0xf]  ;;  %v3308_v30 = vld [vmem:[%s5788_s0 + $0x538] sm:$0xf] }
 0x2ae   :  { %v1900_v37 = vpop.f32.mrf.mxu1 }
 0x2af   :  { %v2286_v9 = vadd.f32 %v5384_v20, %v2092_v11  ;;  %v1901_v31 = vadd.f32 %v1900_v37, %v1707_v60  ;;  %v3724_v11 = vld [vmem:[%s5788_s0 + $0x548] sm:$0xf0] }
 0x2b1   :  { %v2482_v16 = vpop.f32.mrf.mxu0  ;;  %v2480_v53 = vadd.f32 %v2479_v63, %v2286_v9  ;;  %1939 = vmatmul.bf16.gmra.mxu1 %v3257_v62  ;;  %2133 = vmatmul.bf16.gmra.mxu2 %v3261_v17 }
 0x2b2   :  { %v5507_v51 = vpop.f32.mrf.mxu3 }
 0x2b3   :  { %2597 = vst [vmem:[%s5789_s3 + $0x168] sm:$0xff] %v2480_v53 }
 0x2b4   :  { %3549 = vmatmul.msk.bf16.gmra.mxu0 %vm1466_vm1, %v3269_v59  ;;  %v2094_v35 = vpop.f32.mrf.mxu2  ;;  %v3301_v59 = vor.u32 %v3723_v40, %v3300_v36  ;;  %v3348_v40 = vld [vmem:[%s5788_s0 + $0x588] sm:$0xf] }
 0x2b5   :  { %v2095_v12 = vadd.f32 %v2094_v35, %v1901_v31  ;;  %v5834_v31 = vld [vmem:[#allocation21_spill] sm:$0xff] }
 0x2b6   :  { %v1902_v45 = vpop.f32.mrf.mxu1  ;;  %v1717_v35 = vadd.f32 %v5145_v57, %v5834_v31 }
 0x2b7   :  { %v2289_v20 = vadd.f32 %v5416_v2, %v2095_v12  ;;  %v3274_v2 = vld [vmem:[%s5788_s0 + $0x514] sm:$0xf0]  ;;  %v1903_v38 = vadd.f32 %v1902_v45, %v1709_v23  ;;  %2342 = vmatmul.bf16.gmra.mxu3 %v3325_v5  ;;  %v3362_v23 = vld [vmem:[%s5788_s0 + $0x5bc] sm:$0xf0] }
 0x2b8   :  { %v3277_v14 = vor.u32 %v3715_v25, %v3274_v2  ;;  %v3725_v2 = vld [vmem:[%s5788_s0 + $0x554] sm:$0xf]  ;;  %v3365_v50 = vor.u32 %v3736_v46, %v3362_v23 }
 0x2b9   :  { %v2484_v6 = vpop.f32.mrf.mxu0  ;;  %v2483_v32 = vadd.f32 %v2482_v16, %v2289_v20  ;;  %v3309_v16 = vor.u32 %v3724_v11, %v3308_v30 }
 0x2ba   :  { %v5539_v29 = vpop.f32.mrf.mxu3 }
 0x2bb   :  { %2598 = vst [vmem:[%s5789_s3 + $0x170] sm:$0xff] %v2483_v32  ;;  %v5835_v32 = vld [vmem:[#allocation23_spill] sm:$0xff] }
 0x2bc   :  { %v2096_v58 = vpop.f32.mrf.mxu2  ;;  %v1719_v25 = vadd.f32 %v5145_v57, %v5835_v32  ;;  %v3735_v32 = vld [vmem:[%s5788_s0 + $0x5a4] sm:$0xf] }
 0x2bd   :  { %v2097_v18 = vadd.f32 %v2096_v58, %v1903_v38  ;;  %v3728_v38 = vld [vmem:[%s5788_s0 + $0x568] sm:$0xf0]  ;;  %v3328_v58 = vld [vmem:[%s5788_s0 + $0x560] sm:$0xf] }
 0x2be   :  { %v1905_v42 = vpop.f32.mrf.mxu1 }
 0x2bf   :  { %v2291_v19 = vadd.f32 %v5425_v33, %v2097_v18  ;;  %v1906_v3 = vadd.f32 %v1905_v42, %v1712_v28  ;;  %v3729_v18 = vld [vmem:[%s5788_s0 + $0x570] sm:$0xf0] }
 0x2c1   :  { %v2487_v52 = vpop.f32.mrf.mxu0  ;;  %v2485_v27 = vadd.f32 %v2484_v6, %v2291_v19  ;;  %1944 = vmatmul.bf16.gmra.mxu1 %v3277_v14  ;;  %2138 = vmatmul.bf16.gmra.mxu2 %v3281_v15 }
 0x2c2   :  { %v5548_v55 = vpop.f32.mrf.mxu3 }
 0x2c3   :  { %2599 = vst [vmem:[%s5789_s3 + $0x178] sm:$0xff] %v2485_v27  ;;  %v5836_v27 = vld [vmem:[#allocation25_spill] sm:$0xff] }
 0x2c4   :  { %3550 = vmatmul.msk.bf16.gmra.mxu0 %vm1466_vm1, %v3289_v34  ;;  %v2099_v21 = vpop.f32.mrf.mxu2  ;;  %v3321_v34 = vor.u32 %v3728_v38, %v3320_v54 }
 0x2c5   :  { %v2100_v63 = vadd.f32 %v2099_v21, %v1906_v3  ;;  %v1722_v3 = vadd.f32 %v5145_v57, %v5836_v27 }
 0x2c6   :  { %v1907_v0 = vpop.f32.mrf.mxu1 }
 0x2c7   :  { %v2294_v33 = vadd.f32 %v5457_v44, %v2100_v63  ;;  %v3294_v44 = vld [vmem:[%s5788_s0 + $0x53c] sm:$0xf0]  ;;  %v1908_v24 = vadd.f32 %v1907_v0, %v1714_v7  ;;  %2347 = vmatmul.bf16.gmra.mxu3 %v3345_v43  ;;  %v1724_v7 = vadd.f32 %v5145_v57, %v5837_v48  ;;  %v3334_v43 = vld [vmem:[%s5788_s0 + $0x58c] sm:$0xf0] }
 0x2c8   :  { %v3297_v37 = vor.u32 %v3720_v41, %v3294_v44  ;;  %v3730_v41 = vld [vmem:[%s5788_s0 + $0x57c] sm:$0xf]  ;;  %v3340_v44 = vld [vmem:[%s5788_s0 + $0x580] sm:$0xf] }
 0x2c9   :  { %v2489_v4 = vpop.f32.mrf.mxu0  ;;  %v2488_v61 = vadd.f32 %v2487_v52, %v2294_v33  ;;  %v3329_v52 = vor.u32 %v3729_v18, %v3328_v58 }
 0x2ca   :  { %v5581_v53 = vpop.f32.mrf.mxu3 }
 0x2cb   :  { %2600 = vst [vmem:[%s5789_s3 + $0x180] sm:$0xff] %v2488_v61 }
 0x2cc   :  { %v2101_v62 = vpop.f32.mrf.mxu2 }
 0x2cd   :  { %v2102_v17 = vadd.f32 %v2101_v62, %v1908_v24  ;;  %v3734_v24 = vld [vmem:[%s5788_s0 + $0x598] sm:$0xf0]  ;;  %v3337_v62 = vor.u32 %v3730_v41, %v3334_v43 }
 0x2ce   :  { %v1910_v9 = vpop.f32.mrf.mxu1 }
 0x2cf   :  { %v2296_v13 = vadd.f32 %v5466_v49, %v2102_v17  ;;  %v1911_v45 = vadd.f32 %v1910_v9, %v1717_v35 }
 0x2d1   :  { %v2492_v60 = vpop.f32.mrf.mxu0  ;;  %v2490_v12 = vadd.f32 %v2489_v4, %v2296_v13  ;;  %1949 = vmatmul.bf16.gmra.mxu1 %v3297_v37  ;;  %2143 = vmatmul.bf16.gmra.mxu2 %v3301_v59  ;;  %v3349_v59 = vor.u32 %v3734_v24, %v3348_v40 }
 0x2d2   :  { %v5610_v39 = vpop.f32.mrf.mxu3 }
 0x2d3   :  { %2601 = vst [vmem:[%s5789_s3 + $0x188] sm:$0xff] %v2490_v12 }
 0x2d4   :  { %3551 = vmatmul.msk.bf16.gmra.mxu0 %vm1466_vm1, %v3309_v16  ;;  %v2104_v20 = vpop.f32.mrf.mxu2 }
 0x2d5   :  { %v2105_v6 = vadd.f32 %v2104_v20, %v1911_v45 }
 0x2d6   :  { %v1912_v26 = vpop.f32.mrf.mxu1 }
 0x2d7   :  { %v2299_v49 = vadd.f32 %v5498_v56, %v2105_v6  ;;  %v3314_v56 = vld [vmem:[%s5788_s0 + $0x564] sm:$0xf0]  ;;  %v1913_v47 = vadd.f32 %v1912_v26, %v1719_v25  ;;  %2352 = vmatmul.bf16.gmra.mxu3 %v3365_v50  ;;  %v3354_v25 = vld [vmem:[%s5788_s0 + $0x5b4] sm:$0xf0]  ;;  %v3368_v50 = vld [vmem:[%s5788_s0 + $0x5b0] sm:$0xf] }
 0x2d8   :  { %v3317_v42 = vor.u32 %v3725_v2, %v3314_v56  ;;  %v3739_v56 = vld [vmem:[%s5788_s0 + $0x5c0] sm:$0xf0] }
 0x2d9   :  { %v2494_v8 = vpop.f32.mrf.mxu0  ;;  %v2493_v5 = vadd.f32 %v2492_v60, %v2299_v49  ;;  %v5838_v60 = vld [vmem:[#allocation29_spill] sm:$0xff] }
 0x2da   :  { %v5628_v33 = vpop.f32.mrf.mxu3  ;;  %v1727_v31 = vadd.f32 %v5145_v57, %v5838_v60 }
 0x2db   :  { %2602 = vst [vmem:[%s5789_s3 + $0x190] sm:$0xff] %v2493_v5  ;;  %v3360_v5 = vld [vmem:[%s5788_s0 + $0x5a8] sm:$0xf] }
 0x2dc   :  { %v2106_v14 = vpop.f32.mrf.mxu2 }
 0x2dd   :  { %v2107_v15 = vadd.f32 %v2106_v14, %v1913_v47  ;;  %v3357_v47 = vor.u32 %v3735_v32, %v3354_v25  ;;  %v3369_v14 = vor.u32 %v3739_v56, %v3368_v50  ;;  %v5845_v25 = vld [vmem:[#allocation6_spill] sm:$0xff] }
 0x2de   :  { %v1915_v19 = vpop.f32.mrf.mxu1 }
 0x2df   :  { %v2301_v1 = vadd.f32 %v5507_v51, %v2107_v15  ;;  %v1916_v63 = vadd.f32 %v1915_v19, %v1722_v3 }
 0x2e1   :  { %v2497_v28 = vpop.f32.mrf.mxu0  ;;  %v2495_v21 = vadd.f32 %v2494_v8, %v2301_v1  ;;  %1954 = vmatmul.bf16.gmra.mxu1 %v3317_v42  ;;  %2148 = vmatmul.bf16.gmra.mxu2 %v3321_v34  ;;  %v5839_v8 = vld [vmem:[#allocation31_spill] sm:$0xff]  ;;  %v5840_v34 = vld [vmem:[#allocation32_spill] sm:$0xff] }
 0x2e2   :  { %v2315_v9 = vpop.f32.mrf.mxu3  ;;  %v1729_v46 = vadd.f32 %v5145_v57, %v5839_v8  ;;  %v1732_v19 = vadd.f32 %v5145_v57, %v5840_v34 }
 0x2e3   :  { %2603 = vst [vmem:[%s5789_s3 + $0x198] sm:$0xff] %v2495_v21 }
 0x2e4   :  { %3552 = vmatmul.msk.bf16.gmra.mxu0 %vm1466_vm1, %v3329_v52  ;;  %v2109_v0 = vpop.f32.mrf.mxu2 }
 0x2e5   :  { %v2110_v4 = vadd.f32 %v2109_v0, %v1916_v63  ;;  %v5841_v0 = vld [vmem:[#allocation33_spill] sm:$0xff] }
 0x2e6   :  { %v1917_v10 = vpop.f32.mrf.mxu1 }
 0x2e7   :  { %v2304_v51 = vadd.f32 %v5539_v29, %v2110_v4  ;;  %v3733_v29 = vld [vmem:[%s5788_s0 + $0x590] sm:$0xf0]  ;;  %v1918_v36 = vadd.f32 %v1917_v10, %v1724_v7  ;;  %v1734_v4 = vadd.f32 %v5145_v57, %v5841_v0 }
 0x2e8   :  { %v3341_v17 = vor.u32 %v3733_v29, %v3340_v44  ;;  %v5842_v44 = vld [vmem:[#allocation34_spill] sm:$0xff] }
 0x2e9   :  { %v2499_v22 = vpop.f32.mrf.mxu0  ;;  %v2498_v61 = vadd.f32 %v2497_v28, %v2304_v51  ;;  %v1737_v29 = vadd.f32 %v5145_v57, %v5842_v44 }
 0x2ea   :  { %v2318_v49 = vpop.f32.mrf.mxu3 }
 0x2eb   :  { %2604 = vst [vmem:[%s5789_s3 + $0x1a0] sm:$0xff] %v2498_v61 }
 0x2ec   :  { %v2111_v30 = vpop.f32.mrf.mxu2 }
 0x2ed   :  { %v2112_v11 = vadd.f32 %v2111_v30, %v1918_v36 }
 0x2ee   :  { %v1920_v37 = vpop.f32.mrf.mxu1 }
 0x2ef   :  { %v2306_v16 = vadd.f32 %v5548_v55, %v2112_v11  ;;  %v1921_v12 = vadd.f32 %v1920_v37, %v1727_v31  ;;  %v5706_v37 = vld [vmem:[%s5787_s2] ss:$0 sm:$0xff] }
 0x2f1   :  { %v2502_v13 = vpop.f32.mrf.mxu0  ;;  %v2500_v35 = vadd.f32 %v2499_v22, %v2306_v16  ;;  %1959 = vmatmul.bf16.gmra.mxu1 %v3337_v62  ;;  %2153 = vmatmul.bf16.gmra.mxu2 %v3341_v17 }
 0x2f2   :  { %v2320_v1 = vpop.f32.mrf.mxu3 }
 0x2f3   :  { %2605 = vst [vmem:[%s5789_s3 + $0x1a8] sm:$0xff] %v2500_v35 }
 0x2f4   :  { %3553 = vmatmul.msk.bf16.gmra.mxu0 %vm1466_vm1, %v3349_v59  ;;  %v2114_v45 = vpop.f32.mrf.mxu2  ;;  %v5843_v59 = vld [vmem:[#allocation35_spill] sm:$0xff] }
 0x2f5   :  { %v2115_v20 = vadd.f32 %v2114_v45, %v1921_v12  ;;  %v1739_v57 = vadd.f32 %v5706_v37, %v5843_v59 }
 0x2f6   :  { %v1922_v6 = vpop.f32.mrf.mxu1 }
 0x2f7   :  { %v2309_v26 = vadd.f32 %v5581_v53, %v2115_v20  ;;  %v3738_v53 = vld [vmem:[%s5788_s0 + $0x5b8] sm:$0xf0]  ;;  %v1923_v2 = vadd.f32 %v1922_v6, %v1729_v46  ;;  %v5844_v20 = vld [vmem:[#allocation4_spill] sm:$0xff] }
 0x2f8   :  { %v3361_v58 = vor.u32 %v3738_v53, %v3360_v5  ;;  %v1742_v6 = vadd.f32 %v5706_v37, %v5844_v20  ;;  %v1744_v5 = vadd.f32 %v5706_v37, %v5845_v25 }
 0x2f9   :  { %v2504_v55 = vpop.f32.mrf.mxu0  ;;  %v2503_v23 = vadd.f32 %v2502_v13, %v2309_v26 }
 0x2fa   :  { %v2323_v48 = vpop.f32.mrf.mxu3 }
 0x2fb   :  { %2606 = vst [vmem:[%s5789_s3 + $0x1b0] sm:$0xff] %v2503_v23 }
 0x2fc   :  { %v2116_v54 = vpop.f32.mrf.mxu2 }
 0x2fd   :  { %v2117_v38 = vadd.f32 %v2116_v54, %v1923_v2 }
 0x2fe   :  { %v1925_v18 = vpop.f32.mrf.mxu1 }
 0x2ff   :  { %v2311_v15 = vadd.f32 %v5610_v39, %v2117_v38  ;;  %v1926_v28 = vadd.f32 %v1925_v18, %v1732_v19  ;;  %v5846_v18 = vld [vmem:[#allocation8_spill] sm:$0xff] }
 0x301   :  { %v2507_v42 = vpop.f32.mrf.mxu0  ;;  %v2505_v52 = vadd.f32 %v2504_v55, %v2311_v15  ;;  %1964 = vmatmul.bf16.gmra.mxu1 %v3357_v47  ;;  %2158 = vmatmul.bf16.gmra.mxu2 %v3361_v58 }
 0x302   :  { %v2325_v11 = vpop.f32.mrf.mxu3 }
 0x303   :  { %2607 = vst [vmem:[%s5789_s3 + $0x1b8] sm:$0xff] %v2505_v52 }
 0x304   :  { %3554 = vmatmul.msk.bf16.gmra.mxu0 %vm1466_vm1, %v3369_v14  ;;  %v2119_v27 = vpop.f32.mrf.mxu2  ;;  %v1747_v14 = vadd.f32 %v5706_v37, %v5846_v18 }
 0x305   :  { %v2120_v3 = vadd.f32 %v2119_v27, %v1926_v28 }
 0x306   :  { %v1927_v21 = vpop.f32.mrf.mxu1 }
 0x307   :  { %v2314_v39 = vadd.f32 %v5628_v33, %v2120_v3  ;;  %v1928_v51 = vadd.f32 %v1927_v21, %v1734_v4  ;;  %v5847_v3 = vld [vmem:[#allocation10_spill] sm:$0xff] }
 0x308   :  { %v1749_v21 = vadd.f32 %v5706_v37, %v5847_v3 }
 0x309   :  { %v2509_v63 = vpop.f32.mrf.mxu0  ;;  %v2508_v10 = vadd.f32 %v2507_v42, %v2314_v39 }
 0x30a   :  { %v2328_v45 = vpop.f32.mrf.mxu3 }
 0x30b   :  { %2608 = vst [vmem:[%s5789_s3 + $0x1c0] sm:$0xff] %v2508_v10 }
 0x30c   :  { %v2121_v22 = vpop.f32.mrf.mxu2 }
 0x30d   :  { %v2122_v7 = vadd.f32 %v2121_v22, %v1928_v51 }
 0x30e   :  { %v1930_v61 = vpop.f32.mrf.mxu1 }
 0x30f   :  { %v2316_v41 = vadd.f32 %v2315_v9, %v2122_v7  ;;  %v1931_v36 = vadd.f32 %v1930_v61, %v1737_v29  ;;  %v5848_v7 = vld [vmem:[#allocation12_spill] sm:$0xff] }
 0x310   :  { %v1752_v61 = vadd.f32 %v5706_v37, %v5848_v7 }
 0x311   :  { %v2512_v43 = vpop.f32.mrf.mxu0  ;;  %v2510_v33 = vadd.f32 %v2509_v63, %v2316_v41 }
 0x312   :  { %v2330_v2 = vpop.f32.mrf.mxu3 }
 0x313   :  { %2609 = vst [vmem:[%s5789_s3 + $0x1c8] sm:$0xff] %v2510_v33 }
 0x314   :  { %v2124_v40 = vpop.f32.mrf.mxu2 }
 0x315   :  { %v2125_v24 = vadd.f32 %v2124_v40, %v1931_v36 }
 0x316   :  { %v1932_v30 = vpop.f32.mrf.mxu1 }
 0x317   :  { %v2319_v62 = vadd.f32 %v2318_v49, %v2125_v24  ;;  %v1933_v16 = vadd.f32 %v1932_v30, %v1739_v57  ;;  %v5849_v30 = vld [vmem:[#allocation14_spill] sm:$0xff] }
 0x319   :  { %v2514_v17 = vpop.f32.mrf.mxu0  ;;  %v2513_v9 = vadd.f32 %v2512_v43, %v2319_v62 }
 0x31a   :  { %v2333_v19 = vpop.f32.mrf.mxu3 }
 0x31b   :  { %2610 = vst [vmem:[%s5789_s3 + $0x1d0] sm:$0xff] %v2513_v9 }
 0x31c   :  { %v2126_v13 = vpop.f32.mrf.mxu2 }
 0x31d   :  { %v2127_v60 = vadd.f32 %v2126_v13, %v1933_v16 }
 0x31e   :  { %v1935_v31 = vpop.f32.mrf.mxu1 }
 0x31f   :  { %v2321_v35 = vadd.f32 %v2320_v1, %v2127_v60  ;;  %v1936_v55 = vadd.f32 %v1935_v31, %v1742_v6  ;;  %v5850_v60 = vld [vmem:[#allocation16_spill] sm:$0xff] }
 0x320   :  { %v1757_v31 = vadd.f32 %v5706_v37, %v5850_v60 }
 0x321   :  { %v2517_v12 = vpop.f32.mrf.mxu0  ;;  %v2515_v26 = vadd.f32 %v2514_v17, %v2321_v35 }
 0x322   :  { %v2335_v51 = vpop.f32.mrf.mxu3 }
 0x323   :  { %2611 = vst [vmem:[%s5789_s3 + $0x1d8] sm:$0xff] %v2515_v26 }
 0x324   :  { %v2129_v49 = vpop.f32.mrf.mxu2 }
 0x325   :  { %v2130_v8 = vadd.f32 %v2129_v49, %v1936_v55 }
 0x326   :  { %v1937_v46 = vpop.f32.mrf.mxu1 }
 0x327   :  { %v2324_v23 = vadd.f32 %v2323_v48, %v2130_v8  ;;  %v1938_v50 = vadd.f32 %v1937_v46, %v1744_v5  ;;  %v5851_v8 = vld [vmem:[#allocation18_spill] sm:$0xff] }
 0x328   :  { %v1759_v46 = vadd.f32 %v5706_v37, %v5851_v8 }
 0x329   :  { %v2519_v32 = vpop.f32.mrf.mxu0  ;;  %v2518_v53 = vadd.f32 %v2517_v12, %v2324_v23 }
 0x32a   :  { %v2338_v24 = vpop.f32.mrf.mxu3 }
 0x32b   :  { %2612 = vst [vmem:[%s5789_s3 + $0x1e0] sm:$0xff] %v2518_v53 }
 0x32c   :  { %v2131_v56 = vpop.f32.mrf.mxu2 }
 0x32d   :  { %v2132_v54 = vadd.f32 %v2131_v56, %v1938_v50 }
 0x32e   :  { %v1940_v38 = vpop.f32.mrf.mxu1 }
 0x32f   :  { %v2326_v47 = vadd.f32 %v2325_v11, %v2132_v54  ;;  %v1941_v42 = vadd.f32 %v1940_v38, %v1747_v14  ;;  %v1754_v11 = vadd.f32 %v5706_v37, %v5849_v30  ;;  %v5852_v54 = vld [vmem:[#allocation20_spill] sm:$0xff] }
 0x330   :  { %v1762_v38 = vadd.f32 %v5706_v37, %v5852_v54 }
 0x331   :  { %v2522_v58 = vpop.f32.mrf.mxu0  ;;  %v2520_v15 = vadd.f32 %v2519_v32, %v2326_v47 }
 0x332   :  { %v2340_v12 = vpop.f32.mrf.mxu3 }
 0x333   :  { %2613 = vst [vmem:[%s5789_s3 + $0x1e8] sm:$0xff] %v2520_v15 }
 0x334   :  { %v2134_v34 = vpop.f32.mrf.mxu2 }
 0x335   :  { %v2135_v52 = vadd.f32 %v2134_v34, %v1941_v42 }
 0x336   :  { %v1942_v1 = vpop.f32.mrf.mxu1 }
 0x337   :  { %v2329_v28 = vadd.f32 %v2328_v45, %v2135_v52  ;;  %v1943_v63 = vadd.f32 %v1942_v1, %v1749_v21  ;;  %v5853_v52 = vld [vmem:[#allocation22_spill] sm:$0xff] }
 0x338   :  { %v1764_v1 = vadd.f32 %v5706_v37, %v5853_v52 }
 0x339   :  { %v2524_v27 = vpop.f32.mrf.mxu0  ;;  %v2523_v39 = vadd.f32 %v2522_v58, %v2329_v28 }
 0x33a   :  { %v2343_v5 = vpop.f32.mrf.mxu3 }
 0x33b   :  { %2614 = vst [vmem:[%s5789_s3 + $0x1f0] sm:$0xff] %v2523_v39 }
 0x33c   :  { %v2136_v0 = vpop.f32.mrf.mxu2 }
 0x33d   :  { %v2137_v4 = vadd.f32 %v2136_v0, %v1943_v63 }
 0x33e   :  { %v1945_v10 = vpop.f32.mrf.mxu1 }
 0x33f   :  { %v2331_v22 = vadd.f32 %v2330_v2, %v2137_v4  ;;  %v1946_v43 = vadd.f32 %v1945_v10, %v1752_v61  ;;  %v5854_v4 = vld [vmem:[#allocation24_spill] sm:$0xff] }
 0x340   :  { %v1767_v10 = vadd.f32 %v5706_v37, %v5854_v4 }
 0x341   :  { %v2527_v48 = vpop.f32.mrf.mxu0  ;;  %v2525_v41 = vadd.f32 %v2524_v27, %v2331_v22 }
 0x342   :  { %v2345_v42 = vpop.f32.mrf.mxu3 }
 0x343   :  { %2615 = vst [vmem:[%s5789_s3 + $0x1f8] sm:$0xff] %v2525_v41 }
 0x344   :  { %v2139_v44 = vpop.f32.mrf.mxu2 }
 0x345   :  { %v2140_v29 = vadd.f32 %v2139_v44, %v1946_v43  ;;  %v5855_v44 = vld [vmem:[#allocation26_spill] sm:$0xff] }
 0x346   :  { %v1947_v33 = vpop.f32.mrf.mxu1 }
 0x347   :  { %v2334_v36 = vadd.f32 %v2333_v19, %v2140_v29  ;;  %v1948_v17 = vadd.f32 %v1947_v33, %v1754_v11  ;;  %v1769_v29 = vadd.f32 %v5706_v37, %v5855_v44 }
 0x349   :  { %v2529_v40 = vpop.f32.mrf.mxu0  ;;  %v2528_v62 = vadd.f32 %v2527_v48, %v2334_v36 }
 0x34a   :  { %v2348_v0 = vpop.f32.mrf.mxu3 }
 0x34b   :  { %2616 = vst [vmem:[%s5789_s3 + $0x200] sm:$0xff] %v2528_v62 }
 0x34c   :  { %v2141_v59 = vpop.f32.mrf.mxu2 }
 0x34d   :  { %v2142_v57 = vadd.f32 %v2141_v59, %v1948_v17  ;;  %v5856_v59 = vld [vmem:[#allocation28_spill] sm:$0xff] }
 0x34e   :  { %v1950_v9 = vpop.f32.mrf.mxu1 }
 0x34f   :  { %v2336_v16 = vadd.f32 %v2335_v51, %v2142_v57  ;;  %v1951_v45 = vadd.f32 %v1950_v9, %v1757_v31  ;;  %v1772_v57 = vadd.f32 %v5706_v37, %v5856_v59 }
 0x351   :  { %v2532_v13 = vpop.f32.mrf.mxu0  ;;  %v2530_v35 = vadd.f32 %v2529_v40, %v2336_v16 }
 0x352   :  { %v2350_v36 = vpop.f32.mrf.mxu3 }
 0x353   :  { %2617 = vst [vmem:[%s5789_s3 + $0x208] sm:$0xff] %v2530_v35 }
 0x354   :  { %v2144_v20 = vpop.f32.mrf.mxu2 }
 0x355   :  { %v2145_v6 = vadd.f32 %v2144_v20, %v1951_v45  ;;  %v5857_v20 = vld [vmem:[#allocation30_spill] sm:$0xff] }
 0x356   :  { %v1952_v26 = vpop.f32.mrf.mxu1 }
 0x357   :  { %v2339_v55 = vadd.f32 %v2338_v24, %v2145_v6  ;;  %v1953_v32 = vadd.f32 %v1952_v26, %v1759_v46  ;;  %v1774_v6 = vadd.f32 %v5706_v37, %v5857_v20 }
 0x359   :  { %v2534_v49 = vpop.f32.mrf.mxu0  ;;  %v2533_v23 = vadd.f32 %v2532_v13, %v2339_v55 }
 0x35a   :  { %v2353_v13 = vpop.f32.mrf.mxu3 }
 0x35b   :  { %2618 = vst [vmem:[%s5789_s3 + $0x210] sm:$0xff] %v2533_v23 }
 0x35c   :  { %v2146_v25 = vpop.f32.mrf.mxu2 }
 0x35d   :  { %v2147_v53 = vadd.f32 %v2146_v25, %v1953_v32 }
 0x35e   :  { %v1955_v2 = vpop.f32.mrf.mxu1 }
 0x35f   :  { %v2341_v50 = vadd.f32 %v2340_v12, %v2147_v53  ;;  %v1956_v58 = vadd.f32 %v1955_v2, %v1762_v38 }
 0x361   :  { %v2537_v56 = vpop.f32.mrf.mxu0  ;;  %v2535_v47 = vadd.f32 %v2534_v49, %v2341_v50 }
 0x362   :  { %v2355_v46 = vpop.f32.mrf.mxu3 }
 0x363   :  { %2619 = vst [vmem:[%s5789_s3 + $0x218] sm:$0xff] %v2535_v47 }
 0x364   :  { %v2149_v18 = vpop.f32.mrf.mxu2 }
 0x365   :  { %v2150_v14 = vadd.f32 %v2149_v18, %v1956_v58 }
 0x366   :  { %v1957_v15 = vpop.f32.mrf.mxu1 }
 0x367   :  { %v2344_v34 = vadd.f32 %v2343_v5, %v2150_v14  ;;  %v1958_v27 = vadd.f32 %v1957_v15, %v1764_v1 }
 0x369   :  { %v2539_v19 = vpop.f32.mrf.mxu0  ;;  %v2538_v28 = vadd.f32 %v2537_v56, %v2344_v34 }
 0x36b   :  { %2620 = vst [vmem:[%s5789_s3 + $0x220] sm:$0xff] %v2538_v28 }
 0x36c   :  { %v2151_v3 = vpop.f32.mrf.mxu2 }
 0x36d   :  { %v2152_v21 = vadd.f32 %v2151_v3, %v1958_v27 }
 0x36e   :  { %v1960_v39 = vpop.f32.mrf.mxu1 }
 0x36f   :  { %v2346_v63 = vadd.f32 %v2345_v42, %v2152_v21  ;;  %v1961_v48 = vadd.f32 %v1960_v39, %v1767_v10 }
 0x371   :  { %v2540_v51 = vadd.f32 %v2539_v19, %v2346_v63  ;;  %v2542_v22 = vpop.f32.mrf.mxu0 }
 0x373   :  { %2621 = vst [vmem:[%s5789_s3 + $0x228] sm:$0xff] %v2540_v51 }
 0x374   :  { %v2154_v7 = vpop.f32.mrf.mxu2 }
 0x375   :  { %v2155_v61 = vadd.f32 %v2154_v7, %v1961_v48 }
 0x376   :  { %v1962_v41 = vpop.f32.mrf.mxu1 }
 0x377   :  { %v2349_v43 = vadd.f32 %v2348_v0, %v2155_v61  ;;  %v1963_v40 = vadd.f32 %v1962_v41, %v1769_v29 }
 0x379   :  { %v2543_v33 = vadd.f32 %v2542_v22, %v2349_v43  ;;  %v2544_v24 = vpop.f32.mrf.mxu0 }
 0x37b   :  { %2622 = vst [vmem:[%s5789_s3 + $0x230] sm:$0xff] %v2543_v33 }
 0x37c   :  { %v2156_v30 = vpop.f32.mrf.mxu2 }
 0x37d   :  { %v2157_v11 = vadd.f32 %v2156_v30, %v1963_v40 }
 0x37e   :  { %v1965_v62 = vpop.f32.mrf.mxu1 }
 0x37f   :  { %v2351_v17 = vadd.f32 %v2350_v36, %v2157_v11  ;;  %v1966_v16 = vadd.f32 %v1965_v62, %v1772_v57 }
 0x381   :  { %v2545_v9 = vadd.f32 %v2544_v24, %v2351_v17  ;;  %v2547_v35 = vpop.f32.mrf.mxu0 }
 0x383   :  { %2623 = vst [vmem:[%s5789_s3 + $0x238] sm:$0xff] %v2545_v9 }
 0x384   :  { %v2159_v60 = vpop.f32.mrf.mxu2 }
 0x385   :  { %v2160_v31 = vadd.f32 %v2159_v60, %v1966_v16 }
 0x386   :  { %v1967_v45 = vpop.f32.mrf.mxu1 }
 0x387   :  { %v2354_v12 = vadd.f32 %v2353_v13, %v2160_v31  ;;  %v1968_v55 = vadd.f32 %v1967_v45, %v1774_v6 }
 0x389   :  { %v2548_v26 = vadd.f32 %v2547_v35, %v2354_v12  ;;  %v2549_v32 = vpop.f32.mrf.mxu0 }
 0x38b   :  { %2624 = vst [vmem:[%s5789_s3 + $0x240] sm:$0xff] %v2548_v26 }
 0x38c   :  { %v2161_v49 = vpop.f32.mrf.mxu2 }
 0x38d   :  { %v2162_v8 = vadd.f32 %v2161_v49, %v1968_v55 }
 0x38f   :  { %v2356_v23 = vadd.f32 %v2355_v46, %v2162_v8 }
 0x391   :  { %v2550_v25 = vadd.f32 %v2549_v32, %v2356_v23 }
 0x393   :  { %2625 = vst [vmem:[%s5789_s3 + $0x248] sm:$0xff] %v2550_v25 }

// kernel: _lambda_.10
= control target key start
LH: loop header
LB: loop body
LE: loop exit
PB: predicated region body
PF: predicated region fallthrough
CT: control target
= control target key end

     0   :  { %s697_s6 = smov 0   ;;  %s1048_s0 = inlined_call_operand.vmem [shape: f32[2,17,2176], index: 0, kind: input, shape index: {}]   ;;  %s1049_s1 = inlined_call_operand.vmem [shape: f32[2,15,1920], index: 1, kind: output, shape index: {}]  }
   0x1 LB: > { %s660_s7 = sadd.s32 4294967295, %s685_s6   ;;  %p664_p0 = scmp.ge.s32.totalorder %s685_s6, 1  ;;  %s685_s6 = sphi %s697_s6, %s11_s6  }
   0x2   : > { %p87_p1 = scmp.lt.s32.totalorder %s685_s6, 3 }
   0x4   : > { %p88_p2 = pnand %p664_p0, %p87_p1 }
   0x5   : > { %p107_p3 = scmp.lt.s32.totalorder (!%p88_p2), %s660_s7, 1 }
   0x6   : > { %91 = sbr.rel (%p88_p2) target bundleno = 98 (0x62), region = 24 }
   0xb   : > { %s1053_s7 = smov (!%p107_p3, %s660_s7), 1  ;;  %vm288_vm0 = vcmask 1046528   ;;  %vm409_vm1 = vcmask 1045504  }
   0xc   : > { %s669_s8 = smul.u32 408, %s1053_s7 }
   0xd   : > { %s670_s12 = smul.u32 240, %s1053_s7 }
   0xe   : > { %s711_s11 = scalar_lea.vmem %s1048_s0, %s669_s8 }
   0xf   : > { %v117_v0 = vld [vmem:[%s711_s11] sm:$0xff]  ;;  %v118_v1 = vld [vmem:[%s711_s11 + $0x8] sm:$0xff]  ;;  %v119_v2 = vld [vmem:[%s711_s11 + $0x10] sm:$0xff]  ;;  %s764_s15 = scalar_lea.vmem %s1049_s1, %s670_s12 }
  0x10   : > { %v134_v3 = vld [vmem:[%s711_s11 + $0x88] sm:$0xff]  ;;  %v135_v4 = vld [vmem:[%s711_s11 + $0x90] sm:$0xff]  ;;  %v136_v5 = vld [vmem:[%s711_s11 + $0x98] sm:$0xff]  ;;  %v168_v6 = vmax.f32 %v117_v0, %v118_v1  ;;  %v169_v7 = vmax.f32 %v118_v1, %v119_v2 }
  0x11   : > { %v183_v8 = vmax.f32 %v134_v3, %v135_v4  ;;  %v120_v9 = vld [vmem:[%s711_s11 + $0x18] sm:$0xff]  ;;  %v137_v10 = vld [vmem:[%s711_s11 + $0xa0] sm:$0xff]  ;;  %v184_v11 = vmax.f32 %v135_v4, %v136_v5  ;;  %v723_v15 = vld [vmem:[%s711_s11 + $0xa8] sm:$0xff] }
  0x12   : > { %v121_v12 = vld [vmem:[%s711_s11 + $0x20] sm:$0xff]  ;;  %v213_v13 = vmax.f32 %v168_v6, %v119_v2  ;;  %v214_v14 = vmax.f32 %v169_v7, %v120_v9  ;;  %v170_v16 = vmax.f32 %v119_v2, %v120_v9  ;;  %v185_v17 = vmax.f32 %v136_v5, %v137_v10  ;;  %v122_v30 = vld [vmem:[%s711_s11 + $0x28] sm:$0xff]  ;;  %v139_v31 = vld [vmem:[%s711_s11 + $0xb0] sm:$0xff] }
  0x13   : > { %v725_v18 = vmax.f32 %v183_v8, %v136_v5  ;;  %v727_v19 = vmax.f32 %v184_v11, %v137_v10  ;;  %v171_v20 = vmax.f32 %v120_v9, %v121_v12  ;;  %v186_v21 = vmax.f32 %v137_v10, %v723_v15  ;;  %v123_v52 = vld [vmem:[%s711_s11 + $0x30] sm:$0xff]  ;;  %v140_v57 = vld [vmem:[%s711_s11 + $0xb8] sm:$0xff]  ;;  %v141_v63 = vld [vmem:[%s711_s11 + $0xc0] sm:$0xff] }
  0x14   : > { %v289_v22 = vrot.slane %v213_v13, 1  ;;  %v410_v23 = vrot.slane %v213_v13, 2  ;;  %v292_v24 = vrot.slane %v214_v14, 1  ;;  %v413_v25 = vrot.slane %v214_v14, 2  ;;  %v124_v58 = vld [vmem:[%s711_s11 + $0x38] sm:$0xff] }
  0x15   : > { %v290_v26 = vrot.slane %v725_v18, 1  ;;  %v411_v27 = vrot.slane %v725_v18, 2  ;;  %v293_v28 = vrot.slane %v727_v19, 1  ;;  %v414_v29 = vrot.slane %v727_v19, 2 }
  0x16   : > { %v215_v32 = vmax.f32 %v170_v16, %v121_v12  ;;  %v737_v33 = vmax.f32 %v185_v17, %v723_v15  ;;  %v216_v34 = vmax.f32 %v171_v20, %v122_v30  ;;  %v739_v35 = vmax.f32 %v186_v21, %v139_v31  ;;  %v125_v16 = vld [vmem:[%s711_s11 + $0x40] sm:$0xff]  ;;  %v142_v17 = vld [vmem:[%s711_s11 + $0xc8] sm:$0xff] }
  0x17   : > { %v291_v36 = vsel %vm288_vm0, %v289_v22, %v290_v26  ;;  %v412_v37 = vsel %vm409_vm1, %v410_v23, %v411_v27  ;;  %v294_v38 = vsel %vm288_vm0, %v292_v24, %v293_v28  ;;  %v415_v39 = vsel %vm409_vm1, %v413_v25, %v414_v29 }
  0x18   : > { %v364_v40 = vmax.f32 %v213_v13, %v291_v36  ;;  %v365_v41 = vmax.f32 %v214_v14, %v294_v38  ;;  %v295_v42 = vrot.slane %v215_v32, 1  ;;  %v296_v43 = vrot.slane %v737_v33, 1  ;;  %v126_v36 = vld [vmem:[%s711_s11 + $0x48] sm:$0xff] }
  0x19   : > { %v416_v44 = vrot.slane %v215_v32, 2  ;;  %v417_v45 = vrot.slane %v737_v33, 2  ;;  %v298_v46 = vrot.slane %v216_v34, 1  ;;  %v299_v47 = vrot.slane %v739_v35, 1 }
  0x1a   : > { %v515_v48 = vmax.f32 %v364_v40, %v412_v37  ;;  %v516_v49 = vmax.f32 %v365_v41, %v415_v39  ;;  %v297_v50 = vsel %vm288_vm0, %v295_v42, %v296_v43  ;;  %v419_v51 = vrot.slane %v216_v34, 2 }
  0x1b   : > { %v366_v53 = vmax.f32 %v215_v32, %v297_v50  ;;  %v418_v54 = vsel %vm409_vm1, %v416_v44, %v417_v45  ;;  %v300_v55 = vsel %vm288_vm0, %v298_v46, %v299_v47  ;;  %v420_v56 = vrot.slane %v739_v35, 2  ;;  %v143_v44 = vld [vmem:[%s711_s11 + $0xd0] sm:$0xff] }
  0x1c   : > { %v545_v59 = vmax.f32 %v515_v48, 0.0  ;;  %v546_v60 = vmax.f32 %v516_v49, 0.0  ;;  %v367_v61 = vmax.f32 %v216_v34, %v300_v55  ;;  %v172_v62 = vmax.f32 %v121_v12, %v122_v30 }
  0x1d   : > { %v517_v0 = vmax.f32 %v366_v53, %v418_v54  ;;  %v421_v1 = vsel %vm409_vm1, %v419_v51, %v420_v56  ;;  %v187_v2 = vmax.f32 %v723_v15, %v139_v31  ;;  %v173_v3 = vmax.f32 %v122_v30, %v123_v52 }
  0x1e   : > { %575 = vst [vmem:[%s764_s15] sm:$0xff] %v545_v59  ;;  %v518_v4 = vmax.f32 %v367_v61, %v421_v1  ;;  %v217_v5 = vmax.f32 %v172_v62, %v123_v52  ;;  %v188_v6 = vmax.f32 %v139_v31, %v140_v57  ;;  %v174_v7 = vmax.f32 %v123_v52, %v124_v58  ;;  %v127_v59 = vld [vmem:[%s711_s11 + $0x50] sm:$0xff] }
  0x1f   : > { %576 = vst [vmem:[%s764_s15 + $0x8] sm:$0xff] %v546_v60  ;;  %v547_v8 = vmax.f32 %v517_v0, 0.0  ;;  %v782_v9 = vmax.f32 %v187_v2, %v140_v57  ;;  %v218_v10 = vmax.f32 %v173_v3, %v124_v58  ;;  %v189_v11 = vmax.f32 %v140_v57, %v141_v63 }
  0x20   : > { %v548_v12 = vmax.f32 %v518_v4, 0.0  ;;  %v301_v13 = vrot.slane %v217_v5, 1  ;;  %v422_v14 = vrot.slane %v217_v5, 2  ;;  %v784_v15 = vmax.f32 %v188_v6, %v141_v63  ;;  %v144_v4 = vld [vmem:[%s711_s11 + $0xd8] sm:$0xff] }
  0x21   : > { %577 = vst [vmem:[%s764_s15 + $0x10] sm:$0xff] %v547_v8  ;;  %v302_v20 = vrot.slane %v782_v9, 1  ;;  %v423_v21 = vrot.slane %v782_v9, 2  ;;  %v304_v22 = vrot.slane %v218_v10, 1  ;;  %v425_v23 = vrot.slane %v218_v10, 2 }
  0x22   : > { %578 = vst [vmem:[%s764_s15 + $0x18] sm:$0xff] %v548_v12  ;;  %v305_v24 = vrot.slane %v784_v15, 1  ;;  %v426_v25 = vrot.slane %v784_v15, 2  ;;  %v219_v30 = vmax.f32 %v174_v7, %v125_v16  ;;  %v794_v31 = vmax.f32 %v189_v11, %v142_v17  ;;  %v145_v11 = vld [vmem:[%s711_s11 + $0xe0] sm:$0xff] }
  0x23   : > { %v303_v32 = vsel %vm288_vm0, %v301_v13, %v302_v20  ;;  %v424_v34 = vsel %vm409_vm1, %v422_v14, %v423_v21  ;;  %v175_v37 = vmax.f32 %v124_v58, %v125_v16  ;;  %v190_v38 = vmax.f32 %v141_v63, %v142_v17 }
  0x24   : > { %v368_v39 = vmax.f32 %v217_v5, %v303_v32  ;;  %v306_v40 = vsel %vm288_vm0, %v304_v22, %v305_v24  ;;  %v427_v41 = vsel %vm409_vm1, %v425_v23, %v426_v25  ;;  %v307_v42 = vrot.slane %v219_v30, 1  ;;  %v129_v22 = vld [vmem:[%s711_s11 + $0x60] sm:$0xff] }
  0x25   : > { %v369_v46 = vmax.f32 %v218_v10, %v306_v40  ;;  %v308_v48 = vrot.slane %v794_v31, 1  ;;  %v428_v49 = vrot.slane %v219_v30, 2  ;;  %v429_v50 = vrot.slane %v794_v31, 2  ;;  %v128_v10 = vld [vmem:[%s711_s11 + $0x58] sm:$0xff] }
  0x26   : > { %v519_v51 = vmax.f32 %v368_v39, %v424_v34  ;;  %v220_v52 = vmax.f32 %v175_v37, %v126_v36  ;;  %v812_v53 = vmax.f32 %v190_v38, %v143_v44  ;;  %v176_v54 = vmax.f32 %v125_v16, %v126_v36 }
  0x27   : > { %v520_v55 = vmax.f32 %v369_v46, %v427_v41  ;;  %v309_v57 = vsel %vm288_vm0, %v307_v42, %v308_v48  ;;  %v430_v58 = vsel %vm409_vm1, %v428_v49, %v429_v50  ;;  %v191_v60 = vmax.f32 %v142_v17, %v143_v44  ;;  %v146_v46 = vld [vmem:[%s711_s11 + $0xe8] sm:$0xff] }
  0x28   : > { %v549_v61 = vmax.f32 %v519_v51, 0.0  ;;  %v370_v62 = vmax.f32 %v219_v30, %v309_v57  ;;  %v310_v63 = vrot.slane %v220_v52, 1  ;;  %v311_v0 = vrot.slane %v812_v53, 1  ;;  %v130_v49 = vld [vmem:[%s711_s11 + $0x68] sm:$0xff] }
  0x29   : > { %v550_v1 = vmax.f32 %v520_v55, 0.0  ;;  %v431_v2 = vrot.slane %v220_v52, 2  ;;  %v432_v3 = vrot.slane %v812_v53, 2  ;;  %v221_v5 = vmax.f32 %v176_v54, %v127_v59 }
  0x2a   : > { %579 = vst [vmem:[%s764_s15 + $0x20] sm:$0xff] %v549_v61  ;;  %v521_v6 = vmax.f32 %v370_v62, %v430_v58  ;;  %v312_v7 = vsel %vm288_vm0, %v310_v63, %v311_v0  ;;  %v828_v8 = vmax.f32 %v191_v60, %v144_v4  ;;  %v177_v12 = vmax.f32 %v126_v36, %v127_v59 }
  0x2b   : > { %580 = vst [vmem:[%s764_s15 + $0x28] sm:$0xff] %v550_v1  ;;  %v371_v13 = vmax.f32 %v220_v52, %v312_v7  ;;  %v433_v14 = vsel %vm409_vm1, %v431_v2, %v432_v3  ;;  %v313_v16 = vrot.slane %v221_v5, 1  ;;  %v434_v17 = vrot.slane %v221_v5, 2  ;;  %v147_v7 = vld [vmem:[%s711_s11 + $0xf0] sm:$0xff] }
  0x2c   : > { %v551_v23 = vmax.f32 %v521_v6, 0.0  ;;  %v314_v30 = vrot.slane %v828_v8, 1  ;;  %v435_v32 = vrot.slane %v828_v8, 2  ;;  %v192_v34 = vmax.f32 %v143_v44, %v144_v4 }
  0x2d   : > { %v522_v37 = vmax.f32 %v371_v13, %v433_v14  ;;  %v222_v38 = vmax.f32 %v177_v12, %v128_v10  ;;  %v178_v36 = vmax.f32 %v127_v59, %v128_v10  ;;  %v193_v39 = vmax.f32 %v144_v4, %v145_v11  ;;  %v131_v14 = vld [vmem:[%s711_s11 + $0x70] sm:$0xff] }
  0x2e   : > { %581 = vst [vmem:[%s764_s15 + $0x30] sm:$0xff] %v551_v23  ;;  %v315_v40 = vsel %vm288_vm0, %v313_v16, %v314_v30  ;;  %v436_v41 = vsel %vm409_vm1, %v434_v17, %v435_v32  ;;  %v846_v42 = vmax.f32 %v192_v34, %v145_v11  ;;  %v179_v51 = vmax.f32 %v128_v10, %v129_v22  ;;  %v148_v34 = vld [vmem:[%s711_s11 + $0xf8] sm:$0xff] }
  0x2f   : > { %v552_v44 = vmax.f32 %v522_v37, 0.0  ;;  %v372_v52 = vmax.f32 %v221_v5, %v315_v40  ;;  %v316_v54 = vrot.slane %v222_v38, 1  ;;  %v437_v55 = vrot.slane %v222_v38, 2 }
  0x30   : > { %v317_v57 = vrot.slane %v846_v42, 1  ;;  %v438_v58 = vrot.slane %v846_v42, 2  ;;  %v223_v59 = vmax.f32 %v178_v36, %v129_v22  ;;  %v852_v60 = vmax.f32 %v193_v39, %v146_v46 }
  0x31   : > { %582 = vst [vmem:[%s764_s15 + $0x38] sm:$0xff] %v552_v44  ;;  %v523_v61 = vmax.f32 %v372_v52, %v436_v41  ;;  %v194_v62 = vmax.f32 %v145_v11, %v146_v46  ;;  %v224_v63 = vmax.f32 %v179_v51, %v130_v49  ;;  %v180_v1 = vmax.f32 %v129_v22, %v130_v49 }
  0x32   : > { %v318_v2 = vsel %vm288_vm0, %v316_v54, %v317_v57  ;;  %v439_v4 = vsel %vm409_vm1, %v437_v55, %v438_v58  ;;  %v319_v5 = vrot.slane %v223_v59, 1  ;;  %v320_v6 = vrot.slane %v852_v60, 1 }
  0x33   : > { %v553_v10 = vmax.f32 %v523_v61, 0.0  ;;  %v373_v12 = vmax.f32 %v222_v38, %v318_v2  ;;  %v440_v13 = vrot.slane %v223_v59, 2  ;;  %v441_v11 = vrot.slane %v852_v60, 2  ;;  %v132_v61 = vld [vmem:[%s711_s11 + $0x78] sm:$0xff] }
  0x34   : > { %v321_v16 = vsel %vm288_vm0, %v319_v5, %v320_v6  ;;  %v868_v17 = vmax.f32 %v194_v62, %v147_v7  ;;  %v322_v22 = vrot.slane %v224_v63, 1  ;;  %v443_v23 = vrot.slane %v224_v63, 2  ;;  %v152_v5 = vld [vmem:[%s711_s11 + $0x118] sm:$0x1] }
  0x35   : > { %583 = vst [vmem:[%s764_s15 + $0x40] sm:$0xff] %v553_v10  ;;  %v524_v37 = vmax.f32 %v373_v12, %v439_v4  ;;  %v374_v36 = vmax.f32 %v223_v59, %v321_v16  ;;  %v442_v38 = vsel %vm409_vm1, %v440_v13, %v441_v11  ;;  %v195_v39 = vmax.f32 %v146_v46, %v147_v7  ;;  %v149_v59 = vld [vmem:[%s711_s11 + $0x100] sm:$0xff]  ;;  %v151_v4 = vld [vmem:[%s711_s11 + $0x110] sm:$0x1] }
  0x36   : > { %v323_v40 = vrot.slane %v868_v17, 1  ;;  %v1050_v41 = vrot.slane %v868_v17, 2  ;;  %v225_v51 = vmax.f32 %v180_v1, %v131_v14  ;;  %v181_v44 = vmax.f32 %v130_v49, %v131_v14 }
  0x37   : > { %v554_v52 = vmax.f32 %v524_v37, 0.0  ;;  %v525_v54 = vmax.f32 %v374_v36, %v442_v38  ;;  %v877_v55 = vmax.f32 %v195_v39, %v148_v34  ;;  %v196_v62 = vmax.f32 %v147_v7, %v148_v34  ;;  %v150_v36 = vld [vmem:[%s711_s11 + $0x108] sm:$0xff] }
  0x38   : > { %v324_v46 = vsel %vm288_vm0, %v322_v22, %v323_v40  ;;  %v445_v2 = vsel %vm409_vm1, %v443_v23, %v1050_v41  ;;  %v325_v1 = vrot.slane %v225_v51, 1  ;;  %v446_v49 = vrot.slane %v225_v51, 2  ;;  %v133_v22 = vld [vmem:[%s711_s11 + $0x80] sm:$0xff] }
  0x39   : > { %584 = vst [vmem:[%s764_s15 + $0x48] sm:$0xff] %v554_v52  ;;  %v555_v10 = vmax.f32 %v525_v54, 0.0  ;;  %v375_v12 = vmax.f32 %v224_v63, %v324_v46  ;;  %v326_v13 = vrot.slane %v877_v55, 1  ;;  %v447_v7 = vrot.slane %v877_v55, 2 }
  0x3a   : > { %v226_v16 = vmax.f32 %v181_v44, %v132_v61  ;;  %v892_v37 = vmax.f32 %v196_v62, %v149_v59  ;;  %v182_v38 = vmax.f32 %v131_v14, %v132_v61  ;;  %v197_v23 = vmax.f32 %v148_v34, %v149_v59 }
  0x3b   : > { %585 = vst [vmem:[%s764_s15 + $0x50] sm:$0xff] %v555_v10  ;;  %v526_v39 = vmax.f32 %v375_v12, %v445_v2  ;;  %v327_v52 = vsel %vm288_vm0, %v325_v1, %v326_v13  ;;  %v448_v63 = vsel %vm409_vm1, %v446_v49, %v447_v7  ;;  %v198_v54 = vmax.f32 %v151_v4, %v152_v5  ;;  %v153_v2 = vld [vmem:[%s711_s11 + $0x120] sm:$0x1] }
  0x3c   : > { %v376_v44 = vmax.f32 %v225_v51, %v327_v52  ;;  %v328_v62 = vrot.slane %v226_v16, 1  ;;  %v329_v46 = vrot.slane %v892_v37, 1  ;;  %v449_v41 = vrot.slane %v226_v16, 2 }
  0x3d   : > { %v556_v14 = vmax.f32 %v526_v39, 0.0  ;;  %v450_v34 = vrot.slane %v892_v37, 2  ;;  %v227_v61 = vmax.f32 %v182_v38, %v133_v22  ;;  %v905_v59 = vmax.f32 %v197_v23, %v150_v36  ;;  %v154_v38 = vld [vmem:[%s711_s11 + $0x128] sm:$0x1] }
  0x3e   : > { %v527_v1 = vmax.f32 %v376_v44, %v448_v63  ;;  %v330_v10 = vsel %vm288_vm0, %v328_v62, %v329_v46  ;;  %v243_v49 = vmax.f32 %v198_v54, %v153_v2  ;;  %v379_v51 = vmax.f32 %v725_v18, %v290_v26  ;;  %v155_v44 = vld [vmem:[%s711_s11 + $0x130] sm:$0x1] }
  0x3f   : > { %586 = vst [vmem:[%s764_s15 + $0x58] sm:$0xff] %v556_v14  ;;  %v377_v4 = vmax.f32 %v226_v16, %v330_v10  ;;  %v451_v12 = vsel %vm409_vm1, %v449_v41, %v450_v34  ;;  %v331_v22 = vrot.slane %v227_v61, 1  ;;  %v332_v36 = vrot.slane %v905_v59, 1 }
  0x40   : > { %v557_v23 = vmax.f32 %v527_v1, 0.0  ;;  %v452_v39 = vrot.slane %v227_v61, 2  ;;  %v453_v52 = vrot.slane %v905_v59, 2  ;;  %v455_v63 = vrot.slane %v243_v49, 2  ;;  %v156_v49 = vld [vmem:[%s711_s11 + $0x138] sm:$0x1] }
  0x41   : > { %v528_v54 = vmax.f32 %v377_v4, %v451_v12  ;;  %v333_v26 = vsel %vm288_vm0, %v331_v22, %v332_v36  ;;  %v199_v16 = vmax.f32 %v152_v5, %v153_v2  ;;  %v380_v41 = vmax.f32 %v727_v19, %v293_v28  ;;  %v157_v22 = vld [vmem:[%s711_s11 + $0x140] sm:$0x1] }
  0x42   : > { %587 = vst [vmem:[%s764_s15 + $0x60] sm:$0xff] %v557_v23  ;;  %v378_v62 = vmax.f32 %v227_v61, %v333_v26  ;;  %v454_v14 = vsel %vm409_vm1, %v452_v39, %v453_v52  ;;  %v456_v1 = vsel %vm409_vm1, %v411_v27, %v455_v63  ;;  %v200_v10 = vmax.f32 %v153_v2, %v154_v38  ;;  %v158_v27 = vld [vmem:[%s711_s11 + $0x148] sm:$0x1] }
  0x43   : > { %v558_v5 = vmax.f32 %v528_v54, 0.0  ;;  %v530_v4 = vmax.f32 %v379_v51, %v456_v1  ;;  %v244_v12 = vmax.f32 %v199_v16, %v154_v38  ;;  %v381_v28 = vmax.f32 %v737_v33, %v296_v43 }
  0x44   : > { %v529_v61 = vmax.f32 %v378_v62, %v454_v14  ;;  %v245_v23 = vmax.f32 %v200_v10, %v155_v44  ;;  %v201_v26 = vmax.f32 %v154_v38, %v155_v44  ;;  %v382_v18 = vmax.f32 %v739_v35, %v299_v47 }
  0x45   : > { %588 = vst [vmem:[%s764_s15 + $0x68] sm:$0xff] %v558_v5  ;;  %v560_v2 = vmax.f32 %v530_v4, 0.0  ;;  %v457_v51 = vrot.slane %v244_v12, 2  ;;  %v202_v39 = vmax.f32 %v155_v44, %v156_v49  ;;  %v383_v43 = vmax.f32 %v782_v9, %v302_v20  ;;  %v159_v44 = vld [vmem:[%s711_s11 + $0x150] sm:$0x1] }
  0x46   : > { %v559_v63 = vmax.f32 %v529_v61, 0.0  ;;  %v459_v54 = vrot.slane %v245_v23, 2  ;;  %v246_v16 = vmax.f32 %v201_v26, %v156_v49  ;;  %v203_v62 = vmax.f32 %v156_v49, %v157_v22 }
  0x47   : > { %590 = vst [vmem:[%s764_s15 + $0x78] sm:$0x7f] %v560_v2  ;;  %v458_v38 = vsel %vm409_vm1, %v414_v29, %v457_v51  ;;  %v247_v47 = vmax.f32 %v202_v39, %v157_v22  ;;  %v384_v14 = vmax.f32 %v784_v15, %v305_v24  ;;  %v204_v1 = vmax.f32 %v157_v22, %v158_v27  ;;  %v160_v22 = vld [vmem:[%s711_s11 + $0x158] sm:$0x1]  ;;  %v161_v2 = vld [vmem:[%s711_s11 + $0x160] sm:$0x1] }
  0x48   : > { %589 = vst [vmem:[%s764_s15 + $0x70] sm:$0xff] %v559_v63  ;;  %v531_v10 = vmax.f32 %v380_v41, %v458_v38  ;;  %v460_v20 = vsel %vm409_vm1, %v417_v45, %v459_v54  ;;  %v461_v49 = vrot.slane %v246_v16, 2  ;;  %v248_v5 = vmax.f32 %v203_v62, %v158_v27  ;;  %v162_v15 = vld [vmem:[%s711_s11 + $0x168] sm:$0x1]  ;;  %v163_v63 = vld [vmem:[%s711_s11 + $0x170] sm:$0x1] }
  0x49   : > { %v532_v19 = vmax.f32 %v381_v28, %v460_v20  ;;  %v463_v4 = vrot.slane %v247_v47, 2  ;;  %v249_v29 = vmax.f32 %v204_v1, %v159_v44  ;;  %v385_v12 = vmax.f32 %v794_v31, %v308_v48 }
  0x4a   : > { %v561_v24 = vmax.f32 %v531_v10, 0.0  ;;  %v462_v41 = vsel %vm409_vm1, %v420_v56, %v461_v49  ;;  %v465_v33 = vrot.slane %v248_v5, 2  ;;  %v205_v45 = vmax.f32 %v158_v27, %v159_v44 }
  0x4b   : > { %v562_v61 = vmax.f32 %v532_v19, 0.0  ;;  %v533_v23 = vmax.f32 %v382_v18, %v462_v41  ;;  %v464_v28 = vsel %vm409_vm1, %v423_v21, %v463_v4  ;;  %v467_v26 = vrot.slane %v249_v29, 2 }
  0x4c   : > { %591 = vst [vmem:[%s764_s15 + $0x80] sm:$0x7f] %v561_v24  ;;  %v534_v48 = vmax.f32 %v383_v43, %v464_v28  ;;  %v466_v35 = vsel %vm409_vm1, %v426_v25, %v465_v33  ;;  %v250_v56 = vmax.f32 %v205_v45, %v160_v22  ;;  %v386_v27 = vmax.f32 %v812_v53, %v311_v0  ;;  %v167_v45 = vld [vmem:[%s711_s11 + $0x190] sm:$0x1] }
  0x4d   : > { %592 = vst [vmem:[%s764_s15 + $0x88] sm:$0x7f] %v562_v61  ;;  %v563_v9 = vmax.f32 %v533_v23, 0.0  ;;  %v535_v21 = vmax.f32 %v384_v14, %v466_v35  ;;  %v468_v18 = vsel %vm409_vm1, %v429_v50, %v467_v26  ;;  %v206_v51 = vmax.f32 %v159_v44, %v160_v22  ;;  %v164_v50 = vld [vmem:[%s711_s11 + $0x178] sm:$0x1] }
  0x4e   : > { %v564_v39 = vmax.f32 %v534_v48, 0.0  ;;  %v536_v25 = vmax.f32 %v385_v12, %v468_v18  ;;  %v469_v43 = vrot.slane %v250_v56, 2  ;;  %v387_v0 = vmax.f32 %v828_v8, %v314_v30 }
  0x4f   : > { %593 = vst [vmem:[%s764_s15 + $0x90] sm:$0x7f] %v563_v9  ;;  %v565_v54 = vmax.f32 %v535_v21, 0.0  ;;  %v251_v16 = vmax.f32 %v206_v51, %v161_v2  ;;  %v207_v62 = vmax.f32 %v160_v22, %v161_v2  ;;  %v388_v31 = vmax.f32 %v846_v42, %v317_v57  ;;  %v165_v57 = vld [vmem:[%s711_s11 + $0x180] sm:$0x1] }
  0x50   : > { %594 = vst [vmem:[%s764_s15 + $0x98] sm:$0x7f] %v564_v39  ;;  %v566_v38 = vmax.f32 %v536_v25, 0.0  ;;  %v470_v47 = vsel %vm409_vm1, %v432_v3, %v469_v43  ;;  %v208_v30 = vmax.f32 %v161_v2, %v162_v15  ;;  %v389_v14 = vmax.f32 %v852_v60, %v320_v6  ;;  %v166_v6 = vld [vmem:[%s711_s11 + $0x188] sm:$0x1] }
  0x51   : > { %595 = vst [vmem:[%s764_s15 + $0xa0] sm:$0x7f] %v565_v54  ;;  %v537_v44 = vmax.f32 %v386_v27, %v470_v47  ;;  %v471_v1 = vrot.slane %v251_v16, 2  ;;  %v252_v10 = vmax.f32 %v207_v62, %v162_v15  ;;  %v209_v20 = vmax.f32 %v162_v15, %v163_v63 }
  0x52   : > { %596 = vst [vmem:[%s764_s15 + $0xa8] sm:$0x7f] %v566_v38  ;;  %v253_v49 = vmax.f32 %v208_v30, %v163_v63  ;;  %v390_v53 = vmax.f32 %v868_v17, %v323_v40  ;;  %v210_v3 = vmax.f32 %v163_v63, %v164_v50  ;;  %v391_v5 = vmax.f32 %v877_v55, %v326_v13 }
  0x53   : > { %v567_v19 = vmax.f32 %v537_v44, 0.0  ;;  %v472_v4 = vsel %vm409_vm1, %v435_v32, %v471_v1  ;;  %v473_v29 = vrot.slane %v252_v10, 2  ;;  %v254_v12 = vmax.f32 %v209_v20, %v164_v50 }
  0x54   : > { %v538_v24 = vmax.f32 %v387_v0, %v472_v4  ;;  %v475_v41 = vrot.slane %v253_v49, 2  ;;  %v255_v33 = vmax.f32 %v210_v3, %v165_v57  ;;  %v211_v22 = vmax.f32 %v164_v50, %v165_v57 }
  0x55   : > { %597 = vst [vmem:[%s764_s15 + $0xb0] sm:$0x7f] %v567_v19  ;;  %v474_v40 = vsel %vm409_vm1, %v438_v58, %v473_v29  ;;  %v477_v13 = vrot.slane %v254_v12, 2  ;;  %v392_v8 = vmax.f32 %v892_v37, %v329_v46  ;;  %v212_v61 = vmax.f32 %v165_v57, %v166_v6 }
  0x56   : > { %v568_v32 = vmax.f32 %v538_v24, 0.0  ;;  %v539_v23 = vmax.f32 %v388_v31, %v474_v40  ;;  %v476_v28 = vsel %vm409_vm1, %v441_v11, %v475_v41  ;;  %v479_v26 = vrot.slane %v255_v33, 2 }
  0x57   : > { %v540_v48 = vmax.f32 %v389_v14, %v476_v28  ;;  %v1051_v42 = vrot.slane %v868_v17, 2  ;;  %v256_v35 = vmax.f32 %v211_v22, %v166_v6  ;;  %v257_v56 = vmax.f32 %v212_v61, %v167_v45 }
  0x58   : > { %598 = vst [vmem:[%s764_s15 + $0xb8] sm:$0x7f] %v568_v32  ;;  %v569_v46 = vmax.f32 %v539_v23, 0.0  ;;  %v480_v60 = vsel %vm409_vm1, %v447_v7, %v479_v26  ;;  %v393_v11 = vmax.f32 %v905_v59, %v332_v36 }
  0x59   : > { %v478_v58 = vsel %vm409_vm1, %v1051_v42, %v477_v13  ;;  %v570_v2 = vmax.f32 %v540_v48, 0.0  ;;  %v542_v17 = vmax.f32 %v391_v5, %v480_v60  ;;  %v481_v9 = vrot.slane %v256_v35, 2 }
  0x5a   : > { %v541_v27 = vmax.f32 %v390_v53, %v478_v58  ;;  %v483_v21 = vrot.slane %v257_v56, 2  ;;  %599 = vst [vmem:[%s764_s15 + $0xc0] sm:$0x7f] %v569_v46 }
  0x5b   : > { %600 = vst [vmem:[%s764_s15 + $0xc8] sm:$0x7f] %v570_v2  ;;  %v572_v51 = vmax.f32 %v542_v17, 0.0  ;;  %v482_v55 = vsel %vm409_vm1, %v450_v34, %v481_v9 }
  0x5c   : > { %v571_v18 = vmax.f32 %v541_v27, 0.0  ;;  %v484_v7 = vsel %vm409_vm1, %v453_v52, %v483_v21  ;;  %v543_v36 = vmax.f32 %v392_v8, %v482_v55 }
  0x5d   : > { %v544_v15 = vmax.f32 %v393_v11, %v484_v7  ;;  %602 = vst [vmem:[%s764_s15 + $0xd8] sm:$0x7f] %v572_v51 }
  0x5e   : > { %601 = vst [vmem:[%s764_s15 + $0xd0] sm:$0x7f] %v571_v18  ;;  %v573_v39 = vmax.f32 %v543_v36, 0.0 }
  0x5f   : > { %v574_v25 = vmax.f32 %v544_v15, 0.0 }
  0x60   : > { %603 = vst [vmem:[%s764_s15 + $0xe0] sm:$0x7f] %v573_v39 }
  0x61   : > { %604 = vst [vmem:[%s764_s15 + $0xe8] sm:$0x7f] %v574_v25 }
  0x62 PF: > { %s11_s6 = sadd.s32 1, %s685_s6  }
  0x63   : > { %p8_p4 = scmp.ge.s32.totalorder %s11_s6, 4  }
  0x65   :  { %10 = sbr.rel (!%p8_p4) target bundleno = 1 (0x1), region = 54 }

// kernel: _lambda_.11
= control target key start
LH: loop header
LB: loop body
LE: loop exit
PB: predicated region body
PF: predicated region fallthrough
CT: control target
= control target key end

     0   :  { %vm462_vm0 = vcmask 523264   ;;  %s1339_s1 = inlined_call_operand.vmem [shape: bf16[576,128], index: 1, kind: input, shape index: {}]   ;;  %s1340_s2 = inlined_call_operand.vmem [shape: f32[1,128], index: 2, kind: input, shape index: {}]   ;;  %s1341_s0 = inlined_call_operand.vmem [shape: bf16[80,576], index: 0, kind: input, shape index: {}]   ;;  %s1342_s3 = inlined_call_operand.vmem [shape: f32[80,128], index: 3, kind: output, shape index: {}]  }
   0x1   :  { %v953_v0 = vld [vmem:[%s1339_s1 + $0x38] sm:$0xff]  ;;  %v952_v1 = vld [vmem:[%s1339_s1 + $0x30] sm:$0xff]  ;;  %v951_v4 = vld [vmem:[%s1339_s1 + $0x28] sm:$0xff] }
   0x2   :  { %478 = vmatpush.bf16.msra.mxu0 %v953_v0  ;;  %982 = vmatpush.bf16.msra.mxu1 %v953_v0  ;;  %v977_v2 = vld [vmem:[%s1339_s1 + $0xf8] sm:$0xff]  ;;  %v976_v3 = vld [vmem:[%s1339_s1 + $0xf0] sm:$0xff]  ;;  %v975_v5 = vld [vmem:[%s1339_s1 + $0xe8] sm:$0xff] }
   0x3   :  { %983 = vmatpush.bf16.msra.mxu2 %v953_v0  ;;  %580 = vmatpush.bf16.msra.mxu3 %v977_v2  ;;  %v950_v6 = vld [vmem:[%s1339_s1 + $0x20] sm:$0xff]  ;;  %v949_v8 = vld [vmem:[%s1339_s1 + $0x18] sm:$0xff]  ;;  %v948_v10 = vld [vmem:[%s1339_s1 + $0x10] sm:$0xff] }
   0x4   :  { %v974_v7 = vld [vmem:[%s1339_s1 + $0xe0] sm:$0xff]  ;;  %v973_v9 = vld [vmem:[%s1339_s1 + $0xd8] sm:$0xff]  ;;  %v972_v11 = vld [vmem:[%s1339_s1 + $0xd0] sm:$0xff] }
   0x5   :  { %v947_v12 = vld [vmem:[%s1339_s1 + $0x8] sm:$0xff]  ;;  %v946_v14 = vld [vmem:[%s1339_s1] sm:$0xff]  ;;  %v923_v16 = vld [vmem:[%s1341_s0 + $0x10] sm:$0xf0] }
   0x6   :  { %479 = vmatpush.bf16.msra.mxu0 %v952_v1  ;;  %984 = vmatpush.bf16.msra.mxu1 %v952_v1  ;;  %v971_v13 = vld [vmem:[%s1339_s1 + $0xc8] sm:$0xff]  ;;  %v674_v15 = vld [vmem:[%s1341_s0] sm:$0xf]  ;;  %v714_v17 = vld [vmem:[%s1341_s0 + $0x50] sm:$0xf] }
   0x7   :  { %985 = vmatpush.bf16.msra.mxu2 %v952_v1  ;;  %581 = vmatpush.bf16.msra.mxu3 %v976_v3  ;;  %v933_v18 = vld [vmem:[%s1341_s0 + $0x60] sm:$0xf0]  ;;  %v961_v19 = vld [vmem:[%s1339_s1 + $0x78] sm:$0xff]  ;;  %v754_v20 = vld [vmem:[%s1341_s0 + $0xa0] sm:$0xf]  ;;  %v675_v24 = vor.u32 %v923_v16, %v674_v15 }
   0x8   :  { %v943_v21 = vld [vmem:[%s1341_s0 + $0xb0] sm:$0xf0]  ;;  %v969_v22 = vld [vmem:[%s1339_s1 + $0xb8] sm:$0xff]  ;;  %v715_v25 = vor.u32 %v933_v18, %v714_v17  ;;  %v970_v27 = vld [vmem:[%s1339_s1 + $0xc0] sm:$0xff] }
   0x9   :  { %v981_v23 = vld [vmem:[%s1339_s1 + $0x118] sm:$0xff]  ;;  %v755_v26 = vor.u32 %v943_v21, %v754_v20  ;;  %v922_v28 = vld [vmem:[%s1341_s0 + $0xc] sm:$0xf]  ;;  %v684_v29 = vld [vmem:[%s1341_s0 + $0x1c] sm:$0xf0] }
   0xa   :  { %480 = vmatpush.bf16.msra.mxu0 %v951_v4  ;;  %986 = vmatpush.bf16.msra.mxu1 %v951_v4  ;;  %v960_v30 = vld [vmem:[%s1339_s1 + $0x70] sm:$0xff]  ;;  %v687_v33 = vor.u32 %v922_v28, %v684_v29  ;;  %v959_v34 = vld [vmem:[%s1339_s1 + $0x68] sm:$0xff]  ;;  %v958_v37 = vld [vmem:[%s1339_s1 + $0x60] sm:$0xff] }
   0xb   :  { %987 = vmatpush.bf16.msra.mxu2 %v951_v4  ;;  %582 = vmatpush.bf16.msra.mxu3 %v975_v5  ;;  %v968_v31 = vld [vmem:[%s1339_s1 + $0xb0] sm:$0xff]  ;;  %v967_v35 = vld [vmem:[%s1339_s1 + $0xa8] sm:$0xff]  ;;  %v966_v38 = vld [vmem:[%s1339_s1 + $0xa0] sm:$0xff] }
   0xc   :  { %v980_v32 = vld [vmem:[%s1339_s1 + $0x110] sm:$0xff]  ;;  %v979_v36 = vld [vmem:[%s1339_s1 + $0x108] sm:$0xff]  ;;  %v978_v39 = vld [vmem:[%s1339_s1 + $0x100] sm:$0xff] }
   0xd   :  { %v694_v40 = vld [vmem:[%s1341_s0 + $0x28] sm:$0xf]  ;;  %v928_v41 = vld [vmem:[%s1341_s0 + $0x38] sm:$0xf0]  ;;  %v734_v42 = vld [vmem:[%s1341_s0 + $0x78] sm:$0xf] }
   0xe   :  { %481 = vmatpush.bf16.msra.mxu0 %v950_v6  ;;  %988 = vmatpush.bf16.msra.mxu1 %v950_v6  ;;  %v938_v43 = vld [vmem:[%s1341_s0 + $0x88] sm:$0xf0]  ;;  %v957_v44 = vld [vmem:[%s1339_s1 + $0x58] sm:$0xff]  ;;  %v695_v46 = vor.u32 %v928_v41, %v694_v40  ;;  %v927_v48 = vld [vmem:[%s1341_s0 + $0x34] sm:$0xf] }
   0xf   :  { %989 = vmatpush.bf16.msra.mxu2 %v950_v6  ;;  %583 = vmatpush.bf16.msra.mxu3 %v974_v7  ;;  %v965_v45 = vld [vmem:[%s1339_s1 + $0x98] sm:$0xff]  ;;  %v735_v47 = vor.u32 %v938_v43, %v734_v42  ;;  %v704_v49 = vld [vmem:[%s1341_s0 + $0x44] sm:$0xf0]  ;;  %v956_v50 = vld [vmem:[%s1339_s1 + $0x50] sm:$0xff] }
  0x10   :  { %v964_v51 = vld [vmem:[%s1339_s1 + $0x90] sm:$0xff]  ;;  %v707_v52 = vor.u32 %v927_v48, %v704_v49  ;;  %v955_v53 = vld [vmem:[%s1339_s1 + $0x48] sm:$0xff]  ;;  %v954_v55 = vld [vmem:[%s1339_s1 + $0x40] sm:$0xff] }
  0x11   :  { %v963_v54 = vld [vmem:[%s1339_s1 + $0x88] sm:$0xff]  ;;  %v962_v56 = vld [vmem:[%s1339_s1 + $0x80] sm:$0xff]  ;;  %v924_v58 = vld [vmem:[%s1341_s0 + $0x18] sm:$0xf0] }
  0x12   :  { %482 = vmatpush.bf16.msra.mxu0 %v949_v8  ;;  %990 = vmatpush.bf16.msra.mxu1 %v949_v8  ;;  %v682_v57 = vld [vmem:[%s1341_s0 + $0x8] sm:$0xf]  ;;  %v921_v59 = vld [vmem:[%s1341_s0 + $0x4] sm:$0xf]  ;;  %v676_v60 = vld [vmem:[%s1341_s0 + $0x14] sm:$0xf0] }
  0x13   :  { %991 = vmatpush.bf16.msra.mxu2 %v949_v8  ;;  %584 = vmatpush.bf16.msra.mxu3 %v973_v9  ;;  %v690_v61 = vld [vmem:[%s1341_s0 + $0x10] sm:$0xf]  ;;  %v925_v62 = vld [vmem:[%s1341_s0 + $0x20] sm:$0xf0]  ;;  %v683_v63 = vor.u32 %v924_v58, %v682_v57  ;;  %v679_v0 = vor.u32 %v921_v59, %v676_v60  ;;  %v932_v2 = vld [vmem:[%s1341_s0 + $0x5c] sm:$0xf] }
  0x14   :  { %v691_v1 = vor.u32 %v925_v62, %v690_v61  ;;  %v724_v3 = vld [vmem:[%s1341_s0 + $0x6c] sm:$0xf0]  ;;  %v929_v6 = vld [vmem:[%s1341_s0 + $0x40] sm:$0xf0]  ;;  %v926_v7 = vld [vmem:[%s1341_s0 + $0x2c] sm:$0xf] }
  0x15   :  { %v727_v4 = vor.u32 %v932_v2, %v724_v3  ;;  %v702_v5 = vld [vmem:[%s1341_s0 + $0x30] sm:$0xf]  ;;  %v696_v8 = vld [vmem:[%s1341_s0 + $0x3c] sm:$0xf0]  ;;  %v710_v9 = vld [vmem:[%s1341_s0 + $0x38] sm:$0xf] }
  0x16   :  { %483 = vmatpush.bf16.msra.mxu0 %v948_v10  ;;  %992 = vmatpush.bf16.msra.mxu1 %v948_v10  ;;  %v744_v15 = vld [vmem:[%s1341_s0 + $0x94] sm:$0xf0]  ;;  %v934_v18 = vld [vmem:[%s1341_s0 + $0x68] sm:$0xf0]  ;;  %v716_v20 = vld [vmem:[%s1341_s0 + $0x64] sm:$0xf0] }
  0x17   :  { %993 = vmatpush.bf16.msra.mxu2 %v948_v10  ;;  %585 = vmatpush.bf16.msra.mxu3 %v972_v11  ;;  %v930_v10 = vld [vmem:[%s1341_s0 + $0x48] sm:$0xf0]  ;;  %v703_v11 = vor.u32 %v929_v6, %v702_v5  ;;  %v722_v17 = vld [vmem:[%s1341_s0 + $0x58] sm:$0xf]  ;;  %v730_v21 = vld [vmem:[%s1341_s0 + $0x60] sm:$0xf] }
  0x18   :  { %v742_v29 = vld [vmem:[%s1341_s0 + $0x80] sm:$0xf]  ;;  %v941_v40 = vld [vmem:[%s1341_s0 + $0xa4] sm:$0xf]  ;;  %v756_v41 = vld [vmem:[%s1341_s0 + $0xb4] sm:$0xf0] }
  0x19   :  { %v770_v42 = vld [vmem:[%s1341_s0 + $0xb0] sm:$0xf]  ;;  %v945_v43 = vld [vmem:[%s1341_s0 + $0xc0] sm:$0xf0]  ;;  %v1285_v49 = vld [vmem:[%s1340_s2] ss:$0 sm:$0xff] }
  0x1a   :  { %484 = vmatpush.bf16.msra.mxu0 %v947_v12  ;;  %994 = vmatpush.bf16.msra.mxu1 %v947_v12 }
  0x1b   :  { %995 = vmatpush.bf16.msra.mxu2 %v947_v12  ;;  %586 = vmatpush.bf16.msra.mxu3 %v971_v13  ;;  %v699_v12 = vor.u32 %v926_v7, %v696_v8  ;;  %v711_v13 = vor.u32 %v930_v10, %v710_v9 }
  0x1e   :  { %485 = vmatpush.bf16.msra.mxu0 %v946_v14  ;;  %996 = vmatpush.bf16.msra.mxu1 %v946_v14 }
  0x1f   :  { %997 = vmatpush.bf16.msra.mxu2 %v946_v14  ;;  %587 = vmatpush.bf16.msra.mxu3 %v970_v27  ;;  %v937_v14 = vld [vmem:[%s1341_s0 + $0x84] sm:$0xf]  ;;  %v764_v27 = vld [vmem:[%s1341_s0 + $0xbc] sm:$0xf0] }
  0x20   :  { %v747_v16 = vor.u32 %v937_v14, %v744_v15 }
  0x21   :  { %486 = vmatmul.bf16.vlgmr.msra.gmra.mxu0 %v675_v24  ;;  %496 = vmatmul.bf16.vlgmr.msra.gmra.mxu1 %v715_v25 }
  0x22   :  { %512 = vmatpush.bf16.msrb.mxu1 %v961_v19  ;;  %618 = vmatpush.bf16.msrb.mxu0 %v981_v23  ;;  %v931_v19 = vld [vmem:[%s1341_s0 + $0x54] sm:$0xf]  ;;  %v723_v23 = vor.u32 %v934_v18, %v722_v17 }
  0x23   :  { %546 = vmatpush.bf16.msrb.mxu2 %v969_v22  ;;  %588 = vmatmul.bf16.vlgmr.msra.gmra.mxu3 %v687_v33  ;;  %v935_v22 = vld [vmem:[%s1341_s0 + $0x70] sm:$0xf0]  ;;  %v719_v24 = vor.u32 %v931_v19, %v716_v20  ;;  %v750_v33 = vld [vmem:[%s1341_s0 + $0x88] sm:$0xf] }
  0x24   :  { %506 = vmatmul.bf16.vlgmr.msra.gmra.mxu2 %v755_v26  ;;  %v731_v25 = vor.u32 %v935_v22, %v730_v21  ;;  %v942_v26 = vld [vmem:[%s1341_s0 + $0xac] sm:$0xf] }
  0x25   :  { %v767_v28 = vor.u32 %v942_v26, %v764_v27 }
  0x26   :  { %513 = vmatpush.bf16.msrb.mxu1 %v960_v30  ;;  %619 = vmatpush.bf16.msrb.mxu0 %v980_v32  ;;  %v939_v30 = vld [vmem:[%s1341_s0 + $0x90] sm:$0xf0]  ;;  %v736_v32 = vld [vmem:[%s1341_s0 + $0x8c] sm:$0xf0] }
  0x27   :  { %547 = vmatpush.bf16.msrb.mxu2 %v968_v31  ;;  %v936_v31 = vld [vmem:[%s1341_s0 + $0x7c] sm:$0xf] }
  0x2a   :  { %514 = vmatpush.bf16.msrb.mxu1 %v959_v34  ;;  %620 = vmatpush.bf16.msrb.mxu0 %v979_v36  ;;  %v940_v34 = vld [vmem:[%s1341_s0 + $0x98] sm:$0xf0]  ;;  %v739_v36 = vor.u32 %v936_v31, %v736_v32 }
  0x2b   :  { %548 = vmatpush.bf16.msrb.mxu2 %v967_v35  ;;  %v743_v35 = vor.u32 %v939_v30, %v742_v29 }
  0x2e   :  { %515 = vmatpush.bf16.msrb.mxu1 %v958_v37  ;;  %621 = vmatpush.bf16.msrb.mxu0 %v978_v39  ;;  %v751_v37 = vor.u32 %v940_v34, %v750_v33  ;;  %v944_v39 = vld [vmem:[%s1341_s0 + $0xb8] sm:$0xf0] }
  0x2f   :  { %549 = vmatpush.bf16.msrb.mxu2 %v966_v38  ;;  %v762_v38 = vld [vmem:[%s1341_s0 + $0xa8] sm:$0xf] }
  0x31   :  { %491 = vmatmul.bf16.gmra.mxu0 %v695_v46  ;;  %501 = vmatmul.bf16.gmra.mxu1 %v735_v47  ;;  %v771_v46 = vor.u32 %v945_v43, %v770_v42 }
  0x32   :  { %516 = vmatpush.bf16.msrb.mxu1 %v957_v44  ;;  %v763_v44 = vor.u32 %v944_v39, %v762_v38 }
  0x33   :  { %550 = vmatpush.bf16.msrb.mxu2 %v965_v45  ;;  %593 = vmatmul.bf16.gmra.mxu3 %v707_v52  ;;  %v759_v45 = vor.u32 %v941_v40, %v756_v41 }
  0x36   :  { %517 = vmatpush.bf16.msrb.mxu1 %v956_v50 }
  0x37   :  { %551 = vmatpush.bf16.msrb.mxu2 %v964_v51 }
  0x3a   :  { %518 = vmatpush.bf16.msrb.mxu1 %v955_v53 }
  0x3b   :  { %552 = vmatpush.bf16.msrb.mxu2 %v963_v54 }
  0x3e   :  { %519 = vmatpush.bf16.msrb.mxu1 %v954_v55 }
  0x3f   :  { %553 = vmatpush.bf16.msrb.mxu2 %v962_v56 }
  0x41   :  { %520 = vmatmul.bf16.vlgmr.msrb.gmra.mxu1 %v679_v0  ;;  %916 = vmatmul.msk.bf16.vlgmr.msrb.gmra.mxu0 %vm462_vm0, %v691_v1 }
  0x42   :  { %554 = vmatmul.bf16.vlgmr.msrb.gmra.mxu2 %v683_v63 }
  0x43   :  { %598 = vmatmul.bf16.gmra.mxu3 %v727_v4 }
  0x51   :  { %525 = vmatmul.bf16.gmra.mxu1 %v699_v12  ;;  %917 = vmatmul.msk.bf16.gmra.mxu0 %vm462_vm0, %v711_v13 }
  0x52   :  { %559 = vmatmul.bf16.gmra.mxu2 %v703_v11 }
  0x53   :  { %603 = vmatmul.bf16.gmra.mxu3 %v747_v16 }
  0x61   :  { %530 = vmatmul.bf16.gmra.mxu1 %v719_v24  ;;  %918 = vmatmul.msk.bf16.gmra.mxu0 %vm462_vm0, %v731_v25 }
  0x62   :  { %564 = vmatmul.bf16.gmra.mxu2 %v723_v23 }
  0x63   :  { %608 = vmatmul.bf16.gmra.mxu3 %v767_v28 }
  0x71   :  { %535 = vmatmul.bf16.gmra.mxu1 %v739_v36  ;;  %919 = vmatmul.msk.bf16.gmra.mxu0 %vm462_vm0, %v751_v37 }
  0x72   :  { %569 = vmatmul.bf16.gmra.mxu2 %v743_v35 }
  0x81   :  { %540 = vmatmul.bf16.gmra.mxu1 %v759_v45  ;;  %920 = vmatmul.msk.bf16.gmra.mxu0 %vm462_vm0, %v771_v46 }
  0x82   :  { %574 = vmatmul.bf16.gmra.mxu2 %v763_v44 }
  0x9e   :  { %v487_v47 = vpop.f32.mrf.mxu0  ;;  %v497_v48 = vpop.f32.mrf.mxu1 }
  0x9f   :  { %v488_v62 = vadd.f32 %v1285_v49, %v487_v47  ;;  %v498_v34 = vadd.f32 %v1285_v49, %v497_v48 }
  0xa6   :  { %v489_v51 = vpop.f32.mrf.mxu0  ;;  %v499_v52 = vpop.f32.mrf.mxu1 }
  0xa7   :  { %v507_v50 = vpop.f32.mrf.mxu2  ;;  %v589_v58 = vpop.f32.mrf.mxu3  ;;  %v490_v4 = vadd.f32 %v1285_v49, %v489_v51  ;;  %v500_v44 = vadd.f32 %v1285_v49, %v499_v52 }
  0xa8   :  { %v1288_v53 = vadd.f32 %v1285_v49, %v507_v50 }
  0xae   :  { %v492_v55 = vpop.f32.mrf.mxu0  ;;  %v1290_v56 = vpop.f32.mrf.mxu1 }
  0xaf   :  { %v509_v54 = vpop.f32.mrf.mxu2  ;;  %v591_v61 = vpop.f32.mrf.mxu3  ;;  %v493_v14 = vadd.f32 %v1285_v49, %v492_v55 }
  0xb0   :  { %v1293_v57 = vadd.f32 %v1285_v49, %v509_v54 }
  0xb6   :  { %v494_v59 = vpop.f32.mrf.mxu0  ;;  %v1295_v60 = vpop.f32.mrf.mxu1 }
  0xb7   :  { %v594_v6 = vpop.f32.mrf.mxu3  ;;  %v495_v24 = vadd.f32 %v1285_v49, %v494_v59 }
  0xbe   :  { %v521_v63 = vpop.f32.mrf.mxu1  ;;  %v623_v0 = vpop.f32.mrf.mxu0 }
  0xbf   :  { %v522_v1 = vadd.f32 %v521_v63, %v488_v62  ;;  %v596_v20 = vpop.f32.mrf.mxu3 }
  0xc5   :  { %v555_v2 = vpop.f32.mrf.mxu2 }
  0xc6   :  { %v556_v3 = vadd.f32 %v555_v2, %v522_v1  ;;  %v523_v7 = vpop.f32.mrf.mxu1  ;;  %v625_v8 = vpop.f32.mrf.mxu0 }
  0xc7   :  { %v524_v10 = vadd.f32 %v523_v7, %v490_v4  ;;  %v599_v32 = vpop.f32.mrf.mxu3  ;;  %v505_v4 = vadd.f32 %v1285_v49, %v1295_v60 }
  0xc8   :  { %v590_v5 = vadd.f32 %v589_v58, %v556_v3  ;;  %v503_v58 = vadd.f32 %v1285_v49, %v1290_v56 }
  0xca   :  { %v624_v9 = vadd.f32 %v623_v0, %v590_v5 }
  0xcc   :  { %v648_v11 = vmax.f32 %v624_v9, 0.0 }
  0xcd   :  { %v557_v12 = vpop.f32.mrf.mxu2 }
  0xce   :  { %658 = vst [vmem:[%s1342_s3] sm:$0xff] %v648_v11  ;;  %v558_v13 = vadd.f32 %v557_v12, %v524_v10  ;;  %v526_v16 = vpop.f32.mrf.mxu1  ;;  %v628_v17 = vpop.f32.mrf.mxu0 }
  0xcf   :  { %v527_v19 = vadd.f32 %v526_v16, %v493_v14  ;;  %v601_v43 = vpop.f32.mrf.mxu3 }
  0xd0   :  { %v592_v15 = vadd.f32 %v591_v61, %v558_v13 }
  0xd2   :  { %v626_v18 = vadd.f32 %v625_v8, %v592_v15 }
  0xd4   :  { %v649_v21 = vmax.f32 %v626_v18, 0.0 }
  0xd5   :  { %v560_v22 = vpop.f32.mrf.mxu2 }
  0xd6   :  { %659 = vst [vmem:[%s1342_s3 + $0x8] sm:$0xff] %v649_v21  ;;  %v561_v23 = vadd.f32 %v560_v22, %v527_v19  ;;  %v528_v26 = vpop.f32.mrf.mxu1  ;;  %v630_v27 = vpop.f32.mrf.mxu0 }
  0xd7   :  { %v529_v29 = vadd.f32 %v528_v26, %v495_v24  ;;  %v604_v61 = vpop.f32.mrf.mxu3 }
  0xd8   :  { %v595_v25 = vadd.f32 %v594_v6, %v561_v23 }
  0xda   :  { %v629_v28 = vadd.f32 %v628_v17, %v595_v25 }
  0xdc   :  { %v650_v30 = vmax.f32 %v629_v28, 0.0 }
  0xdd   :  { %v562_v31 = vpop.f32.mrf.mxu2 }
  0xde   :  { %660 = vst [vmem:[%s1342_s3 + $0x10] sm:$0xff] %v650_v30  ;;  %v563_v33 = vadd.f32 %v562_v31, %v529_v29  ;;  %v531_v36 = vpop.f32.mrf.mxu1  ;;  %v633_v37 = vpop.f32.mrf.mxu0 }
  0xdf   :  { %v532_v39 = vadd.f32 %v531_v36, %v498_v34  ;;  %v606_v8 = vpop.f32.mrf.mxu3 }
  0xe0   :  { %v597_v35 = vadd.f32 %v596_v20, %v563_v33 }
  0xe2   :  { %v631_v38 = vadd.f32 %v630_v27, %v597_v35 }
  0xe4   :  { %v651_v40 = vmax.f32 %v631_v38, 0.0 }
  0xe5   :  { %v565_v41 = vpop.f32.mrf.mxu2 }
  0xe6   :  { %661 = vst [vmem:[%s1342_s3 + $0x18] sm:$0xff] %v651_v40  ;;  %v566_v42 = vadd.f32 %v565_v41, %v532_v39  ;;  %v533_v46 = vpop.f32.mrf.mxu1  ;;  %v635_v47 = vpop.f32.mrf.mxu0 }
  0xe7   :  { %v534_v48 = vadd.f32 %v533_v46, %v500_v44  ;;  %v609_v49 = vpop.f32.mrf.mxu3 }
  0xe8   :  { %v600_v45 = vadd.f32 %v599_v32, %v566_v42 }
  0xea   :  { %v634_v50 = vadd.f32 %v633_v37, %v600_v45 }
  0xec   :  { %v652_v51 = vmax.f32 %v634_v50, 0.0 }
  0xed   :  { %v567_v54 = vpop.f32.mrf.mxu2 }
  0xee   :  { %662 = vst [vmem:[%s1342_s3 + $0x20] sm:$0xff] %v652_v51  ;;  %v568_v55 = vadd.f32 %v567_v54, %v534_v48  ;;  %v536_v62 = vpop.f32.mrf.mxu1  ;;  %v638_v0 = vpop.f32.mrf.mxu0 }
  0xef   :  { %v537_v52 = vadd.f32 %v536_v62, %v503_v58  ;;  %v611_v26 = vpop.f32.mrf.mxu3 }
  0xf0   :  { %v602_v59 = vadd.f32 %v601_v43, %v568_v55 }
  0xf2   :  { %v636_v63 = vadd.f32 %v635_v47, %v602_v59 }
  0xf4   :  { %v653_v1 = vmax.f32 %v636_v63, 0.0 }
  0xf5   :  { %v570_v2 = vpop.f32.mrf.mxu2 }
  0xf6   :  { %663 = vst [vmem:[%s1342_s3 + $0x28] sm:$0xff] %v653_v1  ;;  %v571_v3 = vadd.f32 %v570_v2, %v537_v52  ;;  %v538_v6 = vpop.f32.mrf.mxu1  ;;  %v640_v10 = vpop.f32.mrf.mxu0 }
  0xf7   :  { %v539_v56 = vadd.f32 %v538_v6, %v505_v4 }
  0xf8   :  { %v605_v5 = vadd.f32 %v604_v61, %v571_v3 }
  0xfa   :  { %v639_v7 = vadd.f32 %v638_v0, %v605_v5 }
  0xfc   :  { %v654_v9 = vmax.f32 %v639_v7, 0.0 }
  0xfd   :  { %v572_v11 = vpop.f32.mrf.mxu2 }
  0xfe   :  { %664 = vst [vmem:[%s1342_s3 + $0x30] sm:$0xff] %v654_v9  ;;  %v573_v12 = vadd.f32 %v572_v11, %v539_v56  ;;  %v541_v14 = vpop.f32.mrf.mxu1  ;;  %v643_v19 = vpop.f32.mrf.mxu0 }
  0xff   :  { %v542_v16 = vadd.f32 %v541_v14, %v1288_v53 }
 0x100   :  { %v607_v13 = vadd.f32 %v606_v8, %v573_v12 }
 0x102   :  { %v641_v15 = vadd.f32 %v640_v10, %v607_v13 }
 0x104   :  { %v655_v17 = vmax.f32 %v641_v15, 0.0 }
 0x105   :  { %v575_v60 = vpop.f32.mrf.mxu2 }
 0x106   :  { %665 = vst [vmem:[%s1342_s3 + $0x38] sm:$0xff] %v655_v17  ;;  %v576_v18 = vadd.f32 %v575_v60, %v542_v16  ;;  %v543_v21 = vpop.f32.mrf.mxu1  ;;  %v645_v28 = vpop.f32.mrf.mxu0 }
 0x107   :  { %v544_v23 = vadd.f32 %v543_v21, %v1293_v57 }
 0x108   :  { %v610_v20 = vadd.f32 %v609_v49, %v576_v18 }
 0x10a   :  { %v644_v22 = vadd.f32 %v643_v19, %v610_v20 }
 0x10c   :  { %v656_v24 = vmax.f32 %v644_v22, 0.0 }
 0x10d   :  { %v577_v25 = vpop.f32.mrf.mxu2 }
 0x10e   :  { %666 = vst [vmem:[%s1342_s3 + $0x40] sm:$0xff] %v656_v24  ;;  %v578_v53 = vadd.f32 %v577_v25, %v544_v23 }
 0x110   :  { %v612_v27 = vadd.f32 %v611_v26, %v578_v53 }
 0x112   :  { %v646_v29 = vadd.f32 %v645_v28, %v612_v27 }
 0x114   :  { %v657_v30 = vmax.f32 %v646_v29, 0.0 }
 0x116   :  { %667 = vst [vmem:[%s1342_s3 + $0x48] sm:$0xff] %v657_v30 }

// kernel: _lambda_.12
= control target key start
LH: loop header
LB: loop body
LE: loop exit
PB: predicated region body
PF: predicated region fallthrough
CT: control target
= control target key end

     0   :  { %vm537_vm0 = vcmask 785408   ;;  %s1321_s1 = inlined_call_operand.vmem [shape: bf16[864,128], index: 1, kind: input, shape index: {}]   ;;  %s1322_s2 = inlined_call_operand.vmem [shape: f32[1,128], index: 2, kind: input, shape index: {}]   ;;  %s1323_s0 = inlined_call_operand.vmem [shape: bf16[32,864], index: 0, kind: input, shape index: {}]   ;;  %s1324_s3 = inlined_call_operand.vmem [shape: f32[32,128], index: 3, kind: output, shape index: {}]  }
   0x1   :  { %v984_v0 = vld [vmem:[%s1321_s1 + $0x38] sm:$0xff]  ;;  %v983_v4 = vld [vmem:[%s1321_s1 + $0x30] sm:$0xff]  ;;  %v982_v8 = vld [vmem:[%s1321_s1 + $0x28] sm:$0xff] }
   0x2   :  { %v992_v1 = vld [vmem:[%s1321_s1 + $0x78] sm:$0xff]  ;;  %544 = vmatpush.bf16.msra.mxu0 %v984_v0  ;;  %v991_v5 = vld [vmem:[%s1321_s1 + $0x70] sm:$0xff]  ;;  %v990_v9 = vld [vmem:[%s1321_s1 + $0x68] sm:$0xff] }
   0x3   :  { %v1000_v2 = vld [vmem:[%s1321_s1 + $0xb8] sm:$0xff]  ;;  %563 = vmatpush.bf16.msra.mxu1 %v992_v1  ;;  %v999_v6 = vld [vmem:[%s1321_s1 + $0xb0] sm:$0xff]  ;;  %v998_v10 = vld [vmem:[%s1321_s1 + $0xa8] sm:$0xff] }
   0x4   :  { %v1008_v3 = vld [vmem:[%s1321_s1 + $0xf8] sm:$0xff]  ;;  %582 = vmatpush.bf16.msra.mxu2 %v1000_v2  ;;  %v1007_v7 = vld [vmem:[%s1321_s1 + $0xf0] sm:$0xff]  ;;  %v1006_v11 = vld [vmem:[%s1321_s1 + $0xe8] sm:$0xff] }
   0x5   :  { %601 = vmatpush.bf16.msra.mxu3 %v1008_v3  ;;  %v981_v12 = vld [vmem:[%s1321_s1 + $0x20] sm:$0xff]  ;;  %v980_v16 = vld [vmem:[%s1321_s1 + $0x18] sm:$0xff]  ;;  %v979_v20 = vld [vmem:[%s1321_s1 + $0x10] sm:$0xff] }
   0x6   :  { %545 = vmatpush.bf16.msra.mxu0 %v983_v4  ;;  %v989_v13 = vld [vmem:[%s1321_s1 + $0x60] sm:$0xff]  ;;  %v988_v17 = vld [vmem:[%s1321_s1 + $0x58] sm:$0xff]  ;;  %v987_v21 = vld [vmem:[%s1321_s1 + $0x50] sm:$0xff] }
   0x7   :  { %564 = vmatpush.bf16.msra.mxu1 %v991_v5  ;;  %v997_v14 = vld [vmem:[%s1321_s1 + $0xa0] sm:$0xff]  ;;  %v996_v18 = vld [vmem:[%s1321_s1 + $0x98] sm:$0xff]  ;;  %v995_v22 = vld [vmem:[%s1321_s1 + $0x90] sm:$0xff] }
   0x8   :  { %583 = vmatpush.bf16.msra.mxu2 %v999_v6  ;;  %v1005_v15 = vld [vmem:[%s1321_s1 + $0xe0] sm:$0xff]  ;;  %v1004_v19 = vld [vmem:[%s1321_s1 + $0xd8] sm:$0xff]  ;;  %v1003_v23 = vld [vmem:[%s1321_s1 + $0xd0] sm:$0xff] }
   0x9   :  { %602 = vmatpush.bf16.msra.mxu3 %v1007_v7  ;;  %v978_v24 = vld [vmem:[%s1321_s1 + $0x8] sm:$0xff]  ;;  %v977_v28 = vld [vmem:[%s1321_s1] sm:$0xff]  ;;  %v966_v33 = vld [vmem:[%s1323_s0 + $0x18] sm:$0xf0] }
   0xa   :  { %546 = vmatpush.bf16.msra.mxu0 %v982_v8  ;;  %v986_v25 = vld [vmem:[%s1321_s1 + $0x48] sm:$0xff]  ;;  %v985_v29 = vld [vmem:[%s1321_s1 + $0x40] sm:$0xff]  ;;  %v1016_v41 = vld [vmem:[%s1321_s1 + $0x138] sm:$0xff] }
   0xb   :  { %565 = vmatpush.bf16.msra.mxu1 %v990_v9  ;;  %v994_v26 = vld [vmem:[%s1321_s1 + $0x88] sm:$0xff]  ;;  %v993_v30 = vld [vmem:[%s1321_s1 + $0x80] sm:$0xff]  ;;  %v1024_v46 = vld [vmem:[%s1321_s1 + $0x178] sm:$0xff] }
   0xc   :  { %584 = vmatpush.bf16.msra.mxu2 %v998_v10  ;;  %v1002_v27 = vld [vmem:[%s1321_s1 + $0xc8] sm:$0xff]  ;;  %v1001_v31 = vld [vmem:[%s1321_s1 + $0xc0] sm:$0xff]  ;;  %v1015_v47 = vld [vmem:[%s1321_s1 + $0x130] sm:$0xff] }
   0xd   :  { %603 = vmatpush.bf16.msra.mxu3 %v1006_v11  ;;  %v691_v32 = vld [vmem:[%s1323_s0] sm:$0xf]  ;;  %v963_v34 = vld [vmem:[%s1323_s0 + $0x4] sm:$0xf]  ;;  %v699_v36 = vld [vmem:[%s1323_s0 + $0x8] sm:$0xf] }
   0xe   :  { %547 = vmatpush.bf16.msra.mxu0 %v981_v12  ;;  %v693_v35 = vld [vmem:[%s1323_s0 + $0x1c] sm:$0xf0]  ;;  %v967_v37 = vld [vmem:[%s1323_s0 + $0x20] sm:$0xf0]  ;;  %v964_v38 = vld [vmem:[%s1323_s0 + $0xc] sm:$0xf]  ;;  %v692_v42 = vor.u32 %v966_v33, %v691_v32 }
   0xf   :  { %566 = vmatpush.bf16.msra.mxu1 %v989_v13  ;;  %v701_v39 = vld [vmem:[%s1323_s0 + $0x24] sm:$0xf0]  ;;  %v696_v43 = vor.u32 %v963_v34, %v693_v35  ;;  %v700_v44 = vor.u32 %v967_v37, %v699_v36  ;;  %v1029_v48 = vld [vmem:[%s1321_s1 + $0x1a0] sm:$0xff]  ;;  %v1023_v49 = vld [vmem:[%s1321_s1 + $0x170] sm:$0xff] }
  0x10   :  { %585 = vmatpush.bf16.msra.mxu2 %v997_v14  ;;  %v1030_v40 = vld [vmem:[%s1321_s1 + $0x1a8] sm:$0xff]  ;;  %v704_v45 = vor.u32 %v964_v38, %v701_v39  ;;  %v1028_v51 = vld [vmem:[%s1321_s1 + $0x198] sm:$0xff]  ;;  %v1013_v53 = vld [vmem:[%s1321_s1 + $0x120] sm:$0xff] }
  0x11   :  { %604 = vmatpush.bf16.msra.mxu3 %v1005_v15  ;;  %v1014_v50 = vld [vmem:[%s1321_s1 + $0x128] sm:$0xff]  ;;  %v1027_v54 = vld [vmem:[%s1321_s1 + $0x190] sm:$0xff]  ;;  %v1021_v55 = vld [vmem:[%s1321_s1 + $0x160] sm:$0xff] }
  0x12   :  { %548 = vmatpush.bf16.msra.mxu0 %v980_v16  ;;  %v1022_v52 = vld [vmem:[%s1321_s1 + $0x168] sm:$0xff]  ;;  %v719_v56 = vld [vmem:[%s1323_s0 + $0x38] sm:$0xf]  ;;  %v973_v57 = vld [vmem:[%s1323_s0 + $0x50] sm:$0xf0] }
  0x13   :  { %567 = vmatpush.bf16.msra.mxu1 %v988_v17  ;;  %v970_v58 = vld [vmem:[%s1323_s0 + $0x3c] sm:$0xf]  ;;  %v721_v59 = vld [vmem:[%s1323_s0 + $0x54] sm:$0xf0]  ;;  %v727_v60 = vld [vmem:[%s1323_s0 + $0x40] sm:$0xf]  ;;  %v720_v2 = vor.u32 %v973_v57, %v719_v56 }
  0x14   :  { %586 = vmatpush.bf16.msra.mxu2 %v996_v18  ;;  %v974_v61 = vld [vmem:[%s1323_s0 + $0x58] sm:$0xf0]  ;;  %v971_v62 = vld [vmem:[%s1323_s0 + $0x44] sm:$0xf]  ;;  %v729_v63 = vld [vmem:[%s1323_s0 + $0x5c] sm:$0xf0]  ;;  %v724_v3 = vor.u32 %v970_v58, %v721_v59 }
  0x15   :  { %605 = vmatpush.bf16.msra.mxu3 %v1004_v19  ;;  %v1012_v0 = vld [vmem:[%s1321_s1 + $0x118] sm:$0xff]  ;;  %v1026_v1 = vld [vmem:[%s1321_s1 + $0x188] sm:$0xff]  ;;  %v728_v4 = vor.u32 %v974_v61, %v727_v60  ;;  %v732_v5 = vor.u32 %v971_v62, %v729_v63  ;;  %v1011_v7 = vld [vmem:[%s1321_s1 + $0x110] sm:$0xff] }
  0x16   :  { %549 = vmatpush.bf16.msra.mxu0 %v979_v20  ;;  %v1020_v6 = vld [vmem:[%s1321_s1 + $0x158] sm:$0xff]  ;;  %v1025_v8 = vld [vmem:[%s1321_s1 + $0x180] sm:$0xff]  ;;  %v1019_v9 = vld [vmem:[%s1321_s1 + $0x150] sm:$0xff] }
  0x17   :  { %568 = vmatpush.bf16.msra.mxu1 %v987_v21  ;;  %v1010_v10 = vld [vmem:[%s1321_s1 + $0x108] sm:$0xff]  ;;  %v1009_v12 = vld [vmem:[%s1321_s1 + $0x100] sm:$0xff]  ;;  %v707_v14 = vld [vmem:[%s1323_s0 + $0x10] sm:$0xf] }
  0x18   :  { %587 = vmatpush.bf16.msra.mxu2 %v995_v22  ;;  %v1018_v11 = vld [vmem:[%s1321_s1 + $0x148] sm:$0xff]  ;;  %v1017_v13 = vld [vmem:[%s1321_s1 + $0x140] sm:$0xff]  ;;  %v965_v18 = vld [vmem:[%s1323_s0 + $0x14] sm:$0xf] }
  0x19   :  { %606 = vmatpush.bf16.msra.mxu3 %v1003_v23  ;;  %v968_v15 = vld [vmem:[%s1323_s0 + $0x28] sm:$0xf0]  ;;  %v735_v16 = vld [vmem:[%s1323_s0 + $0x48] sm:$0xf]  ;;  %v975_v17 = vld [vmem:[%s1323_s0 + $0x60] sm:$0xf0] }
  0x1a   :  { %550 = vmatpush.bf16.msra.mxu0 %v978_v24  ;;  %v709_v19 = vld [vmem:[%s1323_s0 + $0x2c] sm:$0xf0]  ;;  %v715_v20 = vld [vmem:[%s1323_s0 + $0x18] sm:$0xf]  ;;  %v969_v21 = vld [vmem:[%s1323_s0 + $0x30] sm:$0xf0]  ;;  %v708_v22 = vor.u32 %v968_v15, %v707_v14  ;;  %v736_v23 = vor.u32 %v975_v17, %v735_v16 }
  0x1b   :  { %569 = vmatpush.bf16.msra.mxu1 %v986_v25  ;;  %v712_v24 = vor.u32 %v965_v18, %v709_v19  ;;  %v716_v25 = vor.u32 %v969_v21, %v715_v20 }
  0x1c   :  { %588 = vmatpush.bf16.msra.mxu2 %v994_v26  ;;  %v972_v26 = vld [vmem:[%s1323_s0 + $0x4c] sm:$0xf] }
  0x1d   :  { %607 = vmatpush.bf16.msra.mxu3 %v1002_v27  ;;  %v737_v27 = vld [vmem:[%s1323_s0 + $0x64] sm:$0xf0] }
  0x1e   :  { %551 = vmatpush.bf16.msra.mxu0 %v977_v28  ;;  %v743_v28 = vld [vmem:[%s1323_s0 + $0x50] sm:$0xf] }
  0x1f   :  { %570 = vmatpush.bf16.msra.mxu1 %v985_v29  ;;  %v976_v29 = vld [vmem:[%s1323_s0 + $0x68] sm:$0xf0] }
  0x20   :  { %589 = vmatpush.bf16.msra.mxu2 %v993_v30  ;;  %v740_v30 = vor.u32 %v972_v26, %v737_v27 }
  0x21   :  { %608 = vmatpush.bf16.msra.mxu3 %v1001_v31  ;;  %552 = vmatmul.bf16.vlgmr.msra.gmra.mxu0 %v692_v42  ;;  %v744_v31 = vor.u32 %v976_v29, %v743_v28 }
  0x22   :  { %620 = vmatpush.bf16.msrb.mxu0 %v1016_v41  ;;  %571 = vmatmul.bf16.vlgmr.msra.gmra.mxu1 %v696_v43 }
  0x23   :  { %590 = vmatmul.bf16.vlgmr.msra.gmra.mxu2 %v700_v44  ;;  %639 = vmatpush.bf16.msrb.mxu1 %v1024_v46 }
  0x24   :  { %660 = vmatpush.bf16.msrb.mxu2 %v1030_v40  ;;  %609 = vmatmul.bf16.vlgmr.msra.gmra.mxu3 %v704_v45 }
  0x25   :  { %1031 = vmatpush.bf16.msrb.mxu3 %v1016_v41  ;;  %v1039_v41 = vld [vmem:[%s1322_s2] ss:$0 sm:$0xff] }
  0x26   :  { %621 = vmatpush.bf16.msrb.mxu0 %v1015_v47 }
  0x27   :  { %640 = vmatpush.bf16.msrb.mxu1 %v1023_v49 }
  0x28   :  { %661 = vmatpush.bf16.msrb.mxu2 %v1029_v48 }
  0x29   :  { %1032 = vmatpush.bf16.msrb.mxu3 %v1015_v47 }
  0x2a   :  { %622 = vmatpush.bf16.msrb.mxu0 %v1014_v50 }
  0x2b   :  { %641 = vmatpush.bf16.msrb.mxu1 %v1022_v52 }
  0x2c   :  { %662 = vmatpush.bf16.msrb.mxu2 %v1028_v51 }
  0x2d   :  { %1033 = vmatpush.bf16.msrb.mxu3 %v1014_v50 }
  0x2e   :  { %623 = vmatpush.bf16.msrb.mxu0 %v1013_v53 }
  0x2f   :  { %642 = vmatpush.bf16.msrb.mxu1 %v1021_v55 }
  0x30   :  { %663 = vmatpush.bf16.msrb.mxu2 %v1027_v54 }
  0x31   :  { %1034 = vmatpush.bf16.msrb.mxu3 %v1013_v53  ;;  %557 = vmatmul.bf16.gmra.mxu0 %v720_v2 }
  0x32   :  { %624 = vmatpush.bf16.msrb.mxu0 %v1012_v0  ;;  %576 = vmatmul.bf16.gmra.mxu1 %v724_v3 }
  0x33   :  { %595 = vmatmul.bf16.gmra.mxu2 %v728_v4  ;;  %643 = vmatpush.bf16.msrb.mxu1 %v1020_v6 }
  0x34   :  { %664 = vmatpush.bf16.msrb.mxu2 %v1026_v1  ;;  %614 = vmatmul.bf16.gmra.mxu3 %v732_v5 }
  0x35   :  { %1035 = vmatpush.bf16.msrb.mxu3 %v1012_v0 }
  0x36   :  { %625 = vmatpush.bf16.msrb.mxu0 %v1011_v7 }
  0x37   :  { %644 = vmatpush.bf16.msrb.mxu1 %v1019_v9 }
  0x38   :  { %665 = vmatpush.bf16.msrb.mxu2 %v1025_v8 }
  0x39   :  { %1036 = vmatpush.bf16.msrb.mxu3 %v1011_v7 }
  0x3a   :  { %626 = vmatpush.bf16.msrb.mxu0 %v1010_v10 }
  0x3b   :  { %645 = vmatpush.bf16.msrb.mxu1 %v1018_v11 }
  0x3d   :  { %1037 = vmatpush.bf16.msrb.mxu3 %v1010_v10 }
  0x3e   :  { %627 = vmatpush.bf16.msrb.mxu0 %v1009_v12 }
  0x3f   :  { %646 = vmatpush.bf16.msrb.mxu1 %v1017_v13 }
  0x41   :  { %1038 = vmatpush.bf16.msrb.mxu3 %v1009_v12  ;;  %628 = vmatmul.bf16.vlgmr.msrb.gmra.mxu0 %v708_v22 }
  0x42   :  { %647 = vmatmul.bf16.vlgmr.msrb.gmra.mxu1 %v712_v24 }
  0x43   :  { %961 = vmatmul.msk.bf16.vlgmr.msrb.gmra.mxu2 %vm537_vm0, %v716_v25 }
  0x44   :  { %633 = vmatmul.bf16.vlgmr.msrb.gmra.mxu3 %v736_v23 }
  0x52   :  { %652 = vmatmul.bf16.gmra.mxu1 %v740_v30 }
  0x53   :  { %962 = vmatmul.msk.bf16.gmra.mxu2 %vm537_vm0, %v744_v31 }
  0x9e   :  { %v553_v32 = vpop.f32.mrf.mxu0 }
  0x9f   :  { %v572_v33 = vpop.f32.mrf.mxu1  ;;  %v554_v43 = vadd.f32 %v1039_v41, %v553_v32 }
  0xa1   :  { %v573_v47 = vadd.f32 %v572_v33, %v554_v43 }
  0xa6   :  { %v591_v34 = vpop.f32.mrf.mxu2  ;;  %v555_v36 = vpop.f32.mrf.mxu0 }
  0xa7   :  { %v610_v35 = vpop.f32.mrf.mxu3  ;;  %v574_v37 = vpop.f32.mrf.mxu1  ;;  %v592_v49 = vadd.f32 %v591_v34, %v573_v47  ;;  %v556_v50 = vadd.f32 %v1039_v41, %v555_v36 }
  0xa9   :  { %v611_v53 = vadd.f32 %v610_v35, %v592_v49  ;;  %v575_v55 = vadd.f32 %v574_v37, %v556_v50 }
  0xae   :  { %v593_v38 = vpop.f32.mrf.mxu2  ;;  %v558_v39 = vpop.f32.mrf.mxu0 }
  0xaf   :  { %v577_v40 = vpop.f32.mrf.mxu1  ;;  %v612_v42 = vpop.f32.mrf.mxu3  ;;  %v594_v57 = vadd.f32 %v593_v38, %v575_v55  ;;  %v559_v59 = vadd.f32 %v1039_v41, %v558_v39 }
  0xb1   :  { %v613_v63 = vadd.f32 %v612_v42, %v594_v57  ;;  %v578_v2 = vadd.f32 %v577_v40, %v559_v59 }
  0xb6   :  { %v596_v44 = vpop.f32.mrf.mxu2  ;;  %v560_v45 = vpop.f32.mrf.mxu0 }
  0xb7   :  { %v579_v46 = vpop.f32.mrf.mxu1  ;;  %v615_v48 = vpop.f32.mrf.mxu3  ;;  %v597_v5 = vadd.f32 %v596_v44, %v578_v2  ;;  %v561_v9 = vadd.f32 %v1039_v41, %v560_v45 }
  0xb9   :  { %v616_v12 = vadd.f32 %v615_v48, %v597_v5  ;;  %v580_v14 = vadd.f32 %v579_v46, %v561_v9 }
  0xbe   :  { %v598_v51 = vpop.f32.mrf.mxu2  ;;  %v629_v52 = vpop.f32.mrf.mxu0 }
  0xbf   :  { %v648_v54 = vpop.f32.mrf.mxu1  ;;  %v630_v56 = vadd.f32 %v629_v52, %v611_v53  ;;  %v617_v58 = vpop.f32.mrf.mxu3  ;;  %v599_v16 = vadd.f32 %v598_v51, %v580_v14 }
  0xc1   :  { %v649_v60 = vadd.f32 %v648_v54, %v630_v56  ;;  %v618_v21 = vadd.f32 %v617_v58, %v599_v16 }
  0xc6   :  { %v667_v61 = vpop.f32.mrf.mxu2  ;;  %v631_v62 = vpop.f32.mrf.mxu0 }
  0xc7   :  { %v668_v0 = vadd.f32 %v667_v61, %v649_v60  ;;  %v650_v1 = vpop.f32.mrf.mxu1  ;;  %v632_v4 = vadd.f32 %v631_v62, %v613_v63  ;;  %v634_v7 = vpop.f32.mrf.mxu3 }
  0xc8   :  { %v635_v15 = vadd.f32 %v634_v7, %v616_v12 }
  0xc9   :  { %v677_v3 = vmax.f32 %v668_v0, 0.0  ;;  %v651_v6 = vadd.f32 %v650_v1, %v632_v4 }
  0xcb   :  { %681 = vst [vmem:[%s1324_s3] sm:$0xff] %v677_v3 }
  0xce   :  { %v669_v8 = vpop.f32.mrf.mxu2 }
  0xcf   :  { %v670_v10 = vadd.f32 %v669_v8, %v651_v6  ;;  %v653_v11 = vpop.f32.mrf.mxu1  ;;  %v636_v20 = vpop.f32.mrf.mxu3 }
  0xd0   :  { %v654_v17 = vadd.f32 %v653_v11, %v635_v15  ;;  %v637_v24 = vadd.f32 %v636_v20, %v618_v21 }
  0xd1   :  { %v678_v13 = vmax.f32 %v670_v10, 0.0 }
  0xd3   :  { %682 = vst [vmem:[%s1324_s3 + $0x8] sm:$0xff] %v678_v13 }
  0xd6   :  { %v672_v18 = vpop.f32.mrf.mxu2 }
  0xd7   :  { %v673_v19 = vadd.f32 %v672_v18, %v654_v17  ;;  %v655_v23 = vpop.f32.mrf.mxu1 }
  0xd8   :  { %v656_v25 = vadd.f32 %v655_v23, %v637_v24 }
  0xd9   :  { %v679_v22 = vmax.f32 %v673_v19, 0.0 }
  0xdb   :  { %683 = vst [vmem:[%s1324_s3 + $0x10] sm:$0xff] %v679_v22 }
  0xde   :  { %v674_v26 = vpop.f32.mrf.mxu2 }
  0xdf   :  { %v675_v27 = vadd.f32 %v674_v26, %v656_v25 }
  0xe1   :  { %v680_v28 = vmax.f32 %v675_v27, 0.0 }
  0xe3   :  { %684 = vst [vmem:[%s1324_s3 + $0x18] sm:$0xff] %v680_v28 }

// kernel: _lambda_.13
= control target key start
LH: loop header
LB: loop body
LE: loop exit
PB: predicated region body
PF: predicated region fallthrough
CT: control target
= control target key end

     0   :  { %vm494_vm0 = vcmask 785408   ;;  %s1142_s1 = inlined_call_operand.vmem [shape: bf16[864,128], index: 1, kind: input, shape index: {}]   ;;  %s1143_s2 = inlined_call_operand.vmem [shape: f32[1,128], index: 2, kind: input, shape index: {}]   ;;  %s1144_s0 = inlined_call_operand.vmem [shape: bf16[16,864], index: 0, kind: input, shape index: {}]   ;;  %s1145_s3 = inlined_call_operand.vmem [shape: f32[16,128], index: 3, kind: output, shape index: {}]  }
   0x1   :  { %v861_v0 = vld [vmem:[%s1142_s1 + $0x38] sm:$0xff]  ;;  %v860_v3 = vld [vmem:[%s1142_s1 + $0x30] sm:$0xff]  ;;  %v859_v8 = vld [vmem:[%s1142_s1 + $0x28] sm:$0xff] }
   0x2   :  { %v869_v1 = vld [vmem:[%s1142_s1 + $0x78] sm:$0xff]  ;;  %498 = vmatpush.bf16.msra.mxu0 %v861_v0  ;;  %v868_v4 = vld [vmem:[%s1142_s1 + $0x70] sm:$0xff]  ;;  %v867_v9 = vld [vmem:[%s1142_s1 + $0x68] sm:$0xff] }
   0x3   :  { %v877_v2 = vld [vmem:[%s1142_s1 + $0xb8] sm:$0xff]  ;;  %512 = vmatpush.bf16.msra.mxu1 %v869_v1  ;;  %v876_v6 = vld [vmem:[%s1142_s1 + $0xb0] sm:$0xff]  ;;  %v875_v10 = vld [vmem:[%s1142_s1 + $0xa8] sm:$0xff] }
   0x4   :  { %v885_v5 = vld [vmem:[%s1142_s1 + $0xf8] sm:$0xff]  ;;  %526 = vmatpush.bf16.msra.mxu2 %v877_v2  ;;  %v884_v7 = vld [vmem:[%s1142_s1 + $0xf0] sm:$0xff]  ;;  %v883_v11 = vld [vmem:[%s1142_s1 + $0xe8] sm:$0xff] }
   0x5   :  { %540 = vmatpush.bf16.msra.mxu3 %v885_v5  ;;  %v858_v12 = vld [vmem:[%s1142_s1 + $0x20] sm:$0xff]  ;;  %v857_v16 = vld [vmem:[%s1142_s1 + $0x18] sm:$0xff]  ;;  %v856_v20 = vld [vmem:[%s1142_s1 + $0x10] sm:$0xff] }
   0x6   :  { %499 = vmatpush.bf16.msra.mxu0 %v860_v3  ;;  %v866_v13 = vld [vmem:[%s1142_s1 + $0x60] sm:$0xff]  ;;  %v865_v17 = vld [vmem:[%s1142_s1 + $0x58] sm:$0xff]  ;;  %v864_v21 = vld [vmem:[%s1142_s1 + $0x50] sm:$0xff] }
   0x7   :  { %513 = vmatpush.bf16.msra.mxu1 %v868_v4  ;;  %v874_v14 = vld [vmem:[%s1142_s1 + $0xa0] sm:$0xff]  ;;  %v873_v18 = vld [vmem:[%s1142_s1 + $0x98] sm:$0xff]  ;;  %v872_v22 = vld [vmem:[%s1142_s1 + $0x90] sm:$0xff] }
   0x8   :  { %527 = vmatpush.bf16.msra.mxu2 %v876_v6  ;;  %v882_v15 = vld [vmem:[%s1142_s1 + $0xe0] sm:$0xff]  ;;  %v881_v19 = vld [vmem:[%s1142_s1 + $0xd8] sm:$0xff]  ;;  %v880_v23 = vld [vmem:[%s1142_s1 + $0xd0] sm:$0xff] }
   0x9   :  { %541 = vmatpush.bf16.msra.mxu3 %v884_v7  ;;  %v855_v24 = vld [vmem:[%s1142_s1 + $0x8] sm:$0xff]  ;;  %v854_v27 = vld [vmem:[%s1142_s1] sm:$0xff]  ;;  %v893_v31 = vld [vmem:[%s1142_s1 + $0x138] sm:$0xff] }
   0xa   :  { %500 = vmatpush.bf16.msra.mxu0 %v859_v8  ;;  %v863_v25 = vld [vmem:[%s1142_s1 + $0x48] sm:$0xff]  ;;  %v862_v29 = vld [vmem:[%s1142_s1 + $0x40] sm:$0xff]  ;;  %v850_v34 = vld [vmem:[%s1144_s0 + $0x18] sm:$0xf0] }
   0xb   :  { %514 = vmatpush.bf16.msra.mxu1 %v867_v9  ;;  %v871_v26 = vld [vmem:[%s1142_s1 + $0x88] sm:$0xff]  ;;  %v870_v30 = vld [vmem:[%s1142_s1 + $0x80] sm:$0xff]  ;;  %v901_v38 = vld [vmem:[%s1142_s1 + $0x178] sm:$0xff] }
   0xc   :  { %528 = vmatpush.bf16.msra.mxu2 %v875_v10  ;;  %v879_v28 = vld [vmem:[%s1142_s1 + $0xc8] sm:$0xff]  ;;  %v604_v33 = vld [vmem:[%s1144_s0] sm:$0xf]  ;;  %v851_v35 = vld [vmem:[%s1144_s0 + $0x20] sm:$0xf0] }
   0xd   :  { %542 = vmatpush.bf16.msra.mxu3 %v883_v11  ;;  %v612_v32 = vld [vmem:[%s1144_s0 + $0x8] sm:$0xf]  ;;  %v847_v36 = vld [vmem:[%s1144_s0 + $0x4] sm:$0xf]  ;;  %v606_v37 = vld [vmem:[%s1144_s0 + $0x1c] sm:$0xf0]  ;;  %v605_v41 = vor.u32 %v850_v34, %v604_v33 }
   0xe   :  { %501 = vmatpush.bf16.msra.mxu0 %v858_v12  ;;  %v907_v39 = vld [vmem:[%s1142_s1 + $0x1a8] sm:$0xff]  ;;  %v878_v40 = vld [vmem:[%s1142_s1 + $0xc0] sm:$0xff]  ;;  %v613_v42 = vor.u32 %v851_v35, %v612_v32  ;;  %v609_v45 = vor.u32 %v847_v36, %v606_v37  ;;  %v892_v46 = vld [vmem:[%s1142_s1 + $0x130] sm:$0xff] }
   0xf   :  { %515 = vmatpush.bf16.msra.mxu1 %v866_v13  ;;  %v848_v43 = vld [vmem:[%s1144_s0 + $0xc] sm:$0xf]  ;;  %v614_v44 = vld [vmem:[%s1144_s0 + $0x24] sm:$0xf0]  ;;  %v900_v47 = vld [vmem:[%s1142_s1 + $0x170] sm:$0xff] }
  0x10   :  { %529 = vmatpush.bf16.msra.mxu2 %v874_v14  ;;  %v906_v48 = vld [vmem:[%s1142_s1 + $0x1a0] sm:$0xff]  ;;  %v617_v49 = vor.u32 %v848_v43, %v614_v44  ;;  %v891_v50 = vld [vmem:[%s1142_s1 + $0x128] sm:$0xff]  ;;  %v905_v52 = vld [vmem:[%s1142_s1 + $0x198] sm:$0xff] }
  0x11   :  { %543 = vmatpush.bf16.msra.mxu3 %v882_v15  ;;  %v899_v51 = vld [vmem:[%s1142_s1 + $0x168] sm:$0xff]  ;;  %v890_v53 = vld [vmem:[%s1142_s1 + $0x120] sm:$0xff]  ;;  %v904_v55 = vld [vmem:[%s1142_s1 + $0x190] sm:$0xff] }
  0x12   :  { %502 = vmatpush.bf16.msra.mxu0 %v857_v16  ;;  %v898_v54 = vld [vmem:[%s1142_s1 + $0x160] sm:$0xff]  ;;  %v889_v56 = vld [vmem:[%s1142_s1 + $0x118] sm:$0xff]  ;;  %v903_v58 = vld [vmem:[%s1142_s1 + $0x188] sm:$0xff] }
  0x13   :  { %516 = vmatpush.bf16.msra.mxu1 %v865_v17  ;;  %v897_v57 = vld [vmem:[%s1142_s1 + $0x158] sm:$0xff]  ;;  %v888_v59 = vld [vmem:[%s1142_s1 + $0x110] sm:$0xff]  ;;  %v902_v61 = vld [vmem:[%s1142_s1 + $0x180] sm:$0xff] }
  0x14   :  { %530 = vmatpush.bf16.msra.mxu2 %v873_v18  ;;  %v896_v60 = vld [vmem:[%s1142_s1 + $0x150] sm:$0xff]  ;;  %v628_v62 = vld [vmem:[%s1144_s0 + $0x18] sm:$0xf]  ;;  %v887_v1 = vld [vmem:[%s1142_s1 + $0x108] sm:$0xff] }
  0x15   :  { %544 = vmatpush.bf16.msra.mxu3 %v881_v19  ;;  %v853_v63 = vld [vmem:[%s1144_s0 + $0x30] sm:$0xf0]  ;;  %v895_v2 = vld [vmem:[%s1142_s1 + $0x148] sm:$0xff]  ;;  %v886_v3 = vld [vmem:[%s1142_s1 + $0x100] sm:$0xff] }
  0x16   :  { %503 = vmatpush.bf16.msra.mxu0 %v856_v20  ;;  %v629_v0 = vor.u32 %v853_v63, %v628_v62  ;;  %v620_v4 = vld [vmem:[%s1144_s0 + $0x10] sm:$0xf]  ;;  %v852_v5 = vld [vmem:[%s1144_s0 + $0x28] sm:$0xf0]  ;;  %v894_v6 = vld [vmem:[%s1142_s1 + $0x140] sm:$0xff] }
  0x17   :  { %517 = vmatpush.bf16.msra.mxu1 %v864_v21  ;;  %v849_v7 = vld [vmem:[%s1144_s0 + $0x14] sm:$0xf]  ;;  %v622_v8 = vld [vmem:[%s1144_s0 + $0x2c] sm:$0xf0]  ;;  %v621_v9 = vor.u32 %v852_v5, %v620_v4  ;;  %v908_v12 = vld [vmem:[%s1143_s2] ss:$0 sm:$0xff] }
  0x18   :  { %531 = vmatpush.bf16.msra.mxu2 %v872_v22  ;;  %v625_v10 = vor.u32 %v849_v7, %v622_v8 }
  0x19   :  { %545 = vmatpush.bf16.msra.mxu3 %v880_v23 }
  0x1a   :  { %504 = vmatpush.bf16.msra.mxu0 %v855_v24 }
  0x1b   :  { %518 = vmatpush.bf16.msra.mxu1 %v863_v25 }
  0x1c   :  { %532 = vmatpush.bf16.msra.mxu2 %v871_v26 }
  0x1d   :  { %546 = vmatpush.bf16.msra.mxu3 %v879_v28 }
  0x1e   :  { %505 = vmatpush.bf16.msra.mxu0 %v854_v27 }
  0x1f   :  { %519 = vmatpush.bf16.msra.mxu1 %v862_v29 }
  0x20   :  { %533 = vmatpush.bf16.msra.mxu2 %v870_v30 }
  0x21   :  { %547 = vmatpush.bf16.msra.mxu3 %v878_v40  ;;  %506 = vmatmul.bf16.vlgmr.msra.gmra.mxu0 %v605_v41 }
  0x22   :  { %554 = vmatpush.bf16.msrb.mxu0 %v893_v31  ;;  %520 = vmatmul.bf16.vlgmr.msra.gmra.mxu1 %v609_v45 }
  0x23   :  { %568 = vmatpush.bf16.msrb.mxu1 %v901_v38  ;;  %534 = vmatmul.bf16.vlgmr.msra.gmra.mxu2 %v613_v42 }
  0x24   :  { %584 = vmatpush.bf16.msrb.mxu2 %v907_v39  ;;  %548 = vmatmul.bf16.vlgmr.msra.gmra.mxu3 %v617_v49 }
  0x26   :  { %555 = vmatpush.bf16.msrb.mxu0 %v892_v46 }
  0x27   :  { %569 = vmatpush.bf16.msrb.mxu1 %v900_v47 }
  0x28   :  { %585 = vmatpush.bf16.msrb.mxu2 %v906_v48 }
  0x2a   :  { %556 = vmatpush.bf16.msrb.mxu0 %v891_v50 }
  0x2b   :  { %570 = vmatpush.bf16.msrb.mxu1 %v899_v51 }
  0x2c   :  { %586 = vmatpush.bf16.msrb.mxu2 %v905_v52 }
  0x2e   :  { %557 = vmatpush.bf16.msrb.mxu0 %v890_v53 }
  0x2f   :  { %571 = vmatpush.bf16.msrb.mxu1 %v898_v54 }
  0x30   :  { %587 = vmatpush.bf16.msrb.mxu2 %v904_v55 }
  0x32   :  { %558 = vmatpush.bf16.msrb.mxu0 %v889_v56 }
  0x33   :  { %572 = vmatpush.bf16.msrb.mxu1 %v897_v57 }
  0x34   :  { %588 = vmatpush.bf16.msrb.mxu2 %v903_v58 }
  0x36   :  { %559 = vmatpush.bf16.msrb.mxu0 %v888_v59 }
  0x37   :  { %573 = vmatpush.bf16.msrb.mxu1 %v896_v60 }
  0x38   :  { %589 = vmatpush.bf16.msrb.mxu2 %v902_v61 }
  0x3a   :  { %560 = vmatpush.bf16.msrb.mxu0 %v887_v1 }
  0x3b   :  { %846 = vmatmul.msk.bf16.vlgmr.msrb.gmra.mxu2 %vm494_vm0, %v629_v0  ;;  %574 = vmatpush.bf16.msrb.mxu1 %v895_v2 }
  0x3e   :  { %561 = vmatpush.bf16.msrb.mxu0 %v886_v3 }
  0x3f   :  { %575 = vmatpush.bf16.msrb.mxu1 %v894_v6 }
  0x41   :  { %562 = vmatmul.bf16.vlgmr.msrb.gmra.mxu0 %v621_v9 }
  0x42   :  { %576 = vmatmul.bf16.vlgmr.msrb.gmra.mxu1 %v625_v10 }
  0x9e   :  { %v507_v11 = vpop.f32.mrf.mxu0 }
  0x9f   :  { %v521_v13 = vpop.f32.mrf.mxu1  ;;  %v508_v15 = vadd.f32 %v908_v12, %v507_v11 }
  0xa1   :  { %v522_v16 = vadd.f32 %v521_v13, %v508_v15 }
  0xa6   :  { %v535_v14 = vpop.f32.mrf.mxu2  ;;  %v509_v17 = vpop.f32.mrf.mxu0 }
  0xa7   :  { %v523_v18 = vpop.f32.mrf.mxu1  ;;  %v549_v19 = vpop.f32.mrf.mxu3  ;;  %v536_v21 = vadd.f32 %v535_v14, %v522_v16  ;;  %v510_v22 = vadd.f32 %v908_v12, %v509_v17 }
  0xa9   :  { %v550_v23 = vadd.f32 %v549_v19, %v536_v21  ;;  %v524_v24 = vadd.f32 %v523_v18, %v510_v22 }
  0xae   :  { %v537_v20 = vpop.f32.mrf.mxu2 }
  0xaf   :  { %v538_v29 = vadd.f32 %v537_v20, %v524_v24  ;;  %v551_v31 = vpop.f32.mrf.mxu3 }
  0xb1   :  { %v552_v33 = vadd.f32 %v551_v31, %v538_v29 }
  0xbe   :  { %v563_v25 = vpop.f32.mrf.mxu0  ;;  %v591_v28 = vpop.f32.mrf.mxu2 }
  0xbf   :  { %v564_v26 = vadd.f32 %v563_v25, %v550_v23  ;;  %v577_v27 = vpop.f32.mrf.mxu1 }
  0xc1   :  { %v578_v30 = vadd.f32 %v577_v27, %v564_v26 }
  0xc3   :  { %v592_v32 = vadd.f32 %v591_v28, %v578_v30 }
  0xc5   :  { %596 = vst [vmem:[%s1145_s3] sm:$0xff] %v592_v32 }
  0xc6   :  { %v565_v34 = vpop.f32.mrf.mxu0  ;;  %v593_v38 = vpop.f32.mrf.mxu2 }
  0xc7   :  { %v566_v35 = vadd.f32 %v565_v34, %v552_v33  ;;  %v579_v36 = vpop.f32.mrf.mxu1 }
  0xc9   :  { %v580_v37 = vadd.f32 %v579_v36, %v566_v35 }
  0xcb   :  { %v594_v39 = vadd.f32 %v593_v38, %v580_v37 }
  0xcd   :  { %597 = vst [vmem:[%s1145_s3 + $0x8] sm:$0xff] %v594_v39 }

</bundles_post_ra>
